<compile_context>
chip_gen: v5e
topology: v5e:2x2
jax: 0.10.0
libtpu: 0.0.40
codegen_flags: <defaults>
</compile_context>

<pallas_src>
import functools
from dataclasses import dataclass

import jax
import jax.numpy as jnp
import numpy as np
from jax.experimental import pallas as pl
from jax.experimental.pallas import tpu as pltpu


# ----------------------------------------------------------------------------
# Config (mirrors the fields of `cfg` used by the PyTorch module).
# ----------------------------------------------------------------------------
@dataclass(frozen=True)
class NerfConfig:
    n_harmonic_functions_xyz: int = 6
    n_harmonic_functions_dir: int = 4      # unused by forward()
    n_layers_xyz: int = 4
    n_hidden_neurons_xyz: int = 128
    n_hidden_neurons_dir: int = 64
    append_xyz: tuple = (2,)
    density_noise_std: float = 0.0         # unused by forward()


# TODO(synk): harmonic_embedding_dir and density_noise_std exist in the PyTorch
# module but are never used inside forward(), so they are not implemented.


# ----------------------------------------------------------------------------
# Kernel factory: the layer structure (n_layers, skip set) is static.
# Kernel args: pts, sfreq, <flat weights/biases...>, packed_out
# ----------------------------------------------------------------------------
def _make_nerf_kernel(n_layers, skips, hid):
    skips = frozenset(skips)

    def kernel(*refs):
        out_ref = refs[-1]
        pts_ref, sfreq_ref = refs[0], refs[1]
        wrefs = refs[2:-1]

        idx = [0]

        def nxt():
            r = wrefs[idx[0]]
            idx[0] += 1
            return r[...]

        def dotb(a, w):
            # bf16 MXU matmul with f32 accumulation; bias/ReLU stay in f32.
            return jnp.dot(a.astype(jnp.bfloat16), w,
                           preferred_element_type=jnp.float32)

        pts = pts_ref[...]                        # (TN, 3)  f32
        sfreq = sfreq_ref[...]                    # (3, 3H)  f32

        # Harmonic phase in exact f32 on the VPU (no MXU, no bf16 rounding of
        # the 2^j-amplified phase):  emb[:, c*H+j] = pts[:, c] * 2**j
        # (sfreq rows are zero outside their own column block, so the sum of
        #  the three broadcast products reproduces the torch column ordering).
        emb = (pts[:, 0:1] * sfreq[0:1, :]
               + pts[:, 1:2] * sfreq[1:2, :]
               + pts[:, 2:3] * sfreq[2:3, :])     # (TN, 3H)
        z = jnp.concatenate([jnp.sin(emb), jnp.cos(emb), pts], axis=-1)  # (TN, 3(2H+1))

        # MLP with input skips; fused (unsplit) weights, single matmul/layer.
        y = None
        for li in range(n_layers):
            w, b = nxt(), nxt()
            if li == 0:
                inp = z
            elif li in skips:
                inp = jnp.concatenate([y, z], axis=-1)   # (TN, hid + 3(2H+1))
            else:
                inp = y
            y = jnp.maximum(dotb(inp, w) + b, 0.0)

        # Fused density + first colour layer:  W = [Wc0 | Wd]  ->  (hid, hid+1)
        wdc, bdc = nxt(), nxt()
        hdc = jnp.maximum(dotb(y, wdc) + bdc, 0.0)        # (TN, hid+1)
        h = hdc[:, :hid]                                  # colour hidden
        dens = hdc[:, hid:hid + 1]                        # ReLU(Linear(feat,1))

        # Remaining colour head: Linear+ReLU, Linear+Sigmoid
        wc1, bc1 = nxt(), nxt()
        wc2, bc2 = nxt(), nxt()
        h = jnp.maximum(dotb(h, wc1) + bc1, 0.0)
        logits = dotb(h, wc2) + bc2
        rgb = 1.0 / (1.0 + jnp.exp(-logits))              # (TN, 3)

        # Single packed output slab: [density | rgb]  ->  (TN, 4)
        out_ref[...] = jnp.concatenate([dens, rgb], axis=-1)

    return kernel


# ----------------------------------------------------------------------------
# Wrapper helpers
# ----------------------------------------------------------------------------
def make_sfreq(cfg):
    """(3, 3H) matrix S with S[c, c*H+j] = 2**j; reproduces PyTorch's
    (x[..., None] * frequencies).view(..., -1) column ordering."""
    H = cfg.n_harmonic_functions_xyz
    freqs = (2.0 ** np.arange(H)).astype(np.float32)     # omega0 = 1, logspace
    S = np.zeros((3, 3 * H), np.float32)
    for c in range(3):
        S[c, c * H:(c + 1) * H] = freqs
    return jnp.asarray(S)


def prepare_params(cfg, params):
    """Flatten params into the kernel argument order.  Matmul weights are
    stored in bf16 (MXU-native on all TPU gens); biases stay f32.  The density
    head is fused into the first colour layer as an extra output column."""
    assert 0 not in set(cfg.append_xyz), "append_xyz containing layer 0 is unsupported"
    flat = []
    for (W, b) in params["mlp"]:
        flat += [W.astype(jnp.bfloat16), b.astype(jnp.float32)]
    Wd, bd = params["density"]
    (Wc0, bc0), (Wc1, bc1), (Wc2, bc2) = params["colour"]
    flat += [
        jnp.concatenate([Wc0, Wd], axis=1).astype(jnp.bfloat16),   # (hid, hid+1)
        jnp.concatenate([bc0, bd], axis=1).astype(jnp.float32),    # (1,   hid+1)
        Wc1.astype(jnp.bfloat16), bc1.astype(jnp.float32),
        Wc2.astype(jnp.bfloat16), bc2.astype(jnp.float32),
    ]
    return flat


@functools.partial(jax.jit, static_argnames=("cfg", "tile_n"))
def nerf_forward(sample_points, flat_params, sfreq, *, cfg, tile_n=1024):
    """Equivalent of NeuralRadianceField.forward: returns density (N,1), rgb (N,3)."""
    pts = sample_points.reshape(-1, 3).astype(jnp.float32)
    n = pts.shape[0]

    # Tile rows: as large as sensible (amortizes ~0.35us/step + MXU drain),
    # but keep >= 2 grid steps so both v7x TensorCores get work.
    tn = max(8, min(int(tile_n), ((n + 15) // 16) * 8))
    n_pad = ((n + tn - 1) // tn) * tn
    if n_pad != n:
        pts = jnp.pad(pts, ((0, n_pad - n), (0, 0)))
    grid = (n_pad // tn,)

    kernel = _make_nerf_kernel(cfg.n_layers_xyz, cfg.append_xyz,
                               cfg.n_hidden_neurons_xyz)

    weight_specs = [pl.BlockSpec(w.shape, lambda i: (0, 0)) for w in flat_params]

    # Advisory cost estimate: 2*K*N flops per weight matrix, 2*3H sin/cos +
    # 3 exp per point, ~28 B/point streamed + one pass over the weights.
    mat_params = sum(int(w.shape[0]) * int(w.shape[1])
                     for w in flat_params if w.shape[0] > 1)
    H = cfg.n_harmonic_functions_xyz
    cost = pl.CostEstimate(
        flops=2 * n_pad * mat_params,
        transcendentals=n_pad * (2 * 3 * H + 3),
        bytes_accessed=n_pad * 28 + sum(int(w.size) * w.dtype.itemsize
                                        for w in flat_params),
    )

    # VMEM use at tn=1024 is only a few MiB; raise the scoped limit only for
    # very large tiles (v5e's default scoped limit is 16 MiB).
    vmem_limit = 48 * 1024 * 1024 if tn >= 2048 else None

    packed = pl.pallas_call(
        kernel,
        out_shape=jax.ShapeDtypeStruct((n_pad, 4), jnp.float32),
        grid_spec=pltpu.PrefetchScalarGridSpec(
            num_scalar_prefetch=0,
            grid=grid,
            in_specs=[
                pl.BlockSpec((tn, 3), lambda i: (i, 0)),      # points tile (streams)
                pl.BlockSpec(sfreq.shape, lambda i: (0, 0)),  # frequencies (resident)
            ] + weight_specs,                                 # weights (resident)
            out_specs=pl.BlockSpec((tn, 4), lambda i: (i, 0)),
        ),
        compiler_params=pltpu.CompilerParams(
            dimension_semantics=("parallel",),                # v7x: 2 TCs share grid
            vmem_limit_bytes=vmem_limit,
        ),
        cost_estimate=cost,
    )(pts, sfreq, *flat_params)

    return {"density": packed[:n, 0:1], "feature": packed[:n, 1:4]}


# ----------------------------------------------------------------------------
# Deterministic parameter construction (mirrors the PyTorch __init__ shapes).
# ----------------------------------------------------------------------------
def init_params(cfg, key):
    H = cfg.n_harmonic_functions_xyz
    d_embed = 3 * (2 * H + 1)
    hid = cfg.n_hidden_neurons_xyz
    dhid = cfg.n_hidden_neurons_dir
    skips = set(cfg.append_xyz)
    keys = iter(jax.random.split(key, 64))

    def linear(kin, kout):
        lim = 1.0 / np.sqrt(kin)
        W = jax.random.uniform(next(keys), (kin, kout), jnp.float32, -lim, lim)
        b = jax.random.uniform(next(keys), (1, kout), jnp.float32, -lim, lim)
        return W, b

    params = {"mlp": []}
    for li in range(cfg.n_layers_xyz):
        if li == 0:
            dimin = d_embed
        elif li in skips:
            dimin = hid + d_embed
        else:
            dimin = hid
        params["mlp"].append(linear(dimin, hid))

    # density head: xavier-uniform weight, zero bias (matching the torch init)
    lim = np.sqrt(6.0 / (hid + 1))
    Wd = jax.random.uniform(next(keys), (hid, 1), jnp.float32, -lim, lim)
    params["density"] = (Wd, jnp.zeros((1, 1), jnp.float32))

    params["colour"] = [linear(hid, hid), linear(hid, dhid), linear(dhid, 3)]
    return params


# ----------------------------------------------------------------------------
# Pure-JAX reference (torch-style concatenation, HIGHEST-precision f32).
# ----------------------------------------------------------------------------
def nerf_ref(cfg, sample_points, params):
    hp = jax.lax.Precision.HIGHEST
    H = cfg.n_harmonic_functions_xyz
    freqs = 2.0 ** jnp.arange(H, dtype=jnp.float32)
    p = sample_points.reshape(-1, 3).astype(jnp.float32)
    emb = (p[:, :, None] * freqs[None, None, :]).reshape(p.shape[0], -1)
    z = jnp.concatenate([jnp.sin(emb), jnp.cos(emb), p], axis=-1)
    skips = set(cfg.append_xyz)
    y = z
    for li, (W, b) in enumerate(params["mlp"]):
        if li in skips and li != 0:
            y = jnp.concatenate([y, z], axis=-1)
        y = jax.nn.relu(jnp.dot(y, W, precision=hp) + b)
    Wd, bd = params["density"]
    density = jax.nn.relu(jnp.dot(y, Wd, precision=hp) + bd)
    (W0, b0), (W1, b1), (W2, b2) = params["colour"]
    h = jax.nn.relu(jnp.dot(y, W0, precision=hp) + b0)
    h = jax.nn.relu(jnp.dot(h, W1, precision=hp) + b1)
    rgb = jax.nn.sigmoid(jnp.dot(h, W2, precision=hp) + b2)
    return {"density": density, "feature": rgb}


if __name__ == "__main__":
    cfg = NerfConfig()
    key = jax.random.PRNGKey(0)
    k_pts, k_par = jax.random.split(key)

    # ray_bundle.sample_points: (batch=2, rays=16, pts_per_ray=8, 3) -> N=256 points
    sample_points = jax.random.normal(k_pts, (2, 16, 8, 3), jnp.float32) * 0.5

    params = init_params(cfg, k_par)
    flat = prepare_params(cfg, params)
    sfreq = make_sfreq(cfg)

    out = nerf_forward(sample_points, flat, sfreq, cfg=cfg, tile_n=1024)
    out = jax.block_until_ready(out)

    ref = nerf_ref(cfg, sample_points, params)
    n = 2 * 16 * 8
    assert out["density"].shape == (n, 1), out["density"].shape
    assert out["feature"].shape == (n, 3), out["feature"].shape

    d_kernel = np.asarray(out["density"]); d_ref = np.asarray(ref["density"])
    r_kernel = np.asarray(out["feature"]); r_ref = np.asarray(ref["feature"])
    ok = (np.allclose(d_kernel, d_ref, atol=2e-2, rtol=2e-2)
          and np.allclose(r_kernel, r_ref, atol=2e-2, rtol=2e-2))
    if ok:
        print("KERNEL_OK")
    else:
        print("mismatch vs reference: density max err %.3e, rgb max err %.3e"
              % (np.max(np.abs(d_kernel - d_ref)), np.max(np.abs(r_kernel - r_ref))))
</pallas_src>

<mosaic_0001>
module attributes {stable_mosaic.version = 11 : i64} {
  func.func @kernel(%arg0: i32, %arg1: memref<128x3xf32, #tpu.memory_space<vmem>>, %arg2: memref<3x18xf32, #tpu.memory_space<vmem>>, %arg3: memref<39x128xbf16, #tpu.memory_space<vmem>>, %arg4: memref<1x128xf32, #tpu.memory_space<vmem>>, %arg5: memref<128x128xbf16, #tpu.memory_space<vmem>>, %arg6: memref<1x128xf32, #tpu.memory_space<vmem>>, %arg7: memref<167x128xbf16, #tpu.memory_space<vmem>>, %arg8: memref<1x128xf32, #tpu.memory_space<vmem>>, %arg9: memref<128x128xbf16, #tpu.memory_space<vmem>>, %arg10: memref<1x128xf32, #tpu.memory_space<vmem>>, %arg11: memref<128x129xbf16, #tpu.memory_space<vmem>>, %arg12: memref<1x129xf32, #tpu.memory_space<vmem>>, %arg13: memref<128x64xbf16, #tpu.memory_space<vmem>>, %arg14: memref<1x64xf32, #tpu.memory_space<vmem>>, %arg15: memref<64x3xbf16, #tpu.memory_space<vmem>>, %arg16: memref<1x3xf32, #tpu.memory_space<vmem>>, %arg17: memref<128x4xf32, #tpu.memory_space<vmem>>) attributes {dimension_semantics = [#tpu.dimension_semantics<parallel>], iteration_bounds = array<i64: 2>, scalar_prefetch = 0 : i64, scratch_operands = 0 : i64, tpu.core_type = #tpu.core_type<tc>, window_params = [{transform_indices = @transform_0, window_bounds = array<i64: 128, 3>}, {pipeline_mode = #tpu.pipeline_mode<synchronous>, transform_indices = @transform_1, window_bounds = array<i64: 3, 18>}, {pipeline_mode = #tpu.pipeline_mode<synchronous>, transform_indices = @transform_2, window_bounds = array<i64: 39, 128>}, {pipeline_mode = #tpu.pipeline_mode<synchronous>, transform_indices = @transform_3, window_bounds = array<i64: 1, 128>}, {pipeline_mode = #tpu.pipeline_mode<synchronous>, transform_indices = @transform_4, window_bounds = array<i64: 128, 128>}, {pipeline_mode = #tpu.pipeline_mode<synchronous>, transform_indices = @transform_5, window_bounds = array<i64: 1, 128>}, {pipeline_mode = #tpu.pipeline_mode<synchronous>, transform_indices = @transform_6, window_bounds = array<i64: 167, 128>}, {pipeline_mode = #tpu.pipeline_mode<synchronous>, transform_indices = @transform_7, window_bounds = array<i64: 1, 128>}, {pipeline_mode = #tpu.pipeline_mode<synchronous>, transform_indices = @transform_8, window_bounds = array<i64: 128, 128>}, {pipeline_mode = #tpu.pipeline_mode<synchronous>, transform_indices = @transform_9, window_bounds = array<i64: 1, 128>}, {pipeline_mode = #tpu.pipeline_mode<synchronous>, transform_indices = @transform_10, window_bounds = array<i64: 128, 129>}, {pipeline_mode = #tpu.pipeline_mode<synchronous>, transform_indices = @transform_11, window_bounds = array<i64: 1, 129>}, {pipeline_mode = #tpu.pipeline_mode<synchronous>, transform_indices = @transform_12, window_bounds = array<i64: 128, 64>}, {pipeline_mode = #tpu.pipeline_mode<synchronous>, transform_indices = @transform_13, window_bounds = array<i64: 1, 64>}, {pipeline_mode = #tpu.pipeline_mode<synchronous>, transform_indices = @transform_14, window_bounds = array<i64: 64, 3>}, {pipeline_mode = #tpu.pipeline_mode<synchronous>, transform_indices = @transform_15, window_bounds = array<i64: 1, 3>}, {transform_indices = @transform_16, window_bounds = array<i64: 128, 4>}]} {
    %c0 = arith.constant 0 : index
    %c0_0 = arith.constant 0 : index
    %0 = vector.load %arg1[%c0, %c0_0] : memref<128x3xf32, #tpu.memory_space<vmem>>, vector<128x3xf32>
    %c0_1 = arith.constant 0 : index
    %c0_2 = arith.constant 0 : index
    %1 = vector.load %arg2[%c0_1, %c0_2] : memref<3x18xf32, #tpu.memory_space<vmem>>, vector<3x18xf32>
    %2 = vector.extract_strided_slice %0 {offsets = [0, 0], sizes = [128, 1], strides = [1, 1]} : vector<128x3xf32> to vector<128x1xf32>
    %3 = vector.extract_strided_slice %1 {offsets = [0, 0], sizes = [1, 18], strides = [1, 1]} : vector<3x18xf32> to vector<1x18xf32>
    %4 = vector.broadcast %2 : vector<128x1xf32> to vector<128x18xf32>
    %5 = vector.broadcast %3 : vector<1x18xf32> to vector<128x18xf32>
    %6 = arith.mulf %4, %5 : vector<128x18xf32>
    %7 = vector.extract_strided_slice %0 {offsets = [0, 1], sizes = [128, 1], strides = [1, 1]} : vector<128x3xf32> to vector<128x1xf32>
    %8 = vector.extract_strided_slice %1 {offsets = [1, 0], sizes = [1, 18], strides = [1, 1]} : vector<3x18xf32> to vector<1x18xf32>
    %9 = vector.broadcast %7 : vector<128x1xf32> to vector<128x18xf32>
    %10 = vector.broadcast %8 : vector<1x18xf32> to vector<128x18xf32>
    %11 = arith.mulf %9, %10 : vector<128x18xf32>
    %12 = arith.addf %6, %11 : vector<128x18xf32>
    %13 = vector.extract_strided_slice %0 {offsets = [0, 2], sizes = [128, 1], strides = [1, 1]} : vector<128x3xf32> to vector<128x1xf32>
    %14 = vector.extract_strided_slice %1 {offsets = [2, 0], sizes = [1, 18], strides = [1, 1]} : vector<3x18xf32> to vector<1x18xf32>
    %15 = vector.broadcast %13 : vector<128x1xf32> to vector<128x18xf32>
    %16 = vector.broadcast %14 : vector<1x18xf32> to vector<128x18xf32>
    %17 = arith.mulf %15, %16 : vector<128x18xf32>
    %18 = arith.addf %12, %17 : vector<128x18xf32>
    %19 = math.sin %18 : vector<128x18xf32>
    %20 = math.cos %18 : vector<128x18xf32>
    %21 = tpu.concatenate %19, %20, %0 in 1 : vector<128x18xf32>, vector<128x18xf32>, vector<128x3xf32> -> vector<128x39xf32>
    %c0_3 = arith.constant 0 : index
    %c0_4 = arith.constant 0 : index
    %22 = vector.load %arg3[%c0_3, %c0_4] : memref<39x128xbf16, #tpu.memory_space<vmem>>, vector<39x128xbf16>
    %c0_5 = arith.constant 0 : index
    %c0_6 = arith.constant 0 : index
    %23 = vector.load %arg4[%c0_5, %c0_6] : memref<1x128xf32, #tpu.memory_space<vmem>>, vector<1x128xf32>
    %24 = arith.truncf %21 : vector<128x39xf32> to vector<128x39xbf16>
    %cst = arith.constant dense<0.000000e+00> : vector<128x128xf32>
    %25 = tpu.matmul %24, %22, %cst {dimension_numbers = #tpu.dot_dimension_numbers<[1], [0], [0], [1], [0, 0, 1, 1], [], []>} : vector<128x39xbf16>, vector<39x128xbf16>, vector<128x128xf32> -> vector<128x128xf32>
    %26 = vector.broadcast %23 : vector<1x128xf32> to vector<128x128xf32>
    %27 = arith.addf %25, %26 : vector<128x128xf32>
    %cst_7 = arith.constant 0.000000e+00 : f32
    %28 = vector.broadcast %cst_7 : f32 to vector<128x128xf32>
    %29 = arith.maximumf %27, %28 : vector<128x128xf32>
    %c0_8 = arith.constant 0 : index
    %c0_9 = arith.constant 0 : index
    %30 = vector.load %arg5[%c0_8, %c0_9] : memref<128x128xbf16, #tpu.memory_space<vmem>>, vector<128x128xbf16>
    %c0_10 = arith.constant 0 : index
    %c0_11 = arith.constant 0 : index
    %31 = vector.load %arg6[%c0_10, %c0_11] : memref<1x128xf32, #tpu.memory_space<vmem>>, vector<1x128xf32>
    %32 = arith.truncf %29 : vector<128x128xf32> to vector<128x128xbf16>
    %cst_12 = arith.constant dense<0.000000e+00> : vector<128x128xf32>
    %33 = tpu.matmul %32, %30, %cst_12 {dimension_numbers = #tpu.dot_dimension_numbers<[1], [0], [0], [1], [0, 0, 1, 1], [], []>} : vector<128x128xbf16>, vector<128x128xbf16>, vector<128x128xf32> -> vector<128x128xf32>
    %34 = vector.broadcast %31 : vector<1x128xf32> to vector<128x128xf32>
    %35 = arith.addf %33, %34 : vector<128x128xf32>
    %cst_13 = arith.constant 0.000000e+00 : f32
    %36 = vector.broadcast %cst_13 : f32 to vector<128x128xf32>
    %37 = arith.maximumf %35, %36 : vector<128x128xf32>
    %c0_14 = arith.constant 0 : index
    %c0_15 = arith.constant 0 : index
    %38 = vector.load %arg7[%c0_14, %c0_15] : memref<167x128xbf16, #tpu.memory_space<vmem>>, vector<167x128xbf16>
    %c0_16 = arith.constant 0 : index
    %c0_17 = arith.constant 0 : index
    %39 = vector.load %arg8[%c0_16, %c0_17] : memref<1x128xf32, #tpu.memory_space<vmem>>, vector<1x128xf32>
    %40 = tpu.concatenate %37, %21 in 1 : vector<128x128xf32>, vector<128x39xf32> -> vector<128x167xf32>
    %41 = arith.truncf %40 : vector<128x167xf32> to vector<128x167xbf16>
    %cst_18 = arith.constant dense<0.000000e+00> : vector<128x128xf32>
    %42 = tpu.matmul %41, %38, %cst_18 {dimension_numbers = #tpu.dot_dimension_numbers<[1], [0], [0], [1], [0, 0, 1, 1], [], []>} : vector<128x167xbf16>, vector<167x128xbf16>, vector<128x128xf32> -> vector<128x128xf32>
    %43 = vector.broadcast %39 : vector<1x128xf32> to vector<128x128xf32>
    %44 = arith.addf %42, %43 : vector<128x128xf32>
    %cst_19 = arith.constant 0.000000e+00 : f32
    %45 = vector.broadcast %cst_19 : f32 to vector<128x128xf32>
    %46 = arith.maximumf %44, %45 : vector<128x128xf32>
    %c0_20 = arith.constant 0 : index
    %c0_21 = arith.constant 0 : index
    %47 = vector.load %arg9[%c0_20, %c0_21] : memref<128x128xbf16, #tpu.memory_space<vmem>>, vector<128x128xbf16>
    %c0_22 = arith.constant 0 : index
    %c0_23 = arith.constant 0 : index
    %48 = vector.load %arg10[%c0_22, %c0_23] : memref<1x128xf32, #tpu.memory_space<vmem>>, vector<1x128xf32>
    %49 = arith.truncf %46 : vector<128x128xf32> to vector<128x128xbf16>
    %cst_24 = arith.constant dense<0.000000e+00> : vector<128x128xf32>
    %50 = tpu.matmul %49, %47, %cst_24 {dimension_numbers = #tpu.dot_dimension_numbers<[1], [0], [0], [1], [0, 0, 1, 1], [], []>} : vector<128x128xbf16>, vector<128x128xbf16>, vector<128x128xf32> -> vector<128x128xf32>
    %51 = vector.broadcast %48 : vector<1x128xf32> to vector<128x128xf32>
    %52 = arith.addf %50, %51 : vector<128x128xf32>
    %cst_25 = arith.constant 0.000000e+00 : f32
    %53 = vector.broadcast %cst_25 : f32 to vector<128x128xf32>
    %54 = arith.maximumf %52, %53 : vector<128x128xf32>
    %c0_26 = arith.constant 0 : index
    %c0_27 = arith.constant 0 : index
    %55 = vector.load %arg11[%c0_26, %c0_27] : memref<128x129xbf16, #tpu.memory_space<vmem>>, vector<128x129xbf16>
    %c0_28 = arith.constant 0 : index
    %c0_29 = arith.constant 0 : index
    %56 = vector.load %arg12[%c0_28, %c0_29] : memref<1x129xf32, #tpu.memory_space<vmem>>, vector<1x129xf32>
    %57 = arith.truncf %54 : vector<128x128xf32> to vector<128x128xbf16>
    %cst_30 = arith.constant dense<0.000000e+00> : vector<128x129xf32>
    %58 = tpu.matmul %57, %55, %cst_30 {dimension_numbers = #tpu.dot_dimension_numbers<[1], [0], [0], [1], [0, 0, 1, 1], [], []>} : vector<128x128xbf16>, vector<128x129xbf16>, vector<128x129xf32> -> vector<128x129xf32>
    %59 = vector.broadcast %56 : vector<1x129xf32> to vector<128x129xf32>
    %60 = arith.addf %58, %59 : vector<128x129xf32>
    %cst_31 = arith.constant 0.000000e+00 : f32
    %61 = vector.broadcast %cst_31 : f32 to vector<128x129xf32>
    %62 = arith.maximumf %60, %61 : vector<128x129xf32>
    %63 = vector.extract_strided_slice %62 {offsets = [0, 0], sizes = [128, 128], strides = [1, 1]} : vector<128x129xf32> to vector<128x128xf32>
    %64 = vector.extract_strided_slice %62 {offsets = [0, 128], sizes = [128, 1], strides = [1, 1]} : vector<128x129xf32> to vector<128x1xf32>
    %c0_32 = arith.constant 0 : index
    %c0_33 = arith.constant 0 : index
    %65 = vector.load %arg13[%c0_32, %c0_33] : memref<128x64xbf16, #tpu.memory_space<vmem>>, vector<128x64xbf16>
    %c0_34 = arith.constant 0 : index
    %c0_35 = arith.constant 0 : index
    %66 = vector.load %arg14[%c0_34, %c0_35] : memref<1x64xf32, #tpu.memory_space<vmem>>, vector<1x64xf32>
    %c0_36 = arith.constant 0 : index
    %c0_37 = arith.constant 0 : index
    %67 = vector.load %arg15[%c0_36, %c0_37] : memref<64x3xbf16, #tpu.memory_space<vmem>>, vector<64x3xbf16>
    %c0_38 = arith.constant 0 : index
    %c0_39 = arith.constant 0 : index
    %68 = vector.load %arg16[%c0_38, %c0_39] : memref<1x3xf32, #tpu.memory_space<vmem>>, vector<1x3xf32>
    %69 = arith.truncf %63 : vector<128x128xf32> to vector<128x128xbf16>
    %cst_40 = arith.constant dense<0.000000e+00> : vector<128x64xf32>
    %70 = tpu.matmul %69, %65, %cst_40 {dimension_numbers = #tpu.dot_dimension_numbers<[1], [0], [0], [1], [0, 0, 1, 1], [], []>} : vector<128x128xbf16>, vector<128x64xbf16>, vector<128x64xf32> -> vector<128x64xf32>
    %71 = vector.broadcast %66 : vector<1x64xf32> to vector<128x64xf32>
    %72 = arith.addf %70, %71 : vector<128x64xf32>
    %cst_41 = arith.constant 0.000000e+00 : f32
    %73 = vector.broadcast %cst_41 : f32 to vector<128x64xf32>
    %74 = arith.maximumf %72, %73 : vector<128x64xf32>
    %75 = arith.truncf %74 : vector<128x64xf32> to vector<128x64xbf16>
    %cst_42 = arith.constant dense<0.000000e+00> : vector<128x3xf32>
    %76 = tpu.matmul %75, %67, %cst_42 {dimension_numbers = #tpu.dot_dimension_numbers<[1], [0], [0], [1], [0, 0, 1, 1], [], []>} : vector<128x64xbf16>, vector<64x3xbf16>, vector<128x3xf32> -> vector<128x3xf32>
    %77 = vector.broadcast %68 : vector<1x3xf32> to vector<128x3xf32>
    %78 = arith.addf %76, %77 : vector<128x3xf32>
    %cst_43 = arith.constant 0.000000e+00 : f32
    %79 = vector.broadcast %cst_43 : f32 to vector<128x3xf32>
    %80 = arith.subf %79, %78 : vector<128x3xf32>
    %81 = math.exp %80 : vector<128x3xf32>
    %cst_44 = arith.constant 1.000000e+00 : f32
    %82 = vector.broadcast %cst_44 : f32 to vector<128x3xf32>
    %83 = arith.addf %82, %81 : vector<128x3xf32>
    %cst_45 = arith.constant 1.000000e+00 : f32
    %84 = vector.broadcast %cst_45 : f32 to vector<128x3xf32>
    %85 = arith.divf %84, %83 : vector<128x3xf32>
    %86 = tpu.concatenate %64, %85 in 1 : vector<128x1xf32>, vector<128x3xf32> -> vector<128x4xf32>
    %c0_46 = arith.constant 0 : index
    %c0_47 = arith.constant 0 : index
    %87 = vector.load %arg17[%c0_46, %c0_47] : memref<128x4xf32, #tpu.memory_space<vmem>>, vector<128x4xf32>
    tpu.vector_store %arg17[%c0_46, %c0_47], %86 {strides = array<i32>} : memref<128x4xf32, #tpu.memory_space<vmem>>, vector<128x4xf32>,
    return
  }
  func.func @transform_0(%arg0: i32) -> (i32, i32) {
    %c0_i32 = arith.constant 0 : i32
    %c0_i32_0 = arith.constant 0 : i32
    return %arg0, %c0_i32 : i32, i32
  }
  func.func @transform_1(%arg0: i32) -> (i32, i32) {
    %c0_i32 = arith.constant 0 : i32
    %c0_i32_0 = arith.constant 0 : i32
    %c0_i32_1 = arith.constant 0 : i32
    return %c0_i32, %c0_i32_0 : i32, i32
  }
  func.func @transform_2(%arg0: i32) -> (i32, i32) {
    %c0_i32 = arith.constant 0 : i32
    %c0_i32_0 = arith.constant 0 : i32
    %c0_i32_1 = arith.constant 0 : i32
    return %c0_i32, %c0_i32_0 : i32, i32
  }
  func.func @transform_3(%arg0: i32) -> (i32, i32) {
    %c0_i32 = arith.constant 0 : i32
    %c0_i32_0 = arith.constant 0 : i32
    %c0_i32_1 = arith.constant 0 : i32
    return %c0_i32, %c0_i32_0 : i32, i32
  }
  func.func @transform_4(%arg0: i32) -> (i32, i32) {
    %c0_i32 = arith.constant 0 : i32
    %c0_i32_0 = arith.constant 0 : i32
    %c0_i32_1 = arith.constant 0 : i32
    return %c0_i32, %c0_i32_0 : i32, i32
  }
  func.func @transform_5(%arg0: i32) -> (i32, i32) {
    %c0_i32 = arith.constant 0 : i32
    %c0_i32_0 = arith.constant 0 : i32
    %c0_i32_1 = arith.constant 0 : i32
    return %c0_i32, %c0_i32_0 : i32, i32
  }
  func.func @transform_6(%arg0: i32) -> (i32, i32) {
    %c0_i32 = arith.constant 0 : i32
    %c0_i32_0 = arith.constant 0 : i32
    %c0_i32_1 = arith.constant 0 : i32
    return %c0_i32, %c0_i32_0 : i32, i32
  }
  func.func @transform_7(%arg0: i32) -> (i32, i32) {
    %c0_i32 = arith.constant 0 : i32
    %c0_i32_0 = arith.constant 0 : i32
    %c0_i32_1 = arith.constant 0 : i32
    return %c0_i32, %c0_i32_0 : i32, i32
  }
  func.func @transform_8(%arg0: i32) -> (i32, i32) {
    %c0_i32 = arith.constant 0 : i32
    %c0_i32_0 = arith.constant 0 : i32
    %c0_i32_1 = arith.constant 0 : i32
    return %c0_i32, %c0_i32_0 : i32, i32
  }
  func.func @transform_9(%arg0: i32) -> (i32, i32) {
    %c0_i32 = arith.constant 0 : i32
    %c0_i32_0 = arith.constant 0 : i32
    %c0_i32_1 = arith.constant 0 : i32
    return %c0_i32, %c0_i32_0 : i32, i32
  }
  func.func @transform_10(%arg0: i32) -> (i32, i32) {
    %c0_i32 = arith.constant 0 : i32
    %c0_i32_0 = arith.constant 0 : i32
    %c0_i32_1 = arith.constant 0 : i32
    return %c0_i32, %c0_i32_0 : i32, i32
  }
  func.func @transform_11(%arg0: i32) -> (i32, i32) {
    %c0_i32 = arith.constant 0 : i32
    %c0_i32_0 = arith.constant 0 : i32
    %c0_i32_1 = arith.constant 0 : i32
    return %c0_i32, %c0_i32_0 : i32, i32
  }
  func.func @transform_12(%arg0: i32) -> (i32, i32) {
    %c0_i32 = arith.constant 0 : i32
    %c0_i32_0 = arith.constant 0 : i32
    %c0_i32_1 = arith.constant 0 : i32
    return %c0_i32, %c0_i32_0 : i32, i32
  }
  func.func @transform_13(%arg0: i32) -> (i32, i32) {
    %c0_i32 = arith.constant 0 : i32
    %c0_i32_0 = arith.constant 0 : i32
    %c0_i32_1 = arith.constant 0 : i32
    return %c0_i32, %c0_i32_0 : i32, i32
  }
  func.func @transform_14(%arg0: i32) -> (i32, i32) {
    %c0_i32 = arith.constant 0 : i32
    %c0_i32_0 = arith.constant 0 : i32
    %c0_i32_1 = arith.constant 0 : i32
    return %c0_i32, %c0_i32_0 : i32, i32
  }
  func.func @transform_15(%arg0: i32) -> (i32, i32) {
    %c0_i32 = arith.constant 0 : i32
    %c0_i32_0 = arith.constant 0 : i32
    %c0_i32_1 = arith.constant 0 : i32
    return %c0_i32, %c0_i32_0 : i32, i32
  }
  func.func @transform_16(%arg0: i32) -> (i32, i32) {
    %c0_i32 = arith.constant 0 : i32
    %c0_i32_0 = arith.constant 0 : i32
    return %arg0, %c0_i32 : i32, i32
  }
}

</mosaic_0001>

<bundles_post_ra>
// kernel: nerf_forward.1
= control target key start
LH: loop header
LB: loop body
LE: loop exit
PB: predicated region body
PF: predicated region fallthrough
CT: control target
= control target key end

     0   :  { %s8255_s21 = smov 0   ;;  %s12057_s0 = inlined_call_operand.vmem [shape: f32[256,3], index: 0, kind: input, shape index: {}]   ;;  %s12058_s1 = inlined_call_operand.vmem [shape: f32[3,18], index: 1, kind: input, shape index: {}]   ;;  %s12059_s2 = inlined_call_operand.vmem [shape: bf16[39,128], index: 2, kind: input, shape index: {}]   ;;  %s12060_s3 = inlined_call_operand.vmem [shape: f32[1,128], index: 3, kind: input, shape index: {}]   ;;  %s12061_s4 = inlined_call_operand.vmem [shape: bf16[128,128], index: 4, kind: input, shape index: {}]   ;;  %s12062_s5 = inlined_call_operand.vmem [shape: f32[1,128], index: 5, kind: input, shape index: {}]   ;;  %s12063_s6 = inlined_call_operand.vmem [shape: bf16[167,128], index: 6, kind: input, shape index: {}]   ;;  %s12064_s7 = inlined_call_operand.vmem [shape: f32[1,128], index: 7, kind: input, shape index: {}]   ;;  %s12065_s8 = inlined_call_operand.vmem [shape: bf16[128,128], index: 8, kind: input, shape index: {}]   ;;  %s12066_s9 = inlined_call_operand.vmem [shape: f32[1,128], index: 9, kind: input, shape index: {}]   ;;  %s12067_s10 = inlined_call_operand.vmem [shape: bf16[128,129], index: 10, kind: input, shape index: {}]   ;;  %s12068_s11 = inlined_call_operand.vmem [shape: f32[1,129], index: 11, kind: input, shape index: {}]   ;;  %s12069_s12 = inlined_call_operand.vmem [shape: bf16[128,64], index: 12, kind: input, shape index: {}]   ;;  %s12070_s13 = inlined_call_operand.vmem [shape: f32[1,64], index: 13, kind: input, shape index: {}]   ;;  %s12071_s14 = inlined_call_operand.vmem [shape: bf16[64,3], index: 14, kind: input, shape index: {}]   ;;  %s12072_s15 = inlined_call_operand.vmem [shape: f32[1,3], index: 15, kind: input, shape index: {}]   ;;  %s12073_s16 = inlined_call_operand.vmem [shape: f32[256,4], index: 16, kind: output, shape index: {}]  }
   0x1   :  { %12245 = sst [smem:[#allocation88_spill]] %s12057_s0 }
   0x2 LB: > { %s7505_s22 = sadd.s32 4294967295, %s8155_s21   ;;  %p7509_p0 = scmp.ge.s32.totalorder %s8155_s21, 1  ;;  %s8155_s21 = sphi %s8255_s21, %s26_s21  }
   0x3   : > { %p463_p1 = scmp.lt.s32.totalorder %s8155_s21, 3 }
   0x5   : > { %p464_p2 = pnand %p7509_p0, %p463_p1 }
   0x7   : > { %467 = sbr.rel (%p464_p2) target bundleno = 2120 (0x848), region = 84 }
   0xc   : > { %s7510_s23 = sshll.u32 %s7505_s22, 4  ;;  %v8157_v0 = vmov 2   ;;  %v8158_v1 = vmov 1   ;;  %v12078_v2 = vmov 0   ;;  %s12246_s27 = sld [smem:[#allocation88_spill]] }
   0xd   : > { %7948 = vset.pattern.permute.xlu2 %v8157_v0  ;;  %7947 = vset.pattern.permute.xlu1 %v8158_v1  ;;  %p514_p3 = scmp.lt.s32.totalorder %s7510_s23, 31  ;;  %v542_v26 = vld [vmem:[%s12058_s1] sm:$0x7]  ;;  %s8166_s0 = smov 36  }
   0xe   : > { %7946 = vset.pattern.permute.xlu0 %v12078_v2  ;;  %v8335_v27 = vperm.slane %v542_v26, 1  ;;  %v8337_v28 = vperm.slane %v542_v26, 0  ;;  %v8344_v32 = vperm.slane %v542_v26, 2  ;;  %s8167_s17 = smov 18  }
   0xf   : > { %s12652_s23 = smov (!%p514_p3, %s7510_s23), 31 }
  0x10   : > { %s7511_s24 = sshll.u32 %s12652_s23, 3 }
  0x11   : > { %s11981_s30 = scalar_lea.vmem %s12073_s16, %s7511_s24 }
  0x12   : > { %s8274_s28 = scalar_lea.vmem %s12246_s27, %s7511_s24  ;;  %s8169_s27 = smov 1  }
  0x13   : > { %v8277_v3 = vld [vmem:[%s8274_s28] sm:$0xff]  ;;  %v8283_v4 = vld [vmem:[%s8274_s28 + $0x8] sm:$0xff]  ;;  %v528_v5 = vld [vmem:[%s8274_s28 + $0x10] sm:$0xff] }
  0x14   : > { %738 = vperm.xlu2 %7948, %v8277_v3   ;;  %641 = vperm.xlu1 %7947, %v8277_v3   ;;  %v529_v6 = vld [vmem:[%s8274_s28 + $0x18] sm:$0xff]  ;;  %v530_v7 = vld [vmem:[%s8274_s28 + $0x20] sm:$0xff]  ;;  %v531_v8 = vld [vmem:[%s8274_s28 + $0x28] sm:$0xff] }
  0x15   : > { %545 = vperm.xlu0 %7946, %v8277_v3   ;;  %v532_v9 = vld [vmem:[%s8274_s28 + $0x30] sm:$0xff]  ;;  %v533_v10 = vld [vmem:[%s8274_s28 + $0x38] sm:$0xff]  ;;  %v535_v11 = vld [vmem:[%s8274_s28 + $0x48] sm:$0xff] }
  0x16   : > { %v536_v12 = vld [vmem:[%s8274_s28 + $0x50] sm:$0xff]  ;;  %v534_v13 = vld [vmem:[%s8274_s28 + $0x40] sm:$0xff]  ;;  %v537_v14 = vld [vmem:[%s8274_s28 + $0x58] sm:$0xff] }
  0x17   : > { %v538_v15 = vld [vmem:[%s8274_s28 + $0x60] sm:$0xff]  ;;  %v539_v17 = vld [vmem:[%s8274_s28 + $0x68] sm:$0xff]  ;;  %v540_v19 = vld [vmem:[%s8274_s28 + $0x70] sm:$0xff] }
  0x18   : > { %v541_v31 = vld [vmem:[%s8274_s28 + $0x78] sm:$0xff] }
  0x1c   : > { %742 = vperm.xlu2 %7948, %v8283_v4   ;;  %645 = vperm.xlu1 %7947, %v8283_v4  }
  0x1d   : > { %550 = vperm.xlu0 %7946, %v8283_v4  }
  0x24   : > { %7950 = vset.pattern.permute.xlu2 %v8158_v1  ;;  %7949 = vset.pattern.permute.xlu1 %v12078_v2 }
  0x25   : > { %555 = vperm.xlu0 %7946, %v528_v5   ;;  %649 = vperm.xlu2 %7950, %v528_v5  }
  0x26   : > { %560 = vperm.xlu1 %7949, %v529_v6  }
  0x2d   : > { %7951 = vset.pattern.permute.xlu0 %v8158_v1  ;;  %7953 = vset.pattern.permute.xlu2 %v8157_v0 }
  0x2e   : > { %7952 = vset.pattern.permute.xlu1 %v8157_v0  ;;  %653 = vperm.xlu0 %7951, %v529_v6  }
  0x2f   : > { %750 = vperm.xlu2 %7953, %v529_v6   ;;  %746 = vperm.xlu1 %7952, %v528_v5  }
  0x36   : > { %657 = vperm.xlu0 %7951, %v530_v7  }
  0x37   : > { %7955 = vset.pattern.permute.xlu2 %v12078_v2  ;;  %7954 = vset.pattern.permute.xlu1 %v12078_v2 }
  0x38   : > { %570 = vperm.xlu2 %7955, %v531_v8   ;;  %565 = vperm.xlu1 %7954, %v530_v7  }
  0x3e   : > { %7958 = vset.pattern.permute.xlu0 %v8157_v0 }
  0x3f   : > { %758 = vperm.xlu0 %7958, %v531_v8  }
  0x40   : > { %7957 = vset.pattern.permute.xlu2 %v8157_v0  ;;  %7956 = vset.pattern.permute.xlu1 %v8158_v1 }
  0x41   : > { %754 = vperm.xlu2 %7957, %v530_v7   ;;  %661 = vperm.xlu1 %7956, %v531_v8  }
  0x47   : > { %762 = vperm.xlu0 %7958, %v532_v9  }
  0x49   : > { %7960 = vset.pattern.permute.xlu2 %v12078_v2  ;;  %7959 = vset.pattern.permute.xlu1 %v12078_v2 }
  0x4a   : > { %580 = vperm.xlu2 %7960, %v533_v10   ;;  %575 = vperm.xlu1 %7959, %v532_v9  }
  0x4f   : > { %7965 = vset.pattern.permute.xlu0 %v12078_v2 }
  0x50   : > { %590 = vperm.xlu0 %7965, %v535_v11  }
  0x52   : > { %7962 = vset.pattern.permute.xlu2 %v8158_v1  ;;  %7961 = vset.pattern.permute.xlu1 %v8158_v1 }
  0x53   : > { %669 = vperm.xlu2 %7962, %v533_v10   ;;  %665 = vperm.xlu1 %7961, %v532_v9  }
  0x58   : > { %595 = vperm.xlu0 %7965, %v536_v12  }
  0x5b   : > { %7964 = vset.pattern.permute.xlu2 %v12078_v2  ;;  %7963 = vset.pattern.permute.xlu1 %v8157_v0 }
  0x5c   : > { %585 = vperm.xlu2 %7964, %v534_v13   ;;  %766 = vperm.xlu1 %7963, %v533_v10  }
  0x60   : > { %7972 = vset.pattern.permute.xlu0 %v8158_v1 }
  0x61   : > { %685 = vperm.xlu0 %7972, %v537_v14  }
  0x64   : > { %7967 = vset.pattern.permute.xlu2 %v8158_v1  ;;  %7966 = vset.pattern.permute.xlu1 %v8158_v1 }
  0x65   : > { %677 = vperm.xlu2 %7967, %v535_v11   ;;  %673 = vperm.xlu1 %7966, %v534_v13  }
  0x69   : > { %689 = vperm.xlu0 %7972, %v538_v15  }
  0x6d   : > { %7969 = vset.pattern.permute.xlu2 %v8157_v0  ;;  %7968 = vset.pattern.permute.xlu1 %v8157_v0 }
  0x6e   : > { %774 = vperm.xlu2 %7969, %v535_v11   ;;  %770 = vperm.xlu1 %7968, %v534_v13   ;;  %v739_v16 = vpop.permute.xlu2 %738 }
  0x6f   : > { %v802_v38 = vmul.f32 %v8344_v32, %v739_v16 }
  0x71   : > { %7979 = vset.pattern.permute.xlu0 %v8157_v0 }
  0x72   : > { %790 = vperm.xlu0 %7979, %v539_v17  }
  0x76   : > { %7970 = vset.pattern.permute.xlu1 %v12078_v2  ;;  %7971 = vset.pattern.permute.xlu2 %v8158_v1  ;;  %v743_v18 = vpop.permute.xlu2 %742 }
  0x77   : > { %600 = vperm.xlu1 %7970, %v537_v14   ;;  %681 = vperm.xlu2 %7971, %v536_v12   ;;  %v803_v49 = vmul.f32 %v8344_v32, %v743_v18 }
  0x7a   : > { %794 = vperm.xlu0 %7979, %v540_v19  }
  0x7f   : > { %7973 = vset.pattern.permute.xlu1 %v8157_v0  ;;  %7974 = vset.pattern.permute.xlu2 %v8157_v0  ;;  %v650_v20 = vpop.permute.xlu2 %649 }
  0x80   : > { %778 = vperm.xlu1 %7973, %v536_v12   ;;  %782 = vperm.xlu2 %7974, %v537_v14   ;;  %v707_v36 = vmul.f32 %v8335_v27, %v650_v20 }
  0x86   : > { %v642_v21 = vpop.permute.xlu1 %641 }
  0x87   : > { %v546_v22 = vpop.permute.xlu0 %545  ;;  %v705_v33 = vmul.f32 %v8335_v27, %v642_v21 }
  0x88   : > { %7975 = vset.pattern.permute.xlu1 %v12078_v2  ;;  %7976 = vset.pattern.permute.xlu2 %v12078_v2  ;;  %v624_v34 = vmul.f32 %v8337_v28, %v546_v22 }
  0x89   : > { %605 = vperm.xlu1 %7975, %v538_v15   ;;  %610 = vperm.xlu2 %7976, %v539_v17   ;;  %v751_v24 = vpop.permute.xlu2 %750 }
  0x8a   : > { %v721_v39 = vadd.f32 %v705_v33, %v624_v34  ;;  %v805_v61 = vmul.f32 %v8344_v32, %v751_v24 }
  0x8c   : > { %v8354_v46 = vadd.f32 %v802_v38, %v721_v39 }
  0x8e   : > { %v646_v23 = vpop.permute.xlu1 %645  ;;  %12247 = vst [vmem:[#allocation2_spill] sm:$0xff] %v8354_v46  ;;  %v837_v51 = vand.u32 2139095040, %v8354_v46 }
  0x8f   : > { %v551_v25 = vpop.permute.xlu0 %550  ;;  %v706_v40 = vmul.f32 %v8335_v27, %v646_v23 }
  0x90   : > { %v625_v41 = vmul.f32 %v8337_v28, %v551_v25  ;;  %v838_v55 = vshrl.u32 %v837_v51, 23 }
  0x91   : > { %7977 = vset.pattern.permute.xlu1 %v8158_v1  ;;  %7978 = vset.pattern.permute.xlu2 %v8157_v0 }
  0x92   : > { %693 = vperm.xlu1 %7977, %v539_v17   ;;  %786 = vperm.xlu2 %7978, %v538_v15   ;;  %v8339_v29 = vpop.permute.xlu2 %570  ;;  %v722_v47 = vadd.f32 %v706_v40, %v625_v41  ;;  %v7514_v62 = vadd.s32 4294967169, %v838_v55  ;;  %v12084_v41 = vmov 920167782  }
  0x93   : > { %v629_v20 = vmul.f32 %v8337_v28, %v8339_v29  ;;  %v12092_v29 = vmov 1326507024  }
  0x94   : > { %v8363_v52 = vadd.f32 %v803_v49, %v722_v47  ;;  %v844_v7 = vadd.s32 1, %v7514_v62  ;;  %v12076_v47 = vmov 2131351028  }
  0x96   : > { %v992_v56 = vand.u32 2139095040, %v8363_v52  ;;  %vm845_vm1 = vcmp.gt.s32.totalorder %v844_v7, 0 }
  0x97   : > { %v556_v35 = vpop.permute.xlu0 %555  ;;  %v846_v15 = vsel %vm845_vm1, %v844_v7, 0 }
  0x98   : > { %v561_v30 = vpop.permute.xlu1 %560  ;;  %v626_v37 = vmul.f32 %v8337_v28, %v556_v35  ;;  %v993_v63 = vshrl.u32 %v992_v56, 23 }
  0x99   : > { %v627_v60 = vmul.f32 %v8337_v28, %v561_v30 }
  0x9a   : > { %7980 = vset.pattern.permute.xlu1 %v12078_v2  ;;  %7981 = vset.pattern.permute.xlu2 %v12078_v2  ;;  %v723_v42 = vadd.f32 %v707_v36, %v626_v37  ;;  %v7517_v8 = vadd.s32 4294967169, %v993_v63 }
  0x9b   : > { %615 = vperm.xlu1 %7980, %v540_v19   ;;  %620 = vperm.xlu2 %7981, %v541_v31   ;;  %v755_v44 = vpop.permute.xlu2 %754 }
  0x9c   : > { %v806_v37 = vmul.f32 %v8344_v32, %v755_v44 }
  0xa0   : > { %v654_v53 = vpop.permute.xlu0 %653 }
  0xa1   : > { %v747_v43 = vpop.permute.xlu1 %746  ;;  %v708_v57 = vmul.f32 %v8335_v27, %v654_v53 }
  0xa2   : > { %v804_v45 = vmul.f32 %v8344_v32, %v747_v43 }
  0xa3   : > { %7982 = vset.pattern.permute.xlu1 %v8158_v1  ;;  %7983 = vset.pattern.permute.xlu2 %v8158_v1  ;;  %v724_v1 = vadd.f32 %v708_v57, %v627_v60  ;;  %v12080_v57 = vmov 2475754826  }
  0xa4   : > { %v8358_v48 = vadd.f32 %v804_v45, %v723_v42  ;;  %697 = vperm.xlu1 %7982, %v540_v19   ;;  %701 = vperm.xlu2 %7983, %v541_v31   ;;  %v8367_v59 = vpop.permute.xlu2 %580  ;;  %v8379_v19 = vand.u32 31, %v846_v15 }
  0xa5   : > { %v8372_v9 = vadd.f32 %v805_v61, %v724_v1 }
  0xa6   : > { %12248 = vst [vmem:[#allocation3_spill] sm:$0xff] %v8358_v48  ;;  %v1147_v50 = vand.u32 2139095040, %v8358_v48  ;;  %v8393_v34 = vsub.s32 32, %v8379_v19  ;;  %v12074_v40 = vand.u32 2147483647, %v8358_v48 }
  0xa7   : > { %12249 = vst [vmem:[#allocation4_spill] sm:$0xff] %v8372_v9  ;;  %v1302_v13 = vand.u32 2139095040, %v8372_v9  ;;  %v12260_v48 = vmov 920167782  }
  0xa8   : > { %v1148_v54 = vshrl.u32 %v1147_v50, 23  ;;  %v658_v10 = vpop.permute.xlu0 %657  ;;  %v12090_v50 = vmov 2102212464   ;;  %v861_v53 = vshrl.u32 %v12084_v41, %v8393_v34  ;;  %v1151_v1 = vand.u32 8388607, %v12074_v40 }
  0xa9   : > { %v1303_v17 = vshrl.u32 %v1302_v13, 23  ;;  %v709_v24 = vmul.f32 %v8335_v27, %v658_v10  ;;  %v860_v63 = vshll.u32 %v12090_v50, %v8379_v19  ;;  %v8438_v10 = vshrl.u32 %v846_v15, 5 }
  0xaa   : > { %v7520_v58 = vadd.s32 4294967169, %v1148_v54  ;;  %v566_v6 = vpop.permute.xlu1 %565  ;;  %v12075_v15 = vand.u32 2147483647, %v8354_v46 }
  0xab   : > { %v7523_v25 = vadd.s32 4294967169, %v1303_v17  ;;  %v628_v26 = vmul.f32 %v8337_v28, %v566_v6  ;;  %v863_v17 = vshll.u32 %v12084_v41, %v8379_v19  ;;  %vm869_vm8 = vcmp.lt.s32.totalorder %v8438_v10, 4 }
  0xac   : > { %7984 = vset.pattern.permute.xlu1 %v8157_v0  ;;  %v1154_v5 = vadd.s32 1, %v7520_v58  ;;  %v999_v0 = vadd.s32 1, %v7517_v8 }
  0xad   : > { %798 = vperm.xlu1 %7984, %v541_v31   ;;  %v8374_v12 = vpop.permute.xlu2 %669  ;;  %v1309_v39 = vadd.s32 1, %v7523_v25  ;;  %v725_v43 = vadd.f32 %v709_v24, %v628_v26  ;;  %v1152_v26 = vor.u32 8388608, %v1151_v1 }
  0xae   : > { %vm1155_vm0 = vcmp.gt.s32.totalorder %v1154_v5, 0  ;;  %vm1000_vm2 = vcmp.gt.s32.totalorder %v999_v0, 0 }
  0xaf   : > { %v1156_v11 = vsel %vm1155_vm0, %v1154_v5, 0  ;;  %v1001_v23 = vsel %vm1000_vm2, %v999_v0, 0  ;;  %vm1310_vm3 = vcmp.gt.s32.totalorder %v1309_v39, 0  ;;  %v8431_v5 = vadd.f32 %v806_v37, %v725_v43 }
  0xb0   : > { %v8377_v14 = vand.u32 31, %v1156_v11  ;;  %v8397_v36 = vand.u32 31, %v1001_v23  ;;  %v8405_v45 = vshrl.u32 %v1156_v11, 5  ;;  %v864_v11 = vshrl.u32 %v12092_v29, %v8393_v34 }
  0xb1   : > { %v759_v18 = vpop.permute.xlu0 %758  ;;  %12251 = vst [vmem:[#allocation6_spill] sm:$0xff] %v8431_v5  ;;  %v1311_v25 = vsel %vm1310_vm3, %v1309_v39, 0 }
  0xb2   : > { %v8384_v21 = vsub.s32 32, %v8377_v14  ;;  %v807_v31 = vmul.f32 %v8344_v32, %v759_v18  ;;  %v1173_v42 = vshll.u32 %v12084_v41, %v8377_v14  ;;  %v8417_v56 = vsub.s32 32, %v8397_v36 }
  0xb3   : > { %v662_v16 = vpop.permute.xlu1 %661  ;;  %v1164_v58 = vshll.u32 %v12080_v57, %v8377_v14  ;;  %v1167_v60 = vshll.u32 %v12076_v47, %v8377_v14  ;;  %v1170_v61 = vshll.u32 %v12090_v50, %v8377_v14  ;;  %vm1179_vm4 = vcmp.lt.s32.totalorder %v8405_v45, 4 }
  0xb4   : > { %v710_v22 = vmul.f32 %v8335_v27, %v662_v16  ;;  %v1174_v35 = vshrl.u32 %v12092_v29, %v8384_v21  ;;  %v1165_v49 = vshrl.u32 %v12076_v47, %v8384_v21  ;;  %v1168_v44 = vshrl.u32 %v12090_v50, %v8384_v21 }
  0xb5   : > { %v1171_v51 = vshrl.u32 %v12084_v41, %v8384_v21  ;;  %v8444_v16 = vor.u32 %v861_v53, %v860_v63  ;;  %v1016_v18 = vshrl.u32 %v12084_v41, %v8417_v56  ;;  %v1019_v24 = vshrl.u32 %v12092_v29, %v8417_v56 }
  0xb6   : > { %v726_v30 = vadd.f32 %v710_v22, %v629_v20  ;;  %v8390_v33 = vpop.permute.xlu2 %585  ;;  %v1175_v54 = vor.u32 %v1174_v35, %v1173_v42  ;;  %v8433_v6 = vor.u32 %v1165_v49, %v1164_v58  ;;  %v8435_v7 = vor.u32 %v1168_v44, %v1167_v60 }
  0xb7   : > { %v1172_v8 = vor.u32 %v1171_v51, %v1170_v61  ;;  %vm1176_vm5 = vcmp.lt.s32.totalorder %v8405_v45, 1  ;;  %vm1178_vm6 = vcmp.lt.s32.totalorder %v8405_v45, 3  ;;  %v1457_v35 = vand.u32 2139095040, %v8431_v5 }
  0xb8   : > { %v8400_v38 = vadd.f32 %v807_v31, %v726_v30  ;;  %v1189_v0 = vsel %vm1179_vm4, %v1175_v54, 1326507024  ;;  %v1188_v30 = vsel %vm1176_vm5, %v8433_v6, %v8435_v7  ;;  %v865_v37 = vor.u32 %v864_v11, %v863_v17 }
  0xb9   : > { %v8425_v62 = vpop.permute.xlu0 %762  ;;  %v1190_v31 = vsel %vm1178_vm6, %v1172_v8, %v1189_v0  ;;  %v8465_v42 = vshrl.u32 %v1001_v23, 5  ;;  %v1015_v39 = vshll.u32 %v12090_v50, %v8397_v36  ;;  %v1018_v49 = vshll.u32 %v12084_v41, %v8397_v36 }
  0xba   : > { %12250 = vst [vmem:[#allocation5_spill] sm:$0xff] %v8400_v38  ;;  %v1612_v55 = vand.u32 2139095040, %v8400_v38  ;;  %v8471_v44 = vand.u32 31, %v1311_v25  ;;  %v1162_v51 = vshrl.u32 %v12080_v57, %v8384_v21  ;;  %vm1177_vm7 = vcmp.lt.s32.totalorder %v8405_v45, 2 }
  0xbb   : > { %v8477_v53 = vor.u32 %v1016_v18, %v1015_v39  ;;  %v8481_v23 = vsel %vm1177_vm7, %v1188_v30, %v1190_v31  ;;  %v8485_v54 = vand.u32 8388607, %v12075_v15  ;;  %v12082_v58 = vmov 683565275  }
  0xbc   : > { %v1613_v13 = vshrl.u32 %v1612_v55, 23  ;;  %v8450_v20 = vpop.permute.xlu1 %575  ;;  %12252 = vst [vmem:[#allocation7_spill] sm:$0xff] %v8471_v44  ;;  %v1020_v55 = vor.u32 %v1019_v24, %v1018_v49  ;;  %v1161_v60 = vshll.u32 %v12082_v58, %v8377_v14  ;;  %v8489_v61 = vshll.u32 %v1152_v26, 8 }
  0xbd   : > { %12253 = vst [vmem:[#allocation8_spill] sm:$0xff] %v8477_v53  ;;  %v1458_v63 = vshrl.u32 %v1457_v35, 23  ;;  %v8494_v11 = vsel %vm869_vm8, %v8444_v16, 920167782  ;;  %v8498_v0 = vsel %vm869_vm8, %v865_v37, 1326507024  ;;  %v631_v24 = vmul.f32 %v8337_v28, %v8367_v59 }
  0xbe   : > { %v7529_v43 = vadd.s32 4294967169, %v1613_v13  ;;  %12254 = vst [vmem:[#allocation9_spill] sm:$0xff] %v8489_v61  ;;  %vm1024_vm9 = vcmp.lt.s32.totalorder %v8465_v42, 4  ;;  %v8502_v17 = vsub.s32 32, %v8471_v44  ;;  %v1163_v14 = vor.u32 %v1162_v51, %v1161_v60 }
  0xbf   : > { %v678_v22 = vpop.permute.xlu2 %677  ;;  %v1196_v18 = vshrl.u32 %v8481_v23, 16  ;;  %v8510_v26 = vsel %vm1024_vm9, %v8477_v53, 920167782  ;;  %v8517_v37 = vsel %vm1024_vm9, %v1020_v55, 1326507024  ;;  %v1193_v59 = vand.u32 65535, %v8489_v61 }
  0xc0   : > { %v1619_v13 = vadd.s32 1, %v7529_v43  ;;  %12255 = vst [vmem:[#allocation10_spill] sm:$0xff] %v8502_v17  ;;  %v714_v30 = vmul.f32 %v8335_v27, %v678_v22  ;;  %v1185_v39 = vsel %vm1179_vm4, %v1172_v8, 920167782  ;;  %v7526_v43 = vadd.s32 4294967169, %v1458_v63 }
  0xc1   : > { %12256 = vst [vmem:[#allocation11_spill] sm:$0xff] %v8510_v26  ;;  %v1160_v60 = vshrl.u32 %v12082_v58, %v8384_v21  ;;  %v1194_v22 = vshrl.u32 %v8489_v61, 16  ;;  %v1326_v55 = vshrl.u32 %v12084_v41, %v8502_v17  ;;  %v1181_v8 = vsel %vm1179_vm4, %v8435_v7, 2102212464 }
  0xc2   : > { %v591_v1 = vpop.permute.xlu0 %590  ;;  %12257 = vst [vmem:[#allocation12_spill] sm:$0xff] %v8517_v37  ;;  %vm1620_vm10 = vcmp.gt.s32.totalorder %v1619_v13, 0  ;;  %v1184_v63 = vsel %vm1176_vm5, %v1163_v14, %v8433_v6  ;;  %v8535_v40 = vmul.u32 %v1196_v18, %v1193_v59  ;;  %v1186_v21 = vsel %vm1178_vm6, %v8435_v7, %v1185_v39 }
  0xc3   : > { %v633_v31 = vmul.f32 %v8337_v28, %v591_v1  ;;  %v712_v1 = vmul.f32 %v8335_v27, %v8374_v12  ;;  %v1329_v47 = vshrl.u32 %v12092_v29, %v8502_v17  ;;  %v1195_v2 = vand.u32 65535, %v8481_v23 }
  0xc4   : > { %12258 = vst [vmem:[#allocation13_spill] sm:$0xff] %v8535_v40  ;;  %v1464_v57 = vadd.s32 1, %v7526_v43  ;;  %v1621_v58 = vsel %vm1620_vm10, %v1619_v13, 0  ;;  %v8545_v41 = vshrl.u32 %v1311_v25, 5  ;;  %v1325_v5 = vshll.u32 %v12090_v50, %v8471_v44 }
  0xc5   : > { %v666_v49 = vpop.permute.xlu1 %665  ;;  %v730_v15 = vadd.f32 %v714_v30, %v633_v31  ;;  %v1328_v7 = vshll.u32 %v12260_v48, %v8471_v44  ;;  %v630_v30 = vmul.f32 %v8337_v28, %v8450_v20  ;;  %v1180_v31 = vsel %vm1176_vm5, %v1160_v60, %v1163_v14 }
  0xc6   : > { %v711_v12 = vmul.f32 %v8335_v27, %v666_v49  ;;  %12259 = vst [vmem:[#allocation14_spill] sm:$0xff] %v8545_v41  ;;  %v1182_v23 = vsel %vm1178_vm6, %v8433_v6, %v1181_v8  ;;  %v1187_v25 = vsel %vm1177_vm7, %v1184_v63, %v1186_v21  ;;  %v1201_v13 = vshll.u32 %v8535_v40, 16 }
  0xc7   : > { %v1623_v39 = vand.u32 31, %v1621_v58  ;;  %v808_v43 = vmul.f32 %v8344_v32, %v8425_v62  ;;  %v8565_v20 = vor.u32 %v1326_v55, %v1325_v5  ;;  %v1330_v50 = vor.u32 %v1329_v47, %v1328_v7 }
  0xc8   : > { %v775_v51 = vpop.permute.xlu2 %774  ;;  %v727_v49 = vadd.f32 %v711_v12, %v630_v30  ;;  %v1197_v14 = vmul.u32 %v1195_v2, %v1193_v59  ;;  %vm1465_vm11 = vcmp.gt.s32.totalorder %v1464_v57, 0  ;;  %v1217_v60 = vand.u32 65535, %v1187_v25 }
  0xc9   : > { %v811_v35 = vmul.f32 %v8344_v32, %v775_v51  ;;  %12262 = vst [vmem:[#allocation16_spill] sm:$0xff] %v8565_v20  ;;  %v728_v29 = vadd.f32 %v712_v1, %v631_v24  ;;  %v12263_v6 = vmov 683565275   ;;  %vm1334_vm12 = vcmp.lt.s32.totalorder %v8545_v41, 4 }
  0xca   : > { %v8569_v8 = vshrl.u32 %v12263_v6, %v8393_v34  ;;  %v851_v63 = vshll.u32 %v12263_v6, %v8379_v19  ;;  %v8576_v62 = vsel %vm1177_vm7, %v1180_v31, %v1182_v23  ;;  %vm1205_vm13 = vc.u32 %v1197_v14, %v1201_v13 }
  0xcb   : > { %v8563_v51 = vadd.f32 %v811_v35, %v730_v15  ;;  %12264 = vst [vmem:[#allocation17_spill] sm:$0xff] %v8576_v62  ;;  %v1218_v5 = vshrl.u32 %v1187_v25, 16  ;;  %v1466_v47 = vsel %vm1465_vm11, %v1464_v57, 0  ;;  %v8578_v15 = vsub.s32 32, %v1623_v39 }
  0xcc   : > { %v8580_v35 = vadd.f32 %v808_v43, %v727_v49  ;;  %v8586_v1 = vsel %vm1334_vm12, %v8565_v20, 920167782  ;;  %v8590_v55 = vsel %vm1334_vm12, %v1330_v50, 1326507024  ;;  %v8592_v45 = vmul.u32 %v1195_v2, %v1194_v22 }
  0xcd   : > { %12261 = vst [vmem:[#allocation15_spill] sm:$0xff] %v8563_v51  ;;  %v2232_v24 = vand.u32 2139095040, %v8563_v51  ;;  %v12269_v57 = vmov 2475754826   ;;  %v1200_v7 = vmul.u32 %v1196_v18, %v1194_v22  ;;  %v8596_v30 = vmul.u32 %v1217_v60, %v1193_v59 }
  0xce   : > { %12265 = vst [vmem:[#allocation18_spill] sm:$0xff] %v8580_v35  ;;  %v767_v21 = vpop.permute.xlu1 %766  ;;  %v852_v12 = vshrl.u32 %v12269_v57, %v8393_v34  ;;  %v12271_v25 = vmov 0   ;;  %v8602_v49 = vmul.u32 %v1218_v5, %v1193_v59  ;;  %v8604_v50 = vmul.u32 %v1217_v60, %v1194_v22 }
  0xcf   : > { %12266 = vst [vmem:[#allocation19_spill] sm:$0xff] %v8586_v1  ;;  %v1206_v43 = vsel %vm1205_vm13, 1, %v12271_v25  ;;  %v8606_v2 = vand.u32 31, %v1466_v47  ;;  %v8608_v1 = vmul.u32 %v1218_v5, %v1194_v22  ;;  %v12276_v20 = vmov 1326507024  }
  0xd0   : > { %12267 = vst [vmem:[#allocation20_spill] sm:$0xff] %v8590_v55  ;;  %v1639_v18 = vshrl.u32 %v12276_v20, %v8578_v15  ;;  %v1767_v55 = vand.u32 2139095040, %v8580_v35  ;;  %v2233_v41 = vshrl.u32 %v2232_v24, 23  ;;  %v8614_v44 = vadd.s32 %v1201_v13, %v1197_v14 }
  0xd1   : > { %12268 = vst [vmem:[#allocation21_spill] sm:$0xff] %v8592_v45  ;;  %v8618_v59 = vmul.f32 %v8337_v28, %v8390_v33  ;;  %v809_v60 = vmul.f32 %v8344_v32, %v767_v21  ;;  %v8621_v23 = vadd.s32 %v1206_v43, %v1200_v7  ;;  %v12279_v22 = vand.u32 2147483647, %v8400_v38 }
  0xd2   : > { %12270 = vst [vmem:[#allocation22_spill] sm:$0xff] %v8596_v30  ;;  %v1636_v17 = vshrl.u32 %v12260_v48, %v8578_v15  ;;  %v1638_v24 = vshll.u32 %v12260_v48, %v1623_v39  ;;  %v8629_v31 = vsub.s32 32, %v8606_v2  ;;  %v8631_v13 = vshrl.u32 %v1621_v58, 5 }
  0xd3   : > { %12272 = vst [vmem:[#allocation23_spill] sm:$0xff] %v8602_v49  ;;  %v1616_v5 = vand.u32 8388607, %v12279_v22  ;;  %v12281_v33 = vmov 2131351028   ;;  %v1768_v22 = vshrl.u32 %v1767_v55, 23  ;;  %v1627_v9 = vshrl.u32 %v12269_v57, %v8578_v15 }
  0xd4   : > { %12273 = vst [vmem:[#allocation24_spill] sm:$0xff] %v8604_v50  ;;  %v1630_v14 = vshrl.u32 %v12281_v33, %v8578_v15  ;;  %v12282_v21 = vmov 2102212464   ;;  %v1640_v38 = vor.u32 %v1639_v18, %v1638_v24  ;;  %v7541_v35 = vadd.s32 4294967169, %v2233_v41 }
  0xd5   : > { %12274 = vst [vmem:[#allocation25_spill] sm:$0xff] %v8606_v2  ;;  %v1633_v7 = vshrl.u32 %v12282_v21, %v8578_v15  ;;  %v1635_v43 = vshll.u32 %v12282_v21, %v1623_v39  ;;  %v1629_v62 = vshll.u32 %v12269_v57, %v1623_v39  ;;  %v1632_v61 = vshll.u32 %v12281_v33, %v1623_v39 }
  0xd6   : > { %12275 = vst [vmem:[#allocation26_spill] sm:$0xff] %v8608_v1  ;;  %v8642_v58 = vadd.f32 %v809_v60, %v728_v29  ;;  %v8644_v1 = vshrl.u32 %v1466_v47, 5  ;;  %v8648_v50 = vor.u32 %v852_v12, %v851_v63  ;;  %v1626_v55 = vshll.u32 %v12263_v6, %v1623_v39 }
  0xd7   : > { %12277 = vst [vmem:[#allocation27_spill] sm:$0xff] %v8614_v44  ;;  %v1637_v40 = vor.u32 %v1636_v17, %v1635_v43  ;;  %v1631_v41 = vor.u32 %v1630_v14, %v1629_v62  ;;  %v1634_v18 = vor.u32 %v1633_v7, %v1632_v61  ;;  %vm1644_vm14 = vcmp.lt.s32.totalorder %v8631_v13, 4  ;;  %v674_v24 = vpop.permute.xlu1 %673 }
  0xd8   : > { %12278 = vst [vmem:[#allocation28_spill] sm:$0xff] %v8621_v23  ;;  %v1480_v23 = vshll.u32 %v12282_v21, %v8606_v2  ;;  %v1483_v44 = vshll.u32 %v12260_v48, %v8606_v2  ;;  %v1617_v29 = vor.u32 8388608, %v1616_v5  ;;  %v1654_v47 = vsel %vm1644_vm14, %v1640_v38, 1326507024 }
  0xd9   : > { %12280 = vst [vmem:[#allocation29_spill] sm:$0xff] %v8629_v31  ;;  %v2239_v60 = vadd.s32 1, %v7541_v35  ;;  %v1481_v17 = vshrl.u32 %v12260_v48, %v8629_v31  ;;  %v1628_v63 = vor.u32 %v1627_v9, %v1626_v55  ;;  %v7532_v12 = vadd.s32 4294967169, %v1768_v22 }
  0xda   : > { %12283 = vst [vmem:[#allocation30_spill] sm:$0xff] %v8642_v58  ;;  %v1922_v39 = vand.u32 2139095040, %v8642_v58  ;;  %v1484_v61 = vshrl.u32 %v12276_v20, %v8629_v31  ;;  %vm1489_vm15 = vcmp.lt.s32.totalorder %v8644_v1, 4  ;;  %vm1641_vm0 = vcmp.lt.s32.totalorder %v8631_v13, 1 }
  0xdb   : > { %12284 = vst [vmem:[#allocation31_spill] sm:$0xff] %v8644_v1  ;;  %vm1643_vm1 = vcmp.lt.s32.totalorder %v8631_v13, 3  ;;  %v1650_v38 = vsel %vm1644_vm14, %v1637_v40, 920167782  ;;  %v1653_v62 = vsel %vm1641_vm0, %v1631_v41, %v1634_v18  ;;  %v854_v35 = vshll.u32 %v12269_v57, %v8379_v19 }
  0xdc   : > { %v1655_v9 = vsel %vm1643_vm1, %v1637_v40, %v1654_v47  ;;  %v855_v5 = vshrl.u32 %v12281_v33, %v8393_v34  ;;  %vm1642_vm2 = vcmp.lt.s32.totalorder %v8631_v13, 2  ;;  %v1646_v14 = vsel %vm1644_vm14, %v1634_v18, 2102212464 }
  0xdd   : > { %v8677_v7 = vshll.u32 %v1617_v29, 8  ;;  %vm2240_vm3 = vcmp.gt.s32.totalorder %v2239_v60, 0  ;;  %v1649_v43 = vsel %vm1641_vm0, %v1628_v63, %v1631_v41  ;;  %v1651_v40 = vsel %vm1643_vm1, %v1634_v18, %v1650_v38 }
  0xde   : > { %v1774_v22 = vadd.s32 1, %v7532_v12  ;;  %v1923_v55 = vshrl.u32 %v1922_v39, 23  ;;  %v8683_v47 = vor.u32 %v1481_v17, %v1480_v23  ;;  %v1625_v31 = vshrl.u32 %v12263_v6, %v8578_v15 }
  0xdf   : > { %12285 = vst [vmem:[#allocation32_spill] sm:$0xff] %v8677_v7  ;;  %v1656_v2 = vsel %vm1642_vm2, %v1653_v62, %v1655_v9  ;;  %v12121_v29 = vand.u32 2147483647, %v8563_v51  ;;  %v1485_v45 = vor.u32 %v1484_v61, %v1483_v44  ;;  %v2241_v46 = vsel %vm2240_vm3, %v2239_v60, 0  ;;  %v8764_v51 = vpop.permute.xlu0 %595 }
  0xe0   : > { %12286 = vst [vmem:[#allocation33_spill] sm:$0xff] %v8683_v47  ;;  %v8690_v30 = vor.u32 %v855_v5, %v854_v35  ;;  %v8694_v49 = vshll.u32 %v12281_v33, %v8379_v19  ;;  %v1645_v23 = vsel %vm1641_vm0, %v1625_v31, %v1628_v63  ;;  %v1647_v18 = vsel %vm1643_vm1, %v1631_v41, %v1646_v14  ;;  %v771_v39 = vpop.permute.xlu1 %770 }
  0xe1   : > { %v1652_v15 = vsel %vm1642_vm2, %v1649_v43, %v1651_v40  ;;  %v1658_v17 = vand.u32 65535, %v8677_v7  ;;  %v1660_v12 = vand.u32 65535, %v1656_v2  ;;  %v1661_v44 = vshrl.u32 %v1656_v2, 16 }
  0xe2   : > { %vm1775_vm4 = vcmp.gt.s32.totalorder %v1774_v22, 0  ;;  %v7535_v60 = vadd.s32 4294967169, %v1923_v55  ;;  %v1659_v61 = vshrl.u32 %v8677_v7, 16  ;;  %v2236_v19 = vand.u32 8388607, %v12121_v29 }
  0xe3   : > { %v2243_v38 = vand.u32 31, %v2241_v46  ;;  %v713_v31 = vmul.f32 %v8335_v27, %v674_v24  ;;  %v8710_v41 = vsel %vm1489_vm15, %v8683_v47, 920167782  ;;  %v8714_v63 = vsel %vm1642_vm2, %v1645_v23, %v1647_v18 }
  0xe4   : > { %12287 = vst [vmem:[#allocation34_spill] sm:$0xff] %v8710_v41  ;;  %v1682_v2 = vand.u32 65535, %v1652_v15  ;;  %v7990_v62 = vpack.i.bf16 %v8283_v4, %v8277_v3  ;;  %v8720_v9 = vsel %vm1489_vm15, %v1485_v45, 1326507024  ;;  %v1683_v35 = vshrl.u32 %v1652_v15, 16 }
  0xe5   : > { %12288 = vst [vmem:[#allocation35_spill] sm:$0xff] %v8714_v63  ;;  %v1776_v5 = vsel %vm1775_vm4, %v1774_v22, 0  ;;  %v810_v24 = vmul.f32 %v8344_v32, %v771_v39  ;;  %v8723_v14 = vmul.u32 %v1661_v44, %v1658_v17  ;;  %v8725_v43 = vmul.u32 %v1660_v12, %v1659_v61 }
  0xe6   : > { %12289 = vst [vmem:[#allocation36_spill] sm:$0xff] %v8720_v9  ;;  %v1929_v40 = vadd.s32 1, %v7535_v60  ;;  %7991 = vrot.lane.b32.xlu0 %v7990_v62, %s8166_s0  ;;  %v8730_v13 = vshrl.u32 %v12282_v21, %v8393_v34  ;;  %v2237_v4 = vor.u32 8388608, %v2236_v19  ;;  %v2244_v45 = vsub.s32 32, %v2243_v38 }
  0xe7   : > { %12290 = vst [vmem:[#allocation37_spill] sm:$0xff] %v8723_v14  ;;  %v729_v22 = vadd.f32 %v713_v31, %v8618_v59  ;;  %v1662_v55 = vmul.u32 %v1660_v12, %v1658_v17  ;;  %v1665_v23 = vmul.u32 %v1661_v44, %v1659_v61  ;;  %v8735_v18 = vmul.u32 %v1682_v2, %v1658_v17 }
  0xe8   : > { %12291 = vst [vmem:[#allocation38_spill] sm:$0xff] %v8725_v43  ;;  %v8737_v15 = vand.u32 31, %v1776_v5  ;;  %v8739_v60 = vmul.u32 %v1683_v35, %v1658_v17  ;;  %v8741_v39 = vmul.u32 %v1682_v2, %v1659_v61  ;;  %v8743_v62 = vmul.u32 %v1683_v35, %v1659_v61  ;;  %v8783_v43 = vpop.permute.xlu2 %681 }
  0xe9   : > { %12292 = vst [vmem:[#allocation39_spill] sm:$0xff] %v8735_v18  ;;  %v8745_v34 = vadd.f32 %v810_v24, %v729_v22  ;;  %v1666_v29 = vshll.u32 %v8723_v14, 16  ;;  %v8749_v3 = vshrl.u32 %v1776_v5, 5  ;;  %vm1930_vm5 = vcmp.gt.s32.totalorder %v1929_v40, 0 }
  0xea   : > { %12293 = vst [vmem:[#allocation40_spill] sm:$0xff] %v8737_v15  ;;  %v2258_v59 = vshll.u32 %v12260_v48, %v2243_v38  ;;  %v2259_v12 = vshrl.u32 %v12276_v20, %v2244_v45  ;;  %v8753_v44 = vshll.u32 %v2237_v4, 8  ;;  %v8757_v61 = vsub.s32 32, %v8737_v15 }
  0xeb   : > { %12294 = vst [vmem:[#allocation41_spill] sm:$0xff] %v8739_v60  ;;  %v2242_v31 = vshrl.u32 %v2241_v46, 5  ;;  %v2255_v2 = vshll.u32 %v12282_v21, %v2243_v38  ;;  %v2256_v35 = vshrl.u32 %v12260_v48, %v2244_v45  ;;  %v2252_v5 = vshll.u32 %v12281_v33, %v2243_v38 }
  0xec   : > { %12295 = vst [vmem:[#allocation42_spill] sm:$0xff] %v8741_v39  ;;  %v2253_v24 = vshrl.u32 %v12282_v21, %v2244_v45  ;;  %v1931_v22 = vsel %vm1930_vm5, %v1929_v40, 0  ;;  %v2077_v19 = vand.u32 2139095040, %v8745_v34  ;;  %vm1670_vm6 = vc.u32 %v1662_v55, %v1666_v29 }
  0xed   : > { %12296 = vst [vmem:[#allocation43_spill] sm:$0xff] %v8743_v62  ;;  %v8766_v4 = vadd.s32 %v1666_v29, %v1662_v55  ;;  %v2249_v17 = vshll.u32 %v12269_v57, %v2243_v38  ;;  %v2250_v46 = vshrl.u32 %v12281_v33, %v2244_v45  ;;  %v1790_v63 = vshll.u32 %v12282_v21, %v8737_v15 }
  0xee   : > { %12297 = vst [vmem:[#allocation44_spill] sm:$0xff] %v8745_v34  ;;  %v2246_v7 = vshll.u32 %v12263_v6, %v2243_v38  ;;  %v2247_v14 = vshrl.u32 %v12269_v57, %v2244_v45  ;;  %v2260_v62 = vor.u32 %v2259_v12, %v2258_v59  ;;  %v2257_v40 = vor.u32 %v2256_v35, %v2255_v2 }
  0xef   : > { %12298 = vst [vmem:[#allocation45_spill] sm:$0xff] %v8749_v3  ;;  %vm2264_vm7 = vcmp.lt.s32.totalorder %v2242_v31, 4  ;;  %v8774_v39 = vand.u32 31, %v1931_v22  ;;  %v2078_v18 = vshrl.u32 %v2077_v19, 23  ;;  %v1671_v29 = vsel %vm1670_vm6, 1, %v12271_v25 }
  0xf0   : > { %12299 = vst [vmem:[#allocation46_spill] sm:$0xff] %v8753_v44  ;;  %v1791_v55 = vshrl.u32 %v12260_v48, %v8757_v61  ;;  %v8781_v60 = vshll.u32 %v12260_v48, %v8737_v15  ;;  %v2245_v38 = vshrl.u32 %v12263_v6, %v2244_v45  ;;  %v2251_v59 = vor.u32 %v2250_v46, %v2249_v17 }
  0xf1   : > { %12300 = vst [vmem:[#allocation47_spill] sm:$0xff] %v8757_v61  ;;  %vm2261_vm10 = vcmp.lt.s32.totalorder %v2242_v31, 1  ;;  %vm2263_vm11 = vcmp.lt.s32.totalorder %v2242_v31, 3  ;;  %v2248_v12 = vor.u32 %v2247_v14, %v2246_v7  ;;  %v2274_v2 = vsel %vm2264_vm7, %v2260_v62, 1326507024 }
  0xf2   : > { %12301 = vst [vmem:[#allocation48_spill] sm:$0xff] %v8766_v4  ;;  %v2254_v4 = vor.u32 %v2253_v24, %v2252_v5  ;;  %v7538_v35 = vadd.s32 4294967169, %v2078_v18  ;;  %v1794_v47 = vshrl.u32 %v12276_v20, %v8757_v61  ;;  %vm12188_vm13 = vcmp.lt.s32.totalorder %v8749_v3, 4 }
  0xf3   : > { %v2270_v5 = vsel %vm2264_vm7, %v2257_v40, 920167782  ;;  %v8793_v24 = vsub.s32 32, %v8774_v39  ;;  %v8795_v45 = vadd.s32 %v1671_v29, %v1665_v23  ;;  %v8797_v17 = vor.u32 %v1791_v55, %v1790_v63  ;;  %v601_v23 = vpop.permute.xlu1 %600  ;;  %v686_v63 = vpop.permute.xlu0 %685 }
  0xf4   : > { %v2266_v19 = vsel %vm2264_vm7, %v2254_v4, 2102212464  ;;  %vm2262_vm14 = vcmp.lt.s32.totalorder %v2242_v31, 2  ;;  %v2084_v7 = vadd.s32 1, %v7538_v35  ;;  %v2265_v14 = vsel %vm2261_vm10, %v2245_v38, %v2248_v12  ;;  %v783_v31 = vpop.permute.xlu2 %782 }
  0xf5   : > { %12302 = vst [vmem:[#allocation49_spill] sm:$0xff] %v8795_v45  ;;  %v2267_v18 = vsel %vm2263_vm11, %v2251_v59, %v2266_v19  ;;  %v2273_v62 = vsel %vm2261_vm10, %v2251_v59, %v2254_v4  ;;  %v2275_v46 = vsel %vm2263_vm11, %v2257_v40, %v2274_v2  ;;  %v2269_v61 = vsel %vm2261_vm10, %v2248_v12, %v2251_v59 }
  0xf6   : > { %12303 = vst [vmem:[#allocation50_spill] sm:$0xff] %v8797_v17  ;;  %v2271_v15 = vsel %vm2263_vm11, %v2254_v4, %v2270_v5  ;;  %v2278_v9 = vand.u32 65535, %v8753_v44  ;;  %vm2085_vm0 = vcmp.gt.s32.totalorder %v2084_v7, 0  ;;  %v1795_v29 = vor.u32 %v1794_v47, %v8781_v60 }
  0xf7   : > { %v2279_v55 = vshrl.u32 %v8753_v44, 16  ;;  %v12304_v38 = vand.u32 2147483647, %v8642_v58  ;;  %v1949_v35 = vshrl.u32 %v12276_v20, %v8793_v24  ;;  %v8815_v40 = vsel %vm12188_vm13, %v8797_v17, 920167782 }
  0xf8   : > { %12305 = vst [vmem:[#allocation51_spill] sm:$0xff] %v8815_v40  ;;  %v8818_v4 = vsel %vm2262_vm14, %v2265_v14, %v2267_v18  ;;  %v2276_v59 = vsel %vm2262_vm14, %v2273_v62, %v2275_v46  ;;  %v2086_v12 = vsel %vm2085_vm0, %v2084_v7, 0  ;;  %v2272_v47 = vsel %vm2262_vm14, %v2269_v61, %v2271_v15 }
  0xf9   : > { %v1926_v19 = vand.u32 8388607, %v12304_v38  ;;  %12306 = vst [vmem:[#allocation52_spill] sm:$0xff] %v8818_v4  ;;  %v1948_v60 = vshll.u32 %v12260_v48, %v8774_v39  ;;  %v635_v2 = vmul.f32 %v8337_v28, %v601_v23  ;;  %v716_v5 = vmul.f32 %v8335_v27, %v686_v63 }
  0xfa   : > { %v8826_v38 = vshrl.u32 %v1931_v22, 5  ;;  %v1940_v58 = vshrl.u32 %v12281_v33, %v8793_v24  ;;  %v1943_v14 = vshrl.u32 %v12282_v21, %v8793_v24  ;;  %v1946_v7 = vshrl.u32 %v12260_v48, %v8793_v24 }
  0xfb   : > { %v2281_v15 = vshrl.u32 %v2276_v59, 16  ;;  %v1927_v61 = vor.u32 8388608, %v1926_v19  ;;  %v1950_v18 = vor.u32 %v1949_v35, %v1948_v60  ;;  %v8834_v62 = vand.u32 31, %v2086_v12  ;;  %v779_v37 = vpop.permute.xlu1 %778 }
  0xfc   : > { %v2280_v46 = vand.u32 65535, %v2276_v59  ;;  %v1939_v22 = vshll.u32 %v12269_v57, %v8774_v39  ;;  %v1942_v23 = vshll.u32 %v12281_v33, %v8774_v39  ;;  %v1945_v63 = vshll.u32 %v12282_v21, %v8774_v39 }
  0xfd   : > { %v2302_v40 = vand.u32 65535, %v2272_v47  ;;  %v2303_v17 = vshrl.u32 %v2272_v47, 16  ;;  %v732_v45 = vadd.f32 %v716_v5, %v635_v2  ;;  %v813_v41 = vmul.f32 %v8344_v32, %v783_v31 }
  0xfe   : > { %v1941_v1 = vor.u32 %v1940_v58, %v1939_v22  ;;  %v1944_v19 = vor.u32 %v1943_v14, %v1942_v23  ;;  %v1947_v35 = vor.u32 %v1946_v7, %v1945_v63  ;;  %vm1954_vm1 = vcmp.lt.s32.totalorder %v8826_v38, 4 }
  0xff   : > { %v8846_v59 = vsel %vm12188_vm13, %v1795_v29, 1326507024  ;;  %v8848_v60 = vmul.u32 %v2281_v15, %v2278_v9  ;;  %v1964_v26 = vsel %vm1954_vm1, %v1950_v18, 1326507024  ;;  %v8853_v53 = vsub.s32 32, %v8834_v62 }
 0x100   : > { %12307 = vst [vmem:[#allocation53_spill] sm:$0xff] %v8846_v59  ;;  %v8855_v47 = vmul.u32 %v2280_v46, %v2278_v9  ;;  %v8857_v2 = vmul.u32 %v2280_v46, %v2279_v55  ;;  %v8861_v5 = vshll.u32 %v1927_v61, 8  ;;  %v8863_v14 = vmul.u32 %v2281_v15, %v2279_v55 }
 0x101   : > { %12308 = vst [vmem:[#allocation54_spill] sm:$0xff] %v8848_v60  ;;  %vm1951_vm2 = vcmp.lt.s32.totalorder %v8826_v38, 1  ;;  %vm1953_vm3 = vcmp.lt.s32.totalorder %v8826_v38, 3  ;;  %v8867_v29 = vadd.f32 %v813_v41, %v732_v45  ;;  %v8869_v7 = vmul.u32 %v2302_v40, %v2278_v9 }
 0x102   : > { %12309 = vst [vmem:[#allocation55_spill] sm:$0xff] %v8857_v2  ;;  %v8871_v31 = vmul.u32 %v2303_v17, %v2278_v9  ;;  %v1963_v18 = vsel %vm1951_vm2, %v1941_v1, %v1944_v19  ;;  %v1965_v46 = vsel %vm1953_vm3, %v1947_v35, %v1964_v26  ;;  %v12147_v61 = vshll.u32 %v8848_v60, 16 }
 0x103   : > { %12310 = vst [vmem:[#allocation56_spill] sm:$0xff] %v8861_v5  ;;  %v8878_v15 = vmul.u32 %v2302_v40, %v2279_v55  ;;  %v1937_v22 = vshrl.u32 %v12269_v57, %v8793_v24  ;;  %v2104_v41 = vshrl.u32 %v12276_v20, %v8853_v53  ;;  %v8884_v45 = vmul.u32 %v2303_v17, %v2279_v55 }
 0x104   : > { %12311 = vst [vmem:[#allocation57_spill] sm:$0xff] %v8867_v29  ;;  %vm1952_vm4 = vcmp.lt.s32.totalorder %v8826_v38, 2  ;;  %v8888_v9 = vand.u32 65535, %v8861_v5  ;;  %v1936_v26 = vshll.u32 %v12263_v6, %v8774_v39  ;;  %v2103_v63 = vshll.u32 %v12260_v48, %v8834_v62 }
 0x105   : > { %12312 = vst [vmem:[#allocation58_spill] sm:$0xff] %v8869_v7  ;;  %v8895_v40 = vsel %vm1952_vm4, %v1963_v18, %v1965_v46  ;;  %v2542_v17 = vand.u32 2139095040, %v8867_v29  ;;  %v8900_v55 = vshrl.u32 %v2086_v12, 5  ;;  %v2095_v58 = vshrl.u32 %v12281_v33, %v8853_v53 }
 0x106   : > { %12313 = vst [vmem:[#allocation59_spill] sm:$0xff] %v8871_v31  ;;  %v2098_v23 = vshrl.u32 %v12282_v21, %v8853_v53  ;;  %v2101_v39 = vshrl.u32 %v12260_v48, %v8853_v53  ;;  %vm8911_vm5 = vc.u32 %v8855_v47, %v12147_v61  ;;  %v1935_v12 = vshrl.u32 %v12263_v6, %v8793_v24 }
 0x107   : > { %12314 = vst [vmem:[#allocation60_spill] sm:$0xff] %v8878_v15  ;;  %v1938_v46 = vor.u32 %v1937_v22, %v1936_v26  ;;  %v2105_v4 = vor.u32 %v2104_v41, %v2103_v63  ;;  %v12318_v44 = vand.u32 2147483647, %v8745_v34  ;;  %v2094_v7 = vshll.u32 %v12269_v57, %v8834_v62 }
 0x108   : > { %12315 = vst [vmem:[#allocation61_spill] sm:$0xff] %v8884_v45  ;;  %v2097_v15 = vshll.u32 %v12281_v33, %v8834_v62  ;;  %v2100_v61 = vshll.u32 %v12282_v21, %v8834_v62  ;;  %v1956_v31 = vsel %vm1954_vm1, %v1944_v19, 2102212464  ;;  %v1960_v24 = vsel %vm1954_vm1, %v1947_v35, 920167782 }
 0x109   : > { %v2081_v45 = vand.u32 8388607, %v12318_v44  ;;  %v1971_v22 = vshrl.u32 %v8895_v40, 16  ;;  %v2543_v41 = vshrl.u32 %v2542_v17, 23  ;;  %v8930_v26 = vor.u32 %v2095_v58, %v2094_v7 }
 0x10a   : > { %v2099_v44 = vor.u32 %v2098_v23, %v2097_v15  ;;  %v2102_v63 = vor.u32 %v2101_v39, %v2100_v61  ;;  %vm2109_vm6 = vcmp.lt.s32.totalorder %v8900_v55, 4  ;;  %v1955_v34 = vsel %vm1951_vm2, %v1935_v12, %v1938_v46 }
 0x10b   : > { %v1959_v59 = vsel %vm1951_vm2, %v1938_v46, %v1941_v1  ;;  %v2119_v3 = vsel %vm2109_vm6, %v2105_v4, 1326507024  ;;  %v634_v35 = vmul.f32 %v8337_v28, %v8764_v51  ;;  %v1957_v58 = vsel %vm1953_vm3, %v1941_v1, %v1956_v31 }
 0x10c   : > { %v1961_v7 = vsel %vm1953_vm3, %v1944_v19, %v1960_v24  ;;  %v2082_v61 = vor.u32 8388608, %v2081_v45  ;;  %v715_v15 = vmul.f32 %v8335_v27, %v8783_v43  ;;  %v8948_v23 = vmul.u32 %v1971_v22, %v8888_v9 }
 0x10d   : > { %vm2106_vm7 = vcmp.lt.s32.totalorder %v8900_v55, 1  ;;  %vm2108_vm10 = vcmp.lt.s32.totalorder %v8900_v55, 3  ;;  %v7547_v4 = vadd.s32 4294967169, %v2543_v41  ;;  %v2092_v51 = vshrl.u32 %v12269_v57, %v8853_v53 }
 0x10e   : > { %12319 = vst [vmem:[#allocation62_spill] sm:$0xff] %v8948_v23  ;;  %v2118_v1 = vsel %vm2106_vm7, %v8930_v26, %v2099_v44  ;;  %v2120_v19 = vsel %vm2108_vm10, %v2102_v63, %v2119_v3  ;;  %v812_v43 = vmul.f32 %v8344_v32, %v779_v37  ;;  %v2291_v45 = vsel %vm8911_vm5, 1, %v12271_v25 }
 0x10f   : > { %v8966_v17 = vsel %vm1952_vm4, %v1955_v34, %v1957_v58  ;;  %v1970_v39 = vand.u32 65535, %v8895_v40  ;;  %v1962_v12 = vsel %vm1952_vm4, %v1959_v59, %v1961_v7  ;;  %v2091_v3 = vshll.u32 %v12263_v6, %v8834_v62 }
 0x110   : > { %12320 = vst [vmem:[#allocation63_spill] sm:$0xff] %v8966_v17  ;;  %vm2107_vm11 = vcmp.lt.s32.totalorder %v8900_v55, 2  ;;  %v731_v37 = vadd.f32 %v715_v15, %v634_v35  ;;  %v1976_v46 = vshll.u32 %v8948_v23, 16  ;;  %v8977_v24 = vshll.u32 %v2082_v61, 8 }
 0x111   : > { %v2121_v18 = vsel %vm2107_vm11, %v2118_v1, %v2120_v19  ;;  %v2549_v34 = vadd.s32 1, %v7547_v4  ;;  %v1969_v41 = vshrl.u32 %v8861_v5, 16  ;;  %v2093_v40 = vor.u32 %v2092_v51, %v2091_v3 }
 0x112   : > { %12321 = vst [vmem:[#allocation64_spill] sm:$0xff] %v8977_v24  ;;  %v12153_v38 = vand.u32 2147483647, %v8867_v29  ;;  %v8981_v59 = vadd.f32 %v812_v43, %v731_v37  ;;  %v12323_v62 = vshll.u32 %v8848_v60, 16  ;;  %v1972_v35 = vmul.u32 %v1970_v39, %v8888_v9 }
 0x113   : > { %v1992_v7 = vand.u32 65535, %v1962_v12  ;;  %v2115_v61 = vsel %vm2109_vm6, %v2102_v63, 920167782  ;;  %v8992_v15 = vadd.s32 %v2291_v45, %v8863_v14  ;;  %v1993_v4 = vshrl.u32 %v1962_v12, 16 }
 0x114   : > { %12322 = vst [vmem:[#allocation65_spill] sm:$0xff] %v8981_v59  ;;  %v8986_v58 = vadd.s32 %v12323_v62, %v8855_v47  ;;  %v2126_v1 = vshrl.u32 %v2121_v18, 16  ;;  %v8996_v19 = vmul.u32 %v1970_v39, %v1969_v41  ;;  %vm1980_vm14 = vc.u32 %v1972_v35, %v1976_v46 }
 0x115   : > { %12325 = vst [vmem:[#allocation67_spill] sm:$0xff] %v8992_v15  ;;  %v2123_v47 = vand.u32 65535, %v8977_v24  ;;  %vm2550_vm0 = vcmp.gt.s32.totalorder %v2549_v34, 0  ;;  %v2114_v43 = vsel %vm2106_vm7, %v2093_v40, %v8930_v26  ;;  %v2116_v63 = vsel %vm2108_vm10, %v2099_v44, %v2115_v61 }
 0x116   : > { %12324 = vst [vmem:[#allocation66_spill] sm:$0xff] %v8986_v58  ;;  %v2546_v14 = vand.u32 8388607, %v12153_v38  ;;  %v2387_v45 = vand.u32 2139095040, %v8981_v59  ;;  %v1975_v12 = vmul.u32 %v1971_v22, %v1969_v41  ;;  %v9008_v39 = vmul.u32 %v1992_v7, %v8888_v9 }
 0x117   : > { %12326 = vst [vmem:[#allocation68_spill] sm:$0xff] %v8996_v19  ;;  %v2111_v3 = vsel %vm2109_vm6, %v2099_v44, 2102212464  ;;  %v9014_v62 = vmul.u32 %v1993_v4, %v8888_v9  ;;  %v2090_v61 = vshrl.u32 %v12263_v6, %v8853_v53  ;;  %v9018_v51 = vmul.u32 %v2126_v1, %v2123_v47 }
 0x118   : > { %12327 = vst [vmem:[#allocation69_spill] sm:$0xff] %v9008_v39  ;;  %v2551_v38 = vsel %vm2550_vm0, %v2549_v34, 0  ;;  %v1981_v31 = vsel %vm1980_vm14, 1, %v12271_v25  ;;  %v9021_v22 = vmul.u32 %v1992_v7, %v1969_v41  ;;  %v2117_v29 = vsel %vm2107_vm11, %v2114_v43, %v2116_v63 }
 0x119   : > { %12328 = vst [vmem:[#allocation70_spill] sm:$0xff] %v9014_v62  ;;  %v2125_v15 = vand.u32 65535, %v2121_v18  ;;  %v2110_v44 = vsel %vm2106_vm7, %v2090_v61, %v2093_v40  ;;  %v2112_v9 = vsel %vm2108_vm10, %v8930_v26, %v2111_v3  ;;  %v2547_v37 = vor.u32 8388608, %v2546_v14 }
 0x11a   : > { %12329 = vst [vmem:[#allocation71_spill] sm:$0xff] %v9018_v51  ;;  %v2388_v53 = vshrl.u32 %v2387_v45, 23  ;;  %v9030_v60 = vmul.u32 %v1993_v4, %v1969_v41  ;;  %v2124_v34 = vshrl.u32 %v8977_v24, 16  ;;  %v2553_v17 = vand.u32 31, %v2551_v38 }
 0x11b   : > { %12330 = vst [vmem:[#allocation72_spill] sm:$0xff] %v9021_v22  ;;  %v12332_v7 = vand.u32 2147483647, %v8981_v59  ;;  %v9036_v18 = vadd.s32 %v1976_v46, %v1972_v35  ;;  %v2131_v40 = vshll.u32 %v9018_v51, 16  ;;  %v2147_v63 = vand.u32 65535, %v2117_v29 }
 0x11c   : > { %12331 = vst [vmem:[#allocation73_spill] sm:$0xff] %v9030_v60  ;;  %v9039_v61 = vadd.s32 %v1981_v31, %v1975_v12  ;;  %v9043_v26 = vsel %vm2107_vm11, %v2110_v44, %v2112_v9  ;;  %v9045_v41 = vmul.u32 %v2125_v15, %v2124_v34  ;;  %v2148_v4 = vshrl.u32 %v2117_v29, 16 }
 0x11d   : > { %v2391_v5 = vand.u32 8388607, %v12332_v7  ;;  %12333 = vst [vmem:[#allocation74_spill] sm:$0xff] %v9036_v18  ;;  %v2127_v14 = vmul.u32 %v2125_v15, %v2123_v47  ;;  %v9047_v45 = vshll.u32 %v2547_v37, 8  ;;  %v7544_v3 = vadd.s32 4294967169, %v2388_v53 }
 0x11e   : > { %12334 = vst [vmem:[#allocation75_spill] sm:$0xff] %v9039_v61  ;;  %v859_v46 = vor.u32 %v8730_v13, %v8694_v49  ;;  %v2554_v35 = vsub.s32 32, %v2553_v17  ;;  %vm866_vm1 = vcmp.lt.s32.totalorder %v8438_v10, 1  ;;  %vm867_vm2 = vcmp.lt.s32.totalorder %v8438_v10, 2 }
 0x11f   : > { %12335 = vst [vmem:[#allocation76_spill] sm:$0xff] %v9043_v26  ;;  %v2392_v7 = vor.u32 8388608, %v2391_v5  ;;  %v9053_v31 = vmul.u32 %v2126_v1, %v2124_v34  ;;  %vm2135_vm3 = vc.u32 %v2127_v14, %v2131_v40  ;;  %v9055_v55 = vmul.u32 %v2147_v63, %v2123_v47 }
 0x120   : > { %12336 = vst [vmem:[#allocation77_spill] sm:$0xff] %v9045_v41  ;;  %v9060_v12 = vmul.u32 %v2148_v4, %v2123_v47  ;;  %v9062_v37 = vmul.u32 %v2147_v63, %v2124_v34  ;;  %v9064_v49 = vmul.u32 %v2148_v4, %v2124_v34  ;;  %v9066_v13 = vshrl.u32 %v2551_v38, 5 }
 0x121   : > { %12337 = vst [vmem:[#allocation78_spill] sm:$0xff] %v9047_v45  ;;  %v9069_v5 = vand.u32 65535, %v9047_v45  ;;  %v9072_v1 = vshrl.u32 %v9047_v45, 16  ;;  %v9074_v44 = vadd.s32 1, %v7544_v3  ;;  %v9077_v9 = vsel %vm2135_vm3, 1, %v12271_v25 }
 0x122   : > { %12338 = vst [vmem:[#allocation79_spill] sm:$0xff] %v9055_v55  ;;  %v9079_v53 = vadd.s32 %v2131_v40, %v2127_v14  ;;  %v2557_v47 = vshrl.u32 %v12269_v57, %v2554_v35  ;;  %v9082_v63 = vshll.u32 %v2392_v7, 8  ;;  %v2556_v38 = vshll.u32 %v12263_v6, %v2553_v17 }
 0x123   : > { %12339 = vst [vmem:[#allocation80_spill] sm:$0xff] %v9060_v12  ;;  %v2563_v34 = vshrl.u32 %v12282_v21, %v2554_v35  ;;  %vm868_vm4 = vcmp.lt.s32.totalorder %v8438_v10, 3  ;;  %v874_v4 = vsel %vm866_vm1, %v8648_v50, %v8690_v30  ;;  %v2559_v3 = vshll.u32 %v12269_v57, %v2553_v17 }
 0x124   : > { %12340 = vst [vmem:[#allocation81_spill] sm:$0xff] %v9062_v37  ;;  %v2562_v40 = vshll.u32 %v12281_v33, %v2553_v17  ;;  %v2565_v14 = vshll.u32 %v12282_v21, %v2553_v17  ;;  %v876_v7 = vsel %vm868_vm4, %v859_v46, %v8494_v11  ;;  %v2560_v29 = vshrl.u32 %v12281_v33, %v2554_v35 }
 0x125   : > { %12341 = vst [vmem:[#allocation82_spill] sm:$0xff] %v9064_v49  ;;  %v2566_v15 = vshrl.u32 %v12260_v48, %v2554_v35  ;;  %v9100_v43 = vshll.u32 %v12260_v48, %v2553_v17  ;;  %v9103_v59 = vshrl.u32 %v12276_v20, %v2554_v35  ;;  %v9105_v26 = vor.u32 %v2557_v47, %v2556_v38 }
 0x126   : > { %12342 = vst [vmem:[#allocation83_spill] sm:$0xff] %v9079_v53  ;;  %v877_v24 = vsel %vm867_vm2, %v874_v4, %v876_v7  ;;  %v878_v51 = vsel %vm866_vm1, %v8690_v30, %v859_v46  ;;  %v880_v11 = vsel %vm868_vm4, %v8444_v16, %v8498_v0  ;;  %v9116_v49 = vor.u32 %v2563_v34, %v2562_v40 }
 0x127   : > { %12343 = vst [vmem:[#allocation84_spill] sm:$0xff] %v9082_v63  ;;  %v871_v17 = vsel %vm869_vm8, %v859_v46, 2102212464  ;;  %v881_v47 = vsel %vm867_vm2, %v878_v51, %v880_v11  ;;  %v12344_v38 = vor.u32 8388608, %v8485_v54  ;;  %v907_v41 = vand.u32 65535, %v877_v24 }
 0x128   : > { %v885_v7 = vand.u32 65535, %v881_v47  ;;  %v886_v53 = vshrl.u32 %v881_v47, 16  ;;  %v908_v37 = vshrl.u32 %v877_v24, 16  ;;  %v2555_v55 = vshrl.u32 %v12263_v6, %v2554_v35 }
 0x129   : > { %v9124_v4 = vshll.u32 %v12344_v38, 8  ;;  %vm2571_vm5 = vcmp.lt.s32.totalorder %v9066_v13, 1  ;;  %v9130_v46 = vor.u32 %v2560_v29, %v2559_v3  ;;  %v9132_v34 = vor.u32 %v2566_v15, %v2565_v14 }
 0x12a   : > { %v870_v54 = vsel %vm866_vm1, %v8569_v8, %v8648_v50  ;;  %v872_v24 = vsel %vm868_vm4, %v8690_v30, %v871_v17  ;;  %vm2574_vm8 = vcmp.lt.s32.totalorder %v9066_v13, 4  ;;  %v9147_v29 = vsel %vm2571_vm5, %v2555_v55, %v9105_v26 }
 0x12b   : > { %v883_v16 = vand.u32 65535, %v9124_v4  ;;  %v884_v0 = vshrl.u32 %v9124_v4, 16  ;;  %v2576_v8 = vsel %vm2574_vm8, %v9116_v49, 2102212464  ;;  %v9154_v30 = vsel %vm867_vm2, %v870_v54, %v872_v24 }
 0x12c   : > { %v12171_v11 = vand.u32 2147483647, %v8363_v52  ;;  %vm2573_vm7 = vcmp.lt.s32.totalorder %v9066_v13, 3  ;;  %vm2395_vm0 = vcmp.gt.s32.totalorder %v9074_v44, 0  ;;  %vm2572_vm1 = vcmp.lt.s32.totalorder %v9066_v13, 2 }
 0x12d   : > { %v888_v35 = vmul.u32 %v886_v53, %v883_v16  ;;  %v889_v40 = vmul.u32 %v885_v7, %v884_v0  ;;  %v910_v50 = vmul.u32 %v908_v37, %v883_v16  ;;  %v911_v15 = vmul.u32 %v907_v41, %v884_v0 }
 0x12e   : > { %v887_v3 = vmul.u32 %v885_v7, %v883_v16  ;;  %v890_v17 = vmul.u32 %v886_v53, %v884_v0  ;;  %v909_v38 = vmul.u32 %v907_v41, %v883_v16  ;;  %v912_v58 = vmul.u32 %v908_v37, %v884_v0 }
 0x12f   : > { %v891_v14 = vshll.u32 %v888_v35, 16  ;;  %v892_v47 = vshrl.u32 %v888_v35, 16  ;;  %v913_v51 = vshll.u32 %v910_v50, 16  ;;  %v893_v55 = vshll.u32 %v889_v40, 16 }
 0x130   : > { %v915_v60 = vshll.u32 %v911_v15, 16  ;;  %v996_v53 = vand.u32 8388607, %v12171_v11  ;;  %v894_v41 = vshrl.u32 %v889_v40, 16  ;;  %v914_v0 = vshrl.u32 %v910_v50, 16 }
 0x131   : > { %vm895_vm6 = vc.u32 %v887_v3, %v891_v14  ;;  %v897_v12 = vadd.s32 %v891_v14, %v887_v3  ;;  %vm917_vm10 = vc.u32 %v909_v38, %v913_v51  ;;  %v919_v10 = vadd.s32 %v913_v51, %v909_v38 }
 0x132   : > { %v896_v2 = vsel %vm895_vm6, 1, %v12271_v25  ;;  %v918_v7 = vsel %vm917_vm10, 1, %v12271_v25  ;;  %v997_v3 = vor.u32 8388608, %v996_v53  ;;  %v1009_v40 = vshll.u32 %v12269_v57, %v8397_v36 }
 0x133   : > { %v898_v54 = vadd.s32 %v896_v2, %v890_v17  ;;  %vm899_vm11 = vc.u32 %v897_v12, %v893_v55  ;;  %v920_v24 = vadd.s32 %v918_v7, %v912_v58  ;;  %vm921_vm14 = vc.u32 %v919_v10, %v915_v60 }
 0x134   : > { %v900_v16 = vsel %vm899_vm11, 1, %v12271_v25  ;;  %v922_v35 = vsel %vm921_vm14, 1, %v12271_v25  ;;  %v1006_v2 = vshll.u32 %v12263_v6, %v8397_v36  ;;  %v1007_v12 = vshrl.u32 %v12269_v57, %v8417_v56 }
 0x135   : > { %v902_v37 = vadd.s32 %v900_v16, %v898_v54  ;;  %v924_v51 = vadd.s32 %v922_v35, %v920_v24  ;;  %v1010_v58 = vshrl.u32 %v12281_v33, %v8417_v56  ;;  %v1012_v50 = vshll.u32 %v12281_v33, %v8397_v36  ;;  %v12345_v36 = vld [vmem:[#allocation12_spill] sm:$0xff] }
 0x136   : > { %v1013_v17 = vshrl.u32 %v12282_v21, %v8417_v56  ;;  %v916_v38 = vshrl.u32 %v911_v15, 16  ;;  %v9177_v55 = vadd.s32 %v919_v10, %v915_v60  ;;  %v9179_v7 = vor.u32 %v1007_v12, %v1006_v2 }
 0x137   : > { %v903_v14 = vadd.s32 %v902_v37, %v892_v47  ;;  %v925_v54 = vadd.s32 %v924_v51, %v914_v0  ;;  %v9184_v47 = vor.u32 %v1010_v58, %v1009_v40  ;;  %vm1023_vm2 = vcmp.lt.s32.totalorder %v8465_v42, 3  ;;  %v12346_v37 = vld [vmem:[#allocation8_spill] sm:$0xff] }
 0x138   : > { %v1014_v16 = vor.u32 %v1013_v17, %v1012_v50  ;;  %vm1021_vm3 = vcmp.lt.s32.totalorder %v8465_v42, 1  ;;  %v1035_v60 = vsel %vm1023_vm2, %v12346_v37, %v12345_v36  ;;  %v9192_v15 = vshll.u32 %v997_v3, 8  ;;  %v12347_v3 = vld [vmem:[#allocation11_spill] sm:$0xff] }
 0x139   : > { %v9182_v53 = vadd.s32 %v903_v14, %v894_v41  ;;  %v926_v24 = vadd.s32 %v925_v54, %v916_v38  ;;  %v2577_v10 = vsel %vm2573_vm7, %v9130_v46, %v2576_v8  ;;  %v9201_v41 = vsel %vm2571_vm5, %v9105_v26, %v9130_v46 }
 0x13a   : > { %v1029_v0 = vsel %vm1021_vm3, %v9179_v7, %v9184_v47  ;;  %vm1022_vm6 = vcmp.lt.s32.totalorder %v8465_v42, 2  ;;  %v1031_v8 = vsel %vm1023_vm2, %v1014_v16, %v12347_v3  ;;  %v1033_v26 = vsel %vm1021_vm3, %v9184_v47, %v1014_v16 }
 0x13b   : > { %vm929_vm4 = vc.u32 %v9182_v53, %v9177_v55  ;;  %v930_v35 = vadd.s32 1, %v926_v24  ;;  %v927_v51 = vmul.u32 %v9124_v4, %v9154_v30  ;;  %v1032_v2 = vsel %vm1022_vm6, %v1029_v0, %v1031_v8 }
 0x13c   : > { %v1036_v12 = vsel %vm1022_vm6, %v1033_v26, %v1035_v60  ;;  %v1038_v40 = vand.u32 65535, %v9192_v15  ;;  %v1039_v58 = vshrl.u32 %v9192_v15, 16  ;;  %v2580_v38 = vsel %vm2574_vm8, %v9132_v34, 920167782 }
 0x13d   : > { %v931_v14 = vsel %vm929_vm4, %v930_v35, %v926_v24  ;;  %v1040_v50 = vand.u32 65535, %v1036_v12  ;;  %v1041_v17 = vshrl.u32 %v1036_v12, 16  ;;  %v1062_v36 = vand.u32 65535, %v1032_v2 }
 0x13e   : > { %v932_v54 = vadd.s32 %v931_v14, %v927_v51  ;;  %v1063_v4 = vshrl.u32 %v1032_v2, 16  ;;  %v2583_v30 = vsel %vm2571_vm5, %v9130_v46, %v9116_v49  ;;  %v12348_v37 = vor.u32 %v9103_v59, %v9100_v43 }
 0x13f   : > { %v1043_v60 = vmul.u32 %v1041_v17, %v1038_v40  ;;  %v1044_v0 = vmul.u32 %v1040_v50, %v1039_v58  ;;  %v2396_v35 = vsel %vm2395_vm0, %v9074_v44, 0  ;;  %v1066_v26 = vmul.u32 %v1062_v36, %v1039_v58 }
 0x140   : > { %v2584_v24 = vsel %vm2574_vm8, %v12348_v37, 1326507024  ;;  %v933_v3 = vadd.s32 536870912, %v932_v54  ;;  %v1065_v8 = vmul.u32 %v1063_v4, %v1038_v40  ;;  %v9242_v51 = vsel %vm2572_vm1, %v9147_v29, %v2577_v10 }
 0x141   : > { %12349 = vst [vmem:[#allocation12_spill] sm:$0xff] %v9242_v51  ;;  %v2581_v59 = vsel %vm2573_vm7, %v9116_v49, %v2580_v38  ;;  %v1042_v43 = vmul.u32 %v1040_v50, %v1038_v40  ;;  %v1046_v46 = vshll.u32 %v1043_v60, 16  ;;  %v1045_v12 = vmul.u32 %v1041_v17, %v1039_v58 }
 0x142   : > { %v9247_v2 = vshrl.u32 %v933_v3, 30  ;;  %v1064_v14 = vmul.u32 %v1062_v36, %v1038_v40  ;;  %v1068_v37 = vshll.u32 %v1065_v8, 16  ;;  %v1048_v44 = vshll.u32 %v1044_v0, 16 }
 0x143   : > { %vm1050_vm5 = vc.u32 %v1042_v43, %v1046_v46  ;;  %v1052_v11 = vadd.s32 %v1046_v46, %v1042_v43  ;;  %v1067_v39 = vmul.u32 %v1063_v4, %v1039_v58  ;;  %v1070_v10 = vshll.u32 %v1066_v26, 16 }
 0x144   : > { %v935_v22 = vshll.u32 %v9247_v2, 30  ;;  %v1051_v29 = vsel %vm1050_vm5, 1, %v12271_v25  ;;  %vm1072_vm8 = vc.u32 %v1064_v14, %v1068_v37  ;;  %v1074_v50 = vadd.s32 %v1068_v37, %v1064_v14 }
 0x145   : > { %v1053_v61 = vadd.s32 %v1051_v29, %v1045_v12  ;;  %vm1054_vm10 = vc.u32 %v1052_v11, %v1048_v44  ;;  %v1073_v49 = vsel %vm1072_vm8, 1, %v12271_v25  ;;  %v2585_v40 = vsel %vm2573_vm7, %v9132_v34, %v2584_v24 }
 0x146   : > { %v9255_v17 = vsub.s32 %v932_v54, %v935_v22  ;;  %v1055_v38 = vsel %vm1054_vm10, 1, %v12271_v25  ;;  %v1075_v58 = vadd.s32 %v1073_v49, %v1067_v39  ;;  %v1026_v36 = vsel %vm1024_vm9, %v1014_v16, 2102212464 }
 0x147   : > { %v1047_v4 = vshrl.u32 %v1043_v60, 16  ;;  %v1057_v3 = vadd.s32 %v1055_v38, %v1053_v61  ;;  %vm1076_vm11 = vc.u32 %v1074_v50, %v1070_v10  ;;  %v1005_v43 = vshrl.u32 %v12263_v6, %v8417_v56  ;;  %v611_v56 = vpop.permute.xlu2 %610 }
 0x148   : > { %vm937_vm14 = vcmp.lt.s32.totalorder %v9255_v17, 0  ;;  %v938_v11 = vsub.s32 0, %v9255_v17  ;;  %v1077_v34 = vsel %vm1076_vm11, 1, %v12271_v25  ;;  %v1049_v22 = vshrl.u32 %v1044_v0, 16 }
 0x149   : > { %v1058_v54 = vadd.s32 %v1057_v3, %v1047_v4  ;;  %v1069_v24 = vshrl.u32 %v1065_v8, 16  ;;  %v1079_v46 = vadd.s32 %v1077_v34, %v1075_v58  ;;  %v2586_v39 = vsel %vm2572_vm1, %v2583_v30, %v2585_v40  ;;  %v12351_v34 = vld [vmem:[#allocation23_spill] sm:$0xff] }
 0x14a   : > { %v939_v16 = vsel %vm937_vm14, %v938_v11, %v9255_v17  ;;  %v1025_v61 = vsel %vm1021_vm3, %v1005_v43, %v9179_v7  ;;  %v1027_v60 = vsel %vm1023_vm2, %v9184_v47, %v1026_v36  ;;  %v1071_v0 = vshrl.u32 %v1066_v26, 16 }
 0x14b   : > { %v940_v12 = vclz %v939_v16  ;;  %v9274_v14 = vadd.s32 %v1058_v54, %v1049_v22  ;;  %v1080_v8 = vadd.s32 %v1079_v46, %v1069_v24  ;;  %v9279_v30 = vsel %vm2572_vm1, %v9201_v41, %v2581_v59  ;;  %v12353_v16 = vld [vmem:[#allocation22_spill] sm:$0xff] }
 0x14c   : > { %v9281_v37 = vand.u32 31, %v2396_v35  ;;  %v9284_v44 = vmul.f32 %v8337_v28, %v611_v56  ;;  %v9286_v7 = vadd.s32 %v1074_v50, %v1070_v10  ;;  %v9290_v47 = vadd.s32 %v9077_v9, %v9053_v31 }
 0x14d   : > { %v7515_v29 = vadd.s32 4294967294, %v940_v12  ;;  %v1028_v26 = vsel %vm1022_vm6, %v1025_v61, %v1027_v60  ;;  %v1081_v49 = vadd.s32 %v1080_v8, %v1071_v0  ;;  %v2590_v40 = vand.u32 65535, %v2586_v39  ;;  %v12356_v0 = vld [vmem:[#allocation2_spill] sm:$0xff] }
 0x14e   : > { %12350 = vst [vmem:[#allocation8_spill] sm:$0xff] %v9290_v47  ;;  %v9296_v41 = vshrl.u32 %v2396_v35, 5  ;;  %vm1084_vm9 = vc.u32 %v9274_v14, %v9286_v7  ;;  %v2591_v59 = vshrl.u32 %v2586_v39, 16  ;;  %v2612_v10 = vand.u32 65535, %v9279_v30 }
 0x14f   : > { %vm7516_vm7 = vcmp.lt.s32.totalorder %v7515_v29, 0  ;;  %v1085_v31 = vadd.s32 1, %v1081_v49  ;;  %v12176_v9 = vshrl.u32 %v9279_v30, 16  ;;  %v9303_v42 = vsub.s32 32, %v9281_v37 }
 0x150   : > { %v943_v50 = vsel %vm7516_vm7, 0, %v7515_v29  ;;  %v1082_v38 = vmul.u32 %v9192_v15, %v1028_v26  ;;  %v928_v35 = vadd.s32 %v9177_v55, %v9182_v53  ;;  %v9310_v3 = vshll.u32 %v12263_v6, %v9281_v37  ;;  %v12357_v29 = vld [vmem:[#allocation21_spill] sm:$0xff] }
 0x151   : > { %v944_v58 = vsub.s32 32, %v943_v50  ;;  %v948_v36 = vsub.s32 4294967266, %v943_v50  ;;  %v1086_v4 = vsel %vm1084_vm9, %v1085_v31, %v1081_v49  ;;  %v9314_v11 = vshll.u32 %v12269_v57, %v9281_v37  ;;  %v12359_v49 = vld [vmem:[#allocation27_spill] sm:$0xff] }
 0x152   : > { %v1087_v43 = vadd.s32 %v1086_v4, %v1082_v38  ;;  %v1223_v22 = vshll.u32 %v12351_v34, 16  ;;  %v9319_v15 = vshll.u32 %v12281_v33, %v9281_v37  ;;  %v945_v55 = vshll.u32 %v9255_v17, %v943_v50 }
 0x153   : > { %v946_v53 = vshrl.u32 %v928_v35, %v944_v58  ;;  %v949_v54 = vadd.s32 127, %v948_v36  ;;  %v9323_v24 = vmul.u32 %v2590_v40, %v9069_v5  ;;  %v9326_v46 = vmul.u32 %v2591_v59, %v9069_v5  ;;  %v12363_v35 = vld [vmem:[#allocation24_spill] sm:$0xff] }
 0x154   : > { %v1088_v39 = vadd.s32 536870912, %v1087_v43  ;;  %vm1227_vm0 = vc.u32 %v12353_v16, %v1223_v22  ;;  %v9330_v61 = vmul.u32 %v2590_v40, %v9072_v1  ;;  %v9333_v60 = vmul.u32 %v2591_v59, %v9072_v1 }
 0x155   : > { %12352 = vst [vmem:[#allocation11_spill] sm:$0xff] %v9326_v46  ;;  %v947_v56 = vor.u32 %v946_v53, %v945_v55  ;;  %v950_v12 = vshll.u32 %v949_v54, 23  ;;  %v9336_v17 = vmul.u32 %v2612_v10, %v9069_v5  ;;  %vm836_vm1 = vcmp.lt.s32.totalorder %v12356_v0, 0  ;;  %v12364_v55 = vld [vmem:[#allocation13_spill] sm:$0xff]  ;;  %v12365_v54 = vld [vmem:[#allocation28_spill] sm:$0xff] }
 0x156   : > { %12354 = vst [vmem:[#allocation23_spill] sm:$0xff] %v9330_v61  ;;  %v9339_v8 = vshrl.u32 %v1088_v39, 30  ;;  %v12358_v26 = vshll.u32 %v12357_v29, 16  ;;  %v1228_v31 = vsel %vm1227_vm0, 1, %v12271_v25  ;;  %v12360_v40 = vand.u32 2147483647, %v12356_v0 }
 0x157   : > { %12355 = vst [vmem:[#allocation22_spill] sm:$0xff] %v9336_v17  ;;  %v951_v50 = vor.u32 4788187, %v950_v12  ;;  %v1225_v58 = vshll.u32 %v12363_v35, 16  ;;  %v1229_v36 = vadd.s32 %v1223_v22, %v12353_v16  ;;  %v1202_v53 = vshrl.u32 %v12364_v55, 16  ;;  %v12370_v17 = vld [vmem:[#allocation17_spill] sm:$0xff] }
 0x158   : > { %vm1209_vm2 = vc.u32 %v12359_v49, %v12358_v26  ;;  %vm9347_vm3 = vcmp.le.f32.partialorder %v12360_v40, 0.7853982  ;;  %v1090_v4 = vshll.u32 %v9339_v8, 30  ;;  %v12366_v26 = vld [vmem:[#allocation26_spill] sm:$0xff]  ;;  %v9361_v40 = vmul.u32 %v12176_v9, %v9069_v5  ;;  %v12369_v5 = vld [vmem:[#allocation9_spill] sm:$0xff] }
 0x159   : > { %v1210_v38 = vsel %vm1209_vm2, 1, %v12271_v25  ;;  %v1230_v49 = vadd.s32 %v1228_v31, %v12366_v26  ;;  %v952_v12 = vand.u32 2147483647, %v951_v50  ;;  %v954_v13 = vcvt.s32.f32 %v947_v56 }
 0x15a   : > { %v1212_v39 = vadd.s32 %v1210_v38, %v12365_v54  ;;  %12367 = vst [vmem:[#allocation2_spill] sm:$0xff] %v9361_v40  ;;  %vm1231_vm4 = vc.u32 %v1229_v36, %v1225_v58  ;;  %v9364_v51 = vmul.u32 %v2612_v10, %v9072_v1  ;;  %v9366_v22 = vsub.s32 %v1087_v43, %v1090_v4 }
 0x15b   : > { %v1232_v55 = vsel %vm1231_vm4, 1, %v12271_v25  ;;  %v955_v45 = vmul.f32 %v954_v13, %v952_v12  ;;  %v1204_v38 = vshrl.u32 %v12357_v29, 16  ;;  %v1224_v31 = vshrl.u32 %v12351_v34, 16 }
 0x15c   : > { %12368 = vst [vmem:[#allocation21_spill] sm:$0xff] %v9364_v51  ;;  %v1213_v16 = vadd.s32 %v1212_v39, %v1202_v53  ;;  %v1234_v54 = vadd.s32 %v1232_v55, %v1230_v49  ;;  %v958_v50 = vsub.s32 4, %v9247_v2  ;;  %vm1092_vm6 = vcmp.lt.s32.totalorder %v9366_v22, 0 }
 0x15d   : > { %v1093_v10 = vsub.s32 0, %v9366_v22  ;;  %v956_v56 = vxor.u32 2147483648, %v955_v45  ;;  %v1226_v4 = vshrl.u32 %v12363_v35, 16  ;;  %v2400_v13 = vshrl.u32 %v12263_v6, %v9303_v42 }
 0x15e   : > { %v9375_v43 = vadd.s32 %v1213_v16, %v1204_v38  ;;  %v1235_v53 = vadd.s32 %v1234_v54, %v1224_v31  ;;  %v2402_v34 = vshrl.u32 %v12269_v57, %v9303_v42  ;;  %v2405_v29 = vshrl.u32 %v12281_v33, %v9303_v42 }
 0x15f   : > { %v1094_v39 = vsel %vm1092_vm6, %v1093_v10, %v9366_v22  ;;  %v957_v26 = vsel %vm836_vm1, %v956_v56, %v955_v45  ;;  %v9387_v12 = vadd.s32 %v1229_v36, %v1225_v58  ;;  %v2408_v35 = vshrl.u32 %v12282_v21, %v9303_v42 }
 0x160   : > { %v1095_v49 = vclz %v1094_v39  ;;  %v1236_v16 = vadd.s32 %v1235_v53, %v1226_v4  ;;  %v2410_v55 = vshll.u32 %v12282_v21, %v9281_v37  ;;  %v2411_v38 = vshrl.u32 %v12260_v48, %v9303_v42 }
 0x161   : > { %v9398_v31 = vsel %vm9347_vm3, %v12356_v0, %v957_v26  ;;  %v959_v45 = vsel %vm836_vm1, %v958_v50, %v9247_v2  ;;  %vm1239_vm5 = vc.u32 %v9375_v43, %v9387_v12  ;;  %v2403_v54 = vor.u32 %v2402_v34, %v9310_v3 }
 0x162   : > { %v962_v58 = vmul.f32 %v9398_v31, %v9398_v31  ;;  %v7518_v36 = vadd.s32 4294967294, %v1095_v49  ;;  %v9409_v10 = vor.u32 %v2405_v29, %v9314_v11  ;;  %v2413_v56 = vshll.u32 %v12260_v48, %v9281_v37 }
 0x163   : > { %v1240_v4 = vadd.s32 1, %v1236_v16  ;;  %v2414_v53 = vshrl.u32 %v12276_v20, %v9303_v42  ;;  %v2409_v39 = vor.u32 %v2408_v35, %v9319_v15  ;;  %v9418_v26 = vsel %vm9347_vm3, 0, %v959_v45 }
 0x164   : > { %v963_v2 = vmul.f32 -0.001358992, %v962_v58  ;;  %v970_v50 = vmul.f32 -0.00019511016, %v962_v58  ;;  %vm7519_vm8 = vcmp.lt.s32.totalorder %v7518_v36, 0  ;;  %v1083_v37 = vadd.s32 %v9286_v7, %v9274_v14 }
 0x165   : > { %v1098_v3 = vsel %vm7519_vm8, 0, %v7518_v36  ;;  %v1241_v34 = vsel %vm1239_vm5, %v1240_v4, %v1236_v16  ;;  %v2412_v9 = vor.u32 %v2411_v38, %v2410_v55  ;;  %vm2416_vm10 = vcmp.lt.s32.totalorder %v9296_v41, 1 }
 0x166   : > { %v964_v11 = vadd.f32 0.041655596, %v963_v2  ;;  %v971_v29 = vadd.f32 0.008332121, %v970_v50  ;;  %v1099_v49 = vsub.s32 32, %v1098_v3  ;;  %v1103_v42 = vsub.s32 4294967266, %v1098_v3 }
 0x167   : > { %v12371_v51 = vmul.u32 %v12369_v5, %v12370_v17  ;;  %v2415_v35 = vor.u32 %v2414_v53, %v2413_v56  ;;  %v978_v16 = vadd.s32 3, %v9418_v26  ;;  %v1100_v36 = vshll.u32 %v9366_v22, %v1098_v3 }
 0x168   : > { %v965_v59 = vmul.f32 %v964_v11, %v962_v58  ;;  %v972_v45 = vmul.f32 %v971_v29, %v962_v58  ;;  %v1101_v40 = vshrl.u32 %v1083_v37, %v1099_v49  ;;  %v1104_v4 = vadd.s32 127, %v1103_v42  ;;  %v606_v49 = vpop.permute.xlu1 %605 }
 0x169   : > { %v1242_v15 = vadd.s32 %v1241_v34, %v12371_v51  ;;  %vm2417_vm11 = vcmp.lt.s32.totalorder %v9296_v41, 2  ;;  %vm2418_vm14 = vcmp.lt.s32.totalorder %v9296_v41, 3  ;;  %vm2419_vm9 = vcmp.lt.s32.totalorder %v9296_v41, 4 }
 0x16a   : > { %v966_v14 = vadd.f32 -0.4999988, %v965_v59  ;;  %v973_v7 = vadd.f32 -0.16666654, %v972_v45  ;;  %v1102_v17 = vor.u32 %v1101_v40, %v1100_v36  ;;  %v1105_v51 = vshll.u32 %v1104_v4, 23 }
 0x16b   : > { %v1243_v2 = vadd.s32 536870912, %v1242_v15  ;;  %v2420_v55 = vsel %vm2416_vm10, %v2400_v13, %v2403_v54  ;;  %v2421_v38 = vsel %vm2419_vm9, %v2409_v39, 2102212464  ;;  %v12372_v53 = vshll.u32 %v9326_v46, 16 }
 0x16c   : > { %v967_v56 = vmul.f32 %v966_v14, %v962_v58  ;;  %v974_v22 = vmul.f32 %v973_v7, %v962_v58  ;;  %v2424_v40 = vsel %vm2416_vm10, %v2403_v54, %v9409_v10  ;;  %v2429_v3 = vsel %vm2419_vm9, %v2415_v35, 1326507024  ;;  %v690_v58 = vpop.permute.xlu0 %689 }
 0x16d   : > { %v9431_v5 = vshrl.u32 %v1243_v2, 30  ;;  %vm9438_vm7 = vc.u32 %v9323_v24, %v12372_v53  ;;  %v979_v34 = vand.u32 3, %v978_v16  ;;  %v1106_v11 = vor.u32 4788187, %v1105_v51  ;;  %v787_v2 = vpop.permute.xlu2 %786 }
 0x16e   : > { %v2425_v29 = vsel %vm2419_vm9, %v2412_v9, 920167782  ;;  %v9445_v37 = vadd.f32 1.0, %v967_v56  ;;  %v975_v13 = vadd.f32 1.0, %v974_v22  ;;  %v1109_v45 = vcvt.s32.f32 %v1102_v17 }
 0x16f   : > { %v1245_v42 = vshll.u32 %v9431_v5, 30  ;;  %v1107_v59 = vand.u32 2147483647, %v1106_v11  ;;  %v636_v36 = vmul.f32 %v8337_v28, %v606_v49  ;;  %v717_v4 = vmul.f32 %v8335_v27, %v690_v58 }
 0x170   : > { %v2428_v54 = vsel %vm2416_vm10, %v9409_v10, %v2409_v39  ;;  %v2430_v35 = vsel %vm2418_vm14, %v2412_v9, %v2429_v3  ;;  %v9456_v16 = vmul.f32 %v975_v13, %v9398_v31  ;;  %v12181_v14 = vxor.u32 2147483648, %v9445_v37 }
 0x171   : > { %vm984_vm0 = vcmp.eq.s32.totalorder %v979_v34, 2  ;;  %v1110_v7 = vmul.f32 %v1109_v45, %v1107_v59  ;;  %v733_v17 = vadd.f32 %v717_v4, %v636_v36  ;;  %v814_v51 = vmul.f32 %v8344_v32, %v787_v2 }
 0x172   : > { %v2426_v56 = vsel %vm2418_vm14, %v2409_v39, %v2425_v29  ;;  %v12182_v22 = vxor.u32 2147483648, %v9456_v16  ;;  %v986_v53 = vsel %vm984_vm0, %v12181_v14, %v9456_v16  ;;  %v9466_v9 = vsub.s32 %v1242_v15, %v1245_v42 }
 0x173   : > { %v9470_v31 = vsel %vm2417_vm11, %v2428_v54, %v2430_v35  ;;  %vm977_vm1 = vweird.f32 %v12356_v0  ;;  %vm981_vm2 = vcmp.eq.s32.totalorder %v979_v34, 0  ;;  %v1111_v3 = vxor.u32 2147483648, %v1110_v7 }
 0x174   : > { %vm980_vm3 = vcmp.lt.s32.totalorder %v979_v34, 2  ;;  %v983_v39 = vsel %vm981_vm2, %v9445_v37, %v12182_v22  ;;  %vm991_vm4 = vcmp.lt.s32.totalorder %v8363_v52, 0  ;;  %v1113_v11 = vsub.s32 4, %v9339_v8 }
 0x175   : > { %v987_v29 = vsel %vm980_vm3, %v983_v39, %v986_v53  ;;  %v12375_v15 = vand.u32 2147483647, %v8363_v52  ;;  %v1112_v49 = vsel %vm991_vm4, %v1111_v3, %v1110_v7  ;;  %v9486_v58 = vadd.f32 %v814_v51, %v733_v17 }
 0x176   : > { %v2422_v34 = vsel %vm2418_vm14, %v9409_v10, %v2421_v38  ;;  %v9493_v42 = vsel %vm977_vm1, nan, %v987_v29  ;;  %v1248_v45 = vsub.s32 0, %v9466_v9  ;;  %v9501_v36 = vsel %vm2417_vm11, %v2424_v40, %v2426_v56 }
 0x177   : > { %vm9480_vm6 = vcmp.le.f32.partialorder %v12375_v15, 0.7853982  ;;  %12378 = vst [vmem:[#allocation27_spill] sm:$0xff] %v9486_v58  ;;  %v12180_v4 = vshrl.u32 %v9470_v31, 16  ;;  %vm1247_vm5 = vcmp.lt.s32.totalorder %v9466_v9, 0  ;;  %v2601_v38 = vsel %vm9438_vm7, 1, %v12271_v25 }
 0x178   : > { %12379 = vst [vmem:[#allocation24_spill] sm:$0xff] %v9493_v42  ;;  %v1115_v59 = vsel %vm9480_vm6, %v8363_v52, %v1112_v49  ;;  %v12380_v54 = vshrl.u32 %v9279_v30, 16  ;;  %v1114_v40 = vsel %vm991_vm4, %v1113_v11, %v9339_v8  ;;  %v2433_v7 = vand.u32 65535, %v9082_v63 }
 0x179   : > { %v1117_v2 = vmul.f32 %v1115_v59, %v1115_v59  ;;  %v2697_v56 = vand.u32 2139095040, %v9486_v58  ;;  %v12382_v53 = vshll.u32 %v9326_v46, 16  ;;  %v9526_v30 = vsel %vm2417_vm11, %v2420_v55, %v2422_v34 }
 0x17a   : > { %v9512_v35 = vmul.u32 %v12380_v54, %v9072_v1  ;;  %12384 = vst [vmem:[#allocation26_spill] sm:$0xff] %v9526_v30  ;;  %v2457_v1 = vand.u32 65535, %v9501_v36  ;;  %v1249_v3 = vsel %vm1247_vm5, %v1248_v45, %v9466_v9  ;;  %v9532_v8 = vmul.u32 %v12180_v4, %v2433_v7 }
 0x17b   : > { %v1118_v17 = vmul.f32 -0.001358992, %v1117_v2  ;;  %v1125_v51 = vmul.f32 -0.00019511016, %v1117_v2  ;;  %v9522_v50 = vadd.s32 %v12382_v53, %v9323_v24  ;;  %v1116_v39 = vsel %vm9480_vm6, 0, %v1114_v40 }
 0x17c   : > { %12381 = vst [vmem:[#allocation13_spill] sm:$0xff] %v9512_v35  ;;  %v9537_v24 = vadd.s32 %v2601_v38, %v9333_v60  ;;  %v9540_v41 = vshrl.u32 %v9082_v63, 16  ;;  %v2435_v55 = vand.u32 65535, %v9470_v31  ;;  %v12184_v15 = vshrl.u32 %v9501_v36, 16 }
 0x17d   : > { %12383 = vst [vmem:[#allocation28_spill] sm:$0xff] %v9522_v50  ;;  %v1119_v11 = vadd.f32 0.041655596, %v1118_v17  ;;  %v1126_v29 = vadd.f32 0.008332121, %v1125_v51  ;;  %v2698_v45 = vshrl.u32 %v2697_v56, 23  ;;  %v1250_v54 = vclz %v1249_v3 }
 0x17e   : > { %12385 = vst [vmem:[#allocation9_spill] sm:$0xff] %v9532_v8  ;;  %v9544_v53 = vmul.u32 %v2457_v1, %v2433_v7  ;;  %v1133_v40 = vadd.s32 3, %v1116_v39  ;;  %v12388_v17 = vld [vmem:[#allocation4_spill] sm:$0xff]  ;;  %v3458_v4 = vand.u32 3, %v9418_v26  ;;  %v9551_v14 = vmul.u32 %v2435_v55, %v2433_v7 }
 0x17f   : > { %12386 = vst [vmem:[#allocation17_spill] sm:$0xff] %v9537_v24  ;;  %v1120_v49 = vmul.f32 %v1119_v11, %v1117_v2  ;;  %v1127_v34 = vmul.f32 %v1126_v29, %v1117_v2  ;;  %v12183_v60 = vand.u32 2147483647, %v12388_v17  ;;  %v9554_v11 = vmul.u32 %v2435_v55, %v9540_v41  ;;  %v12392_v55 = vld [vmem:[#allocation10_spill] sm:$0xff] }
 0x180   : > { %12387 = vst [vmem:[#allocation85_spill] sm:$0xff] %v9544_v53  ;;  %v9558_v56 = vmul.u32 %v12184_v15, %v2433_v7  ;;  %v9561_v3 = vmul.u32 %v2457_v1, %v9540_v41  ;;  %v7550_v22 = vadd.s32 4294967169, %v2698_v45  ;;  %v7521_v38 = vadd.s32 4294967294, %v1250_v54 }
 0x181   : > { %v1121_v51 = vadd.f32 -0.4999988, %v1120_v49  ;;  %v1128_v10 = vadd.f32 -0.16666654, %v1127_v34  ;;  %12389 = vst [vmem:[#allocation4_spill] sm:$0xff] %v9554_v11  ;;  %vm1132_vm8 = vweird.f32 %v8363_v52  ;;  %v1134_v49 = vand.u32 3, %v1133_v40 }
 0x182   : > { %12390 = vst [vmem:[#allocation86_spill] sm:$0xff] %v9558_v56  ;;  %v3612_v26 = vand.u32 3, %v1116_v39  ;;  %v9566_v34 = vand.u32 8388607, %v12183_v60  ;;  %v1317_v42 = vshrl.u32 %v12269_v57, %v12392_v55  ;;  %v12393_v7 = vshll.u32 %v9532_v8, 16  ;;  %v12397_v40 = vld [vmem:[#allocation7_spill] sm:$0xff] }
 0x183   : > { %12391 = vst [vmem:[#allocation87_spill] sm:$0xff] %v9561_v3  ;;  %v1122_v29 = vmul.f32 %v1121_v51, %v1117_v2  ;;  %v1129_v13 = vmul.f32 %v1128_v10, %v1117_v2  ;;  %vm3460_vm11 = vcmp.eq.s32.totalorder %v3458_v4, 0  ;;  %v1320_v39 = vshrl.u32 %v12281_v33, %v12392_v55 }
 0x184   : > { %vm9573_vm10 = vc.u32 %v9551_v14, %v12393_v7  ;;  %vm3459_vm14 = vcmp.lt.s32.totalorder %v3458_v4, 2  ;;  %v12396_v45 = vxor.u32 2147483648, %v9456_v16  ;;  %vm3463_vm9 = vcmp.eq.s32.totalorder %v3458_v4, 2 }
 0x185   : > { %v1123_v2 = vadd.f32 1.0, %v1122_v29  ;;  %v1130_v10 = vadd.f32 1.0, %v1129_v13  ;;  %v1322_v51 = vshll.u32 %v12281_v33, %v12397_v40  ;;  %v2704_v15 = vadd.s32 1, %v7550_v22  ;;  %v12399_v22 = vld [vmem:[#allocation3_spill] sm:$0xff] }
 0x186   : > { %v3462_v54 = vsel %vm3460_vm11, %v9445_v37, %v12396_v45  ;;  %vm7522_vm7 = vcmp.lt.s32.totalorder %v7521_v38, 0  ;;  %vm1139_vm0 = vcmp.eq.s32.totalorder %v1134_v49, 2  ;;  %vm3613_vm2 = vcmp.lt.s32.totalorder %v3612_v26, 2 }
 0x187   : > { %v1131_v60 = vmul.f32 %v1130_v10, %v1115_v59  ;;  %v1140_v7 = vxor.u32 2147483648, %v1123_v2  ;;  %vm3614_vm3 = vcmp.eq.s32.totalorder %v3612_v26, 0  ;;  %v1323_v13 = vshrl.u32 %v12282_v21, %v12392_v55 }
 0x188   : > { %v12398_v35 = vxor.u32 2147483648, %v9445_v37  ;;  %vm3617_vm4 = vcmp.eq.s32.totalorder %v3612_v26, 2  ;;  %vm1135_vm6 = vcmp.lt.s32.totalorder %v1134_v49, 2  ;;  %vm1136_vm5 = vcmp.eq.s32.totalorder %v1134_v49, 0 }
 0x189   : > { %v1137_v29 = vxor.u32 2147483648, %v1131_v60  ;;  %v1141_v45 = vsel %vm1139_vm0, %v1140_v7, %v1131_v60  ;;  %v9590_v10 = vsel %vm7522_vm7, 0, %v7521_v38  ;;  %vm1146_vm11 = vcmp.lt.s32.totalorder %v12399_v22, 0 }
 0x18a   : > { %v3465_v30 = vsel %vm3463_vm9, %v12398_v35, %v9456_v16  ;;  %v3619_v46 = vsel %vm3617_vm4, %v1140_v7, %v1131_v60  ;;  %vm2705_vm13 = vcmp.gt.s32.totalorder %v2704_v15, 0  ;;  %v1316_v37 = vshll.u32 %v12263_v6, %v12397_v40  ;;  %v12405_v7 = vld [vmem:[#allocation20_spill] sm:$0xff] }
 0x18b   : > { %v3466_v59 = vsel %vm3459_vm14, %v3462_v54, %v3465_v30  ;;  %v3616_v63 = vsel %vm3614_vm3, %v1123_v2, %v1137_v29  ;;  %v1138_v24 = vsel %vm1136_vm5, %v1123_v2, %v1137_v29  ;;  %v1319_v16 = vshll.u32 %v12269_v57, %v12397_v40 }
 0x18c   : > { %v3620_v50 = vsel %vm3613_vm2, %v3616_v63, %v3619_v46  ;;  %v1142_v61 = vsel %vm1135_vm6, %v1138_v24, %v1141_v45  ;;  %v3467_v4 = vsel %vm977_vm1, nan, %v3466_v59  ;;  %v1324_v60 = vor.u32 %v1323_v13, %v1322_v51  ;;  %v12406_v13 = vld [vmem:[#allocation16_spill] sm:$0xff] }
 0x18d   : > { %v3621_v35 = vsel %vm1132_vm8, nan, %v3620_v50  ;;  %v9604_v30 = vsel %vm1132_vm8, nan, %v1142_v61  ;;  %v2706_v63 = vsel %vm2705_vm13, %v2704_v15, 0  ;;  %v1258_v46 = vsub.s32 4294967266, %v9590_v10 }
 0x18e   : > { %12400 = vst [vmem:[#allocation10_spill] sm:$0xff] %v9604_v30  ;;  %v7985_v38 = vpack.i.bf16 %v3621_v35, %v3467_v4  ;;  %v1321_v24 = vor.u32 %v1320_v39, %v1319_v16  ;;  %v12401_v49 = vshrl.u32 %v9470_v31, 16  ;;  %v12402_v2 = vshrl.u32 %v9501_v36, 16  ;;  %v12404_v36 = vld [vmem:[#allocation14_spill] sm:$0xff]  ;;  %v12407_v4 = vld [vmem:[#allocation19_spill] sm:$0xff] }
 0x18f   : > { %v1318_v52 = vor.u32 %v1317_v42, %v1316_v37  ;;  %v2446_v61 = vsel %vm9573_vm10, 1, %v12271_v25  ;;  %v1268_v15 = vsub.s32 4, %v9431_v5  ;;  %v1307_v31 = vor.u32 8388608, %v9566_v34 }
 0x190   : > { %v2440_v26 = vmul.u32 %v12401_v49, %v9540_v41  ;;  %v9614_v50 = vmul.u32 %v12402_v2, %v9540_v41  ;;  %7986 = vrot.lane.b32.xlu2 %v7985_v38, %s8167_s17  ;;  %v1315_v39 = vshrl.u32 %v12263_v6, %v12392_v55  ;;  %v9624_v54 = vand.u32 31, %v2706_v63  ;;  %v694_v41 = vpop.permute.xlu1 %693 }
 0x191   : > { %vm1331_vm13 = vcmp.lt.s32.totalorder %v12404_v36, 1  ;;  %vm1333_vm1 = vcmp.lt.s32.totalorder %v12404_v36, 3  ;;  %v1336_v42 = vsel %vm1334_vm12, %v1324_v60, 2102212464  ;;  %v1254_v1 = vsub.s32 32, %v9590_v10 }
 0x192   : > { %12403 = vst [vmem:[#allocation7_spill] sm:$0xff] %v9614_v50  ;;  %v1259_v40 = vadd.s32 127, %v1258_v46  ;;  %v1343_v51 = vsel %vm1331_vm13, %v1321_v24, %v1324_v60  ;;  %v1345_v34 = vsel %vm1333_vm1, %v12406_v13, %v12405_v7  ;;  %v12191_v29 = vand.u32 2147483647, %v9486_v58 }
 0x193   : > { %v1238_v55 = vadd.s32 %v9387_v12, %v9375_v43  ;;  %vm1332_vm8 = vcmp.lt.s32.totalorder %v12404_v36, 2  ;;  %v1335_v45 = vsel %vm1331_vm13, %v1315_v39, %v1318_v52  ;;  %v1269_v59 = vsel %vm1146_vm11, %v1268_v15, %v9431_v5  ;;  %v791_v39 = vpop.permute.xlu0 %790 }
 0x194   : > { %v1337_v37 = vsel %vm1333_vm1, %v1321_v24, %v1336_v42  ;;  %v1339_v16 = vsel %vm1331_vm13, %v1318_v52, %v1321_v24  ;;  %v1341_v35 = vsel %vm1333_vm1, %v1324_v60, %v12407_v4  ;;  %v2709_v38 = vsub.s32 32, %v9624_v54 }
 0x195   : > { %v718_v46 = vmul.f32 %v8335_v27, %v694_v41  ;;  %v1346_v49 = vsel %vm1332_vm8, %v1343_v51, %v1345_v34  ;;  %v9645_v2 = vshll.u32 %v1307_v31, 8  ;;  %v12408_v43 = vshll.u32 %v9532_v8, 16 }
 0x196   : > { %v12410_v5 = vand.u32 2147483647, %v12399_v22  ;;  %v1256_v60 = vshrl.u32 %v1238_v55, %v1254_v1  ;;  %v1260_v52 = vshll.u32 %v1259_v40, 23  ;;  %v9658_v15 = vadd.s32 %v2446_v61, %v2440_v26 }
 0x197   : > { %v9650_v12 = vadd.s32 %v12408_v43, %v9551_v14  ;;  %v2701_v31 = vand.u32 8388607, %v12191_v29  ;;  %v9668_v14 = vsel %vm1332_vm8, %v1335_v45, %v1337_v37  ;;  %v1255_v41 = vshll.u32 %v9466_v9, %v9590_v10 }
 0x198   : > { %vm9654_vm12 = vcmp.le.f32.partialorder %v12410_v5, 0.7853982  ;;  %12413 = vst [vmem:[#allocation14_spill] sm:$0xff] %v9658_v15  ;;  %v9674_v1 = vsel %vm1332_vm8, %v1339_v16, %v1341_v35  ;;  %v1350_v26 = vand.u32 65535, %v1346_v49  ;;  %v1351_v61 = vshrl.u32 %v1346_v49, 16 }
 0x199   : > { %12409 = vst [vmem:[#allocation3_spill] sm:$0xff] %v9650_v12  ;;  %v9664_v42 = vsel %vm9654_vm12, 0, %v1269_v59  ;;  %v2718_v40 = vshrl.u32 %v12282_v21, %v2709_v38  ;;  %v734_v51 = vadd.f32 %v718_v46, %v9284_v44  ;;  %v815_v7 = vmul.f32 %v8344_v32, %v791_v39 }
 0x19a   : > { %v9680_v13 = vand.u32 65535, %v9645_v2  ;;  %v1257_v34 = vor.u32 %v1256_v60, %v1255_v41  ;;  %v1261_v55 = vor.u32 4788187, %v1260_v52  ;;  %v1288_v45 = vadd.s32 3, %v9664_v42 }
 0x19b   : > { %v9684_v9 = vshrl.u32 %v9645_v2, 16  ;;  %v2702_v10 = vor.u32 8388608, %v2701_v31  ;;  %v2712_v36 = vshrl.u32 %v12269_v57, %v2709_v38  ;;  %v2717_v59 = vshll.u32 %v12281_v33, %v9624_v54 }
 0x19c   : > { %v2721_v44 = vshrl.u32 %v12260_v48, %v2709_v38  ;;  %v9690_v37 = vshrl.u32 %v2706_v63, 5  ;;  %v2715_v16 = vshrl.u32 %v12281_v33, %v2709_v38  ;;  %v1352_v4 = vmul.u32 %v1350_v26, %v9680_v13 }
 0x19d   : > { %v9695_v35 = vmul.u32 %v1351_v61, %v9680_v13  ;;  %v2711_v46 = vshll.u32 %v12263_v6, %v9624_v54  ;;  %v2719_v49 = vor.u32 %v2718_v40, %v2717_v59  ;;  %v2720_v43 = vshll.u32 %v12282_v21, %v9624_v54 }
 0x19e   : > { %v9701_v39 = vadd.f32 %v815_v7, %v734_v51  ;;  %v2714_v63 = vshll.u32 %v12269_v57, %v9624_v54  ;;  %v1262_v5 = vand.u32 2147483647, %v1261_v55  ;;  %v1264_v60 = vcvt.s32.f32 %v1257_v34 }
 0x19f   : > { %v9705_v52 = vand.u32 3, %v1288_v45  ;;  %v2713_v31 = vor.u32 %v2712_v36, %v2711_v46  ;;  %v2722_v41 = vor.u32 %v2721_v44, %v2720_v43  ;;  %v2724_v29 = vshrl.u32 %v12276_v20, %v2709_v38 }
 0x1a0   : > { %12414 = vst [vmem:[#allocation20_spill] sm:$0xff] %v9701_v39  ;;  %v9708_v0 = vshll.u32 %v2702_v10, 8  ;;  %v2716_v58 = vor.u32 %v2715_v16, %v2714_v63  ;;  %vm2729_vm10 = vcmp.lt.s32.totalorder %v9690_v37, 4  ;;  %v1265_v40 = vmul.f32 %v1264_v60, %v1262_v5 }
 0x1a1   : > { %v1356_v51 = vshll.u32 %v9695_v35, 16  ;;  %v2710_v7 = vshrl.u32 %v12263_v6, %v2709_v38  ;;  %v2723_v55 = vshll.u32 %v12260_v48, %v9624_v54  ;;  %v2731_v34 = vsel %vm2729_vm10, %v2719_v49, 2102212464 }
 0x1a2   : > { %12415 = vst [vmem:[#allocation16_spill] sm:$0xff] %v9708_v0  ;;  %v2852_v45 = vand.u32 2139095040, %v9701_v39  ;;  %vm2726_vm14 = vcmp.lt.s32.totalorder %v9690_v37, 1  ;;  %v1266_v10 = vxor.u32 2147483648, %v1265_v40  ;;  %v9720_v36 = vmul.u32 %v1350_v26, %v9684_v9 }
 0x1a3   : > { %v1355_v59 = vmul.u32 %v1351_v61, %v9684_v9  ;;  %v2725_v44 = vor.u32 %v2724_v29, %v2723_v55  ;;  %vm2728_vm9 = vcmp.lt.s32.totalorder %v9690_v37, 3  ;;  %v2730_v38 = vsel %vm2726_vm14, %v2710_v7, %v2713_v31 }
 0x1a4   : > { %v2735_v54 = vsel %vm2729_vm10, %v2722_v41, 920167782  ;;  %v2732_v16 = vsel %vm2728_vm9, %v2716_v58, %v2731_v34  ;;  %v1267_v46 = vsel %vm1146_vm11, %v1266_v10, %v1265_v40  ;;  %vm1360_vm7 = vc.u32 %v1352_v4, %v1356_v51 }
 0x1a5   : > { %v1362_v26 = vadd.s32 %v1356_v51, %v1352_v4  ;;  %v9733_v43 = vand.u32 65535, %v9708_v0  ;;  %v9736_v29 = vshrl.u32 %v9708_v0, 16  ;;  %v12194_v61 = vand.u32 2147483647, %v9701_v39 }
 0x1a6   : > { %v2853_v63 = vshrl.u32 %v2852_v45, 23  ;;  %vm2727_vm0 = vcmp.lt.s32.totalorder %v9690_v37, 2  ;;  %v2734_v5 = vsel %vm2726_vm14, %v2713_v31, %v2716_v58  ;;  %v2736_v60 = vsel %vm2728_vm9, %v2719_v49, %v2735_v54 }
 0x1a7   : > { %v1358_v40 = vshll.u32 %v9720_v36, 16  ;;  %v9747_v4 = vsel %vm2727_vm0, %v2730_v38, %v2732_v16  ;;  %v2739_v51 = vsel %vm2729_vm10, %v2725_v44, 1326507024  ;;  %v1270_v7 = vsel %vm9654_vm12, %v12399_v22, %v1267_v46 }
 0x1a8   : > { %12416 = vst [vmem:[#allocation19_spill] sm:$0xff] %v9747_v4  ;;  %v1361_v55 = vsel %vm1360_vm7, 1, %v12271_v25  ;;  %v1272_v34 = vmul.f32 %v1270_v7, %v1270_v7  ;;  %v1372_v45 = vand.u32 65535, %v9674_v1  ;;  %v9758_v10 = vsel %vm2727_vm0, %v2734_v5, %v2736_v60 }
 0x1a9   : > { %v1363_v31 = vadd.s32 %v1361_v55, %v1355_v59  ;;  %vm1364_vm2 = vc.u32 %v1362_v26, %v1358_v40  ;;  %v2738_v38 = vsel %vm2726_vm14, %v2716_v58, %v2719_v49  ;;  %v1373_v54 = vshrl.u32 %v9674_v1, 16 }
 0x1aa   : > { %v1365_v44 = vsel %vm1364_vm2, 1, %v12271_v25  ;;  %v2740_v24 = vsel %vm2728_vm9, %v2722_v41, %v2739_v51  ;;  %v1273_v16 = vmul.f32 -0.001358992, %v1272_v34  ;;  %v1280_v46 = vmul.f32 -0.00019511016, %v1272_v34 }
 0x1ab   : > { %v1367_v59 = vadd.s32 %v1365_v44, %v1363_v31  ;;  %v9770_v5 = vand.u32 8388607, %v12194_v61  ;;  %v1375_v60 = vmul.u32 %v1373_v54, %v9680_v13  ;;  %v1376_v58 = vmul.u32 %v1372_v45, %v9684_v9 }
 0x1ac   : > { %v7553_v49 = vadd.s32 4294967169, %v2853_v63  ;;  %v1274_v40 = vadd.f32 0.041655596, %v1273_v16  ;;  %v1281_v1 = vadd.f32 0.008332121, %v1280_v46  ;;  %v1357_v55 = vshrl.u32 %v9695_v35, 16 }
 0x1ad   : > { %v9777_v41 = vsel %vm2727_vm0, %v2738_v38, %v2740_v24  ;;  %v1374_v31 = vmul.u32 %v1372_v45, %v9680_v13  ;;  %v1378_v44 = vshll.u32 %v1375_v60, 16  ;;  %v1377_v30 = vmul.u32 %v1373_v54, %v9684_v9  ;;  %v12417_v35 = vld [vmem:[#allocation6_spill] sm:$0xff] }
 0x1ae   : > { %v1275_v61 = vmul.f32 %v1274_v40, %v1272_v34  ;;  %v1282_v26 = vmul.f32 %v1281_v1, %v1272_v34  ;;  %v1368_v39 = vadd.s32 %v1367_v59, %v1357_v55  ;;  %vm1294_vm3 = vcmp.eq.s32.totalorder %v9705_v52, 2 }
 0x1af   : > { %v1380_v63 = vshll.u32 %v1376_v58, 16  ;;  %vm1382_vm4 = vc.u32 %v1374_v31, %v1378_v44  ;;  %v1384_v16 = vadd.s32 %v1378_v44, %v1374_v31  ;;  %v12197_v46 = vand.u32 2147483647, %v12417_v35  ;;  %v12419_v44 = vld [vmem:[#allocation29_spill] sm:$0xff] }
 0x1b0   : > { %v1276_v38 = vadd.f32 -0.4999988, %v1275_v61  ;;  %v1283_v24 = vadd.f32 -0.16666654, %v1282_v26  ;;  %v1383_v51 = vsel %vm1382_vm4, 1, %v12271_v25  ;;  %v2859_v13 = vadd.s32 1, %v7553_v49 }
 0x1b1   : > { %vm1291_vm6 = vcmp.eq.s32.totalorder %v9705_v52, 0  ;;  %v1359_v45 = vshrl.u32 %v9720_v36, 16  ;;  %v1385_v59 = vadd.s32 %v1383_v51, %v1377_v30  ;;  %vm1386_vm5 = vc.u32 %v1384_v16, %v1380_v63 }
 0x1b2   : > { %v1277_v9 = vmul.f32 %v1276_v38, %v1272_v34  ;;  %v1284_v54 = vmul.f32 %v1283_v24, %v1272_v34  ;;  %vm1290_vm11 = vcmp.lt.s32.totalorder %v9705_v52, 2  ;;  %v1379_v40 = vshrl.u32 %v1375_v60, 16  ;;  %v12418_v34 = vld [vmem:[#allocation25_spill] sm:$0xff]  ;;  %v12423_v52 = vld [vmem:[#allocation36_spill] sm:$0xff] }
 0x1b3   : > { %v1387_v1 = vsel %vm1386_vm5, 1, %v12271_v25  ;;  %vm1287_vm13 = vweird.f32 %v12399_v22  ;;  %v9791_v61 = vadd.s32 %v1368_v39, %v1359_v45  ;;  %v1381_v26 = vshrl.u32 %v1376_v58, 16 }
 0x1b4   : > { %v9793_v55 = vadd.s32 %v1384_v16, %v1380_v63  ;;  %v1389_v49 = vadd.s32 %v1387_v1, %v1385_v59  ;;  %v9795_v31 = vadd.f32 1.0, %v1277_v9  ;;  %v1285_v36 = vadd.f32 1.0, %v1284_v54 }
 0x1b5   : > { %v1461_v30 = vand.u32 8388607, %v12197_v46  ;;  %v1471_v51 = vshll.u32 %v12263_v6, %v12418_v34  ;;  %v1472_v38 = vshrl.u32 %v12269_v57, %v12419_v44  ;;  %v1474_v39 = vshll.u32 %v12269_v57, %v12418_v34 }
 0x1b6   : > { %v1390_v60 = vadd.s32 %v1389_v49, %v1379_v40  ;;  %v1475_v58 = vshrl.u32 %v12281_v33, %v12419_v44  ;;  %v9807_v63 = vmul.f32 %v1285_v36, %v1270_v7  ;;  %v12198_v16 = vxor.u32 2147483648, %v9795_v31 }
 0x1b7   : > { %v1477_v24 = vshll.u32 %v12281_v33, %v12418_v34  ;;  %v1478_v45 = vshrl.u32 %v12282_v21, %v12419_v44  ;;  %v2746_v59 = vshrl.u32 %v9777_v41, 16  ;;  %v9815_v54 = vor.u32 %v1472_v38, %v1471_v51  ;;  %v12420_v34 = vld [vmem:[#allocation31_spill] sm:$0xff] }
 0x1b8   : > { %v1391_v9 = vadd.s32 %v1390_v60, %v1381_v26  ;;  %v9817_v40 = vor.u32 %v1475_v58, %v1474_v39  ;;  %v12199_v1 = vxor.u32 2147483648, %v9807_v63  ;;  %v1296_v7 = vsel %vm1294_vm3, %v12198_v16, %v9807_v63 }
 0x1b9   : > { %vm1394_vm1 = vc.u32 %v9791_v61, %v9793_v55  ;;  %v9827_v49 = vor.u32 %v1478_v45, %v1477_v24  ;;  %vm2860_vm8 = vcmp.gt.s32.totalorder %v2859_v13, 0  ;;  %v1462_v26 = vor.u32 8388608, %v1461_v30  ;;  %v12422_v24 = vld [vmem:[#allocation34_spill] sm:$0xff] }
 0x1ba   : > { %v1395_v36 = vadd.s32 1, %v1391_v9  ;;  %vm1486_vm12 = vcmp.lt.s32.totalorder %v12420_v34, 1  ;;  %v1293_v51 = vsel %vm1291_vm6, %v9795_v31, %v12199_v1  ;;  %v1392_v60 = vmul.u32 %v9645_v2, %v9668_v14 }
 0x1bb   : > { %vm1487_vm10 = vcmp.lt.s32.totalorder %v12420_v34, 2  ;;  %v1498_v38 = vsel %vm1486_vm12, %v9817_v40, %v9827_v49  ;;  %v1297_v30 = vsel %vm1290_vm11, %v1293_v51, %v1296_v7  ;;  %vm1488_vm14 = vcmp.lt.s32.totalorder %v12420_v34, 3  ;;  %v12424_v7 = vld [vmem:[#allocation33_spill] sm:$0xff]  ;;  %v12442_v34 = vld [vmem:[#allocation42_spill] sm:$0xff] }
 0x1bc   : > { %v1396_v39 = vsel %vm1394_vm1, %v1395_v36, %v1391_v9  ;;  %v1494_v58 = vsel %vm1486_vm12, %v9815_v54, %v9817_v40  ;;  %v9851_v2 = vsel %vm1287_vm13, nan, %v1297_v30  ;;  %v1496_v45 = vsel %vm1488_vm14, %v9827_v49, %v12422_v24 }
 0x1bd   : > { %12421 = vst [vmem:[#allocation6_spill] sm:$0xff] %v9851_v2  ;;  %v1397_v14 = vadd.s32 %v1396_v39, %v1392_v60  ;;  %v1500_v9 = vsel %vm1488_vm14, %v12424_v7, %v12423_v52  ;;  %v2745_v36 = vand.u32 65535, %v9777_v41  ;;  %v2857_v51 = vor.u32 8388608, %v9770_v5 }
 0x1be   : > { %v1501_v46 = vsel %vm1487_vm10, %v1498_v38, %v1500_v9  ;;  %v9865_v30 = vshll.u32 %v1462_v26, 8  ;;  %v12425_v60 = vand.u32 65535, %v9758_v10  ;;  %v2861_v37 = vsel %vm2860_vm8, %v2859_v13, 0 }
 0x1bf   : > { %v1398_v24 = vadd.s32 536870912, %v1397_v14  ;;  %v1505_v16 = vand.u32 65535, %v1501_v46  ;;  %v1506_v1 = vshrl.u32 %v1501_v46, 16  ;;  %v1497_v41 = vsel %vm1487_vm10, %v1494_v58, %v1496_v45 }
 0x1c0   : > { %v9870_v39 = vmul.u32 %v12425_v60, %v9733_v43  ;;  %v1503_v5 = vand.u32 65535, %v9865_v30  ;;  %v1504_v52 = vshrl.u32 %v9865_v30, 16  ;;  %v9878_v26 = vmul.u32 %v2746_v59, %v9733_v43 }
 0x1c1   : > { %v12427_v38 = vshrl.u32 %v9758_v10, 16  ;;  %v12429_v46 = vmov %v12425_v60  ;;  %v9890_v13 = vshrl.u32 %v1398_v24, 30  ;;  %v9897_v60 = vshll.u32 %v2857_v51, 8 }
 0x1c2   : > { %12426 = vst [vmem:[#allocation25_spill] sm:$0xff] %v9870_v39  ;;  %v9888_v9 = vmul.u32 %v12429_v46, %v9736_v29  ;;  %v1508_v2 = vmul.u32 %v1506_v1, %v1503_v5  ;;  %v9899_v4 = vmul.u32 %v1505_v16, %v1504_v52  ;;  %v2863_v0 = vand.u32 31, %v2861_v37 }
 0x1c3   : > { %v9883_v7 = vmul.u32 %v12427_v38, %v9733_v43  ;;  %v12431_v58 = vmov %v12427_v38  ;;  %12433 = vst [vmem:[#allocation36_spill] sm:$0xff] %v9897_v60  ;;  %v9902_v38 = vmul.u32 %v2745_v36, %v9733_v43  ;;  %v1400_v39 = vshll.u32 %v9890_v13, 30 }
 0x1c4   : > { %12430 = vst [vmem:[#allocation31_spill] sm:$0xff] %v9888_v9  ;;  %v9895_v45 = vmul.u32 %v12431_v58, %v9736_v29  ;;  %v1528_v46 = vshrl.u32 %v1497_v41, 16  ;;  %v9906_v24 = vmul.u32 %v2745_v36, %v9736_v29  ;;  %v9909_v9 = vmul.u32 %v2746_v59, %v9736_v29 }
 0x1c5   : > { %12428 = vst [vmem:[#allocation29_spill] sm:$0xff] %v9883_v7  ;;  %v1507_v10 = vmul.u32 %v1505_v16, %v1503_v5  ;;  %v1511_v58 = vshll.u32 %v1508_v2, 16  ;;  %v1401_v7 = vsub.s32 %v1397_v14, %v1400_v39  ;;  %v1527_v50 = vand.u32 65535, %v1497_v41 }
 0x1c6   : > { %12432 = vst [vmem:[#allocation34_spill] sm:$0xff] %v9895_v45  ;;  %v9912_v45 = vshrl.u32 %v2861_v37, 5  ;;  %v9915_v43 = vand.u32 65535, %v9897_v60  ;;  %v1513_v53 = vshll.u32 %v9899_v4, 16  ;;  %v9918_v36 = vsub.s32 32, %v2863_v0 }
 0x1c7   : > { %vm1515_vm9 = vc.u32 %v1507_v10, %v1511_v58  ;;  %v1517_v3 = vadd.s32 %v1511_v58, %v1507_v10  ;;  %vm1402_vm7 = vcmp.lt.s32.totalorder %v1401_v7, 0  ;;  %v1403_v29 = vsub.s32 0, %v1401_v7 }
 0x1c8   : > { %v1530_v59 = vmul.u32 %v1528_v46, %v1503_v5  ;;  %v9921_v16 = vshll.u32 %v12263_v6, %v2863_v0  ;;  %v1510_v51 = vmul.u32 %v1506_v1, %v1504_v52  ;;  %v1516_v37 = vsel %vm1515_vm9, 1, %v12271_v25 }
 0x1c9   : > { %vm1519_vm0 = vc.u32 %v1517_v3, %v1513_v53  ;;  %v9925_v14 = vshll.u32 %v12269_v57, %v2863_v0  ;;  %v9928_v39 = vshll.u32 %v12281_v33, %v2863_v0  ;;  %v1404_v41 = vsel %vm1402_vm7, %v1403_v29, %v1401_v7 }
 0x1ca   : > { %v1531_v10 = vmul.u32 %v1527_v50, %v1504_v52  ;;  %v9931_v58 = vshll.u32 %v12282_v21, %v2863_v0  ;;  %v1405_v15 = vclz %v1404_v41  ;;  %v1518_v8 = vadd.s32 %v1516_v37, %v1510_v51 }
 0x1cb   : > { %v1520_v56 = vsel %vm1519_vm0, 1, %v12271_v25  ;;  %v9936_v1 = vshrl.u32 %v12263_v6, %v9918_v36  ;;  %v9939_v53 = vshll.u32 %v12260_v48, %v2863_v0  ;;  %v1529_v3 = vmul.u32 %v1527_v50, %v1503_v5 }
 0x1cc   : > { %v1533_v12 = vshll.u32 %v1530_v59, 16  ;;  %v9943_v29 = vshrl.u32 %v12269_v57, %v9918_v36  ;;  %v7524_v11 = vadd.s32 4294967294, %v1405_v15  ;;  %v1512_v47 = vshrl.u32 %v1508_v2, 16 }
 0x1cd   : > { %v1522_v23 = vadd.s32 %v1520_v56, %v1518_v8  ;;  %v1532_v41 = vmul.u32 %v1528_v46, %v1504_v52  ;;  %v1535_v51 = vshll.u32 %v1531_v10, 16  ;;  %v1470_v62 = vshrl.u32 %v12263_v6, %v12419_v44 }
 0x1ce   : > { %vm1537_vm2 = vc.u32 %v1529_v3, %v1533_v12  ;;  %v1539_v37 = vadd.s32 %v1533_v12, %v1529_v3  ;;  %vm7525_vm3 = vcmp.lt.s32.totalorder %v7524_v11, 0  ;;  %v1491_v0 = vsel %vm1489_vm15, %v9827_v49, 2102212464 }
 0x1cf   : > { %v1538_v50 = vsel %vm1537_vm2, 1, %v12271_v25  ;;  %v1408_v5 = vsel %vm7525_vm3, 0, %v7524_v11  ;;  %v1523_v18 = vadd.s32 %v1522_v23, %v1512_v47  ;;  %v1393_v8 = vadd.s32 %v9793_v55, %v9791_v61 }
 0x1d0   : > { %v1540_v19 = vadd.s32 %v1538_v50, %v1532_v41  ;;  %vm1541_vm4 = vc.u32 %v1539_v37, %v1535_v51  ;;  %v1409_v56 = vsub.s32 32, %v1408_v5  ;;  %v1413_v15 = vsub.s32 4294967266, %v1408_v5  ;;  %v12436_v41 = vld [vmem:[#allocation48_spill] sm:$0xff] }
 0x1d1   : > { %v1490_v12 = vsel %vm1486_vm12, %v1470_v62, %v9815_v54  ;;  %v1492_v44 = vsel %vm1488_vm14, %v9817_v40, %v1491_v0  ;;  %v1514_v49 = vshrl.u32 %v9899_v4, 16  ;;  %v1534_v2 = vshrl.u32 %v1530_v59, 16  ;;  %v12434_v62 = vld [vmem:[#allocation38_spill] sm:$0xff]  ;;  %v12437_v59 = vld [vmem:[#allocation41_spill] sm:$0xff] }
 0x1d2   : > { %v1542_v23 = vsel %vm1541_vm4, 1, %v12271_v25  ;;  %v1410_v47 = vshll.u32 %v1401_v7, %v1408_v5  ;;  %v1411_v11 = vshrl.u32 %v1393_v8, %v1409_v56  ;;  %v1414_v52 = vadd.s32 127, %v1413_v15 }
 0x1d3   : > { %v1544_v46 = vadd.s32 %v1542_v23, %v1540_v19  ;;  %v2870_v61 = vshrl.u32 %v12281_v33, %v9918_v36  ;;  %v9963_v55 = vadd.s32 %v1523_v18, %v1514_v49  ;;  %v1536_v3 = vshrl.u32 %v1531_v10, 16  ;;  %v616_v23 = vpop.permute.xlu1 %615 }
 0x1d4   : > { %v12435_v54 = vshll.u32 %v12434_v62, 16  ;;  %v1412_v40 = vor.u32 %v1411_v11, %v1410_v47  ;;  %v1415_v0 = vshll.u32 %v1414_v52, 23  ;;  %v1688_v50 = vshll.u32 %v12437_v59, 16 }
 0x1d5   : > { %v1545_v4 = vadd.s32 %v1544_v46, %v1534_v2  ;;  %v2873_v7 = vshrl.u32 %v12282_v21, %v9918_v36  ;;  %v2876_v19 = vshrl.u32 %v12260_v48, %v9918_v36  ;;  %vm1301_vm6 = vcmp.lt.s32.totalorder %v12388_v17, 0  ;;  %v12441_v2 = vld [vmem:[#allocation39_spill] sm:$0xff] }
 0x1d6   : > { %vm1674_vm15 = vc.u32 %v12436_v41, %v12435_v54  ;;  %v1493_v18 = vsel %vm1487_vm10, %v1490_v12, %v1492_v44  ;;  %v9976_v10 = vadd.s32 %v1539_v37, %v1535_v51  ;;  %v12438_v5 = vand.u32 2147483647, %v12388_v17 }
 0x1d7   : > { %v1416_v56 = vor.u32 4788187, %v1415_v0  ;;  %v1546_v15 = vadd.s32 %v1545_v4, %v1536_v3  ;;  %v1675_v49 = vsel %vm1674_vm15, 1, %v12271_v25  ;;  %vm1692_vm11 = vc.u32 %v12441_v2, %v1688_v50  ;;  %v12443_v3 = vld [vmem:[#allocation43_spill] sm:$0xff]  ;;  %v12444_v4 = vld [vmem:[#allocation49_spill] sm:$0xff] }
 0x1d8   : > { %vm9980_vm5 = vcmp.le.f32.partialorder %v12438_v5, 0.7853982  ;;  %vm1549_vm1 = vc.u32 %v9963_v55, %v9976_v10  ;;  %v1690_v12 = vshll.u32 %v12442_v34, 16  ;;  %v1693_v51 = vsel %vm1692_vm11, 1, %v12271_v25 }
 0x1d9   : > { %v1694_v37 = vadd.s32 %v1688_v50, %v12441_v2  ;;  %v2879_v44 = vshrl.u32 %v12276_v20, %v9918_v36  ;;  %v1417_v47 = vand.u32 2147483647, %v1416_v56  ;;  %v1419_v11 = vcvt.s32.f32 %v1412_v40 }
 0x1da   : > { %v1550_v52 = vadd.s32 1, %v1546_v15  ;;  %vm2881_vm8 = vcmp.lt.s32.totalorder %v9912_v45, 1  ;;  %v1547_v46 = vmul.u32 %v9865_v30, %v1493_v18  ;;  %v1695_v54 = vadd.s32 %v1693_v51, %v12443_v3  ;;  %v12445_v51 = vld [vmem:[#allocation37_spill] sm:$0xff] }
 0x1db   : > { %vm1696_vm12 = vc.u32 %v1694_v37, %v1690_v12  ;;  %v1420_v41 = vmul.f32 %v1419_v11, %v1417_v47  ;;  %v1677_v5 = vadd.s32 %v1675_v49, %v12444_v4  ;;  %v2868_v50 = vor.u32 %v9943_v29, %v9921_v16 }
 0x1dc   : > { %v1551_v0 = vsel %vm1549_vm1, %v1550_v52, %v1546_v15  ;;  %v1697_v48 = vsel %vm1696_vm12, 1, %v12271_v25  ;;  %v1689_v40 = vshrl.u32 %v12437_v59, 16  ;;  %v2871_v2 = vor.u32 %v2870_v61, %v9925_v14 }
 0x1dd   : > { %v1552_v36 = vadd.s32 %v1551_v0, %v1547_v46  ;;  %v1699_v56 = vadd.s32 %v1697_v48, %v1695_v54  ;;  %v2874_v30 = vor.u32 %v2873_v7, %v9928_v39  ;;  %v1421_v18 = vxor.u32 2147483648, %v1420_v41  ;;  %v698_v39 = vpop.permute.xlu1 %697 }
 0x1de   : > { %v1667_v3 = vshrl.u32 %v12445_v51, 16  ;;  %vm2883_vm10 = vcmp.lt.s32.totalorder %v9912_v45, 3  ;;  %v1423_v15 = vsub.s32 4, %v9890_v13  ;;  %v2877_v11 = vor.u32 %v2876_v19, %v9931_v58  ;;  %v795_v19 = vpop.permute.xlu0 %794 }
 0x1df   : > { %v1553_v49 = vadd.s32 536870912, %v1552_v36  ;;  %v1700_v47 = vadd.s32 %v1699_v56, %v1689_v40  ;;  %v2880_v16 = vor.u32 %v2879_v44, %v9939_v53  ;;  %v1422_v48 = vsel %vm1301_vm6, %v1421_v18, %v1420_v41 }
 0x1e0   : > { %v1678_v29 = vadd.s32 %v1677_v5, %v1667_v3  ;;  %vm2884_vm14 = vcmp.lt.s32.totalorder %v9912_v45, 4  ;;  %v10014_v14 = vsel %vm9980_vm5, %v12388_v17, %v1422_v48  ;;  %v1691_v59 = vshrl.u32 %v12442_v34, 16 }
 0x1e1   : > { %v10016_v61 = vshrl.u32 %v1553_v49, 30  ;;  %v2886_v58 = vsel %vm2884_vm14, %v2874_v30, 2102212464  ;;  %v1427_v53 = vmul.f32 %v10014_v14, %v10014_v14  ;;  %v719_v7 = vmul.f32 %v8335_v27, %v698_v39 }
 0x1e2   : > { %v1669_v44 = vshrl.u32 %v12434_v62, 16  ;;  %vm2882_vm9 = vcmp.lt.s32.totalorder %v9912_v45, 2  ;;  %v1424_v52 = vsel %vm1301_vm6, %v1423_v15, %v9890_v13  ;;  %v638_v46 = vmul.f32 %v8337_v28, %v616_v23 }
 0x1e3   : > { %v1555_v34 = vshll.u32 %v10016_v61, 30  ;;  %v1701_v54 = vadd.s32 %v1700_v47, %v1691_v59  ;;  %v2893_v41 = vsel %vm2881_vm8, %v2871_v2, %v2874_v30  ;;  %v1428_v0 = vmul.f32 -0.001358992, %v1427_v53 }
 0x1e4   : > { %v1435_v4 = vmul.f32 -0.00019511016, %v1427_v53  ;;  %v10033_v5 = vadd.s32 %v1678_v29, %v1669_v44  ;;  %v2894_v62 = vsel %vm2884_vm14, %v2880_v16, 1326507024  ;;  %v735_v40 = vadd.f32 %v719_v7, %v638_v46 }
 0x1e5   : > { %v816_v56 = vmul.f32 %v8344_v32, %v795_v19  ;;  %v10038_v18 = vsub.s32 %v1552_v36, %v1555_v34  ;;  %v1426_v13 = vsel %vm9980_vm5, 0, %v1424_v52  ;;  %v1429_v23 = vadd.f32 0.041655596, %v1428_v0 }
 0x1e6   : > { %v1436_v51 = vadd.f32 0.008332121, %v1435_v4  ;;  %v10042_v3 = vadd.s32 %v1694_v37, %v1690_v12  ;;  %v2890_v15 = vsel %vm2884_vm14, %v2877_v11, 920167782  ;;  %v1705_v47 = vadd.s32 1, %v1701_v54 }
 0x1e7   : > { %vm1557_vm7 = vcmp.lt.s32.totalorder %v10038_v18, 0  ;;  %v1558_v49 = vsub.s32 0, %v10038_v18  ;;  %v2895_v16 = vsel %vm2883_vm10, %v2877_v11, %v2894_v62  ;;  %v1430_v36 = vmul.f32 %v1429_v23, %v1427_v53 }
 0x1e8   : > { %v1437_v48 = vmul.f32 %v1436_v51, %v1427_v53  ;;  %vm1704_vm0 = vc.u32 %v10033_v5, %v10042_v3  ;;  %v1443_v8 = vadd.s32 3, %v1426_v13  ;;  %v3766_v12 = vand.u32 3, %v9664_v42 }
 0x1e9   : > { %v10053_v37 = vadd.f32 %v816_v56, %v735_v40  ;;  %v1559_v29 = vsel %vm1557_vm7, %v1558_v49, %v10038_v18  ;;  %v2885_v39 = vsel %vm2881_vm8, %v9936_v1, %v2868_v50  ;;  %v1431_v59 = vadd.f32 -0.4999988, %v1430_v36 }
 0x1ea   : > { %v1438_v7 = vadd.f32 -0.16666654, %v1437_v48  ;;  %v1560_v19 = vclz %v1559_v29  ;;  %v12447_v11 = vshll.u32 %v9878_v26, 16  ;;  %v2887_v42 = vsel %vm2883_vm10, %v2871_v2, %v2886_v58 }
 0x1eb   : > { %12446 = vst [vmem:[#allocation33_spill] sm:$0xff] %v10053_v37  ;;  %v2889_v52 = vsel %vm2881_vm8, %v2868_v50, %v2871_v2  ;;  %v2891_v46 = vsel %vm2883_vm10, %v2874_v30, %v2890_v15  ;;  %v1706_v1 = vsel %vm1704_vm0, %v1705_v47, %v1701_v54  ;;  %v10074_v34 = vsel %vm2882_vm9, %v2893_v41, %v2895_v16  ;;  %v12451_v30 = vld [vmem:[#allocation32_spill] sm:$0xff]  ;;  %v12452_v54 = vld [vmem:[#allocation35_spill] sm:$0xff] }
 0x1ec   : > { %vm10062_vm2 = vc.u32 %v9902_v38, %v12447_v11  ;;  %v1432_v0 = vmul.f32 %v1431_v59, %v1427_v53  ;;  %v1439_v4 = vmul.f32 %v1438_v7, %v1427_v53  ;;  %v7527_v62 = vadd.s32 4294967294, %v1560_v19 }
 0x1ed   : > { %v1444_v40 = vand.u32 3, %v1443_v8  ;;  %vm3768_vm3 = vcmp.eq.s32.totalorder %v3766_v12, 0  ;;  %v3920_v56 = vand.u32 3, %v1426_v13  ;;  %v3007_v23 = vand.u32 2139095040, %v10053_v37 }
 0x1ee   : > { %v1433_v58 = vadd.f32 1.0, %v1432_v0  ;;  %v1440_v51 = vadd.f32 1.0, %v1439_v4  ;;  %v12450_v50 = vxor.u32 2147483648, %v9807_v63  ;;  %v12453_v15 = vmul.u32 %v12451_v30, %v12452_v54 }
 0x1ef   : > { %v2901_v41 = vshrl.u32 %v10074_v34, 16  ;;  %vm1442_vm4 = vweird.f32 %v12388_v17  ;;  %vm3771_vm15 = vcmp.eq.s32.totalorder %v3766_v12, 2  ;;  %vm7528_vm6 = vcmp.lt.s32.totalorder %v7527_v62, 0 }
 0x1f0   : > { %v3770_v2 = vsel %vm3768_vm3, %v9795_v31, %v12450_v50  ;;  %v10083_v49 = vadd.s32 %v1706_v1, %v12453_v15  ;;  %v1441_v53 = vmul.f32 %v1440_v51, %v10014_v14  ;;  %v1450_v13 = vxor.u32 2147483648, %v1433_v58 }
 0x1f1   : > { %vm3767_vm5 = vcmp.lt.s32.totalorder %v3766_v12, 2  ;;  %v12454_v47 = vxor.u32 2147483648, %v9795_v31  ;;  %vm1449_vm11 = vcmp.eq.s32.totalorder %v1444_v40, 2  ;;  %vm3921_vm1 = vcmp.lt.s32.totalorder %v3920_v56, 2 }
 0x1f2   : > { %v3008_v48 = vshrl.u32 %v3007_v23, 23  ;;  %v1447_v8 = vxor.u32 2147483648, %v1441_v53  ;;  %v1451_v29 = vsel %vm1449_vm11, %v1450_v13, %v1441_v53  ;;  %v1563_v59 = vsel %vm7528_vm6, 0, %v7527_v62 }
 0x1f3   : > { %v3773_v16 = vsel %vm3771_vm15, %v12454_v47, %v9807_v63  ;;  %v1708_v7 = vadd.s32 536870912, %v10083_v49  ;;  %vm1445_vm8 = vcmp.lt.s32.totalorder %v1444_v40, 2  ;;  %vm1446_vm12 = vcmp.eq.s32.totalorder %v1444_v40, 0  ;;  %v621_v47 = vpop.permute.xlu2 %620 }
 0x1f4   : > { %v3774_v36 = vsel %vm3767_vm5, %v3770_v2, %v3773_v16  ;;  %vm3922_vm10 = vcmp.eq.s32.totalorder %v3920_v56, 0  ;;  %vm3925_vm14 = vcmp.eq.s32.totalorder %v3920_v56, 2  ;;  %v1448_v31 = vsel %vm1446_vm12, %v1433_v58, %v1447_v8 }
 0x1f5   : > { %v3775_v14 = vsel %vm1287_vm13, nan, %v3774_v36  ;;  %v3924_v12 = vsel %vm3922_vm10, %v1433_v58, %v1447_v8  ;;  %v3927_v19 = vsel %vm3925_vm14, %v1450_v13, %v1441_v53  ;;  %v1452_v11 = vsel %vm1445_vm8, %v1448_v31, %v1451_v29 }
 0x1f6   : > { %v3928_v63 = vsel %vm3921_vm1, %v3924_v12, %v3927_v19  ;;  %v7556_v1 = vadd.s32 4294967169, %v3008_v48  ;;  %v1568_v0 = vsub.s32 4294967266, %v1563_v59  ;;  %v2756_v4 = vsel %vm10062_vm2, 1, %v12271_v25 }
 0x1f7   : > { %v3929_v62 = vsel %vm1442_vm4, nan, %v3928_v63  ;;  %v10101_v40 = vsel %vm1442_vm4, nan, %v1452_v11  ;;  %v10103_v22 = vshrl.u32 %v1708_v7, 30  ;;  %v2892_v56 = vsel %vm2882_vm9, %v2889_v52, %v2891_v46 }
 0x1f8   : > { %12455 = vst [vmem:[#allocation38_spill] sm:$0xff] %v10101_v40  ;;  %v10108_v23 = vmul.u32 %v2901_v41, %v9915_v43  ;;  %v7995_v58 = vpack.i.bf16 %v3929_v62, %v3775_v14  ;;  %v1564_v51 = vsub.s32 32, %v1563_v59  ;;  %v10113_v50 = vsel %vm2882_vm9, %v2885_v39, %v2887_v42 }
 0x1f9   : > { %12457 = vst [vmem:[#allocation41_spill] sm:$0xff] %v10113_v50  ;;  %v2899_v17 = vshrl.u32 %v9897_v60, 16  ;;  %v2900_v2 = vand.u32 65535, %v10074_v34  ;;  %v12458_v30 = vshll.u32 %v9878_v26, 16  ;;  %v3014_v52 = vadd.s32 1, %v7556_v1 }
 0x1fa   : > { %12456 = vst [vmem:[#allocation48_spill] sm:$0xff] %v10108_v23  ;;  %7996 = vrot.lane.b32.xlu1 %v7995_v58, %s8167_s17  ;;  %v1548_v46 = vadd.s32 %v9976_v10, %v9963_v55  ;;  %v1569_v15 = vadd.s32 127, %v1568_v0  ;;  %v10126_v45 = vadd.s32 %v2756_v4, %v9909_v9  ;;  %v2922_v39 = vand.u32 65535, %v2892_v56 }
 0x1fb   : > { %v10120_v54 = vadd.s32 %v12458_v30, %v9902_v38  ;;  %v1578_v42 = vsub.s32 4, %v10016_v61  ;;  %v1710_v34 = vshll.u32 %v10103_v22, 30  ;;  %v2906_v53 = vshll.u32 %v10108_v23, 16 }
 0x1fc   : > { %v2923_v13 = vshrl.u32 %v2892_v56, 16  ;;  %v1566_v16 = vshrl.u32 %v1548_v46, %v1564_v51  ;;  %v2902_v36 = vmul.u32 %v2900_v2, %v9915_v43  ;;  %v10134_v55 = vmul.u32 %v2900_v2, %v2899_v17 }
 0x1fd   : > { %v10136_v10 = vmul.u32 %v2901_v41, %v2899_v17  ;;  %vm1456_vm13 = vcmp.lt.s32.totalorder %v12417_v35, 0  ;;  %v12216_v9 = vand.u32 2147483647, %v10053_v37  ;;  %vm3015_vm9 = vcmp.gt.s32.totalorder %v3014_v52, 0  ;;  %v12461_v41 = vld [vmem:[#allocation18_spill] sm:$0xff] }
 0x1fe   : > { %12459 = vst [vmem:[#allocation39_spill] sm:$0xff] %v10134_v55  ;;  %v1565_v48 = vshll.u32 %v10038_v18, %v1563_v59  ;;  %v1570_v8 = vshll.u32 %v1569_v15, 23  ;;  %v10142_v29 = vmul.u32 %v2922_v39, %v9915_v43  ;;  %v1579_v7 = vsel %vm1456_vm13, %v1578_v42, %v10016_v61  ;;  %v12471_v42 = vld [vmem:[#allocation47_spill] sm:$0xff] }
 0x1ff   : > { %v10148_v14 = vsub.s32 %v10083_v49, %v1710_v34  ;;  %v12217_v12 = vand.u32 2147483647, %v12461_v41  ;;  %vm2910_vm7 = vc.u32 %v2902_v36, %v2906_v53  ;;  %v10152_v19 = vmul.u32 %v2923_v13, %v9915_v43  ;;  %v12468_v49 = vld [vmem:[#allocation5_spill] sm:$0xff] }
 0x200   : > { %12460 = vst [vmem:[#allocation42_spill] sm:$0xff] %v10142_v29  ;;  %v10154_v31 = vmul.u32 %v2922_v39, %v2899_v17  ;;  %v1567_v18 = vor.u32 %v1566_v16, %v1565_v48  ;;  %v10156_v59 = vmul.u32 %v2923_v13, %v2899_v17  ;;  %v3016_v63 = vsel %vm3015_vm9, %v3014_v52, 0  ;;  %v12470_v39 = vld [vmem:[#allocation40_spill] sm:$0xff] }
 0x201   : > { %12462 = vst [vmem:[#allocation43_spill] sm:$0xff] %v10152_v19  ;;  %v12465_v11 = vand.u32 2147483647, %v12417_v35  ;;  %v1571_v61 = vor.u32 4788187, %v1570_v8  ;;  %vm1611_vm2 = vcmp.lt.s32.totalorder %v12468_v49, 0  ;;  %v10166_v4 = vadd.s32 %v2906_v53, %v2902_v36  ;;  %v702_v53 = vpop.permute.xlu2 %701 }
 0x202   : > { %12463 = vst [vmem:[#allocation49_spill] sm:$0xff] %v10154_v31  ;;  %v3011_v43 = vand.u32 8388607, %v12216_v9  ;;  %v10175_v56 = vsel %vm2910_vm7, 1, %v12271_v25  ;;  %v10178_v58 = vmul.f32 %v8337_v28, %v621_v47  ;;  %vm1712_vm3 = vcmp.lt.s32.totalorder %v10148_v14, 0 }
 0x203   : > { %12464 = vst [vmem:[#allocation37_spill] sm:$0xff] %v10156_v59  ;;  %vm10160_vm0 = vcmp.le.f32.partialorder %v12465_v11, 0.7853982  ;;  %v10183_v51 = vand.u32 8388607, %v12217_v12  ;;  %v3018_v17 = vand.u32 31, %v3016_v63  ;;  %v1574_v30 = vcvt.s32.f32 %v1567_v18 }
 0x204   : > { %12469 = vst [vmem:[#allocation32_spill] sm:$0xff] %v10166_v4  ;;  %v10172_v62 = vsel %vm10160_vm0, 0, %v1579_v7  ;;  %v1572_v2 = vand.u32 2147483647, %v1571_v61  ;;  %v1713_v52 = vsub.s32 0, %v10148_v14  ;;  %v1703_v15 = vadd.s32 %v10042_v3, %v10033_v5 }
 0x205   : > { %v1598_v46 = vadd.s32 3, %v10172_v62  ;;  %v10191_v28 = vshll.u32 %v12263_v6, %v12470_v39  ;;  %v1785_v34 = vshrl.u32 %v12281_v33, %v12471_v42  ;;  %v3012_v13 = vor.u32 8388608, %v3011_v43 }
 0x206   : > { %v1575_v47 = vmul.f32 %v1574_v30, %v1572_v2  ;;  %v1714_v16 = vsel %vm1712_vm3, %v1713_v52, %v10148_v14  ;;  %v1788_v36 = vshrl.u32 %v12282_v21, %v12471_v42  ;;  %v1733_v8 = vsub.s32 4, %v10103_v22 }
 0x207   : > { %v1715_v48 = vclz %v1714_v16  ;;  %v10201_v5 = vshrl.u32 %v12269_v57, %v12471_v42  ;;  %v1784_v3 = vshll.u32 %v12269_v57, %v12470_v39  ;;  %v3019_v7 = vsub.s32 32, %v3018_v17 }
 0x208   : > { %v1576_v18 = vxor.u32 2147483648, %v1575_v47  ;;  %v1787_v61 = vshll.u32 %v12281_v33, %v12470_v39  ;;  %v10209_v43 = vmul.f32 %v8335_v27, %v702_v53  ;;  %v10211_v2 = vand.u32 3, %v1598_v46 }
 0x209   : > { %v7530_v30 = vadd.s32 4294967294, %v1715_v48  ;;  %v10213_v52 = vor.u32 %v1785_v34, %v1784_v3  ;;  %v10215_v16 = vshrl.u32 %v3016_v63, 5  ;;  %v10217_v9 = vshll.u32 %v3012_v13, 8 }
 0x20a   : > { %v1577_v38 = vsel %vm1456_vm13, %v1576_v18, %v1575_v47  ;;  %v10221_v0 = vor.u32 %v1788_v36, %v1787_v61  ;;  %v3024_v44 = vshll.u32 %v12269_v57, %v3018_v17  ;;  %v10232_v63 = vsel %vm1611_vm2, %v1733_v8, %v10103_v22 }
 0x20b   : > { %12472 = vst [vmem:[#allocation35_spill] sm:$0xff] %v10217_v9  ;;  %v10227_v27 = vsel %vm10160_vm0, %v12417_v35, %v1577_v38  ;;  %vm7531_vm4 = vcmp.lt.s32.totalorder %v7530_v30, 0  ;;  %v3027_v46 = vshll.u32 %v12281_v33, %v3018_v17  ;;  %v3034_v39 = vshrl.u32 %v12276_v20, %v3019_v7 }
 0x20c   : > { %v1582_v34 = vmul.f32 %v10227_v27, %v10227_v27  ;;  %v1718_v53 = vsel %vm7531_vm4, 0, %v7530_v30  ;;  %v3025_v13 = vshrl.u32 %v12281_v33, %v3019_v7  ;;  %v3028_v1 = vshrl.u32 %v12282_v21, %v3019_v7 }
 0x20d   : > { %v1719_v38 = vsub.s32 32, %v1718_v53  ;;  %v1723_v47 = vsub.s32 4294967266, %v1718_v53  ;;  %v12473_v36 = vmov 920167782   ;;  %v3022_v18 = vshrl.u32 %v12269_v57, %v3019_v7 }
 0x20e   : > { %v3031_v48 = vshrl.u32 %v12473_v36, %v3019_v7  ;;  %v3033_v3 = vshll.u32 %v12473_v36, %v3018_v17  ;;  %v1583_v22 = vmul.f32 -0.001358992, %v1582_v34  ;;  %v1590_v8 = vmul.f32 -0.00019511016, %v1582_v34 }
 0x20f   : > { %v1720_v61 = vshll.u32 %v10148_v14, %v1718_v53  ;;  %v1721_v12 = vshrl.u32 %v1703_v15, %v1719_v38  ;;  %v1724_v11 = vadd.s32 127, %v1723_v47  ;;  %v3030_v30 = vshll.u32 %v12282_v21, %v3018_v17  ;;  %v12477_v38 = vld [vmem:[#allocation45_spill] sm:$0xff] }
 0x210   : > { %v3035_v37 = vor.u32 %v3034_v39, %v3033_v3  ;;  %v1584_v40 = vadd.f32 0.041655596, %v1583_v22  ;;  %v1591_v50 = vadd.f32 0.008332121, %v1590_v8  ;;  %v3021_v60 = vshll.u32 %v12263_v6, %v3018_v17  ;;  %v12479_v3 = vld [vmem:[#allocation50_spill] sm:$0xff] }
 0x211   : > { %v3026_v23 = vor.u32 %v3025_v13, %v3024_v44  ;;  %v1722_v59 = vor.u32 %v1721_v12, %v1720_v61  ;;  %v1725_v31 = vshll.u32 %v1724_v11, 23  ;;  %v3029_v29 = vor.u32 %v3028_v1, %v3027_v46  ;;  %v8136_v46 = vld [vmem:[%s8274_s28 + $0x28] sm:$0xff] }
 0x212   : > { %v3032_v4 = vor.u32 %v3031_v48, %v3030_v30  ;;  %v1585_v55 = vmul.f32 %v1584_v40, %v1582_v34  ;;  %v1592_v19 = vmul.f32 %v1591_v50, %v1582_v34  ;;  %v3020_v14 = vshrl.u32 %v12263_v6, %v3019_v7  ;;  %v8135_v50 = vld [vmem:[%s8274_s28 + $0x20] sm:$0xff]  ;;  %v12478_v48 = vld [vmem:[#allocation53_spill] sm:$0xff] }
 0x213   : > { %v3023_v15 = vor.u32 %v3022_v18, %v3021_v60  ;;  %vm3039_vm15 = vcmp.lt.s32.totalorder %v10215_v16, 4  ;;  %vm1604_vm6 = vcmp.eq.s32.totalorder %v10211_v2, 2  ;;  %v12474_v39 = vand.u32 2147483647, %v12468_v49 }
 0x214   : > { %v1726_v44 = vor.u32 4788187, %v1725_v31  ;;  %v3049_v12 = vsel %vm3039_vm15, %v3035_v37, 1326507024  ;;  %v1586_v11 = vadd.f32 -0.4999988, %v1585_v55  ;;  %v8010_v7 = vpack.i.bf16 %v8136_v46, %v8135_v50 }
 0x215   : > { %vm10251_vm5 = vcmp.le.f32.partialorder %v12474_v39, 0.7853982  ;;  %v1593_v40 = vadd.f32 -0.16666654, %v1592_v19  ;;  %vm3036_vm11 = vcmp.lt.s32.totalorder %v10215_v16, 1  ;;  %vm3038_vm1 = vcmp.lt.s32.totalorder %v10215_v16, 3 }
 0x216   : > { %vm1601_vm8 = vcmp.eq.s32.totalorder %v10211_v2, 0  ;;  %v1727_v60 = vand.u32 2147483647, %v1726_v44  ;;  %v1729_v53 = vcvt.s32.f32 %v1722_v59  ;;  %v3045_v13 = vsel %vm3039_vm15, %v3032_v4, 920167782  ;;  %8011 = vrot.lane.b32.xlu1 %v8010_v7, %s8166_s0 }
 0x217   : > { %v3048_v31 = vsel %vm3036_vm11, %v3026_v23, %v3029_v29  ;;  %v1587_v37 = vmul.f32 %v1586_v11, %v1582_v34  ;;  %v1594_v55 = vmul.f32 %v1593_v40, %v1582_v34  ;;  %vm1600_vm12 = vcmp.lt.s32.totalorder %v10211_v2, 2  ;;  %v8137_v11 = vld [vmem:[%s8274_s28 + $0x10] sm:$0xff]  ;;  %v8138_v40 = vld [vmem:[%s8274_s28 + $0x18] sm:$0xff] }
 0x218   : > { %v3050_v19 = vsel %vm3038_vm1, %v3032_v4, %v3049_v12  ;;  %vm1597_vm10 = vweird.f32 %v12417_v35  ;;  %v1730_v1 = vmul.f32 %v1729_v53, %v1727_v60  ;;  %vm1796_vm14 = vcmp.lt.s32.totalorder %v12477_v38, 1 }
 0x219   : > { %vm1798_vm13 = vcmp.lt.s32.totalorder %v12477_v38, 3  ;;  %v10273_v59 = vadd.f32 1.0, %v1587_v37  ;;  %v1595_v47 = vadd.f32 1.0, %v1594_v55  ;;  %v1808_v34 = vsel %vm1796_vm14, %v10213_v52, %v10221_v0 }
 0x21a   : > { %v1810_v4 = vsel %vm1798_vm13, %v12479_v3, %v12478_v48  ;;  %vm3037_vm9 = vcmp.lt.s32.totalorder %v10215_v16, 2  ;;  %v3041_v22 = vsel %vm3039_vm15, %v3029_v29, 2102212464  ;;  %v3044_v8 = vsel %vm3036_vm11, %v3023_v15, %v3026_v23 }
 0x21b   : > { %v1731_v18 = vxor.u32 2147483648, %v1730_v1  ;;  %v3046_v61 = vsel %vm3038_vm1, %v3029_v29, %v3045_v13  ;;  %v10291_v30 = vmul.f32 %v1595_v47, %v10227_v27  ;;  %v1605_v39 = vxor.u32 2147483648, %v10273_v59 }
 0x21c   : > { %vm1797_vm7 = vcmp.lt.s32.totalorder %v12477_v38, 2  ;;  %v10297_v44 = vsel %vm3037_vm9, %v3048_v31, %v3050_v19  ;;  %v8000_v50 = vpack.i.bf16 %v8138_v40, %v8137_v11  ;;  %v12480_v60 = vor.u32 8388608, %v10183_v51  ;;  %v799_v19 = vpop.permute.xlu1 %798 }
 0x21d   : > { %v1732_v12 = vsel %vm1611_vm2, %v1731_v18, %v1730_v1  ;;  %v10305_v29 = vsel %vm1797_vm7, %v1808_v34, %v1810_v4  ;;  %v1602_v27 = vxor.u32 2147483648, %v10291_v30  ;;  %v1606_v46 = vsel %vm1604_vm6, %v1605_v39, %v10291_v30 }
 0x21e   : > { %v1735_v7 = vsel %vm10251_vm5, %v12468_v49, %v1732_v12  ;;  %v10318_v53 = vshll.u32 %v12480_v60, 8  ;;  %v3040_v13 = vsel %vm3036_vm11, %v3020_v14, %v3023_v15  ;;  %v3042_v31 = vsel %vm3038_vm1, %v3026_v23, %v3041_v22  ;;  %8001 = vrot.lane.b32.xlu2 %v8000_v50, %s8166_s0 }
 0x21f   : > { %v10325_v37 = vand.u32 65535, %v10217_v9  ;;  %v1737_v55 = vmul.f32 %v1735_v7, %v1735_v7  ;;  %v10330_v1 = vsel %vm3037_vm9, %v3044_v8, %v3046_v61  ;;  %v12228_v51 = vshrl.u32 %v10297_v44, 16 }
 0x220   : > { %v1603_v14 = vsel %vm1601_vm8, %v10273_v59, %v1602_v27  ;;  %v1816_v23 = vshrl.u32 %v10305_v29, 16  ;;  %v1736_v47 = vsel %vm10251_vm5, 0, %v10232_v63  ;;  %v12229_v3 = vand.u32 65535, %v10297_v44 }
 0x221   : > { %v1607_v15 = vsel %vm1600_vm12, %v1603_v14, %v1606_v46  ;;  %v1738_v34 = vmul.f32 -0.001358992, %v1737_v55  ;;  %v1745_v48 = vmul.f32 -0.00019511016, %v1737_v55  ;;  %v817_v22 = vmul.f32 %v8344_v32, %v799_v19 }
 0x222   : > { %v10347_v4 = vsel %vm1597_vm10, nan, %v1607_v15  ;;  %v10351_v8 = vand.u32 65535, %v10318_v53  ;;  %v4074_v61 = vand.u32 3, %v10172_v62  ;;  %v10356_v63 = vor.u32 %v10201_v5, %v10191_v28 }
 0x223   : > { %12481 = vst [vmem:[#allocation18_spill] sm:$0xff] %v10347_v4  ;;  %v1739_v18 = vadd.f32 0.041655596, %v1738_v34  ;;  %v1746_v2 = vadd.f32 0.008332121, %v1745_v48  ;;  %v736_v17 = vadd.f32 %v10209_v43, %v10178_v58  ;;  %v10363_v12 = vmul.u32 %v12228_v51, %v10325_v37  ;;  %v12520_v4 = vld [vmem:[#allocation54_spill] sm:$0xff] }
 0x224   : > { %v1753_v32 = vadd.s32 3, %v1736_v47  ;;  %v10368_v11 = vmul.u32 %v1816_v23, %v10351_v8  ;;  %v10372_v62 = vsel %vm3037_vm9, %v3040_v13, %v3042_v31  ;;  %v3077_v28 = vand.u32 65535, %v10330_v1 }
 0x225   : > { %12482 = vst [vmem:[#allocation5_spill] sm:$0xff] %v10363_v12  ;;  %v1740_v5 = vmul.f32 %v1739_v18, %v1737_v55  ;;  %v1747_v40 = vmul.f32 %v1746_v2, %v1737_v55  ;;  %v10378_v58 = vmul.u32 %v12229_v3, %v10325_v37  ;;  %v10381_v50 = vadd.f32 %v817_v22, %v736_v17  ;;  %v12485_v22 = vld [vmem:[#allocation51_spill] sm:$0xff] }
 0x226   : > { %12483 = vst [vmem:[#allocation40_spill] sm:$0xff] %v10372_v62  ;;  %v1815_v46 = vand.u32 65535, %v10305_v29  ;;  %vm4075_vm0 = vcmp.lt.s32.totalorder %v4074_v61, 2  ;;  %v4228_v16 = vand.u32 3, %v1736_v47  ;;  %v3061_v13 = vshll.u32 %v10363_v12, 16  ;;  %v12521_v62 = vld [vmem:[#allocation77_spill] sm:$0xff] }
 0x227   : > { %12484 = vst [vmem:[#allocation47_spill] sm:$0xff] %v10381_v50  ;;  %v1741_v60 = vadd.f32 -0.4999988, %v1740_v5  ;;  %v1748_v19 = vadd.f32 -0.16666654, %v1747_v40  ;;  %v1754_v31 = vand.u32 3, %v1753_v32  ;;  %v1804_v14 = vsel %vm1796_vm14, %v10356_v63, %v10213_v52 }
 0x228   : > { %v1821_v15 = vshll.u32 %v10368_v11, 16  ;;  %v1806_v18 = vsel %vm1798_vm13, %v10221_v0, %v12485_v22  ;;  %v10395_v2 = vshrl.u32 %v10318_v53, 16  ;;  %vm1752_vm2 = vweird.f32 %v12468_v49 }
 0x229   : > { %v1742_v34 = vmul.f32 %v1741_v60, %v1737_v55  ;;  %v1749_v48 = vmul.f32 %v1748_v19, %v1737_v55  ;;  %vm4076_vm3 = vcmp.eq.s32.totalorder %v4074_v61, 0  ;;  %vm4079_vm4 = vcmp.eq.s32.totalorder %v4074_v61, 2 }
 0x22a   : > { %v3162_v47 = vand.u32 2139095040, %v10381_v50  ;;  %v1817_v17 = vmul.u32 %v1815_v46, %v10351_v8  ;;  %vm4229_vm15 = vcmp.lt.s32.totalorder %v4228_v16, 2  ;;  %v10401_v55 = vmul.u32 %v1815_v46, %v10395_v2 }
 0x22b   : > { %v1743_v32 = vadd.f32 1.0, %v1742_v34  ;;  %v1750_v5 = vadd.f32 1.0, %v1749_v48  ;;  %vm1755_vm6 = vcmp.lt.s32.totalorder %v1754_v31, 2  ;;  %vm4230_vm5 = vcmp.eq.s32.totalorder %v4228_v16, 0 }
 0x22c   : > { %v1807_v40 = vsel %vm1797_vm7, %v1804_v14, %v1806_v18  ;;  %vm1825_vm11 = vc.u32 %v1817_v17, %v1821_v15  ;;  %v4078_v22 = vsel %vm4076_vm3, %v10273_v59, %v1602_v27  ;;  %v1827_v51 = vadd.s32 %v1821_v15, %v1817_v17 }
 0x22d   : > { %v1751_v60 = vmul.f32 %v1750_v5, %v1735_v7  ;;  %v1760_v19 = vxor.u32 2147483648, %v1743_v32  ;;  %vm1756_vm1 = vcmp.eq.s32.totalorder %v1754_v31, 0  ;;  %vm1759_vm8 = vcmp.eq.s32.totalorder %v1754_v31, 2 }
 0x22e   : > { %vm4233_vm12 = vcmp.eq.s32.totalorder %v4228_v16, 2  ;;  %v3163_v34 = vshrl.u32 %v3162_v47, 23  ;;  %v4081_v46 = vsel %vm4079_vm4, %v1605_v39, %v10291_v30  ;;  %v1823_v14 = vshll.u32 %v10401_v55, 16 }
 0x22f   : > { %v1757_v48 = vxor.u32 2147483648, %v1751_v60  ;;  %v1761_v3 = vsel %vm1759_vm8, %v1760_v19, %v1751_v60  ;;  %v4082_v7 = vsel %vm4075_vm0, %v4078_v22, %v4081_v46  ;;  %v1820_v27 = vmul.u32 %v1816_v23, %v10395_v2 }
 0x230   : > { %v1826_v15 = vsel %vm1825_vm11, 1, %v12271_v25  ;;  %v1838_v18 = vshrl.u32 %v1807_v40, 16  ;;  %v4235_v17 = vsel %vm4233_vm12, %v1760_v19, %v1751_v60  ;;  %vm1829_vm9 = vc.u32 %v1827_v51, %v1823_v14 }
 0x231   : > { %v4232_v47 = vsel %vm4230_vm5, %v1743_v32, %v1757_v48  ;;  %v1758_v5 = vsel %vm1756_vm1, %v1743_v32, %v1757_v48  ;;  %v7559_v39 = vadd.s32 4294967169, %v3163_v34  ;;  %v1837_v43 = vand.u32 65535, %v1807_v40 }
 0x232   : > { %v4236_v59 = vsel %vm4229_vm15, %v4232_v47, %v4235_v17  ;;  %v1762_v30 = vsel %vm1755_vm6, %v1758_v5, %v1761_v3  ;;  %v4083_v61 = vsel %vm1597_vm10, nan, %v4082_v7  ;;  %v1828_v22 = vadd.s32 %v1826_v15, %v1820_v27  ;;  %v8139_v17 = vld [vmem:[%s8274_s28 + $0x30] sm:$0xff]  ;;  %v8140_v5 = vld [vmem:[%s8274_s28 + $0x38] sm:$0xff] }
 0x233   : > { %v4237_v29 = vsel %vm1752_vm2, nan, %v4236_v59  ;;  %v10427_v23 = vsel %vm1752_vm2, nan, %v1762_v30  ;;  %v10431_v51 = vadd.s32 %v10175_v56, %v10136_v10  ;;  %v1830_v3 = vsel %vm1829_vm9, 1, %v12271_v25 }
 0x234   : > { %12486 = vst [vmem:[#allocation45_spill] sm:$0xff] %v10427_v23  ;;  %v8005_v16 = vpack.i.bf16 %v4237_v29, %v4083_v61  ;;  %v1840_v31 = vmul.u32 %v1838_v18, %v10351_v8  ;;  %v10436_v35 = vshrl.u32 %v10217_v9, 16  ;;  %vm3065_vm10 = vc.u32 %v10378_v58, %v3061_v13 }
 0x235   : > { %v12230_v49 = vand.u32 2147483647, %v10381_v50  ;;  %v1780_v32 = vshrl.u32 %v12263_v6, %v12471_v42  ;;  %v10447_v10 = vmul.u32 %v3077_v28, %v10325_v37  ;;  %v12488_v56 = vshrl.u32 %v10330_v1, 16 }
 0x236   : > { %8006 = vrot.lane.b32.xlu0 %v8005_v16, %s8167_s17  ;;  %v1841_v19 = vmul.u32 %v1837_v43, %v10395_v2  ;;  %v10461_v42 = vmul.u32 %v3077_v28, %v10436_v35  ;;  %v3169_v46 = vadd.s32 1, %v7559_v39  ;;  %v12492_v14 = vand.u32 65535, %v10297_v44 }
 0x237   : > { %12487 = vst [vmem:[#allocation53_spill] sm:$0xff] %v10447_v10  ;;  %v10452_v40 = vmul.u32 %v12488_v56, %v10325_v37  ;;  %v12490_v34 = vmov %v12488_v56  ;;  %v1832_v37 = vadd.s32 %v1830_v3, %v1828_v22  ;;  %v3066_v27 = vsel %vm3065_vm10, 1, %v12271_v25  ;;  %v12494_v3 = vld [vmem:[#allocation68_spill] sm:$0xff]  ;;  %v12528_v10 = vld [vmem:[#allocation71_spill] sm:$0xff] }
 0x238   : > { %12489 = vst [vmem:[#allocation50_spill] sm:$0xff] %v10461_v42  ;;  %v10466_v48 = vmul.u32 %v12490_v34, %v10436_v35  ;;  %v10471_v7 = vmul.u32 %v12492_v14, %v10436_v35  ;;  %v1839_v15 = vmul.u32 %v1837_v43, %v10351_v8  ;;  %v1843_v47 = vshll.u32 %v1840_v31, 16  ;;  %v12496_v34 = vld [vmem:[#allocation74_spill] sm:$0xff] }
 0x239   : > { %v3166_v28 = vand.u32 8388607, %v12230_v49  ;;  %v8020_v1 = vpack.i.bf16 %v8140_v5, %v8139_v17  ;;  %vm12493_vm0 = vcmp.lt.s32.totalorder %v12477_v38, 4  ;;  %v1822_v30 = vshrl.u32 %v10368_v11, 16  ;;  %v12497_v14 = vld [vmem:[#allocation70_spill] sm:$0xff]  ;;  %v12499_v5 = vld [vmem:[#allocation75_spill] sm:$0xff] }
 0x23a   : > { %12491 = vst [vmem:[#allocation51_spill] sm:$0xff] %v10466_v48  ;;  %v1801_v59 = vsel %vm12493_vm0, %v10221_v0, 2102212464  ;;  %v1842_v39 = vmul.u32 %v1838_v18, %v10395_v2  ;;  %v1845_v61 = vshll.u32 %v1841_v19, 16  ;;  %vm1847_vm2 = vc.u32 %v1839_v15, %v1843_v47  ;;  %v12498_v17 = vld [vmem:[#allocation62_spill] sm:$0xff]  ;;  %v12527_v48 = vld [vmem:[#allocation61_spill] sm:$0xff] }
 0x23b   : > { %v1849_v29 = vadd.s32 %v1843_v47, %v1839_v15  ;;  %vm3170_vm3 = vcmp.gt.s32.totalorder %v3169_v46, 0  ;;  %v1800_v8 = vsel %vm1796_vm14, %v1780_v32, %v10356_v63  ;;  %v1833_v43 = vadd.s32 %v1832_v37, %v1822_v30 }
 0x23c   : > { %v1848_v22 = vsel %vm1847_vm2, 1, %v12271_v25  ;;  %v1802_v16 = vsel %vm1798_vm13, %v10213_v52, %v1801_v59  ;;  %v1824_v0 = vshrl.u32 %v10401_v55, 16  ;;  %v3167_v2 = vor.u32 8388608, %v3166_v28 }
 0x23d   : > { %v1850_v11 = vadd.s32 %v1848_v22, %v1842_v39  ;;  %vm1851_vm4 = vc.u32 %v1849_v29, %v1845_v61  ;;  %v12495_v56 = vshll.u32 %v12494_v3, 16  ;;  %v1998_v63 = vshll.u32 %v12497_v14, 16  ;;  %v12500_v39 = vld [vmem:[#allocation72_spill] sm:$0xff] }
 0x23e   : > { %v1852_v18 = vsel %vm1851_vm4, 1, %v12271_v25  ;;  %v3171_v32 = vsel %vm3170_vm3, %v3169_v46, 0  ;;  %8021 = vrot.lane.b32.xlu0 %v8020_v1, %s8166_s0  ;;  %v1844_v37 = vshrl.u32 %v1840_v31, 16  ;;  %v10499_v47 = vadd.s32 %v1833_v43, %v1824_v0 }
 0x23f   : > { %vm1984_vm15 = vc.u32 %v12496_v34, %v12495_v56  ;;  %v1854_v15 = vadd.s32 %v1852_v18, %v1850_v11  ;;  %v1846_v55 = vshrl.u32 %v1841_v19, 16  ;;  %v1977_v28 = vshrl.u32 %v12498_v17, 16  ;;  %v12501_v56 = vld [vmem:[#allocation69_spill] sm:$0xff] }
 0x240   : > { %v1985_v52 = vsel %vm1984_vm15, 1, %v12271_v25  ;;  %v2000_v22 = vshll.u32 %v12500_v39, 16  ;;  %vm2002_vm14 = vc.u32 %v12501_v56, %v1998_v63  ;;  %v2004_v46 = vadd.s32 %v1998_v63, %v12501_v56  ;;  %v12503_v18 = vld [vmem:[#allocation73_spill] sm:$0xff] }
 0x241   : > { %v1987_v59 = vadd.s32 %v1985_v52, %v12499_v5  ;;  %v1855_v30 = vadd.s32 %v1854_v15, %v1844_v37  ;;  %v1803_v31 = vsel %vm1797_vm7, %v1800_v8, %v1802_v16  ;;  %v10508_v1 = vadd.s32 %v1849_v29, %v1845_v61 }
 0x242   : > { %v2003_v43 = vsel %vm2002_vm14, 1, %v12271_v25  ;;  %v10511_v19 = vshll.u32 %v3167_v2, 8  ;;  %vm2006_vm13 = vc.u32 %v2004_v46, %v2000_v22  ;;  %v3173_v37 = vand.u32 31, %v3171_v32 }
 0x243   : > { %v1988_v11 = vadd.s32 %v1987_v59, %v1977_v28  ;;  %v1856_v0 = vadd.s32 %v1855_v30, %v1846_v55  ;;  %v2005_v34 = vadd.s32 %v2003_v43, %v12503_v18  ;;  %vm1859_vm6 = vc.u32 %v10499_v47, %v10508_v1 }
 0x244   : > { %12502 = vst [vmem:[#allocation68_spill] sm:$0xff] %v10511_v19  ;;  %v1979_v63 = vshrl.u32 %v12494_v3, 16  ;;  %v2007_v38 = vsel %vm2006_vm13, 1, %v12271_v25  ;;  %v12504_v61 = vshrl.u32 %v10297_v44, 16  ;;  %v1999_v16 = vshrl.u32 %v12497_v14, 16 }
 0x245   : > { %v1860_v8 = vadd.s32 1, %v1856_v0  ;;  %v2009_v2 = vadd.s32 %v2007_v38, %v2005_v34  ;;  %v10526_v52 = vadd.s32 %v3061_v13, %v10378_v58  ;;  %v1857_v55 = vmul.u32 %v10318_v53, %v1803_v31 }
 0x246   : > { %v3060_v29 = vmul.u32 %v12504_v61, %v10436_v35  ;;  %v10529_v3 = vadd.s32 %v1988_v11, %v1979_v63  ;;  %v2001_v44 = vshrl.u32 %v12500_v39, 16  ;;  %v10534_v5 = vsub.s32 32, %v3173_v37  ;;  %v12507_v11 = vld [vmem:[#allocation55_spill] sm:$0xff]  ;;  %v12510_v61 = vld [vmem:[#allocation80_spill] sm:$0xff] }
 0x247   : > { %v1861_v28 = vsel %vm1859_vm6, %v1860_v8, %v1856_v0  ;;  %v2010_v35 = vadd.s32 %v2009_v2, %v1999_v16  ;;  %v10537_v14 = vand.u32 65535, %v10511_v19  ;;  %v10539_v30 = vadd.s32 %v2004_v46, %v2000_v22  ;;  %v12509_v0 = vld [vmem:[#allocation66_spill] sm:$0xff]  ;;  %v12511_v2 = vld [vmem:[#allocation60_spill] sm:$0xff] }
 0x248   : > { %v10531_v17 = vadd.s32 %v3066_v27, %v3060_v29  ;;  %v1862_v59 = vadd.s32 %v1861_v28, %v1857_v55  ;;  %v10541_v58 = vshrl.u32 %v3171_v32, 5  ;;  %v10544_v53 = vshrl.u32 %v10511_v19, 16  ;;  %v12506_v27 = vld [vmem:[#allocation59_spill] sm:$0xff]  ;;  %v12512_v28 = vld [vmem:[#allocation58_spill] sm:$0xff] }
 0x249   : > { %v2011_v13 = vadd.s32 %v2010_v35, %v2001_v44  ;;  %v2308_v56 = vshll.u32 %v12506_v27, 16  ;;  %v10548_v31 = vshll.u32 %v12263_v6, %v3173_v37  ;;  %vm2014_vm7 = vc.u32 %v10529_v3, %v10539_v30  ;;  %v12515_v35 = vld [vmem:[#allocation56_spill] sm:$0xff] }
 0x24a   : > { %12505 = vst [vmem:[#allocation74_spill] sm:$0xff] %v10531_v17  ;;  %v1863_v39 = vadd.s32 536870912, %v1862_v59  ;;  %v12508_v43 = vshll.u32 %v12507_v11, 16  ;;  %v10556_v32 = vshll.u32 %v12269_v57, %v3173_v37  ;;  %v10559_v22 = vshll.u32 %v12281_v33, %v3173_v37 }
 0x24b   : > { %v10562_v46 = vshll.u32 %v12282_v21, %v3173_v37  ;;  %v2015_v18 = vadd.s32 1, %v2011_v13  ;;  %v10566_v34 = vshrl.u32 %v12263_v6, %v10534_v5  ;;  %v10569_v63 = vshll.u32 %v12473_v36, %v3173_v37 }
 0x24c   : > { %vm2294_vm5 = vc.u32 %v12509_v0, %v12508_v43  ;;  %v10571_v38 = vshrl.u32 %v1863_v39, 30  ;;  %v2153_v29 = vshll.u32 %v12510_v61, 16  ;;  %v2310_v55 = vshll.u32 %v12511_v2, 16  ;;  %v12516_v43 = vld [vmem:[#allocation63_spill] sm:$0xff] }
 0x24d   : > { %v2016_v8 = vsel %vm2014_vm7, %v2015_v18, %v2011_v13  ;;  %v2295_v16 = vsel %vm2294_vm5, 1, %v12271_v25  ;;  %vm10577_vm11 = vc.u32 %v12512_v28, %v2308_v56  ;;  %v12517_v37 = vmul.u32 %v12515_v35, %v12516_v43  ;;  %v12518_v39 = vld [vmem:[#allocation79_spill] sm:$0xff]  ;;  %v12519_v18 = vld [vmem:[#allocation81_spill] sm:$0xff] }
 0x24e   : > { %v1865_v6 = vshll.u32 %v10571_v38, 30  ;;  %vm2157_vm1 = vc.u32 %v12518_v39, %v2153_v29  ;;  %v2314_v49 = vadd.s32 %v2308_v56, %v12512_v28  ;;  %v3177_v13 = vshrl.u32 %v12269_v57, %v10534_v5  ;;  %v12523_v35 = vld [vmem:[#allocation83_spill] sm:$0xff] }
 0x24f   : > { %v2017_v0 = vadd.s32 %v2016_v8, %v12517_v37  ;;  %v2155_v60 = vshll.u32 %v12519_v18, 16  ;;  %v2159_v15 = vadd.s32 %v2153_v29, %v12518_v39  ;;  %v2287_v23 = vshrl.u32 %v12520_v4, 16  ;;  %v12524_v28 = vld [vmem:[#allocation67_spill] sm:$0xff]  ;;  %v12526_v37 = vld [vmem:[#allocation82_spill] sm:$0xff] }
 0x250   : > { %v10592_v50 = vsub.s32 %v1862_v59, %v1865_v6  ;;  %v12522_v9 = vshll.u32 %v12521_v62, 16  ;;  %v2158_v8 = vsel %vm2157_vm1, 1, %v12271_v25  ;;  %v2297_v57 = vadd.s32 %v2295_v16, %v12524_v28  ;;  %v12525_v6 = vld [vmem:[#allocation8_spill] sm:$0xff] }
 0x251   : > { %v2018_v19 = vadd.s32 536870912, %v2017_v0  ;;  %vm2161_vm12 = vc.u32 %v2159_v15, %v2155_v60  ;;  %v2313_v29 = vsel %vm10577_vm11, 1, %v12271_v25  ;;  %vm2316_vm10 = vc.u32 %v2314_v49, %v2310_v55 }
 0x252   : > { %vm2139_vm8 = vc.u32 %v12523_v35, %v12522_v9  ;;  %vm1867_vm9 = vcmp.lt.s32.totalorder %v10592_v50, 0  ;;  %v1868_v4 = vsub.s32 0, %v10592_v50  ;;  %v3180_v9 = vshrl.u32 %v12281_v33, %v10534_v5 }
 0x253   : > { %v2140_v56 = vsel %vm2139_vm8, 1, %v12271_v25  ;;  %v10605_v59 = vshrl.u32 %v2018_v19, 30  ;;  %v2160_v39 = vadd.s32 %v2158_v8, %v12526_v37  ;;  %v2289_v16 = vshrl.u32 %v12507_v11, 16 }
 0x254   : > { %v2142_v43 = vadd.s32 %v2140_v56, %v12525_v6  ;;  %v1869_v35 = vsel %vm1867_vm9, %v1868_v4, %v10592_v50  ;;  %v2162_v28 = vsel %vm2161_vm12, 1, %v12271_v25  ;;  %v2315_v12 = vadd.s32 %v2313_v29, %v12527_v48 }
 0x255   : > { %v2020_v44 = vshll.u32 %v10605_v59, 30  ;;  %v1870_v19 = vclz %v1869_v35  ;;  %v2132_v42 = vshrl.u32 %v12528_v10, 16  ;;  %v2298_v17 = vadd.s32 %v2297_v57, %v2287_v23 }
 0x256   : > { %v2317_v33 = vsel %vm2316_vm10, 1, %v12271_v25  ;;  %v3183_v56 = vshrl.u32 %v12282_v21, %v10534_v5  ;;  %v3186_v11 = vshrl.u32 %v12473_v36, %v10534_v5  ;;  %v1858_v8 = vadd.s32 %v10508_v1, %v10499_v47 }
 0x257   : > { %v10624_v4 = vsub.s32 %v2017_v0, %v2020_v44  ;;  %v7533_v6 = vadd.s32 4294967294, %v1870_v19  ;;  %v2143_v37 = vadd.s32 %v2142_v43, %v2132_v42  ;;  %v2164_v48 = vadd.s32 %v2162_v28, %v2160_v39 }
 0x258   : > { %v2309_v29 = vshrl.u32 %v12506_v27, 16  ;;  %v2154_v10 = vshrl.u32 %v12510_v61, 16  ;;  %v2319_v21 = vadd.s32 %v2317_v33, %v2315_v12  ;;  %v2134_v36 = vshrl.u32 %v12521_v62, 16 }
 0x259   : > { %vm2022_vm0 = vcmp.lt.s32.totalorder %v10624_v4, 0  ;;  %v2023_v23 = vsub.s32 0, %v10624_v4  ;;  %vm7534_vm2 = vcmp.lt.s32.totalorder %v7533_v6, 0  ;;  %v10631_v57 = vadd.s32 %v2298_v17, %v2289_v16 }
 0x25a   : > { %v2311_v47 = vshrl.u32 %v12511_v2, 16  ;;  %v1873_v1 = vsel %vm7534_vm2, 0, %v7533_v6  ;;  %v2156_v0 = vshrl.u32 %v12519_v18, 16  ;;  %v2165_v27 = vadd.s32 %v2164_v48, %v2154_v10 }
 0x25b   : > { %v2024_v42 = vsel %vm2022_vm0, %v2023_v23, %v10624_v4  ;;  %vm1766_vm3 = vcmp.lt.s32.totalorder %v12461_v41, 0  ;;  %v1874_v43 = vsub.s32 32, %v1873_v1  ;;  %v1878_v39 = vsub.s32 4294967266, %v1873_v1 }
 0x25c   : > { %v2025_v35 = vclz %v2024_v42  ;;  %v10637_v61 = vadd.s32 %v2143_v37, %v2134_v36  ;;  %v1875_v12 = vshll.u32 %v10592_v50, %v1873_v1  ;;  %v10640_v62 = vadd.s32 %v2159_v15, %v2155_v60  ;;  %v12533_v36 = vld [vmem:[#allocation64_spill] sm:$0xff] }
 0x25d   : > { %v10642_v17 = vadd.s32 %v2314_v49, %v2310_v55  ;;  %v2320_v2 = vadd.s32 %v2319_v21, %v2309_v29  ;;  %v1876_v16 = vshrl.u32 %v1858_v8, %v1874_v43  ;;  %v1879_v44 = vadd.s32 127, %v1878_v39  ;;  %v12534_v1 = vld [vmem:[#allocation76_spill] sm:$0xff]  ;;  %v12536_v39 = vld [vmem:[#allocation46_spill] sm:$0xff] }
 0x25e   : > { %v7536_v28 = vadd.s32 4294967294, %v2025_v35  ;;  %v2166_v19 = vadd.s32 %v2165_v27, %v2156_v0  ;;  %v10645_v18 = vor.u32 %v3177_v13, %v10548_v31  ;;  %v10648_v33 = vor.u32 %v3180_v9, %v10556_v32  ;;  %v12532_v31 = vld [vmem:[#allocation30_spill] sm:$0xff]  ;;  %v12537_v35 = vld [vmem:[#allocation52_spill] sm:$0xff] }
 0x25f   : > { %v10651_v6 = vor.u32 %v3183_v56, %v10559_v22  ;;  %v10655_v50 = vshrl.u32 %v12276_v20, %v10534_v5  ;;  %v12529_v49 = vand.u32 2147483647, %v12461_v41  ;;  %v1877_v15 = vor.u32 %v1876_v16, %v1875_v12 }
 0x260   : > { %v1880_v55 = vshll.u32 %v1879_v44, 23  ;;  %vm7537_vm15 = vcmp.lt.s32.totalorder %v7536_v28, 0  ;;  %vm2169_vm14 = vc.u32 %v10637_v61, %v10640_v62  ;;  %vm1921_vm13 = vcmp.lt.s32.totalorder %v12532_v31, 0 }
 0x261   : > { %vm10659_vm4 = vcmp.le.f32.partialorder %v12529_v49, 0.7853982  ;;  %v1888_v32 = vsub.s32 4, %v10571_v38  ;;  %v2028_v22 = vsel %vm7537_vm15, 0, %v7536_v28  ;;  %v2170_v13 = vadd.s32 1, %v2166_v19 }
 0x262   : > { %v2321_v20 = vadd.s32 %v2320_v2, %v2311_v47  ;;  %v1881_v5 = vor.u32 4788187, %v1880_v55  ;;  %v2013_v9 = vadd.s32 %v10539_v30, %v10529_v3  ;;  %v2029_v56 = vsub.s32 32, %v2028_v22 }
 0x263   : > { %vm2324_vm6 = vc.u32 %v10631_v57, %v10642_v17  ;;  %v10672_v8 = vor.u32 %v3186_v11, %v10562_v46  ;;  %v2033_v37 = vsub.s32 4294967266, %v2028_v22  ;;  %v2171_v48 = vsel %vm2169_vm14, %v2170_v13, %v2166_v19 }
 0x264   : > { %v2325_v29 = vadd.s32 1, %v2321_v20  ;;  %v1882_v23 = vand.u32 2147483647, %v1881_v5  ;;  %v1884_v10 = vcvt.s32.f32 %v1877_v15  ;;  %v2031_v21 = vshrl.u32 %v2013_v9, %v2029_v56 }
 0x265   : > { %v12535_v47 = vmul.u32 %v12533_v36, %v12534_v1  ;;  %v1889_v3 = vsel %vm1766_vm3, %v1888_v32, %v10571_v38  ;;  %v2030_v30 = vshll.u32 %v10624_v4, %v2028_v22  ;;  %v2034_v0 = vadd.s32 127, %v2033_v37 }
 0x266   : > { %v2326_v27 = vsel %vm2324_vm6, %v2325_v29, %v2321_v20  ;;  %v1885_v46 = vmul.f32 %v1884_v10, %v1882_v23  ;;  %v2043_v11 = vsub.s32 4, %v10605_v59  ;;  %v12538_v12 = vmul.u32 %v12536_v39, %v12537_v35 }
 0x267   : > { %v2172_v42 = vadd.s32 %v2171_v48, %v12535_v47  ;;  %vm12240_vm7 = vcmp.lt.s32.totalorder %v10541_v58, 1  ;;  %vm12241_vm5 = vcmp.lt.s32.totalorder %v10541_v58, 4  ;;  %v2032_v16 = vor.u32 %v2031_v21, %v2030_v30 }
 0x268   : > { %v2327_v2 = vadd.s32 %v2326_v27, %v12538_v12  ;;  %v2035_v44 = vshll.u32 %v2034_v0, 23  ;;  %v1886_v28 = vxor.u32 2147483648, %v1885_v46  ;;  %v1891_v38 = vsel %vm10659_vm4, 0, %v1889_v3 }
 0x269   : > { %v2173_v43 = vadd.s32 536870912, %v2172_v42  ;;  %v3190_v49 = vor.u32 %v10655_v50, %v10569_v63  ;;  %vm12239_vm11 = vcmp.lt.s32.totalorder %v10541_v58, 3  ;;  %v3200_v15 = vsel %vm12241_vm5, %v10672_v8, 920167782 }
 0x26a   : > { %v2328_v19 = vadd.s32 536870912, %v2327_v2  ;;  %v2036_v55 = vor.u32 4788187, %v2035_v44  ;;  %v1887_v32 = vsel %vm1766_vm3, %v1886_v28, %v1885_v46  ;;  %v2044_v22 = vsel %vm1921_vm13, %v2043_v11, %v10605_v59 }
 0x26b   : > { %v10689_v4 = vshrl.u32 %v2173_v43, 30  ;;  %v10708_v5 = vsel %vm10659_vm4, %v12461_v41, %v1887_v32  ;;  %v1908_v9 = vadd.s32 3, %v1891_v38  ;;  %v2039_v37 = vcvt.s32.f32 %v2032_v16 }
 0x26c   : > { %v10703_v20 = vshrl.u32 %v2328_v19, 30  ;;  %v2037_v56 = vand.u32 2147483647, %v2036_v55  ;;  %v1892_v48 = vmul.f32 %v10708_v5, %v10708_v5  ;;  %v12539_v29 = vand.u32 2147483647, %v12532_v31 }
 0x26d   : > { %v2175_v13 = vshll.u32 %v10689_v4, 30  ;;  %v10725_v60 = vsel %vm12240_vm7, %v10645_v18, %v10648_v33  ;;  %v10730_v21 = vsel %vm12239_vm11, %v10651_v6, %v3200_v15  ;;  %v10736_v30 = vand.u32 3, %v1908_v9  ;;  %v12542_v9 = vld [vmem:[#allocation44_spill] sm:$0xff] }
 0x26e   : > { %vm10714_vm1 = vcmp.le.f32.partialorder %v12539_v29, 0.7853982  ;;  %v2330_v10 = vshll.u32 %v10703_v20, 30  ;;  %v2040_v36 = vmul.f32 %v2039_v37, %v2037_v56  ;;  %v1893_v47 = vmul.f32 -0.001358992, %v1892_v48 }
 0x26f   : > { %v10718_v59 = vsub.s32 %v2172_v42, %v2175_v13  ;;  %v2046_v1 = vsel %vm10714_vm1, 0, %v2044_v22  ;;  %v1900_v42 = vmul.f32 -0.00019511016, %v1892_v48  ;;  %v10740_v27 = vadd.s32 %v10642_v17, %v10631_v57 }
 0x270   : > { %v2041_v0 = vxor.u32 2147483648, %v2040_v36  ;;  %v10742_v46 = vsub.s32 %v2327_v2, %v2330_v10  ;;  %v1894_v11 = vadd.f32 0.041655596, %v1893_v47  ;;  %v2063_v39 = vadd.s32 3, %v2046_v1 }
 0x271   : > { %vm2177_vm8 = vcmp.lt.s32.totalorder %v10718_v59, 0  ;;  %v2178_v3 = vsub.s32 0, %v10718_v59  ;;  %v1901_v43 = vadd.f32 0.008332121, %v1900_v42  ;;  %v10747_v16 = vand.u32 3, %v1891_v38 }
 0x272   : > { %v2042_v12 = vsel %vm1921_vm13, %v2041_v0, %v2040_v36  ;;  %vm2332_vm12 = vcmp.lt.s32.totalorder %v10742_v46, 0  ;;  %v1895_v28 = vmul.f32 %v1894_v11, %v1892_v48  ;;  %v2333_v17 = vsub.s32 0, %v10742_v46 }
 0x273   : > { %v2179_v35 = vsel %vm2177_vm8, %v2178_v3, %v10718_v59  ;;  %v1902_v19 = vmul.f32 %v1901_v43, %v1892_v48  ;;  %v10753_v57 = vsel %vm10714_vm1, %v12532_v31, %v2042_v12  ;;  %vm1914_vm9 = vcmp.eq.s32.totalorder %v10736_v30, 2 }
 0x274   : > { %v2180_v44 = vclz %v2179_v35  ;;  %v2047_v2 = vmul.f32 %v10753_v57, %v10753_v57  ;;  %v10759_v15 = vand.u32 3, %v2046_v1  ;;  %v1896_v55 = vadd.f32 -0.4999988, %v1895_v28 }
 0x275   : > { %v1903_v32 = vadd.f32 -0.16666654, %v1902_v19  ;;  %v10761_v22 = vand.u32 3, %v2063_v39  ;;  %v2334_v13 = vsel %vm2332_vm12, %v2333_v17, %v10742_v46  ;;  %vm2076_vm10 = vcmp.lt.s32.totalorder %v12542_v9, 0 }
 0x276   : > { %v7539_v38 = vadd.s32 4294967294, %v2180_v44  ;;  %vm1911_vm0 = vcmp.eq.s32.totalorder %v10736_v30, 0  ;;  %v2048_v56 = vmul.f32 -0.001358992, %v2047_v2  ;;  %v2055_v37 = vmul.f32 -0.00019511016, %v2047_v2 }
 0x277   : > { %v2335_v29 = vclz %v2334_v13  ;;  %v1897_v23 = vmul.f32 %v1896_v55, %v1892_v48  ;;  %v1904_v10 = vmul.f32 %v1903_v32, %v1892_v48  ;;  %vm1910_vm3 = vcmp.lt.s32.totalorder %v10736_v30, 2  ;;  %v12546_v55 = vld [vmem:[#allocation15_spill] sm:$0xff]  ;;  %v5928_v48 = vld [vmem:[%s12059_s2 + $0x10] sm:$0xf] }
 0x278   : > { %vm7540_vm2 = vcmp.lt.s32.totalorder %v7539_v38, 0  ;;  %v2168_v36 = vadd.s32 %v10640_v62, %v10637_v61  ;;  %vm1907_vm4 = vweird.f32 %v12461_v41  ;;  %v2049_v47 = vadd.f32 0.041655596, %v2048_v56 }
 0x279   : > { %v2183_v1 = vsel %vm7540_vm2, 0, %v7539_v38  ;;  %v2056_v42 = vadd.f32 0.008332121, %v2055_v37  ;;  %vm4384_vm15 = vcmp.eq.s32.totalorder %v10747_v16, 0  ;;  %v2198_v0 = vsub.s32 4, %v10689_v4 }
 0x27a   : > { %v2184_v3 = vsub.s32 32, %v2183_v1  ;;  %v1898_v11 = vadd.f32 1.0, %v1897_v23  ;;  %v1905_v43 = vadd.f32 1.0, %v1904_v10  ;;  %v12543_v39 = vand.u32 2147483647, %v12542_v9 }
 0x27b   : > { %v2188_v35 = vsub.s32 4294967266, %v2183_v1  ;;  %v7542_v61 = vadd.s32 4294967294, %v2335_v29  ;;  %v2050_v62 = vmul.f32 %v2049_v47, %v2047_v2  ;;  %v2057_v12 = vmul.f32 %v2056_v42, %v2047_v2 }
 0x27c   : > { %vm10774_vm14 = vcmp.le.f32.partialorder %v12543_v39, 0.7853982  ;;  %vm4387_vm13 = vcmp.eq.s32.totalorder %v10747_v16, 2  ;;  %v2185_v44 = vshll.u32 %v10718_v59, %v2183_v1  ;;  %v2186_v28 = vshrl.u32 %v2168_v36, %v2184_v3 }
 0x27d   : > { %v1906_v19 = vmul.f32 %v1905_v43, %v10708_v5  ;;  %v1915_v17 = vxor.u32 2147483648, %v1898_v11  ;;  %vm4383_vm6 = vcmp.lt.s32.totalorder %v10747_v16, 2  ;;  %v2189_v38 = vadd.s32 127, %v2188_v35 }
 0x27e   : > { %vm7543_vm1 = vcmp.lt.s32.totalorder %v7542_v61, 0  ;;  %vm2231_vm8 = vcmp.lt.s32.totalorder %v12546_v55, 0  ;;  %v2051_v32 = vadd.f32 -0.4999988, %v2050_v62  ;;  %v2058_v13 = vadd.f32 -0.16666654, %v2057_v12 }
 0x27f   : > { %v2187_v56 = vor.u32 %v2186_v28, %v2185_v44  ;;  %v2338_v37 = vsel %vm7543_vm1, 0, %v7542_v61  ;;  %v1912_v29 = vxor.u32 2147483648, %v1906_v19  ;;  %vm4538_vm12 = vcmp.eq.s32.totalorder %v10759_v15, 0 }
 0x280   : > { %vm4541_vm2 = vcmp.eq.s32.totalorder %v10759_v15, 2  ;;  %v1916_v59 = vsel %vm1914_vm9, %v1915_v17, %v1906_v19  ;;  %v2190_v5 = vshll.u32 %v2189_v38, 23  ;;  %v2052_v23 = vmul.f32 %v2051_v32, %v2047_v2 }
 0x281   : > { %v2059_v10 = vmul.f32 %v2058_v13, %v2047_v2  ;;  %vm2065_vm11 = vcmp.lt.s32.totalorder %v10761_v22, 2  ;;  %vm2066_vm7 = vcmp.eq.s32.totalorder %v10761_v22, 0  ;;  %vm4537_vm5 = vcmp.lt.s32.totalorder %v10759_v15, 2 }
 0x282   : > { %v2339_v36 = vsub.s32 32, %v2338_v37  ;;  %v1913_v1 = vsel %vm1911_vm0, %v1898_v11, %v1912_v29  ;;  %v2191_v47 = vor.u32 4788187, %v2190_v5  ;;  %v2199_v42 = vsel %vm2076_vm10, %v2198_v0, %v10689_v4 }
 0x283   : > { %v2353_v3 = vsub.s32 4, %v10703_v20  ;;  %vm3192_vm9 = vcmp.lt.s32.totalorder %v10541_v58, 2  ;;  %v2053_v2 = vadd.f32 1.0, %v2052_v23  ;;  %v2060_v43 = vadd.f32 1.0, %v2059_v10 }
 0x284   : > { %v1917_v39 = vsel %vm1910_vm3, %v1913_v1, %v1916_v59  ;;  %v2194_v35 = vcvt.s32.f32 %v2187_v56  ;;  %v12547_v61 = vand.u32 2147483647, %v12546_v55  ;;  %v4386_v12 = vsel %vm4384_vm15, %v1898_v11, %v1912_v29 }
 0x285   : > { %v10810_v4 = vsel %vm1907_vm4, nan, %v1917_v39  ;;  %v2192_v0 = vand.u32 2147483647, %v2191_v47  ;;  %v2341_v44 = vshrl.u32 %v10740_v27, %v2339_v36  ;;  %v2061_v30 = vmul.f32 %v2060_v43, %v10753_v57 }
 0x286   : > { %vm10802_vm1 = vcmp.le.f32.partialorder %v12547_v61, 0.7853982  ;;  %v2070_v28 = vxor.u32 2147483648, %v2053_v2  ;;  %v10816_v38 = vsel %vm10774_vm14, 0, %v2199_v42  ;;  %v2343_v32 = vsub.s32 4294967266, %v2338_v37 }
 0x287   : > { %vm2069_vm0 = vcmp.eq.s32.totalorder %v10761_v22, 2  ;;  %v4389_v11 = vsel %vm4387_vm13, %v1915_v17, %v1906_v19  ;;  %v2195_v13 = vmul.f32 %v2194_v35, %v2192_v0  ;;  %v2340_v56 = vshll.u32 %v10742_v46, %v2338_v37 }
 0x288   : > { %v2067_v29 = vxor.u32 2147483648, %v2061_v30  ;;  %v2071_v59 = vsel %vm2069_vm0, %v2070_v28, %v2061_v30  ;;  %v4390_v27 = vsel %vm4383_vm6, %v4386_v12, %v4389_v11  ;;  %v2344_v57 = vadd.s32 127, %v2343_v32 }
 0x289   : > { %v2196_v5 = vxor.u32 2147483648, %v2195_v13  ;;  %v2218_v23 = vadd.s32 3, %v10816_v38  ;;  %v2342_v10 = vor.u32 %v2341_v44, %v2340_v56  ;;  %v2354_v36 = vsel %vm2231_vm8, %v2353_v3, %v10703_v20 }
 0x28a   : > { %v2068_v19 = vsel %vm2066_vm7, %v2053_v2, %v2067_v29  ;;  %v4540_v46 = vsel %vm4538_vm12, %v2053_v2, %v2067_v29  ;;  %v4543_v17 = vsel %vm4541_vm2, %v2070_v28, %v2061_v30  ;;  %v2345_v16 = vshll.u32 %v2344_v57, 23 }
 0x28b   : > { %v2072_v37 = vsel %vm2065_vm11, %v2068_v19, %v2071_v59  ;;  %v4391_v1 = vsel %vm1907_vm4, nan, %v4390_v27  ;;  %v4544_v47 = vsel %vm4537_vm5, %v4540_v46, %v4543_v17  ;;  %v2197_v20 = vsel %vm2076_vm10, %v2196_v5, %v2195_v13  ;;  %v7861_v46 = vld [vmem:[%s12059_s2 + $0x8] sm:$0xff] }
 0x28c   : > { %vm12550_vm7 = vweird.f32 %v12532_v31  ;;  %v10851_v22 = vsel %vm10774_vm14, %v12542_v9, %v2197_v20  ;;  %v2346_v41 = vor.u32 4788187, %v2345_v16  ;;  %v10857_v15 = vsel %vm3192_vm9, %v10725_v60, %v10730_v21 }
 0x28d   : > { %v10844_v42 = vsel %vm12550_vm7, nan, %v2072_v37  ;;  %vm12551_vm3 = vmmov %vm12550_vm7  ;;  %v2202_v43 = vmul.f32 %v10851_v22, %v10851_v22  ;;  %v2356_v31 = vsel %vm10802_vm1, 0, %v2354_v36  ;;  %vm12552_vm5 = vcmp.lt.s32.totalorder %v10541_v58, 4  ;;  %v12557_v37 = vld [vmem:[#allocation4_spill] sm:$0xff] }
 0x28e   : > { %v4545_v3 = vsel %vm12551_vm3, nan, %v4544_v47  ;;  %v3204_v39 = vsel %vm12552_vm5, %v3190_v49, 1326507024  ;;  %v10871_v35 = vand.u32 3, %v2218_v23  ;;  %v2347_v60 = vand.u32 2147483647, %v2346_v41 }
 0x28f   : > { %v8015_v2 = vpack.i.bf16 %v4545_v3, %v4391_v1  ;;  %v2349_v21 = vcvt.s32.f32 %v2342_v10  ;;  %v2203_v61 = vmul.f32 -0.001358992, %v2202_v43  ;;  %v2210_v12 = vmul.f32 -0.00019511016, %v2202_v43  ;;  %v12559_v1 = vld [vmem:[#allocation3_spill] sm:$0xff]  ;;  %v12560_v47 = vld [vmem:[#allocation86_spill] sm:$0xff] }
 0x290   : > { %v5950_v0 = vunpack.c.l.b16 %v5928_v48  ;;  %vm5981_vm11 = vcmask 1042432   ;;  %v2373_v30 = vadd.s32 3, %v2356_v31  ;;  %vm5982_vm10 = vcmask 1043456   ;;  %v12561_v41 = vld [vmem:[#allocation9_spill] sm:$0xff] }
 0x291   : > { %8016 = vrot.lane.b32.xlu2 %v8015_v2, %s8167_s17  ;;  %v2350_v44 = vmul.f32 %v2349_v21, %v2347_v60  ;;  %v2204_v28 = vadd.f32 0.041655596, %v2203_v61  ;;  %v2211_v32 = vadd.f32 0.008332121, %v2210_v12  ;;  %v8168_v63 = vmov 65535   ;;  %v12562_v60 = vld [vmem:[#allocation14_spill] sm:$0xff] }
 0x292   : > { %v5953_v11 = vpack.c.b16 %v5950_v0, %v5950_v0  ;;  %v5983_v50 = vsel %vm5981_vm11, 4294967295, %v8168_v63  ;;  %vm12553_vm4 = vcmp.lt.s32.totalorder %v10541_v58, 1  ;;  %vm12556_vm14 = vcmp.lt.s32.totalorder %v10541_v58, 3  ;;  %v12563_v61 = vld [vmem:[#allocation87_spill] sm:$0xff] }
 0x293   : > { %v10878_v49 = vsel %vm12553_vm4, %v10566_v34, %v10645_v18  ;;  %vm12554_vm15 = vmmov %vm12553_vm4  ;;  %v2351_v56 = vxor.u32 2147483648, %v2350_v44  ;;  %v10886_v29 = vsel %vm5982_vm10, %v5983_v50, 0  ;;  %v10891_v59 = vsel %vm12556_vm14, %v10672_v8, %v3204_v39 }
 0x294   : > { %v10884_v13 = vsel %vm12554_vm15, %v10648_v33, %v10651_v6  ;;  %12555 = vst [vmem:[#allocation70_spill] sm:$0xff] %v10886_v29  ;;  %v2205_v27 = vmul.f32 %v2204_v28, %v2202_v43  ;;  %v2212_v57 = vmul.f32 %v2211_v32, %v2202_v43  ;;  %v5986_v5 = vand.u32 %v10886_v29, %v5953_v11 }
 0x295   : > { %v3232_v34 = vand.u32 65535, %v10857_v15  ;;  %vm2224_vm13 = vcmp.eq.s32.totalorder %v10871_v35, 2  ;;  %v2352_v18 = vsel %vm2231_vm8, %v2351_v56, %v2350_v44  ;;  %v10898_v23 = vand.u32 3, %v2373_v30  ;;  %v12564_v30 = vld [vmem:[#allocation85_spill] sm:$0xff] }
 0x296   : > { %v2206_v10 = vadd.f32 -0.4999988, %v2205_v27  ;;  %v2213_v36 = vadd.f32 -0.16666654, %v2212_v57  ;;  %v10903_v8 = vsel %vm10802_vm1, %v12546_v55, %v2352_v18  ;;  %v10906_v19 = vand.u32 3, %v10816_v38  ;;  %5993 = vmatpush.bf16.msra.mxu0 %v5986_v5  ;;  %7916 = vmatpush.bf16.msra.mxu1 %v5986_v5  ;;  %v12565_v57 = vld [vmem:[#allocation7_spill] sm:$0xff] }
 0x297   : > { %vm2221_vm6 = vcmp.eq.s32.totalorder %v10871_v35, 0  ;;  %v2357_v17 = vmul.f32 %v10903_v8, %v10903_v8  ;;  %v10914_v16 = vand.u32 3, %v2356_v31  ;;  %v12558_v62 = vshll.u32 %v12557_v37, 16  ;;  %7917 = vmatpush.bf16.msra.mxu2 %v5986_v5  ;;  %7918 = vmatpush.bf16.msra.mxu3 %v5986_v5 }
 0x298   : > { %v2463_v38 = vshll.u32 %v12560_v47, 16  ;;  %v2207_v20 = vmul.f32 %v2206_v10, %v2202_v43  ;;  %v2214_v3 = vmul.f32 %v2213_v36, %v2202_v43  ;;  %vm2220_vm12 = vcmp.lt.s32.totalorder %v10871_v35, 2  ;;  %v7860_v43 = vld [vmem:[%s12059_s2] sm:$0xff] }
 0x299   : > { %vm2449_vm8 = vc.u32 %v12559_v1, %v12558_v62  ;;  %v2442_v2 = vshrl.u32 %v12561_v41, 16  ;;  %vm2217_vm2 = vweird.f32 %v12542_v9  ;;  %v2358_v31 = vmul.f32 -0.001358992, %v2357_v17 }
 0x29a   : > { %v2450_v48 = vsel %vm2449_vm8, 1, %v12271_v25  ;;  %v2365_v39 = vmul.f32 -0.00019511016, %v2357_v17  ;;  %v2465_v12 = vshll.u32 %v12563_v61, 16  ;;  %v2208_v0 = vadd.f32 1.0, %v2207_v20  ;;  %5994 = vmatpush.bf16.msra.mxu0 %v7861_v46  ;;  %7919 = vmatpush.bf16.msra.mxu1 %v7861_v46 }
 0x29b   : > { %v2452_v21 = vadd.s32 %v2450_v48, %v12562_v60  ;;  %v2215_v44 = vadd.f32 1.0, %v2214_v3  ;;  %vm2467_vm1 = vc.u32 %v12564_v30, %v2463_v38  ;;  %v2469_v28 = vadd.s32 %v2463_v38, %v12564_v30  ;;  %7920 = vmatpush.bf16.msra.mxu2 %v7861_v46  ;;  %7921 = vmatpush.bf16.msra.mxu3 %v7861_v46 }
 0x29c   : > { %v2359_v32 = vadd.f32 0.041655596, %v2358_v31  ;;  %v2366_v11 = vadd.f32 0.008332121, %v2365_v39  ;;  %v2468_v50 = vsel %vm2467_vm1, 1, %v12271_v25  ;;  %v2225_v27 = vxor.u32 2147483648, %v2208_v0 }
 0x29d   : > { %v2453_v63 = vadd.s32 %v2452_v21, %v2442_v2  ;;  %v2216_v56 = vmul.f32 %v2215_v44, %v10851_v22  ;;  %v2470_v5 = vadd.s32 %v2468_v50, %v12565_v57  ;;  %vm2471_vm0 = vc.u32 %v2469_v28, %v2465_v12 }
 0x29e   : > { %v2360_v18 = vmul.f32 %v2359_v32, %v2357_v17  ;;  %v2367_v10 = vmul.f32 %v2366_v11, %v2357_v17  ;;  %vm4691_vm7 = vcmp.lt.s32.totalorder %v10906_v19, 2  ;;  %v2472_v36 = vsel %vm2471_vm0, 1, %v12271_v25  ;;  %5995 = vmatpush.bf16.msra.mxu0 %v7860_v43  ;;  %7922 = vmatpush.bf16.msra.mxu1 %v7860_v43  ;;  %v12569_v32 = vld [vmem:[#allocation28_spill] sm:$0xff] }
 0x29f   : > { %v2222_v62 = vxor.u32 2147483648, %v2216_v56  ;;  %v2226_v1 = vsel %vm2224_vm13, %v2225_v27, %v2216_v56  ;;  %vm2379_vm3 = vcmp.eq.s32.totalorder %v10898_v23, 2  ;;  %vm4692_vm5 = vcmp.eq.s32.totalorder %v10906_v19, 0  ;;  %7923 = vmatpush.bf16.msra.mxu2 %v7860_v43  ;;  %7924 = vmatpush.bf16.msra.mxu3 %v7860_v43  ;;  %v12567_v43 = vld [vmem:[#allocation23_spill] sm:$0xff] }
 0x2a0   : > { %v2444_v22 = vshrl.u32 %v12557_v37, 16  ;;  %v2361_v46 = vadd.f32 -0.4999988, %v2360_v18  ;;  %v2368_v38 = vadd.f32 -0.16666654, %v2367_v10  ;;  %vm4695_vm11 = vcmp.eq.s32.totalorder %v10906_v19, 2 }
 0x2a1   : > { %v2474_v20 = vadd.s32 %v2472_v36, %v2470_v5  ;;  %v2223_v3 = vsel %vm2221_vm6, %v2208_v0, %v2222_v62  ;;  %vm2376_vm10 = vcmp.eq.s32.totalorder %v10898_v23, 0  ;;  %vm4846_vm4 = vcmp.eq.s32.totalorder %v10914_v16, 0  ;;  %v12572_v18 = vld [vmem:[#allocation21_spill] sm:$0xff]  ;;  %v12573_v36 = vld [vmem:[#allocation22_spill] sm:$0xff] }
 0x2a2   : > { %v10946_v41 = vadd.s32 %v2453_v63, %v2444_v22  ;;  %v2464_v2 = vshrl.u32 %v12560_v47, 16  ;;  %v2466_v37 = vshrl.u32 %v12563_v61, 16  ;;  %v2227_v48 = vsel %vm2220_vm12, %v2223_v3, %v2226_v1  ;;  %v12574_v22 = vld [vmem:[#allocation11_spill] sm:$0xff] }
 0x2a3   : > { %v2362_v31 = vmul.f32 %v2361_v46, %v2357_v17  ;;  %v2369_v39 = vmul.f32 %v2368_v38, %v2357_v17  ;;  %vm2375_vm15 = vcmp.lt.s32.totalorder %v10898_v23, 2  ;;  %v4694_v60 = vsel %vm4692_vm5, %v2208_v0, %v2222_v62  ;;  %v12570_v0 = vld [vmem:[#allocation2_spill] sm:$0xff] }
 0x2a4   : > { %vm4845_vm14 = vcmp.lt.s32.totalorder %v10914_v16, 2  ;;  %v10958_v21 = vsel %vm2217_vm2, nan, %v2227_v48  ;;  %vm2372_vm13 = vweird.f32 %v12546_v55  ;;  %v4697_v47 = vsel %vm4695_vm11, %v2225_v27, %v2216_v56  ;;  %v12571_v56 = vld [vmem:[#allocation17_spill] sm:$0xff]  ;;  %v12575_v48 = vld [vmem:[#allocation84_spill] sm:$0xff] }
 0x2a5   : > { %12566 = vst [vmem:[#allocation62_spill] sm:$0xff] %v10958_v21  ;;  %v10963_v35 = vadd.s32 %v2469_v28, %v2465_v12  ;;  %v2475_v61 = vadd.s32 %v2474_v20, %v2464_v2  ;;  %v2363_v17 = vadd.f32 1.0, %v2362_v31  ;;  %v2370_v44 = vadd.f32 1.0, %v2369_v39  ;;  %v12576_v31 = vld [vmem:[#allocation26_spill] sm:$0xff] }
 0x2a6   : > { %v12568_v30 = vshll.u32 %v12567_v43, 16  ;;  %v2618_v11 = vshll.u32 %v12570_v0, 16  ;;  %v4698_v63 = vsel %vm4691_vm7, %v4694_v60, %v4697_v47  ;;  %vm4849_vm8 = vcmp.eq.s32.totalorder %v10914_v16, 2 }
 0x2a7   : > { %v2476_v50 = vadd.s32 %v2475_v61, %v2466_v37  ;;  %v2371_v12 = vmul.f32 %v2370_v44, %v10903_v8  ;;  %v2380_v28 = vxor.u32 2147483648, %v2363_v17  ;;  %vm2479_vm12 = vc.u32 %v10946_v41, %v10963_v35  ;;  %v12578_v44 = vld [vmem:[#allocation13_spill] sm:$0xff] }
 0x2a8   : > { %vm2604_vm6 = vc.u32 %v12569_v32, %v12568_v30  ;;  %v2620_v10 = vshll.u32 %v12572_v18, 16  ;;  %vm2622_vm1 = vc.u32 %v12573_v36, %v2618_v11  ;;  %v2624_v19 = vadd.s32 %v2618_v11, %v12573_v36 }
 0x2a9   : > { %v2605_v57 = vsel %vm2604_vm6, 1, %v12271_v25  ;;  %v2480_v5 = vadd.s32 1, %v2476_v50  ;;  %v2377_v62 = vxor.u32 2147483648, %v2371_v12  ;;  %v4699_v1 = vsel %vm2217_vm2, nan, %v4698_v63 }
 0x2aa   : > { %v2607_v27 = vadd.s32 %v2605_v57, %v12571_v56  ;;  %v2381_v8 = vsel %vm2379_vm3, %v2380_v28, %v2371_v12  ;;  %v2597_v46 = vshrl.u32 %v12574_v22, 16  ;;  %v4851_v38 = vsel %vm4849_vm8, %v2380_v28, %v2371_v12 }
 0x2ab   : > { %v2481_v20 = vsel %vm2479_vm12, %v2480_v5, %v2476_v50  ;;  %v2623_v3 = vsel %vm2622_vm1, 1, %v12271_v25  ;;  %vm2626_vm0 = vc.u32 %v2624_v19, %v2620_v10  ;;  %v4848_v2 = vsel %vm4846_vm4, %v2363_v17, %v2377_v62 }
 0x2ac   : > { %v2378_v37 = vsel %vm2376_vm10, %v2363_v17, %v2377_v62  ;;  %v12577_v9 = vmul.u32 %v12575_v48, %v12576_v31  ;;  %v2608_v60 = vadd.s32 %v2607_v27, %v2597_v46  ;;  %v4852_v47 = vsel %vm4845_vm14, %v4848_v2, %v4851_v38  ;;  %v12581_v27 = vld [vmem:[#allocation29_spill] sm:$0xff] }
 0x2ad   : > { %v2382_v61 = vsel %vm2375_vm15, %v2378_v37, %v2381_v8  ;;  %v2625_v30 = vadd.s32 %v2623_v3, %v12578_v44  ;;  %v2627_v32 = vsel %vm2626_vm0, 1, %v12271_v25  ;;  %v4853_v11 = vsel %vm2372_vm13, nan, %v4852_v47  ;;  %v12583_v38 = vld [vmem:[#allocation25_spill] sm:$0xff]  ;;  %v12584_v37 = vld [vmem:[#allocation34_spill] sm:$0xff] }
 0x2ae   : > { %v2482_v39 = vadd.s32 %v2481_v20, %v12577_v9  ;;  %v11003_v17 = vsel %vm2372_vm13, nan, %v2382_v61  ;;  %v2599_v50 = vshrl.u32 %v12567_v43, 16  ;;  %v3206_v23 = vsel %vm3192_vm9, %v10884_v13, %v10891_v59 }
 0x2af   : > { %12579 = vst [vmem:[#allocation75_spill] sm:$0xff] %v11003_v17  ;;  %v8025_v16 = vpack.i.bf16 %v4853_v11, %v4699_v1  ;;  %v2619_v57 = vshrl.u32 %v12570_v0, 16  ;;  %v2629_v12 = vadd.s32 %v2627_v32, %v2625_v30  ;;  %v12580_v55 = vshll.u32 %v9906_v24, 16  ;;  %v12587_v32 = vld [vmem:[#allocation78_spill] sm:$0xff]  ;;  %v12588_v11 = vld [vmem:[#allocation12_spill] sm:$0xff] }
 0x2b0   : > { %v2483_v63 = vadd.s32 536870912, %v2482_v39  ;;  %v11013_v56 = vadd.s32 %v2608_v60, %v2599_v50  ;;  %v2773_v5 = vshll.u32 %v12581_v27, 16  ;;  %v3233_v43 = vshrl.u32 %v10857_v15, 16 }
 0x2b1   : > { %vm2759_vm2 = vc.u32 %v10120_v54, %v12580_v55  ;;  %8026 = vrot.lane.b32.xlu1 %v8025_v16, %s8167_s17  ;;  %v2621_v13 = vshrl.u32 %v12572_v18, 16  ;;  %v2630_v59 = vadd.s32 %v2629_v12, %v2619_v57  ;;  %v3211_v36 = vshrl.u32 %v3206_v23, 16  ;;  %v12582_v54 = vld [vmem:[#allocation31_spill] sm:$0xff] }
 0x2b2   : > { %v11011_v28 = vshrl.u32 %v2483_v63, 30  ;;  %v2760_v0 = vsel %vm2759_vm2, 1, %v12271_v25  ;;  %v11024_v1 = vadd.s32 %v2624_v19, %v2620_v10  ;;  %v2775_v46 = vshll.u32 %v12582_v54, 16 }
 0x2b3   : > { %v2762_v8 = vadd.s32 %v2760_v0, %v10126_v45  ;;  %v2631_v22 = vadd.s32 %v2630_v59, %v2621_v13  ;;  %vm2777_vm7 = vc.u32 %v12583_v38, %v2773_v5  ;;  %v2779_v20 = vadd.s32 %v2773_v5, %v12583_v38 }
 0x2b4   : > { %v2485_v62 = vshll.u32 %v11011_v28, 30  ;;  %vm2634_vm3 = vc.u32 %v11013_v56, %v11024_v1  ;;  %v2752_v18 = vshrl.u32 %v9878_v26, 16  ;;  %v2778_v2 = vsel %vm2777_vm7, 1, %v12271_v25 }
 0x2b5   : > { %v3210_v10 = vand.u32 65535, %v3206_v23  ;;  %v2635_v19 = vadd.s32 1, %v2631_v22  ;;  %v2780_v45 = vadd.s32 %v2778_v2, %v12584_v37  ;;  %vm2781_vm5 = vc.u32 %v2779_v20, %v2775_v46 }
 0x2b6   : > { %v11030_v3 = vsub.s32 %v2482_v39, %v2485_v62  ;;  %v11038_v48 = vmul.u32 %v3211_v36, %v10537_v14  ;;  %v2763_v9 = vadd.s32 %v2762_v8, %v2752_v18  ;;  %v12585_v39 = vld [vmem:[#allocation65_spill] sm:$0xff]  ;;  %vm12586_vm4 = vcmp.lt.s32.totalorder %v10541_v58, 4 }
 0x2b7   : > { %vm2386_vm10 = vcmp.lt.s32.totalorder %v12585_v39, 0  ;;  %v11046_v26 = vsel %vm12586_vm4, %v10651_v6, 2102212464  ;;  %v11051_v60 = vmul.u32 %v3232_v34, %v10537_v14  ;;  %v2636_v47 = vsel %vm2634_vm3, %v2635_v19, %v2631_v22 }
 0x2b8   : > { %vm2487_vm11 = vcmp.lt.s32.totalorder %v11030_v3, 0  ;;  %v2488_v31 = vsub.s32 0, %v11030_v3  ;;  %v2782_v61 = vsel %vm2781_vm5, 1, %v12271_v25  ;;  %v11057_v44 = vmul.u32 %v3232_v34, %v10544_v53 }
 0x2b9   : > { %v12589_v63 = vmul.u32 %v12587_v32, %v12588_v11  ;;  %v2754_v50 = vshrl.u32 %v9906_v24, 16  ;;  %v11065_v23 = vmul.u32 %v3210_v10, %v10544_v53  ;;  %v2774_v57 = vshrl.u32 %v12581_v27, 16 }
 0x2ba   : > { %v2489_v30 = vsel %vm2487_vm11, %v2488_v31, %v11030_v3  ;;  %v2784_v12 = vadd.s32 %v2782_v61, %v2780_v45  ;;  %v12242_v55 = vshll.u32 %v11038_v48, 16  ;;  %v11070_v15 = vmul.u32 %v3233_v43, %v10537_v14 }
 0x2bb   : > { %v2637_v6 = vadd.s32 %v2636_v47, %v12589_v63  ;;  %v2490_v16 = vclz %v2489_v30  ;;  %v11072_v5 = vadd.s32 %v2763_v9, %v2754_v50  ;;  %v11075_v13 = vmul.u32 %v3233_v43, %v10544_v53  ;;  %v7987_v43 = vpop.permute.xlu2 %7986  ;;  %v11105_v9 = vpop.permute.xlu0 %7991 }
 0x2bc   : > { %v2776_v24 = vshrl.u32 %v12582_v54, 16  ;;  %v2785_v0 = vadd.s32 %v2784_v12, %v2774_v57  ;;  %v11079_v62 = vmul.u32 %v3210_v10, %v10537_v14  ;;  %v2508_v27 = vsub.s32 4, %v11011_v28 }
 0x2bd   : > { %v2638_v34 = vadd.s32 536870912, %v2637_v6  ;;  %v7545_v59 = vadd.s32 4294967294, %v2490_v16  ;;  %v11084_v22 = vadd.s32 %v2779_v20, %v2775_v46  ;;  %v11087_v38 = vmul.u32 %v3211_v36, %v10544_v53  ;;  %v12596_v16 = vld [vmem:[#allocation19_spill] sm:$0xff] }
 0x2be   : > { %v2786_v2 = vadd.s32 %v2785_v0, %v2776_v24  ;;  %vm11093_vm14 = vc.u32 %v11079_v62, %v12242_v55  ;;  %v2478_v53 = vadd.s32 %v10963_v35, %v10946_v41  ;;  %v7989_v19 = vunpack.i.h.bf16 %v7987_v43  ;;  %v12598_v24 = vld [vmem:[#allocation43_spill] sm:$0xff] }
 0x2bf   : > { %v11082_v8 = vshrl.u32 %v2638_v34, 30  ;;  %vm7546_vm15 = vcmp.lt.s32.totalorder %v7545_v59, 0  ;;  %vm2789_vm13 = vc.u32 %v11072_v5, %v11084_v22  ;;  %v7988_v37 = vunpack.i.l.bf16 %v7987_v43  ;;  %v8144_v34 = vld [vmem:[%s8274_s28 + $0x40] sm:$0xff] }
 0x2c0   : > { %v2493_v54 = vsel %vm7546_vm15, 0, %v7545_v59  ;;  %v2790_v20 = vadd.s32 1, %v2786_v2  ;;  %v2509_v45 = vsel %vm2386_vm10, %v2508_v27, %v11011_v28  ;;  %vm5890_vm6 = vcmask 146432   ;;  %v12599_v27 = vld [vmem:[#allocation24_spill] sm:$0xff] }
 0x2c1   : > { %v2640_v10 = vshll.u32 %v11082_v8, 30  ;;  %v2494_v36 = vsub.s32 32, %v2493_v54  ;;  %v2498_v46 = vsub.s32 4294967266, %v2493_v54  ;;  %v2495_v47 = vshll.u32 %v11030_v3, %v2493_v54 }
 0x2c2   : > { %v2791_v32 = vsel %vm2789_vm13, %v2790_v20, %v2786_v2  ;;  %v12592_v41 = vand.u32 2147483647, %v12585_v39  ;;  %v11122_v12 = vsel %vm11093_vm14, 1, %v12271_v25  ;;  %v2928_v0 = vshll.u32 %v12598_v24, 16  ;;  %v12600_v2 = vld [vmem:[#allocation10_spill] sm:$0xff]  ;;  %v12601_v20 = vld [vmem:[#allocation39_spill] sm:$0xff] }
 0x2c3   : > { %v2641_v31 = vsub.s32 %v2637_v6, %v2640_v10  ;;  %v2496_v61 = vshrl.u32 %v2478_v53, %v2494_v36  ;;  %v2499_v30 = vadd.s32 127, %v2498_v46  ;;  %v12595_v6 = vld [vmem:[#allocation16_spill] sm:$0xff]  ;;  %v11128_v43 = vsel %vm5890_vm6, %v12599_v27, %v7988_v37 }
 0x2c4   : > { %vm11110_vm8 = vcmp.le.f32.partialorder %v12592_v41, 0.7853982  ;;  %v12597_v3 = vmul.u32 %v12595_v6, %v12596_v16  ;;  %v11132_v54 = vsel %vm5890_vm6, %v12600_v2, %v7989_v19  ;;  %v7993_v36 = vunpack.i.l.bf16 %v11105_v9 }
 0x2c5   : > { %vm2642_vm12 = vcmp.lt.s32.totalorder %v2641_v31, 0  ;;  %v2643_v11 = vsub.s32 0, %v2641_v31  ;;  %v2497_v63 = vor.u32 %v2496_v61, %v2495_v47  ;;  %v2500_v50 = vshll.u32 %v2499_v30, 23  ;;  %v12603_v47 = vld [vmem:[#allocation32_spill] sm:$0xff]  ;;  %v12604_v61 = vld [vmem:[#allocation57_spill] sm:$0xff] }
 0x2c6   : > { %v2511_v28 = vsel %vm11110_vm8, 0, %v2509_v45  ;;  %v2792_v57 = vadd.s32 %v2791_v32, %v12597_v3  ;;  %v12602_v45 = vshll.u32 %v12601_v20, 16  ;;  %vm2541_vm0 = vcmp.lt.s32.totalorder %v12604_v61, 0 }
 0x2c7   : > { %v2644_v59 = vsel %vm2642_vm12, %v2643_v11, %v2641_v31  ;;  %v2501_v10 = vor.u32 4788187, %v2500_v50  ;;  %v2528_v14 = vadd.s32 3, %v2511_v28  ;;  %v2504_v32 = vcvt.s32.f32 %v2497_v63  ;;  %v12605_v50 = vld [vmem:[#allocation42_spill] sm:$0xff] }
 0x2c8   : > { %v2645_v53 = vclz %v2644_v59  ;;  %v2793_v46 = vadd.s32 536870912, %v2792_v57  ;;  %vm2914_vm1 = vc.u32 %v12603_v47, %v12602_v45  ;;  %v2633_v37 = vadd.s32 %v11024_v1, %v11013_v56  ;;  %v12606_v1 = vld [vmem:[#allocation49_spill] sm:$0xff] }
 0x2c9   : > { %v2502_v30 = vand.u32 2147483647, %v2501_v10  ;;  %v11141_v19 = vand.u32 3, %v2511_v28  ;;  %vm2932_vm2 = vc.u32 %v12605_v50, %v2928_v0  ;;  %v11147_v6 = vadd.s32 %v2928_v0, %v12605_v50  ;;  %v12607_v47 = vld [vmem:[#allocation37_spill] sm:$0xff] }
 0x2ca   : > { %v7548_v41 = vadd.s32 4294967294, %v2645_v53  ;;  %v11143_v11 = vshrl.u32 %v2793_v46, 30  ;;  %v2915_v3 = vsel %vm2914_vm1, 1, %v12271_v25  ;;  %v2933_v59 = vsel %vm2932_vm2, 1, %v12271_v25 }
 0x2cb   : > { %v2505_v16 = vmul.f32 %v2504_v32, %v2502_v30  ;;  %v11151_v63 = vand.u32 3, %v2528_v14  ;;  %v12243_v28 = vshll.u32 %v12606_v1, 16  ;;  %v2663_v46 = vsub.s32 4, %v11082_v8 }
 0x2cc   : > { %vm7549_vm7 = vcmp.lt.s32.totalorder %v7548_v41, 0  ;;  %v2795_v56 = vshll.u32 %v11143_v11, 30  ;;  %v2917_v45 = vadd.s32 %v2915_v3, %v10431_v51  ;;  %v2935_v30 = vadd.s32 %v2933_v59, %v12607_v47 }
 0x2cd   : > { %v2648_v27 = vsel %vm7549_vm7, 0, %v7548_v41  ;;  %v2506_v2 = vxor.u32 2147483648, %v2505_v16  ;;  %vm2936_vm3 = vc.u32 %v11147_v6, %v12243_v28  ;;  %v8143_v28 = vld [vmem:[%s8274_s28 + $0x48] sm:$0xff]  ;;  %vm5956_vm4 = vcmask 318464  }
 0x2ce   : > { %v2649_v10 = vsub.s32 32, %v2648_v27  ;;  %v2653_v53 = vsub.s32 4294967266, %v2648_v27  ;;  %v11156_v0 = vsub.s32 %v2792_v57, %v2795_v56  ;;  %v2650_v32 = vshll.u32 %v2641_v31, %v2648_v27  ;;  %v12608_v57 = vld [vmem:[#allocation48_spill] sm:$0xff] }
 0x2cf   : > { %v2507_v14 = vsel %vm2386_vm10, %v2506_v2, %v2505_v16  ;;  %v2907_v3 = vshrl.u32 %v12608_v57, 16  ;;  %v12609_v16 = vand.u32 2147483647, %v12604_v61  ;;  %v2937_v27 = vsel %vm2936_vm3, 1, %v12271_v25 }
 0x2d0   : > { %v2651_v41 = vshrl.u32 %v2633_v37, %v2649_v10  ;;  %v2654_v50 = vadd.s32 127, %v2653_v53  ;;  %v11168_v18 = vsel %vm11110_vm8, %v12585_v39, %v2507_v14  ;;  %vm2797_vm5 = vcmp.lt.s32.totalorder %v11156_v0, 0 }
 0x2d1   : > { %v2798_v51 = vsub.s32 0, %v11156_v0  ;;  %v2512_v59 = vmul.f32 %v11168_v18, %v11168_v18  ;;  %vm11177_vm11 = vcmp.le.f32.partialorder %v12609_v16, 0.7853982  ;;  %v2664_v56 = vsel %vm2541_vm0, %v2663_v46, %v11082_v8 }
 0x2d2   : > { %v2652_v35 = vor.u32 %v2651_v41, %v2650_v32  ;;  %v2655_v37 = vshll.u32 %v2654_v50, 23  ;;  %v2909_v10 = vshrl.u32 %v12601_v20, 16  ;;  %v2918_v53 = vadd.s32 %v2917_v45, %v2907_v3  ;;  %v8141_v32 = vld [vmem:[%s8274_s28 + $0x50] sm:$0xff]  ;;  %v8142_v41 = vld [vmem:[%s8274_s28 + $0x58] sm:$0xff] }
 0x2d3   : > { %v2799_v2 = vsel %vm2797_vm5, %v2798_v51, %v11156_v0  ;;  %v2513_v47 = vmul.f32 -0.001358992, %v2512_v59  ;;  %v2520_v14 = vmul.f32 -0.00019511016, %v2512_v59  ;;  %v2939_v16 = vadd.s32 %v2937_v27, %v2935_v30 }
 0x2d4   : > { %v2656_v57 = vor.u32 4788187, %v2655_v37  ;;  %v2659_v55 = vcvt.s32.f32 %v2652_v35  ;;  %vm5907_vm10 = vcmask 293888   ;;  %v8040_v50 = vpack.i.bf16 %v8142_v41, %v8141_v32 }
 0x2d5   : > { %v8030_v29 = vpack.i.bf16 %v8143_v28, %v8144_v34  ;;  %v2514_v17 = vadd.f32 0.041655596, %v2513_v47  ;;  %v2521_v21 = vadd.f32 0.008332121, %v2520_v14  ;;  %v5908_v46 = vsel %vm5907_vm10, %v11128_v43, %v7993_v36 }
 0x2d6   : > { %v2657_v8 = vand.u32 2147483647, %v2656_v57  ;;  %v12612_v20 = vunpack.i.h.bf16 %v11105_v9  ;;  %8041 = vrot.lane.b32.xlu1 %v8040_v50, %s8166_s0  ;;  %v2800_v30 = vclz %v2799_v2  ;;  %v2929_v51 = vshrl.u32 %v12598_v24, 16 }
 0x2d7   : > { %8031 = vrot.lane.b32.xlu2 %v8030_v29, %s8166_s0  ;;  %v2515_v34 = vmul.f32 %v2514_v17, %v2512_v59  ;;  %v2522_v28 = vmul.f32 %v2521_v21, %v2512_v59  ;;  %v11202_v43 = vadd.s32 %v2918_v53, %v2909_v10  ;;  %v2931_v9 = vshrl.u32 %v12606_v1, 16  ;;  %v12613_v17 = vld [vmem:[#allocation27_spill] sm:$0xff] }
 0x2d8   : > { %v5909_v45 = vsel %vm5907_vm10, %v11132_v54, %v12612_v20  ;;  %v2660_v3 = vmul.f32 %v2659_v55, %v2657_v8  ;;  %v7551_v37 = vadd.s32 4294967294, %v2800_v30  ;;  %v2940_v36 = vadd.s32 %v2939_v16, %v2929_v51 }
 0x2d9   : > { %v11200_v35 = vpack.c.bf16 %v5909_v45, %v5908_v46  ;;  %v2516_v54 = vadd.f32 -0.4999988, %v2515_v34  ;;  %v2523_v27 = vadd.f32 -0.16666654, %v2522_v28  ;;  %v2788_v29 = vadd.s32 %v11084_v22, %v11072_v5 }
 0x2da   : > { %v2661_v47 = vxor.u32 2147483648, %v2660_v3  ;;  %vm2696_vm15 = vcmp.lt.s32.totalorder %v12613_v17, 0  ;;  %vm2531_vm14 = vcmp.eq.s32.totalorder %v11151_v63, 0  ;;  %v2666_v21 = vsel %vm11177_vm11, 0, %v2664_v56 }
 0x2db   : > { %7618 = vmatmul.msk.bf16.vlgmr.msra.gmra.mxu0 %vm5956_vm4, %v11200_v35  ;;  %vm7552_vm13 = vcmp.lt.s32.totalorder %v7551_v37, 0  ;;  %v12614_v55 = vshll.u32 %v12606_v1, 16  ;;  %v2941_v2 = vadd.s32 %v2940_v36, %v2931_v9  ;;  %v2517_v10 = vmul.f32 %v2516_v54, %v2512_v59 }
 0x2dc   : > { %v2524_v53 = vmul.f32 %v2523_v27, %v2512_v59  ;;  %vm2530_vm8 = vcmp.lt.s32.totalorder %v11151_v63, 2  ;;  %v2662_v5 = vsel %vm2541_vm0, %v2661_v47, %v2660_v3  ;;  %v2803_v22 = vsel %vm7552_vm13, 0, %v7551_v37  ;;  %v12618_v47 = vld [vmem:[#allocation36_spill] sm:$0xff] }
 0x2dd   : > { %v11216_v24 = vadd.s32 %v11147_v6, %v12614_v55  ;;  %vm2527_vm12 = vweird.f32 %v12585_v39  ;;  %v11225_v56 = vsel %vm11177_vm11, %v12604_v61, %v2662_v5  ;;  %v2804_v1 = vsub.s32 32, %v2803_v22 }
 0x2de   : > { %v2808_v14 = vsub.s32 4294967266, %v2803_v22  ;;  %v2518_v6 = vadd.f32 1.0, %v2517_v10  ;;  %v2525_v59 = vadd.f32 1.0, %v2524_v53  ;;  %v2667_v57 = vmul.f32 %v11225_v56, %v11225_v56 }
 0x2df   : > { %vm2944_vm1 = vc.u32 %v11202_v43, %v11216_v24  ;;  %v12615_v16 = vand.u32 2147483647, %v12613_v17  ;;  %v2945_v41 = vadd.s32 1, %v2941_v2  ;;  %vm5000_vm2 = vcmp.eq.s32.totalorder %v11141_v19, 0 }
 0x2e0   : > { %v2805_v31 = vshll.u32 %v11156_v0, %v2803_v22  ;;  %v2806_v50 = vshrl.u32 %v2788_v29, %v2804_v1  ;;  %v2809_v8 = vadd.s32 127, %v2808_v14  ;;  %v2818_v46 = vsub.s32 4, %v11143_v11  ;;  %v12619_v29 = vld [vmem:[#allocation41_spill] sm:$0xff] }
 0x2e1   : > { %vm11233_vm0 = vcmp.le.f32.partialorder %v12615_v16, 0.7853982  ;;  %v2526_v20 = vmul.f32 %v2525_v59, %v11168_v18  ;;  %v2535_v45 = vxor.u32 2147483648, %v2518_v6  ;;  %v2668_v30 = vmul.f32 -0.001358992, %v2667_v57 }
 0x2e2   : > { %v2675_v51 = vmul.f32 -0.00019511016, %v2667_v57  ;;  %vm2534_vm7 = vcmp.eq.s32.totalorder %v11151_v63, 2  ;;  %v2807_v34 = vor.u32 %v2806_v50, %v2805_v31  ;;  %v2810_v28 = vshll.u32 %v2809_v8, 23 }
 0x2e3   : > { %v2946_v3 = vsel %vm2944_vm1, %v2945_v41, %v2941_v2  ;;  %v2532_v37 = vxor.u32 2147483648, %v2526_v20  ;;  %v2536_v9 = vsel %vm2534_vm7, %v2535_v45, %v2526_v20  ;;  %v2669_v0 = vadd.f32 0.041655596, %v2668_v30 }
 0x2e4   : > { %v2676_v36 = vadd.f32 0.008332121, %v2675_v51  ;;  %vm4999_vm3 = vcmp.lt.s32.totalorder %v11141_v19, 2  ;;  %v2683_v54 = vadd.s32 3, %v2666_v21  ;;  %v5152_v27 = vand.u32 3, %v2666_v21 }
 0x2e5   : > { %v2811_v18 = vor.u32 4788187, %v2810_v28  ;;  %v12620_v55 = vmul.u32 %v12618_v47, %v12619_v29  ;;  %v2533_v53 = vsel %vm2531_vm14, %v2518_v6, %v2532_v37  ;;  %v2670_v5 = vmul.f32 %v2669_v0, %v2667_v57 }
 0x2e6   : > { %v2677_v22 = vmul.f32 %v2676_v36, %v2667_v57  ;;  %v2819_v2 = vsel %vm2696_vm15, %v2818_v46, %v11143_v11  ;;  %v2537_v1 = vsel %vm2530_vm8, %v2533_v53, %v2536_v9  ;;  %v2814_v59 = vcvt.s32.f32 %v2807_v34 }
 0x2e7   : > { %v2947_v10 = vadd.s32 %v2946_v3, %v12620_v55  ;;  %v2812_v14 = vand.u32 2147483647, %v2811_v18  ;;  %v11258_v16 = vsel %vm2527_vm12, nan, %v2537_v1  ;;  %v2671_v41 = vadd.f32 -0.4999988, %v2670_v5 }
 0x2e8   : > { %v2678_v31 = vadd.f32 -0.16666654, %v2677_v22  ;;  %vm5003_vm5 = vcmp.eq.s32.totalorder %v11141_v19, 2  ;;  %v2684_v50 = vand.u32 3, %v2683_v54  ;;  %v11263_v30 = vsel %vm11233_vm0, 0, %v2819_v2 }
 0x2e9   : > { %v2948_v21 = vadd.s32 536870912, %v2947_v10  ;;  %v2815_v8 = vmul.f32 %v2814_v59, %v2812_v14  ;;  %v2672_v63 = vmul.f32 %v2671_v41, %v2667_v57  ;;  %v5002_v51 = vsel %vm5000_vm2, %v2518_v6, %v2532_v37 }
 0x2ea   : > { %v2679_v46 = vmul.f32 %v2678_v31, %v2667_v57  ;;  %vm5153_vm11 = vcmp.lt.s32.totalorder %v5152_v27, 2  ;;  %vm2682_vm14 = vweird.f32 %v12604_v61  ;;  %vm5154_vm13 = vcmp.eq.s32.totalorder %v5152_v27, 0 }
 0x2eb   : > { %v11265_v11 = vshrl.u32 %v2948_v21, 30  ;;  %vm5157_vm8 = vcmp.eq.s32.totalorder %v5152_v27, 2  ;;  %v2816_v34 = vxor.u32 2147483648, %v2815_v8  ;;  %v2673_v3 = vadd.f32 1.0, %v2672_v63 }
 0x2ec   : > { %v2680_v9 = vadd.f32 1.0, %v2679_v46  ;;  %v5005_v0 = vsel %vm5003_vm5, %v2535_v45, %v2526_v20  ;;  %v2838_v36 = vadd.s32 3, %v11263_v30  ;;  %vm2685_vm1 = vcmp.lt.s32.totalorder %v2684_v50, 2 }
 0x2ed   : > { %v2950_v28 = vshll.u32 %v11265_v11, 30  ;;  %v5006_v57 = vsel %vm4999_vm3, %v5002_v51, %v5005_v0  ;;  %v2817_v6 = vsel %vm2696_vm15, %v2816_v34, %v2815_v8  ;;  %vm2686_vm2 = vcmp.eq.s32.totalorder %v2684_v50, 0  ;;  %v8145_v0 = vld [vmem:[%s8274_s28 + $0x60] sm:$0xff] }
 0x2ee   : > { %v2681_v54 = vmul.f32 %v2680_v9, %v11225_v56  ;;  %v2690_v18 = vxor.u32 2147483648, %v2673_v3  ;;  %v11284_v47 = vsel %vm11233_vm0, %v12613_v17, %v2817_v6  ;;  %vm2689_vm7 = vcmp.eq.s32.totalorder %v2684_v50, 2 }
 0x2ef   : > { %v11278_v37 = vsub.s32 %v2947_v10, %v2950_v28  ;;  %v2822_v20 = vmul.f32 %v11284_v47, %v11284_v47  ;;  %v5007_v29 = vsel %vm2527_vm12, nan, %v5006_v57  ;;  %v11292_v55 = vand.u32 3, %v2838_v36  ;;  %v8146_v36 = vld [vmem:[%s8274_s28 + $0x68] sm:$0xff] }
 0x2f0   : > { %v2687_v45 = vxor.u32 2147483648, %v2681_v54  ;;  %v2691_v56 = vsel %vm2689_vm7, %v2690_v18, %v2681_v54  ;;  %v12621_v5 = vshll.u32 %v10471_v7, 16  ;;  %v5159_v1 = vsel %vm5157_vm8, %v2690_v18, %v2681_v54 }
 0x2f1   : > { %vm2952_vm3 = vcmp.lt.s32.totalorder %v11278_v37, 0  ;;  %v2953_v19 = vsub.s32 0, %v11278_v37  ;;  %v2823_v10 = vmul.f32 -0.001358992, %v2822_v20  ;;  %v2830_v53 = vmul.f32 -0.00019511016, %v2822_v20 }
 0x2f2   : > { %vm11298_vm15 = vc.u32 %v10526_v52, %v12621_v5  ;;  %v5156_v2 = vsel %vm5154_vm13, %v2673_v3, %v2687_v45  ;;  %v2688_v39 = vsel %vm2686_vm2, %v2673_v3, %v2687_v45  ;;  %v3083_v46 = vshll.u32 %v10452_v40, 16  ;;  %v12625_v45 = vld [vmem:[#allocation74_spill] sm:$0xff] }
 0x2f3   : > { %v2954_v32 = vsel %vm2952_vm3, %v2953_v19, %v11278_v37  ;;  %v5160_v59 = vsel %vm5153_vm11, %v5156_v2, %v5159_v1  ;;  %v2692_v21 = vsel %vm2685_vm1, %v2688_v39, %v2691_v56  ;;  %v2824_v41 = vadd.f32 0.041655596, %v2823_v10  ;;  %v12628_v39 = vld [vmem:[#allocation5_spill] sm:$0xff] }
 0x2f4   : > { %v2955_v14 = vclz %v2954_v32  ;;  %v2831_v31 = vadd.f32 0.008332121, %v2830_v53  ;;  %v5161_v52 = vsel %vm2682_vm14, nan, %v5160_v59  ;;  %v11311_v8 = vsel %vm2682_vm14, nan, %v2692_v21 }
 0x2f5   : > { %v8035_v51 = vpack.i.bf16 %v5161_v52, %v5007_v29  ;;  %v2825_v34 = vmul.f32 %v2824_v41, %v2822_v20  ;;  %v3070_v50 = vsel %vm11298_vm15, 1, %v12271_v25  ;;  %v12624_v28 = vshll.u32 %v11038_v48, 16  ;;  %v12630_v41 = vld [vmem:[#allocation20_spill] sm:$0xff] }
 0x2f6   : > { %v7554_v63 = vadd.s32 4294967294, %v2955_v14  ;;  %v2832_v27 = vmul.f32 %v2831_v31, %v2822_v20  ;;  %v11324_v61 = vadd.s32 %v11122_v12, %v11087_v38  ;;  %v2943_v9 = vadd.s32 %v11216_v24, %v11202_v43  ;;  %v12626_v38 = vld [vmem:[#allocation50_spill] sm:$0xff]  ;;  %v12627_v24 = vld [vmem:[#allocation53_spill] sm:$0xff] }
 0x2f7   : > { %v11320_v3 = vadd.s32 %v12624_v28, %v11079_v62  ;;  %8036 = vrot.lane.b32.xlu0 %v8035_v51, %s8167_s17  ;;  %v8050_v57 = vpack.i.bf16 %v8146_v36, %v8145_v0  ;;  %v2826_v6 = vadd.f32 -0.4999988, %v2825_v34  ;;  %vm2841_vm0 = vcmp.eq.s32.totalorder %v11292_v55, 0  ;;  %v7997_v0 = vpop.permute.xlu1 %7996  ;;  %v8002_v36 = vpop.permute.xlu2 %8001 }
 0x2f8   : > { %vm7555_vm12 = vcmp.lt.s32.totalorder %v7554_v63, 0  ;;  %v2833_v54 = vadd.f32 -0.16666654, %v2832_v27  ;;  %v3072_v29 = vadd.s32 %v3070_v50, %v12625_v45  ;;  %v3085_v12 = vshll.u32 %v12626_v38, 16 }
 0x2f9   : > { %v2958_v18 = vsel %vm7555_vm12, 0, %v7554_v63  ;;  %v2827_v56 = vmul.f32 %v2826_v6, %v2822_v20  ;;  %vm2840_vm5 = vcmp.lt.s32.totalorder %v11292_v55, 2  ;;  %vm3087_vm11 = vc.u32 %v12627_v24, %v3083_v46 }
 0x2fa   : > { %v2959_v62 = vsub.s32 32, %v2958_v18  ;;  %v2963_v19 = vsub.s32 4294967266, %v2958_v18  ;;  %v2834_v10 = vmul.f32 %v2833_v54, %v2822_v20  ;;  %v2960_v43 = vshll.u32 %v11278_v37, %v2958_v18  ;;  %v12629_v20 = vld [vmem:[#allocation51_spill] sm:$0xff] }
 0x2fb   : > { %vm2837_vm14 = vweird.f32 %v12613_v17  ;;  %v3088_v5 = vsel %vm3087_vm11, 1, %v12271_v25  ;;  %v3089_v22 = vadd.s32 %v3083_v46, %v12627_v24  ;;  %v11340_v2 = vadd.f32 1.0, %v2827_v56 }
 0x2fc   : > { %v2961_v53 = vshrl.u32 %v2943_v9, %v2959_v62  ;;  %v2964_v32 = vadd.s32 127, %v2963_v19  ;;  %v2835_v1 = vadd.f32 1.0, %v2834_v10  ;;  %v3062_v14 = vshrl.u32 %v12628_v39, 16 }
 0x2fd   : > { %v3090_v59 = vadd.s32 %v3088_v5, %v12629_v20  ;;  %vm2844_vm13 = vcmp.eq.s32.totalorder %v11292_v55, 2  ;;  %vm3091_vm8 = vc.u32 %v3089_v22, %v3085_v12  ;;  %vm2851_vm1 = vcmp.lt.s32.totalorder %v12630_v41, 0 }
 0x2fe   : > { %v2962_v37 = vor.u32 %v2961_v53, %v2960_v43  ;;  %v2965_v21 = vshll.u32 %v2964_v32, 23  ;;  %v11347_v31 = vmul.f32 %v2835_v1, %v11284_v47  ;;  %v2845_v52 = vxor.u32 2147483648, %v11340_v2  ;;  %v12631_v43 = vld [vmem:[#allocation6_spill] sm:$0xff] }
 0x2ff   : > { %v3073_v63 = vadd.s32 %v3072_v29, %v3062_v14  ;;  %v3092_v46 = vsel %vm3091_vm8, 1, %v12271_v25  ;;  %v2973_v34 = vsub.s32 4, %v11265_v11  ;;  %v3064_v27 = vshrl.u32 %v10471_v7, 16  ;;  %8051 = vrot.lane.b32.xlu0 %v8050_v57, %s8166_s0  ;;  %v12632_v32 = vld [vmem:[#allocation38_spill] sm:$0xff] }
 0x300   : > { %v2966_v51 = vor.u32 4788187, %v2965_v21  ;;  %v3094_v50 = vadd.s32 %v3092_v46, %v3090_v59  ;;  %v2842_v28 = vxor.u32 2147483648, %v11347_v31  ;;  %v2846_v47 = vsel %vm2844_vm13, %v2845_v52, %v11347_v31 }
 0x301   : > { %v2969_v9 = vcvt.s32.f32 %v2962_v37  ;;  %v3084_v6 = vshrl.u32 %v10452_v40, 16  ;;  %v7999_v18 = vunpack.i.h.bf16 %v7997_v0  ;;  %v7998_v62 = vunpack.i.l.bf16 %v7997_v0 }
 0x302   : > { %v2967_v54 = vand.u32 2147483647, %v2966_v51  ;;  %v8004_v19 = vunpack.i.h.bf16 %v8002_v36  ;;  %v2843_v7 = vsel %vm2841_vm0, %v11340_v2, %v2842_v28  ;;  %v8003_v57 = vunpack.i.l.bf16 %v8002_v36  ;;  %v12637_v36 = vld [vmem:[#allocation35_spill] sm:$0xff] }
 0x303   : > { %v11364_v45 = vadd.s32 %v3073_v63, %v3064_v27  ;;  %v3095_v29 = vadd.s32 %v3094_v50, %v3084_v6  ;;  %v2847_v56 = vsel %vm2840_vm5, %v2843_v7, %v2846_v47  ;;  %v5893_v40 = vsel %vm5890_vm6, %v12631_v43, %v7998_v62  ;;  %v12638_v6 = vld [vmem:[#allocation40_spill] sm:$0xff] }
 0x304   : > { %v2970_v10 = vmul.f32 %v2969_v9, %v2967_v54  ;;  %v3086_v24 = vshrl.u32 %v12626_v38, 16  ;;  %v11373_v53 = vsel %vm2837_vm14, nan, %v2847_v56  ;;  %v5894_v5 = vsel %vm5890_vm6, %v12632_v32, %v7999_v18 }
 0x305   : > { %v5910_v1 = vsel %vm5907_vm10, %v5893_v40, %v8003_v57  ;;  %v11378_v39 = vadd.s32 %v3089_v22, %v3085_v12  ;;  %v12633_v55 = vand.u32 2147483647, %v12630_v41  ;;  %v5911_v38 = vsel %vm5907_vm10, %v5894_v5, %v8004_v19 }
 0x306   : > { %v2971_v20 = vxor.u32 2147483648, %v2970_v10  ;;  %v3096_v59 = vadd.s32 %v3095_v29, %v3086_v24  ;;  %v11387_v37 = vpack.c.bf16 %v5911_v38, %v5910_v1  ;;  %v12636_v21 = vshll.u32 %v11065_v23, 16 }
 0x307   : > { %vm11382_vm2 = vcmp.le.f32.partialorder %v12633_v55, 0.7853982  ;;  %vm3099_vm7 = vc.u32 %v11364_v45, %v11378_v39  ;;  %v3238_v12 = vshll.u32 %v11070_v15, 16  ;;  %v2974_v63 = vsel %vm2851_vm1, %v2973_v34, %v11265_v11 }
 0x308   : > { %vm3224_vm3 = vc.u32 %v11320_v3, %v12636_v21  ;;  %v2972_v22 = vsel %vm2851_vm1, %v2971_v20, %v2970_v10  ;;  %v3100_v46 = vadd.s32 1, %v3096_v59  ;;  %7619 = vmatmul.msk.bf16.gmra.mxu0 %vm5956_vm4, %v11387_v37  ;;  %v3217_v3 = vshrl.u32 %v11038_v48, 16 }
 0x309   : > { %v3225_v51 = vsel %vm3224_vm3, 1, %v12271_v25  ;;  %v2975_v27 = vsel %vm11382_vm2, %v12630_v41, %v2972_v22  ;;  %v3240_v47 = vshll.u32 %v11057_v44, 16  ;;  %vm3242_vm15 = vc.u32 %v11051_v60, %v3238_v12 }
 0x30a   : > { %v3227_v50 = vadd.s32 %v3225_v51, %v11324_v61  ;;  %v2977_v9 = vmul.f32 %v2975_v27, %v2975_v27  ;;  %v3101_v0 = vsel %vm3099_vm7, %v3100_v46, %v3096_v59  ;;  %v3244_v11 = vadd.s32 %v3238_v12, %v11051_v60 }
 0x30b   : > { %v2976_v34 = vsel %vm11382_vm2, 0, %v2974_v63  ;;  %v12639_v54 = vmul.u32 %v12637_v36, %v12638_v6  ;;  %v3243_v48 = vsel %vm3242_vm15, 1, %v12271_v25  ;;  %vm12640_vm0 = vcmp.lt.s32.totalorder %v10541_v58, 3 }
 0x30c   : > { %v3228_v62 = vadd.s32 %v3227_v50, %v3217_v3  ;;  %v2978_v19 = vmul.f32 -0.001358992, %v2977_v9  ;;  %v2985_v61 = vmul.f32 -0.00019511016, %v2977_v9  ;;  %v3245_v7 = vadd.s32 %v3243_v48, %v11075_v13 }
 0x30d   : > { %v3102_v18 = vadd.s32 %v3101_v0, %v12639_v54  ;;  %vm3246_vm12 = vc.u32 %v3244_v11, %v3240_v47  ;;  %v3197_v60 = vsel %vm12640_vm0, %v10648_v33, %v11046_v26  ;;  %v3219_v29 = vshrl.u32 %v11065_v23, 16 }
 0x30e   : > { %v3247_v56 = vsel %vm3246_vm12, 1, %v12271_v25  ;;  %v2979_v10 = vadd.f32 0.041655596, %v2978_v19  ;;  %v2986_v43 = vadd.f32 0.008332121, %v2985_v61  ;;  %v3239_v40 = vshrl.u32 %v11070_v15, 16 }
 0x30f   : > { %v3103_v57 = vadd.s32 536870912, %v3102_v18  ;;  %v3249_v24 = vadd.s32 %v3247_v56, %v3245_v7  ;;  %v2993_v32 = vadd.s32 3, %v2976_v34  ;;  %v11427_v13 = vadd.s32 %v3228_v62, %v3219_v29 }
 0x310   : > { %v2980_v1 = vmul.f32 %v2979_v10, %v2977_v9  ;;  %v2987_v55 = vmul.f32 %v2986_v43, %v2977_v9  ;;  %v3241_v14 = vshrl.u32 %v11057_v44, 16  ;;  %v3198_v26 = vsel %vm3192_vm9, %v10878_v49, %v3197_v60  ;;  %v12641_v44 = vld [vmem:[#allocation68_spill] sm:$0xff] }
 0x311   : > { %v11425_v5 = vshrl.u32 %v3103_v57, 30  ;;  %v3250_v33 = vadd.s32 %v3249_v24, %v3239_v40  ;;  %v5306_v25 = vand.u32 3, %v11263_v30  ;;  %v11435_v15 = vadd.s32 %v3244_v11, %v3240_v47 }
 0x312   : > { %v2981_v20 = vadd.f32 -0.4999988, %v2980_v1  ;;  %v2988_v38 = vadd.f32 -0.16666654, %v2987_v55  ;;  %v2994_v21 = vand.u32 3, %v2993_v32  ;;  %v5460_v12 = vand.u32 3, %v2976_v34 }
 0x313   : > { %v3105_v23 = vshll.u32 %v11425_v5, 30  ;;  %v3251_v59 = vadd.s32 %v3250_v33, %v3241_v14  ;;  %vm3254_vm5 = vc.u32 %v11427_v13, %v11435_v15  ;;  %v3252_v63 = vmul.u32 %v12641_v44, %v3198_v26 }
 0x314   : > { %v2982_v46 = vmul.f32 %v2981_v20, %v2977_v9  ;;  %v2989_v58 = vmul.f32 %v2988_v38, %v2977_v9  ;;  %vm2992_vm9 = vweird.f32 %v12630_v41  ;;  %vm5307_vm11 = vcmp.lt.s32.totalorder %v5306_v25, 2  ;;  %v12642_v41 = vld [vmem:[#allocation33_spill] sm:$0xff] }
 0x315   : > { %v3106_v22 = vsub.s32 %v3102_v18, %v3105_v23  ;;  %v3255_v49 = vadd.s32 1, %v3251_v59  ;;  %vm5308_vm13 = vcmp.eq.s32.totalorder %v5306_v25, 0  ;;  %vm5311_vm1 = vcmp.eq.s32.totalorder %v5306_v25, 2 }
 0x316   : > { %v2983_v51 = vadd.f32 1.0, %v2982_v46  ;;  %v2990_v3 = vadd.f32 1.0, %v2989_v58  ;;  %vm2995_vm2 = vcmp.lt.s32.totalorder %v2994_v21, 2  ;;  %vm5461_vm7 = vcmp.lt.s32.totalorder %v5460_v12, 2 }
 0x317   : > { %vm3107_vm8 = vcmp.lt.s32.totalorder %v3106_v22, 0  ;;  %v3108_v30 = vsub.s32 0, %v3106_v22  ;;  %v3256_v50 = vsel %vm3254_vm5, %v3255_v49, %v3251_v59  ;;  %v5310_v9 = vsel %vm5308_vm13, %v11340_v2, %v2842_v28 }
 0x318   : > { %v3257_v0 = vadd.s32 %v3256_v50, %v3252_v63  ;;  %v2991_v11 = vmul.f32 %v2990_v3, %v2975_v27  ;;  %v3000_v34 = vxor.u32 2147483648, %v2983_v51  ;;  %vm2996_vm3 = vcmp.eq.s32.totalorder %v2994_v21, 0 }
 0x319   : > { %v3109_v47 = vsel %vm3107_vm8, %v3108_v30, %v3106_v22  ;;  %vm2999_vm15 = vcmp.eq.s32.totalorder %v2994_v21, 2  ;;  %vm5462_vm12 = vcmp.eq.s32.totalorder %v5460_v12, 0  ;;  %v5313_v18 = vsel %vm5311_vm1, %v2845_v52, %v11347_v31 }
 0x31a   : > { %v3110_v36 = vclz %v3109_v47  ;;  %v3258_v6 = vadd.s32 536870912, %v3257_v0  ;;  %v2997_v54 = vxor.u32 2147483648, %v2991_v11  ;;  %v3001_v62 = vsel %vm2999_vm15, %v3000_v34, %v2991_v11 }
 0x31b   : > { %v5314_v19 = vsel %vm5307_vm11, %v5310_v9, %v5313_v18  ;;  %vm5465_vm0 = vcmp.eq.s32.totalorder %v5460_v12, 2  ;;  %v3098_v27 = vadd.s32 %v11378_v39, %v11364_v45  ;;  %v3128_v17 = vsub.s32 4, %v11425_v5  ;;  %v12644_v9 = vld [vmem:[#allocation47_spill] sm:$0xff] }
 0x31c   : > { %v7557_v48 = vadd.s32 4294967294, %v3110_v36  ;;  %v11450_v61 = vshrl.u32 %v3258_v6, 30  ;;  %v5464_v28 = vsel %vm5462_vm12, %v2983_v51, %v2997_v54  ;;  %v5467_v7 = vsel %vm5465_vm0, %v3000_v34, %v2991_v11 }
 0x31d   : > { %v2998_v60 = vsel %vm2996_vm3, %v2983_v51, %v2997_v54  ;;  %v5468_v57 = vsel %vm5461_vm7, %v5464_v28, %v5467_v7  ;;  %v5315_v52 = vsel %vm2837_vm14, nan, %v5314_v19  ;;  %vm3006_vm14 = vcmp.lt.s32.totalorder %v12642_v41, 0  ;;  %v8012_v19 = vpop.permute.xlu1 %8011  ;;  %v8148_v28 = vld [vmem:[%s8274_s28 + $0x78] sm:$0xff] }
 0x31e   : > { %vm7558_vm5 = vcmp.lt.s32.totalorder %v7557_v48, 0  ;;  %v3002_v29 = vsel %vm2995_vm2, %v2998_v60, %v3001_v62  ;;  %v3260_v31 = vshll.u32 %v11450_v61, 30  ;;  %v5469_v56 = vsel %vm2992_vm9, nan, %v5468_v57  ;;  %v7869_v60 = vld [vmem:[%s12061_s4 + $0x38] sm:$0xff] }
 0x31f   : > { %v3113_v2 = vsel %vm7558_vm5, 0, %v7557_v48  ;;  %v11461_v45 = vsel %vm2992_vm9, nan, %v3002_v29  ;;  %v8045_v10 = vpack.i.bf16 %v5469_v56, %v5315_v52  ;;  %v3129_v20 = vsel %vm3006_vm14, %v3128_v17, %v11425_v5  ;;  %v8007_v48 = vpop.permute.xlu0 %8006  ;;  %v8017_v52 = vpop.permute.xlu2 %8016  ;;  %6129 = vmatpush.bf16.msrb.mxu1 %v7869_v60 }
 0x320   : > { %v3114_v39 = vsub.s32 32, %v3113_v2  ;;  %v3118_v43 = vsub.s32 4294967266, %v3113_v2  ;;  %v3261_v40 = vsub.s32 %v3257_v0, %v3260_v31  ;;  %v3115_v32 = vshll.u32 %v3106_v22, %v3113_v2 }
 0x321   : > { %8046 = vrot.lane.b32.xlu2 %v8045_v10, %s8167_s17  ;;  %v12643_v12 = vand.u32 2147483647, %v12642_v41  ;;  %v3253_v46 = vadd.s32 %v11435_v15, %v11427_v13  ;;  %v3283_v15 = vsub.s32 4, %v11450_v61  ;;  %vm3161_vm8 = vcmp.lt.s32.totalorder %v12644_v9, 0 }
 0x322   : > { %v3116_v24 = vshrl.u32 %v3098_v27, %v3114_v39  ;;  %v3119_v1 = vadd.s32 127, %v3118_v43  ;;  %vm3262_vm11 = vcmp.lt.s32.totalorder %v3261_v40, 0  ;;  %v3263_v55 = vsub.s32 0, %v3261_v40  ;;  %v8147_v27 = vld [vmem:[%s8274_s28 + $0x70] sm:$0xff] }
 0x323   : > { %vm3005_vm9 = vcmp.le.f32.partialorder %v12643_v12, 0.7853982  ;;  %v8060_v7 = vpack.i.bf16 %v8148_v28, %v8147_v27  ;;  %v8009_v29 = vunpack.i.h.bf16 %v8007_v48  ;;  %v8008_v2 = vunpack.i.l.bf16 %v8007_v48  ;;  %v12648_v28 = vld [vmem:[#allocation62_spill] sm:$0xff] }
 0x324   : > { %v3117_v14 = vor.u32 %v3116_v24, %v3115_v32  ;;  %v3120_v33 = vshll.u32 %v3119_v1, 23  ;;  %v3264_v26 = vsel %vm3262_vm11, %v3263_v55, %v3261_v40  ;;  %v11471_v44 = vsel %vm3005_vm9, 0, %v3129_v20  ;;  %v12645_v24 = vld [vmem:[#allocation45_spill] sm:$0xff]  ;;  %v12646_v1 = vld [vmem:[#allocation18_spill] sm:$0xff] }
 0x325   : > { %v3265_v25 = vclz %v3264_v26  ;;  %v3148_v51 = vadd.s32 3, %v11471_v44  ;;  %v8014_v31 = vunpack.i.h.bf16 %v8012_v19  ;;  %v3284_v10 = vsel %vm3161_vm8, %v3283_v15, %v11450_v61 }
 0x326   : > { %v3121_v23 = vor.u32 4788187, %v3120_v33  ;;  %v3124_v21 = vcvt.s32.f32 %v3117_v14  ;;  %v8013_v43 = vunpack.i.l.bf16 %v8012_v19  ;;  %v5896_v32 = vsel %vm5890_vm6, %v12645_v24, %v8009_v29  ;;  %v12649_v29 = vld [vmem:[#allocation75_spill] sm:$0xff] }
 0x327   : > { %v7560_v38 = vadd.s32 4294967294, %v3265_v25  ;;  %v11485_v36 = vand.u32 3, %v3148_v51  ;;  %v5895_v55 = vsel %vm5890_vm6, %v12646_v1, %v8008_v2  ;;  %v8019_v17 = vunpack.i.h.bf16 %v8017_v52  ;;  %v8022_v51 = vpop.permute.xlu0 %8021 }
 0x328   : > { %v3122_v59 = vand.u32 2147483647, %v3121_v23  ;;  %v8018_v26 = vunpack.i.l.bf16 %v8017_v52  ;;  %v5912_v25 = vsel %vm5907_vm10, %v5895_v55, %v8013_v43  ;;  %v5913_v61 = vsel %vm5907_vm10, %v5896_v32, %v8014_v31 }
 0x329   : > { %vm7561_vm13 = vcmp.lt.s32.totalorder %v7560_v38, 0  ;;  %8061 = vrot.lane.b32.xlu2 %v8060_v7, %s8166_s0  ;;  %vm3154_vm2 = vcmp.eq.s32.totalorder %v11485_v36, 2  ;;  %vm3151_vm7 = vcmp.eq.s32.totalorder %v11485_v36, 0  ;;  %vm3150_vm3 = vcmp.lt.s32.totalorder %v11485_v36, 2 }
 0x32a   : > { %v3125_v22 = vmul.f32 %v3124_v21, %v3122_v59  ;;  %v3268_v63 = vsel %vm7561_vm13, 0, %v7560_v38  ;;  %v12647_v59 = vand.u32 2147483647, %v12644_v9  ;;  %v11504_v21 = vpack.c.bf16 %v5913_v61, %v5912_v25 }
 0x32b   : > { %v3269_v58 = vsub.s32 32, %v3268_v63  ;;  %v3273_v49 = vsub.s32 4294967266, %v3268_v63  ;;  %v3270_v5 = vshll.u32 %v3261_v40, %v3268_v63  ;;  %v5898_v63 = vsel %vm5890_vm6, %v10844_v42, %v8019_v17 }
 0x32c   : > { %v3126_v30 = vxor.u32 2147483648, %v3125_v22  ;;  %vm3160_vm1 = vcmp.le.f32.partialorder %v12647_v59, 0.7853982  ;;  %7620 = vmatmul.msk.bf16.vlgmr.msra.gmra.mxu1 %vm5956_vm4, %v11504_v21  ;;  %vm3147_vm15 = vweird.f32 %v12642_v41 }
 0x32d   : > { %v3271_v3 = vshrl.u32 %v3253_v46, %v3269_v58  ;;  %v3274_v50 = vadd.s32 127, %v3273_v49 }
 0x32e   : > { %v3127_v47 = vsel %vm3006_vm14, %v3126_v30, %v3125_v22  ;;  %v3286_v22 = vsel %vm3160_vm1, 0, %v3284_v10  ;;  %v5897_v30 = vsel %vm5890_vm6, %v10810_v4, %v8018_v26 }
 0x32f   : > { %v11479_v0 = vsel %vm3005_vm9, %v12642_v41, %v3127_v47  ;;  %v3272_v11 = vor.u32 %v3271_v3, %v3270_v5  ;;  %v3275_v34 = vshll.u32 %v3274_v50, 23  ;;  %v8027_v5 = vpop.permute.xlu1 %8026  ;;  %v8024_v50 = vunpack.i.h.bf16 %v8022_v51  ;;  %v7866_v41 = vld [vmem:[%s12061_s4 + $0x20] sm:$0xff] }
 0x330   : > { %v3132_v13 = vmul.f32 %v11479_v0, %v11479_v0  ;;  %v8023_v47 = vunpack.i.l.bf16 %v8022_v51  ;;  %v8028_v42 = vunpack.i.l.bf16 %v8027_v5 }
 0x331   : > { %v3276_v6 = vor.u32 4788187, %v3275_v34  ;;  %v3279_v62 = vcvt.s32.f32 %v3272_v11  ;;  %v8029_v11 = vunpack.i.h.bf16 %v8027_v5  ;;  %v8032_v34 = vpop.permute.xlu2 %8031  ;;  %v5915_v4 = vsel %vm5907_vm10, %v5898_v63, %v8024_v50 }
 0x332   : > { %v3133_v54 = vmul.f32 -0.001358992, %v3132_v13  ;;  %v3140_v18 = vmul.f32 -0.00019511016, %v3132_v13  ;;  %v5899_v7 = vsel %vm5890_vm6, %v12648_v28, %v8028_v42  ;;  %v8033_v31 = vunpack.i.l.bf16 %v8032_v34  ;;  %v7865_v42 = vld [vmem:[%s12061_s4 + $0x18] sm:$0xff] }
 0x333   : > { %v3277_v57 = vand.u32 2147483647, %v3276_v6  ;;  %v5900_v2 = vsel %vm5890_vm6, %v12649_v29, %v8029_v11  ;;  %v11567_v28 = vld [vmem:[%s12060_s3] ss:$0 sm:$0xff] }
 0x334   : > { %v3134_v56 = vadd.f32 0.041655596, %v3133_v54  ;;  %v3141_v39 = vadd.f32 0.008332121, %v3140_v18  ;;  %v8034_v54 = vunpack.i.h.bf16 %v8032_v34  ;;  %v5916_v43 = vsel %vm5907_vm10, %v5899_v7, %v8033_v31  ;;  %v7868_v34 = vld [vmem:[%s12061_s4 + $0x30] sm:$0xff] }
 0x335   : > { %v3280_v40 = vmul.f32 %v3279_v62, %v3277_v57  ;;  %v5914_v62 = vsel %vm5907_vm10, %v5897_v30, %v8023_v47  ;;  %6130 = vmatpush.bf16.msrb.mxu1 %v7868_v34 }
 0x336   : > { %v3135_v14 = vmul.f32 %v3134_v56, %v3132_v13  ;;  %v3142_v33 = vmul.f32 %v3141_v39, %v3132_v13  ;;  %v11519_v27 = vpack.c.bf16 %v5915_v4, %v5914_v62  ;;  %v5917_v39 = vsel %vm5907_vm10, %v5900_v2, %v8034_v54 }
 0x337   : > { %v3281_v23 = vxor.u32 2147483648, %v3280_v40  ;;  %v11531_v32 = vpack.c.bf16 %v5917_v39, %v5916_v43 }
 0x338   : > { %v3136_v20 = vadd.f32 -0.4999988, %v3135_v14  ;;  %v3143_v38 = vadd.f32 -0.16666654, %v3142_v33  ;;  %v5614_v14 = vand.u32 3, %v11471_v44 }
 0x339   : > { %v3282_v12 = vsel %vm3161_vm8, %v3281_v23, %v3280_v40  ;;  %v3303_v40 = vadd.s32 3, %v3286_v22  ;;  %7622 = vmatmul.msk.bf16.vlgmr.msra.gmra.mxu2 %vm5956_vm4, %v11531_v32 }
 0x33a   : > { %v3137_v46 = vmul.f32 %v3136_v20, %v3132_v13  ;;  %v3144_v58 = vmul.f32 %v3143_v38, %v3132_v13  ;;  %v3285_v49 = vsel %vm3160_vm1, %v12644_v9, %v3282_v12  ;;  %v5768_v20 = vand.u32 3, %v3286_v22 }
 0x33b   : > { %v3287_v3 = vmul.f32 %v3285_v49, %v3285_v49  ;;  %v3304_v25 = vand.u32 3, %v3303_v40  ;;  %vm5616_vm12 = vcmp.eq.s32.totalorder %v5614_v14, 0  ;;  %vm5615_vm5 = vcmp.lt.s32.totalorder %v5614_v14, 2 }
 0x33c   : > { %v3138_v15 = vadd.f32 1.0, %v3137_v46  ;;  %v3145_v6 = vadd.f32 1.0, %v3144_v58  ;;  %vm5619_vm11 = vcmp.eq.s32.totalorder %v5614_v14, 2  ;;  %7621 = vmatmul.msk.bf16.gmra.mxu1 %vm5956_vm4, %v11519_v27  ;;  %vm5769_vm14 = vcmp.lt.s32.totalorder %v5768_v20, 2 }
 0x33d   : > { %v3288_v13 = vmul.f32 -0.001358992, %v3287_v3  ;;  %v3295_v18 = vmul.f32 -0.00019511016, %v3287_v3  ;;  %vm3309_vm0 = vcmp.eq.s32.totalorder %v3304_v25, 2  ;;  %vm3306_vm9 = vcmp.eq.s32.totalorder %v3304_v25, 0 }
 0x33e   : > { %v3146_v48 = vmul.f32 %v3145_v6, %v11479_v0  ;;  %v3155_v19 = vxor.u32 2147483648, %v3138_v15  ;;  %vm5770_vm13 = vcmp.eq.s32.totalorder %v5768_v20, 0  ;;  %vm5773_vm8 = vcmp.eq.s32.totalorder %v5768_v20, 2 }
 0x33f   : > { %v3289_v60 = vadd.f32 0.041655596, %v3288_v13  ;;  %v3296_v57 = vadd.f32 0.008332121, %v3295_v18  ;;  %vm3305_vm1 = vcmp.lt.s32.totalorder %v3304_v25, 2 }
 0x340   : > { %v3152_v52 = vxor.u32 2147483648, %v3146_v48  ;;  %v3156_v56 = vsel %vm3154_vm2, %v3155_v19, %v3146_v48  ;;  %v5621_v46 = vsel %vm5619_vm11, %v3155_v19, %v3146_v48  ;;  %vm3302_vm2 = vweird.f32 %v12644_v9  ;;  %v7867_v9 = vld [vmem:[%s12061_s4 + $0x28] sm:$0xff]  ;;  %v7864_v48 = vld [vmem:[%s12061_s4 + $0x10] sm:$0xff] }
 0x341   : > { %v3290_v0 = vmul.f32 %v3289_v60, %v3287_v3  ;;  %v3297_v10 = vmul.f32 %v3296_v57, %v3287_v3  ;;  %6131 = vmatpush.bf16.msrb.mxu1 %v7867_v9 }
 0x342   : > { %v3153_v24 = vsel %vm3151_vm7, %v3138_v15, %v3152_v52  ;;  %v5618_v12 = vsel %vm5616_vm12, %v3138_v15, %v3152_v52  ;;  %v7863_v52 = vld [vmem:[%s12061_s4 + $0x8] sm:$0xff] }
 0x343   : > { %v3291_v1 = vadd.f32 -0.4999988, %v3290_v0  ;;  %v3298_v55 = vadd.f32 -0.16666654, %v3297_v10  ;;  %v3157_v17 = vsel %vm3150_vm3, %v3153_v24, %v3156_v56  ;;  %v5622_v58 = vsel %vm5615_vm5, %v5618_v12, %v5621_v46 }
 0x344   : > { %v11537_v33 = vsel %vm3147_vm15, nan, %v3157_v17  ;;  %v5623_v50 = vsel %vm3147_vm15, nan, %v5622_v58  ;;  %v7879_v58 = vld [vmem:[%s12063_s6 + $0x48] sm:$0xff] }
 0x345   : > { %v3292_v26 = vmul.f32 %v3291_v1, %v3287_v3  ;;  %v3299_v36 = vmul.f32 %v3298_v55, %v3287_v3  ;;  %6132 = vmatpush.bf16.msrb.mxu1 %v7866_v41 }
 0x347   : > { %v3293_v23 = vadd.f32 1.0, %v3292_v26  ;;  %v3300_v61 = vadd.f32 1.0, %v3299_v36 }
 0x348   : > { %v8042_v6 = vpop.permute.xlu1 %8041 }
 0x349   : > { %v3301_v38 = vmul.f32 %v3300_v61, %v3285_v49  ;;  %v3310_v59 = vxor.u32 2147483648, %v3293_v23  ;;  %v8044_v13 = vunpack.i.h.bf16 %v8042_v6  ;;  %v8043_v18 = vunpack.i.l.bf16 %v8042_v6  ;;  %6133 = vmatpush.bf16.msrb.mxu1 %v7865_v42  ;;  %v6214_v61 = vld [vmem:[%s12063_s6 + $0x50] sm:$0xf] }
 0x34a   : > { %v6268_v20 = vunpack.c.l.b16 %v6214_v61  ;;  %v7872_v61 = vld [vmem:[%s12063_s6 + $0x10] sm:$0xff] }
 0x34b   : > { %v3307_v44 = vxor.u32 2147483648, %v3301_v38  ;;  %v3311_v63 = vsel %vm3309_vm0, %v3310_v59, %v3301_v38  ;;  %v5775_v49 = vsel %vm5773_vm8, %v3310_v59, %v3301_v38 }
 0x34c   : > { %v6279_v38 = vpack.c.b16 %v6268_v20, %v6268_v20  ;;  %v11656_v20 = vld [vmem:[%s12062_s5] ss:$0 sm:$0xff] }
 0x34d   : > { %v3308_v22 = vsel %vm3306_vm9, %v3293_v23, %v3307_v44  ;;  %v5772_v30 = vsel %vm5770_vm13, %v3293_v23, %v3307_v44  ;;  %6134 = vmatpush.bf16.msrb.mxu1 %v7864_v48 }
 0x34e   : > { %v3312_v51 = vsel %vm3305_vm1, %v3308_v22, %v3311_v63  ;;  %v5776_v5 = vsel %vm5769_vm14, %v5772_v30, %v5775_v49  ;;  %v7878_v30 = vld [vmem:[%s12063_s6 + $0x40] sm:$0xff] }
 0x34f   : > { %v11544_v3 = vsel %vm3302_vm2, nan, %v3312_v51  ;;  %v5777_v47 = vsel %vm3302_vm2, nan, %v5776_v5 }
 0x350   : > { %v8055_v11 = vpack.i.bf16 %v5777_v47, %v5623_v50 }
 0x351   : > { %6135 = vmatpush.bf16.msrb.mxu1 %v7863_v52 }
 0x352   : > { %8056 = vrot.lane.b32.xlu1 %v8055_v11, %s8167_s17 }
 0x358   : > { %v5997_v15 = vpop.f32.mrf.mxu0 }
 0x359   : > { %v5998_v56 = vadd.f32 %v11567_v28, %v5997_v15 }
 0x35b   : > { %v6037_v39 = vmax.f32 %v5998_v56, 0.0 }
 0x360   : > { %v5999_v19 = vpop.f32.mrf.mxu0 }
 0x361   : > { %v6000_v2 = vadd.f32 %v11567_v28, %v5999_v19 }
 0x369   : > { %v8037_v54 = vpop.permute.xlu0 %8036 }
 0x36a   : > { %v8039_v62 = vunpack.i.h.bf16 %v8037_v54  ;;  %v8038_v4 = vunpack.i.l.bf16 %v8037_v54 }
 0x36c   : > { %v5902_v7 = vsel %vm5890_vm6, %v11311_v8, %v8039_v62  ;;  %v5901_v60 = vsel %vm5890_vm6, %v11258_v16, %v8038_v4  ;;  %v6038_v8 = vmax.f32 %v6000_v2, 0.0  ;;  %v7862_v16 = vld [vmem:[%s12061_s4] sm:$0xff] }
 0x36d   : > { %v5918_v57 = vsel %vm5907_vm10, %v5901_v60, %v8043_v18  ;;  %v5919_v29 = vsel %vm5907_vm10, %v5902_v7, %v8044_v13  ;;  %6136 = vmatpush.bf16.msrb.mxu1 %v7862_v16 }
 0x36e   : > { %v11576_v31 = vpack.c.bf16 %v5919_v29, %v5918_v57  ;;  %v6070_v0 = vpack.c.bf16 %v6038_v8, %v6037_v39 }
 0x370   : > { %7623 = vmatmul.msk.bf16.vlgmr.msra.gmra.mxu3 %vm5956_vm4, %v11576_v31  ;;  %6137 = vmatmul.bf16.vlgmr.msrb.gmra.mxu1 %v6070_v0 }
 0x371   : > { %v8052_v10 = vpop.permute.xlu0 %8051 }
 0x372   : > { %v8054_v40 = vunpack.i.h.bf16 %v8052_v10  ;;  %v8053_v24 = vunpack.i.l.bf16 %v8052_v10 }
 0x37b   : > { %v8047_v43 = vpop.permute.xlu2 %8046 }
 0x37c   : > { %v8049_v1 = vunpack.i.h.bf16 %v8047_v43  ;;  %v8048_v55 = vunpack.i.l.bf16 %v8047_v43  ;;  %v7875_v43 = vld [vmem:[%s12063_s6 + $0x28] sm:$0xff] }
 0x37e   : > { %v5903_v17 = vsel %vm5890_vm6, %v11373_v53, %v8048_v55  ;;  %v5904_v14 = vsel %vm5890_vm6, %v11461_v45, %v8049_v1  ;;  %v12650_v45 = vld [vmem:[#allocation70_spill] sm:$0xff] }
 0x37f   : > { %v5920_v26 = vsel %vm5907_vm10, %v5903_v17, %v8053_v24  ;;  %v5921_v36 = vsel %vm5907_vm10, %v5904_v14, %v8054_v40  ;;  %v6291_v12 = vand.u32 %v6279_v38, %v12650_v45  ;;  %v7874_v1 = vld [vmem:[%s12063_s6 + $0x20] sm:$0xff] }
 0x380   : > { %v11593_v25 = vpack.c.bf16 %v5921_v36, %v5920_v26  ;;  %v7873_v26 = vld [vmem:[%s12063_s6 + $0x18] sm:$0xff] }
 0x381   : > { %6347 = vmatpush.bf16.msrb.mxu3 %v6291_v12 }
 0x382   : > { %7624 = vmatmul.msk.bf16.gmra.mxu3 %vm5956_vm4, %v11593_v25 }
 0x383   : > { %v8062_v51 = vpop.permute.xlu2 %8061 }
 0x384   : > { %v8064_v47 = vunpack.i.h.bf16 %v8062_v51  ;;  %v8063_v11 = vunpack.i.l.bf16 %v8062_v51 }
 0x385   : > { %v6002_v23 = vpop.f32.mrf.mxu0  ;;  %6348 = vmatpush.bf16.msrb.mxu3 %v7879_v58 }
 0x386   : > { %v6003_v53 = vadd.f32 %v11567_v28, %v6002_v23 }
 0x388   : > { %v6039_v63 = vmax.f32 %v6003_v53, 0.0 }
 0x389   : > { %6349 = vmatpush.bf16.msrb.mxu3 %v7878_v30 }
 0x38d   : > { %v6004_v59 = vpop.f32.mrf.mxu0 }
 0x38e   : > { %v6005_v44 = vadd.f32 %v11567_v28, %v6004_v59 }
 0x390   : > { %v6040_v46 = vmax.f32 %v6005_v44, 0.0 }
 0x392   : > { %v6071_v22 = vpack.c.bf16 %v6040_v46, %v6039_v63  ;;  %v7870_v63 = vld [vmem:[%s12063_s6] sm:$0xff] }
 0x394   : > { %6142 = vmatmul.bf16.gmra.mxu1 %v6071_v22 }
 0x3a9   : > { %v6007_v49 = vpop.f32.mrf.mxu1 }
 0x3aa   : > { %v6008_v41 = vadd.f32 %v11567_v28, %v6007_v49 }
 0x3ac   : > { %v6041_v4 = vmax.f32 %v6008_v41, 0.0 }
 0x3b1   : > { %v6009_v5 = vpop.f32.mrf.mxu1 }
 0x3b2   : > { %v6010_v34 = vadd.f32 %v11567_v28, %v6009_v5 }
 0x3b4   : > { %v6042_v54 = vmax.f32 %v6010_v34, 0.0 }
 0x3b6   : > { %v6072_v48 = vpack.c.bf16 %v6042_v54, %v6041_v4 }
 0x3b8   : > { %6147 = vmatmul.bf16.gmra.mxu1 %v6072_v48 }
 0x3b9   : > { %v6012_v19 = vpop.f32.mrf.mxu1 }
 0x3ba   : > { %v6013_v60 = vadd.f32 %v11567_v28, %v6012_v19 }
 0x3bc   : > { %v6043_v57 = vmax.f32 %v6013_v60, 0.0  ;;  %v6017_v2 = vpop.f32.mrf.mxu2 }
 0x3bd   : > { %v6018_v8 = vadd.f32 %v11567_v28, %v6017_v2 }
 0x3bf   : > { %v6045_v39 = vmax.f32 %v6018_v8, 0.0 }
 0x3c1   : > { %v6014_v7 = vpop.f32.mrf.mxu1 }
 0x3c4   : > { %v8057_v50 = vpop.permute.xlu1 %8056  ;;  %v6019_v52 = vpop.f32.mrf.mxu2 }
 0x3c5   : > { %v8059_v9 = vunpack.i.h.bf16 %v8057_v50  ;;  %v8058_v15 = vunpack.i.l.bf16 %v8057_v50  ;;  %v6020_v56 = vadd.f32 %v11567_v28, %v6019_v52 }
 0x3c7   : > { %v5906_v6 = vsel %vm5890_vm6, %v11544_v3, %v8059_v9  ;;  %v5905_v42 = vsel %vm5890_vm6, %v11537_v33, %v8058_v15  ;;  %v6015_v3 = vadd.f32 %v11567_v28, %v6014_v7  ;;  %v6046_v16 = vmax.f32 %v6020_v56, 0.0 }
 0x3c8   : > { %v5922_v13 = vsel %vm5907_vm10, %v5905_v42, %v8063_v11  ;;  %v5923_v18 = vsel %vm5907_vm10, %v5906_v6, %v8064_v47  ;;  %vm6973_vm6 = vcmask 523264  }
 0x3c9   : > { %v11617_v62 = vpack.c.bf16 %v5923_v18, %v5922_v13  ;;  %v6044_v33 = vmax.f32 %v6015_v3, 0.0  ;;  %v6074_v0 = vpack.c.bf16 %v6046_v16, %v6045_v39 }
 0x3cb   : > { %7625 = vmatmul.msk.bf16.gmra.mxu3 %vm5956_vm4, %v11617_v62  ;;  %v6073_v29 = vpack.c.bf16 %v6044_v33, %v6043_v57 }
 0x3cd   : > { %6152 = vmatmul.bf16.gmra.mxu1 %v6073_v29 }
 0x3db   : > { %7698 = vmatmul.msk.bf16.vlgmr.msrb.gmra.mxu3 %vm5956_vm4, %v11200_v35  ;;  %v7877_v35 = vld [vmem:[%s12063_s6 + $0x38] sm:$0xff] }
 0x3dc   : > { %6293 = vmatpush.bf16.msrb.mxu2 %v7877_v35 }
 0x3dd   : > { %6157 = vmatmul.bf16.gmra.mxu1 %v6074_v0 }
 0x3eb   : > { %7699 = vmatmul.msk.bf16.gmra.mxu3 %vm5956_vm4, %v11387_v37  ;;  %v7876_v37 = vld [vmem:[%s12063_s6 + $0x30] sm:$0xff] }
 0x3ec   : > { %6294 = vmatpush.bf16.msrb.mxu2 %v7876_v37  ;;  %v7887_v37 = vld [vmem:[%s12065_s8 + $0x38] sm:$0xff] }
 0x3ed   : > { %v6138_v14 = vpop.f32.mrf.mxu1  ;;  %6483 = vmatpush.bf16.msrb.mxu0 %v7887_v37 }
 0x3ee   : > { %v6139_v12 = vadd.f32 %v11656_v20, %v6138_v14  ;;  %v7885_v14 = vld [vmem:[%s12065_s8 + $0x28] sm:$0xff] }
 0x3f0   : > { %6295 = vmatpush.bf16.msrb.mxu2 %v7875_v43  ;;  %v6178_v22 = vmax.f32 %v6139_v12, 0.0 }
 0x3f3   : > { %v6022_v10 = vpop.f32.mrf.mxu3 }
 0x3f4   : > { %v6023_v24 = vadd.f32 %v11567_v28, %v6022_v10  ;;  %6296 = vmatpush.bf16.msrb.mxu2 %v7874_v1 }
 0x3f5   : > { %v6140_v53 = vpop.f32.mrf.mxu1 }
 0x3f6   : > { %v6047_v17 = vmax.f32 %v6023_v24, 0.0  ;;  %v6141_v59 = vadd.f32 %v11656_v20, %v6140_v53 }
 0x3f8   : > { %6297 = vmatpush.bf16.msrb.mxu2 %v7873_v26  ;;  %v6179_v46 = vmax.f32 %v6141_v59, 0.0 }
 0x3fa   : > { %v6216_v49 = vpack.c.bf16 %v6179_v46, %v6178_v22  ;;  %v7882_v46 = vld [vmem:[%s12065_s8 + $0x10] sm:$0xff] }
 0x3fb   : > { %7700 = vmatmul.msk.bf16.gmra.mxu3 %vm5956_vm4, %v11504_v21  ;;  %v6024_v40 = vpop.f32.mrf.mxu3 }
 0x3fc   : > { %v6025_v21 = vadd.f32 %v11567_v28, %v6024_v40  ;;  %6298 = vmatpush.bf16.msrb.mxu2 %v7872_v61 }
 0x3fe   : > { %v6048_v55 = vmax.f32 %v6025_v21, 0.0 }
 0x400   : > { %v6075_v36 = vpack.c.bf16 %v6048_v55, %v6047_v17  ;;  %v7886_v55 = vld [vmem:[%s12065_s8 + $0x30] sm:$0xff] }
 0x401   : > { %6484 = vmatpush.bf16.msrb.mxu0 %v7886_v55 }
 0x402   : > { %6162 = vmatmul.bf16.gmra.mxu1 %v6075_v36  ;;  %v7884_v36 = vld [vmem:[%s12065_s8 + $0x20] sm:$0xff] }
 0x405   : > { %v6027_v23 = vpop.f32.mrf.mxu3  ;;  %6485 = vmatpush.bf16.msrb.mxu0 %v7885_v14 }
 0x406   : > { %v6028_v44 = vadd.f32 %v11567_v28, %v6027_v23 }
 0x408   : > { %v6049_v30 = vmax.f32 %v6028_v44, 0.0 }
 0x409   : > { %6486 = vmatpush.bf16.msrb.mxu0 %v7884_v36 }
 0x40b   : > { %7701 = vmatmul.msk.bf16.gmra.mxu3 %vm5956_vm4, %v11519_v27  ;;  %v7871_v27 = vld [vmem:[%s12063_s6 + $0x8] sm:$0xff] }
 0x40c   : > { %6299 = vmatpush.bf16.msrb.mxu2 %v7871_v27  ;;  %v7883_v27 = vld [vmem:[%s12065_s8 + $0x18] sm:$0xff] }
 0x40d   : > { %v6029_v38 = vpop.f32.mrf.mxu3  ;;  %6487 = vmatpush.bf16.msrb.mxu0 %v7883_v27 }
 0x40e   : > { %v6030_v45 = vadd.f32 %v11567_v28, %v6029_v38  ;;  %v11707_v38 = vld [vmem:[%s12064_s7] ss:$0 sm:$0xff] }
 0x410   : > { %v6050_v58 = vmax.f32 %v6030_v45, 0.0  ;;  %6300 = vmatpush.bf16.msrb.mxu2 %v7870_v63 }
 0x411   : > { %v6143_v5 = vpop.f32.mrf.mxu1  ;;  %6488 = vmatpush.bf16.msrb.mxu0 %v7882_v46 }
 0x412   : > { %v6076_v51 = vpack.c.bf16 %v6050_v58, %v6049_v30  ;;  %v6144_v50 = vadd.f32 %v11656_v20, %v6143_v5  ;;  %v7881_v30 = vld [vmem:[%s12065_s8 + $0x8] sm:$0xff] }
 0x413   : > { %6301 = vmatmul.bf16.vlgmr.msrb.gmra.mxu2 %v6216_v49 }
 0x414   : > { %6167 = vmatmul.bf16.gmra.mxu1 %v6076_v51  ;;  %v6180_v34 = vmax.f32 %v6144_v50, 0.0 }
 0x415   : > { %6489 = vmatpush.bf16.msrb.mxu0 %v7881_v30  ;;  %v7898_v30 = vld [vmem:[%s12067_s10 + $0x54] sm:$0xf] }
 0x419   : > { %v6145_v47 = vpop.f32.mrf.mxu1 }
 0x41a   : > { %v6146_v11 = vadd.f32 %v11656_v20, %v6145_v47 }
 0x41b   : > { %7702 = vmatmul.msk.bf16.gmra.mxu3 %vm5956_vm4, %v11531_v32 }
 0x41c   : > { %v6181_v9 = vmax.f32 %v6146_v11, 0.0 }
 0x41e   : > { %v6217_v15 = vpack.c.bf16 %v6181_v9, %v6180_v34  ;;  %v7880_v34 = vld [vmem:[%s12065_s8] sm:$0xff] }
 0x41f   : > { %6490 = vmatpush.bf16.msrb.mxu0 %v7880_v34  ;;  %v7896_v34 = vld [vmem:[%s12067_s10 + $0x44] sm:$0xf] }
 0x423   : > { %6306 = vmatmul.bf16.gmra.mxu2 %v6217_v15 }
 0x42b   : > { %7703 = vmatmul.msk.bf16.gmra.mxu3 %vm5956_vm4, %v11576_v31 }
 0x435   : > { %v6148_v32 = vpop.f32.mrf.mxu1 }
 0x436   : > { %v6149_v31 = vadd.f32 %v11656_v20, %v6148_v32 }
 0x438   : > { %v6182_v54 = vmax.f32 %v6149_v31, 0.0 }
 0x43b   : > { %7704 = vmatmul.msk.bf16.gmra.mxu3 %vm5956_vm4, %v11593_v25 }
 0x43d   : > { %v6150_v6 = vpop.f32.mrf.mxu1 }
 0x43e   : > { %v6151_v42 = vadd.f32 %v11656_v20, %v6150_v6 }
 0x440   : > { %v6183_v13 = vmax.f32 %v6151_v42, 0.0 }
 0x442   : > { %v6218_v48 = vpack.c.bf16 %v6183_v13, %v6182_v54  ;;  %v7796_v13 = vld [vmem:[%s12067_s10 + $0x70] sm:$0xf] }
 0x444   : > { %6311 = vmatmul.bf16.gmra.mxu2 %v6218_v48 }
 0x44a   : > { %v6153_v3 = vpop.f32.mrf.mxu1 }
 0x44b   : > { %7705 = vmatmul.msk.bf16.gmra.mxu3 %vm5956_vm4, %v11617_v62  ;;  %v6154_v62 = vadd.f32 %v11656_v20, %v6153_v3 }
 0x44d   : > { %v6184_v29 = vmax.f32 %v6154_v62, 0.0 }
 0x44e   : > { %v6032_v41 = vpop.f32.mrf.mxu3 }
 0x44f   : > { %v6033_v25 = vadd.f32 %v11567_v28, %v6032_v41 }
 0x451   : > { %v6051_v19 = vmax.f32 %v6033_v25, 0.0 }
 0x452   : > { %v6155_v33 = vpop.f32.mrf.mxu1 }
 0x453   : > { %v6156_v57 = vadd.f32 %v11656_v20, %v6155_v33  ;;  %v7788_v33 = vld [vmem:[%s12067_s10 + $0x60] sm:$0xf] }
 0x455   : > { %v6185_v2 = vmax.f32 %v6156_v57, 0.0  ;;  %v7901_v57 = vld [vmem:[%s12067_s10 + $0x64] sm:$0xf0] }
 0x456   : > { %v6034_v18 = vpop.f32.mrf.mxu3 }
 0x457   : > { %v6035_v4 = vadd.f32 %v11567_v28, %v6034_v18  ;;  %v6219_v52 = vpack.c.bf16 %v6185_v2, %v6184_v29  ;;  %v7903_v18 = vld [vmem:[%s12067_s10 + $0x74] sm:$0xf0]  ;;  %v7789_v29 = vor.u32 %v7901_v57, %v7788_v33  ;;  %v7758_v33 = vld [vmem:[%s12067_s10 + $0x28] sm:$0xf0] }
 0x459   : > { %v6052_v7 = vmax.f32 %v6035_v4, 0.0  ;;  %6316 = vmatmul.bf16.gmra.mxu2 %v6219_v52 }
 0x45a   : > { %v6158_v56 = vpop.f32.mrf.mxu1 }
 0x45b   : > { %v6077_v60 = vpack.c.bf16 %v6052_v7, %v6051_v19  ;;  %v6159_v8 = vadd.f32 %v11656_v20, %v6158_v56  ;;  %v7797_v7 = vor.u32 %v7903_v18, %v7796_v13 }
 0x45d   : > { %6172 = vmatmul.bf16.gmra.mxu1 %v6077_v60  ;;  %v6186_v39 = vmax.f32 %v6159_v8, 0.0  ;;  %6658 = vmatpush.bf16.msra.mxu3 %v7797_v7 }
 0x45e   : > { %v6351_v23 = vpop.f32.mrf.mxu3 }
 0x461   : > { %6659 = vmatpush.bf16.msra.mxu3 %v7789_v29 }
 0x462   : > { %v6160_v28 = vpop.f32.mrf.mxu1 }
 0x463   : > { %v6161_v16 = vadd.f32 %v11656_v20, %v6160_v28 }
 0x465   : > { %v6187_v0 = vmax.f32 %v6161_v16, 0.0 }
 0x466   : > { %v6353_v5 = vpop.f32.mrf.mxu3 }
 0x467   : > { %v6220_v35 = vpack.c.bf16 %v6187_v0, %v6186_v39 }
 0x469   : > { %6321 = vmatmul.bf16.gmra.mxu2 %v6220_v35 }
 0x46e   : > { %v6356_v15 = vpop.f32.mrf.mxu3 }
 0x476   : > { %v6358_v41 = vpop.f32.mrf.mxu3 }
 0x47e   : > { %v6361_v4 = vpop.f32.mrf.mxu3 }
 0x47f   : > { %v6163_v10 = vpop.f32.mrf.mxu1 }
 0x480   : > { %v6164_v43 = vadd.f32 %v11656_v20, %v6163_v10 }
 0x482   : > { %v6188_v24 = vmax.f32 %v6164_v43, 0.0 }
 0x486   : > { %v6363_v56 = vpop.f32.mrf.mxu3 }
 0x487   : > { %v6165_v40 = vpop.f32.mrf.mxu1 }
 0x488   : > { %v6166_v21 = vadd.f32 %v11656_v20, %v6165_v40 }
 0x48a   : > { %v6189_v1 = vmax.f32 %v6166_v21, 0.0 }
 0x48c   : > { %v6221_v17 = vpack.c.bf16 %v6189_v1, %v6188_v24 }
 0x48e   : > { %6326 = vmatmul.bf16.gmra.mxu2 %v6221_v17  ;;  %v6366_v1 = vpop.f32.mrf.mxu3 }
 0x491   : > { %v6168_v26 = vpop.f32.mrf.mxu1 }
 0x492   : > { %v6169_v53 = vadd.f32 %v11656_v20, %v6168_v26 }
 0x494   : > { %v6190_v12 = vmax.f32 %v6169_v53, 0.0  ;;  %v7780_v53 = vld [vmem:[%s12067_s10 + $0x50] sm:$0xf] }
 0x496   : > { %v6302_v61 = vpop.f32.mrf.mxu2  ;;  %v6368_v36 = vpop.f32.mrf.mxu3 }
 0x497   : > { %v6303_v44 = vadd.f32 %v11707_v38, %v6302_v61 }
 0x499   : > { %v6170_v59 = vpop.f32.mrf.mxu1  ;;  %v6352_v49 = vadd.f32 %v6351_v23, %v6303_v44  ;;  %v7902_v44 = vld [vmem:[%s12067_s10 + $0x74] sm:$0xf] }
 0x49a   : > { %v6171_v45 = vadd.f32 %v11656_v20, %v6170_v59  ;;  %v7899_v59 = vld [vmem:[%s12067_s10 + $0x54] sm:$0xf0] }
 0x49b   : > { %v6391_v47 = vmax.f32 %v6352_v49, 0.0 }
 0x49c   : > { %v6191_v63 = vmax.f32 %v6171_v45, 0.0  ;;  %v7781_v45 = vor.u32 %v7899_v59, %v7780_v53 }
 0x49e   : > { %v6222_v58 = vpack.c.bf16 %v6191_v63, %v6190_v12  ;;  %v6304_v22 = vpop.f32.mrf.mxu2  ;;  %6660 = vmatpush.bf16.msra.mxu3 %v7781_v45  ;;  %v7798_v63 = vld [vmem:[%s12067_s10 + $0x78] sm:$0xf0] }
 0x49f   : > { %v6305_v51 = vadd.f32 %v11707_v38, %v6304_v22  ;;  %v7801_v46 = vor.u32 %v7902_v44, %v7798_v63  ;;  %v7790_v22 = vld [vmem:[%s12067_s10 + $0x68] sm:$0xf0] }
 0x4a0   : > { %6331 = vmatmul.bf16.gmra.mxu2 %v6222_v58  ;;  %v7900_v58 = vld [vmem:[%s12067_s10 + $0x64] sm:$0xf] }
 0x4a1   : > { %v6354_v50 = vadd.f32 %v6353_v5, %v6305_v51  ;;  %6707 = vmatpush.bf16.msra.mxu1 %v7801_v46  ;;  %v7793_v49 = vor.u32 %v7900_v58, %v7790_v22  ;;  %v7782_v51 = vld [vmem:[%s12067_s10 + $0x58] sm:$0xf0]  ;;  %v6371_v5 = vpop.f32.mrf.mxu3  ;;  %v11833_v46 = vld [vmem:[%s12066_s9] ss:$0 sm:$0xff] }
 0x4a3   : > { %v6392_v11 = vmax.f32 %v6354_v50, 0.0  ;;  %v7785_v50 = vor.u32 %v7898_v30, %v7782_v51 }
 0x4a5   : > { %v6424_v9 = vpack.c.bf16 %v6392_v11, %v6391_v47  ;;  %6708 = vmatpush.bf16.msra.mxu1 %v7793_v49  ;;  %v7772_v47 = vld [vmem:[%s12067_s10 + $0x40] sm:$0xf]  ;;  %v7897_v11 = vld [vmem:[%s12067_s10 + $0x44] sm:$0xf0] }
 0x4a6   : > { %v6307_v32 = vpop.f32.mrf.mxu2 }
 0x4a7   : > { %6491 = vmatmul.bf16.vlgmr.msrb.gmra.mxu0 %v6424_v9  ;;  %v6308_v31 = vadd.f32 %v11707_v38, %v6307_v32  ;;  %v7773_v9 = vor.u32 %v7897_v11, %v7772_v47 }
 0x4a9   : > { %v6357_v42 = vadd.f32 %v6356_v15, %v6308_v31  ;;  %6709 = vmatpush.bf16.msra.mxu1 %v7785_v50  ;;  %v7774_v15 = vld [vmem:[%s12067_s10 + $0x48] sm:$0xf0]  ;;  %6661 = vmatpush.bf16.msra.mxu3 %v7773_v9  ;;  %v6373_v31 = vpop.f32.mrf.mxu3 }
 0x4aa   : > { %v7777_v32 = vor.u32 %v7896_v34, %v7774_v15 }
 0x4ab   : > { %v6393_v48 = vmax.f32 %v6357_v42, 0.0  ;;  %v7764_v42 = vld [vmem:[%s12067_s10 + $0x30] sm:$0xf] }
 0x4ad   : > { %6710 = vmatpush.bf16.msra.mxu1 %v7777_v32 }
 0x4ae   : > { %v6309_v6 = vpop.f32.mrf.mxu2 }
 0x4af   : > { %v6310_v25 = vadd.f32 %v11707_v38, %v6309_v6 }
 0x4b1   : > { %v6359_v54 = vadd.f32 %v6358_v41, %v6310_v25  ;;  %v7895_v25 = vld [vmem:[%s12067_s10 + $0x34] sm:$0xf0] }
 0x4b2   : > { %v7765_v18 = vor.u32 %v7895_v25, %v7764_v42 }
 0x4b3   : > { %v6394_v19 = vmax.f32 %v6359_v54, 0.0  ;;  %v7894_v54 = vld [vmem:[%s12067_s10 + $0x34] sm:$0xf] }
 0x4b4   : > { %6662 = vmatpush.bf16.msra.mxu3 %v7765_v18 }
 0x4b5   : > { %v6425_v60 = vpack.c.bf16 %v6394_v19, %v6393_v48  ;;  %v7756_v48 = vld [vmem:[%s12067_s10 + $0x20] sm:$0xf]  ;;  %v7893_v19 = vld [vmem:[%s12067_s10 + $0x24] sm:$0xf0] }
 0x4b6   : > { %v7757_v57 = vor.u32 %v7893_v19, %v7756_v48 }
 0x4b7   : > { %6496 = vmatmul.bf16.gmra.mxu0 %v6425_v60 }
 0x4b8   : > { %6663 = vmatpush.bf16.msra.mxu3 %v7757_v57 }
 0x4c7   : > { %v6312_v62 = vpop.f32.mrf.mxu2 }
 0x4c8   : > { %v6313_v52 = vadd.f32 %v11707_v38, %v6312_v62  ;;  %v7892_v62 = vld [vmem:[%s12067_s10 + $0x24] sm:$0xf] }
 0x4ca   : > { %v6362_v35 = vadd.f32 %v6361_v4, %v6313_v52  ;;  %v7766_v4 = vld [vmem:[%s12067_s10 + $0x38] sm:$0xf0]  ;;  %v6376_v52 = vpop.f32.mrf.mxu3 }
 0x4cb   : > { %v7769_v60 = vor.u32 %v7894_v54, %v7766_v4  ;;  %v7911_v4 = vld [vmem:[%s12069_s12 + $0x38] sm:$0xff] }
 0x4cc   : > { %v6395_v40 = vmax.f32 %v6362_v35, 0.0  ;;  %v7890_v35 = vld [vmem:[%s12067_s10 + $0x14] sm:$0xf]  ;;  %6873 = vmatpush.bf16.msra.mxu2 %v7911_v4 }
 0x4cd   : > { %6711 = vmatpush.bf16.msra.mxu1 %v7769_v60 }
 0x4cf   : > { %v6314_v16 = vpop.f32.mrf.mxu2 }
 0x4d0   : > { %v6315_v10 = vadd.f32 %v11707_v38, %v6314_v16 }
 0x4d2   : > { %v6364_v43 = vadd.f32 %v6363_v56, %v6315_v10 }
 0x4d4   : > { %v6396_v21 = vmax.f32 %v6364_v43, 0.0  ;;  %v7740_v43 = vld [vmem:[%s12067_s10] sm:$0xf] }
 0x4d6   : > { %v6426_v24 = vpack.c.bf16 %v6396_v21, %v6395_v40  ;;  %v7889_v40 = vld [vmem:[%s12067_s10 + $0x4] sm:$0xf0] }
 0x4d8   : > { %6501 = vmatmul.bf16.gmra.mxu0 %v6426_v24  ;;  %v7888_v24 = vld [vmem:[%s12067_s10 + $0x4] sm:$0xf] }
 0x4da   : > { %v6173_v3 = vpop.f32.mrf.mxu1 }
 0x4db   : > { %v6174_v2 = vadd.f32 %v11656_v20, %v6173_v3 }
 0x4dc   : > { %v6317_v55 = vpop.f32.mrf.mxu2 }
 0x4dd   : > { %v6192_v39 = vmax.f32 %v6174_v2, 0.0  ;;  %v6318_v17 = vadd.f32 %v11707_v38, %v6317_v55  ;;  %v7761_v2 = vor.u32 %v7892_v62, %v7758_v33  ;;  %v7741_v55 = vor.u32 %v7889_v40, %v7740_v43 }
 0x4df   : > { %v6367_v26 = vadd.f32 %v6366_v1, %v6318_v17  ;;  %6712 = vmatpush.bf16.msra.mxu1 %v7761_v2  ;;  %v7742_v1 = vld [vmem:[%s12067_s10 + $0x8] sm:$0xf0] }
 0x4e1   : > { %v6397_v61 = vmax.f32 %v6367_v26, 0.0  ;;  %v6378_v26 = vpop.f32.mrf.mxu3 }
 0x4e2   : > { %v6175_v8 = vpop.f32.mrf.mxu1 }
 0x4e3   : > { %v6176_v28 = vadd.f32 %v11656_v20, %v6175_v8 }
 0x4e4   : > { %v6319_v14 = vpop.f32.mrf.mxu2 }
 0x4e5   : > { %v6193_v0 = vmax.f32 %v6176_v28, 0.0  ;;  %v6320_v20 = vadd.f32 %v11707_v38, %v6319_v14  ;;  %v7745_v14 = vor.u32 %v7888_v24, %v7742_v1 }
 0x4e7   : > { %v6223_v37 = vpack.c.bf16 %v6193_v0, %v6192_v39  ;;  %v6369_v23 = vadd.f32 %v6368_v36, %v6320_v20  ;;  %v7748_v39 = vld [vmem:[%s12067_s10 + $0x10] sm:$0xf]  ;;  %v7891_v0 = vld [vmem:[%s12067_s10 + $0x14] sm:$0xf0] }
 0x4e8   : > { %v7749_v10 = vor.u32 %v7891_v0, %v7748_v39 }
 0x4e9   : > { %6336 = vmatmul.bf16.gmra.mxu2 %v6223_v37  ;;  %v6398_v27 = vmax.f32 %v6369_v23, 0.0  ;;  %v7750_v37 = vld [vmem:[%s12067_s10 + $0x18] sm:$0xf0]  ;;  %v6381_v45 = vpop.f32.mrf.mxu3 }
 0x4ea   : > { %v7753_v21 = vor.u32 %v7890_v35, %v7750_v37  ;;  %6664 = vmatpush.bf16.msra.mxu3 %v7749_v10  ;;  %v7910_v37 = vld [vmem:[%s12069_s12 + $0x30] sm:$0xff] }
 0x4eb   : > { %v6427_v12 = vpack.c.bf16 %v6398_v27, %v6397_v61  ;;  %6874 = vmatpush.bf16.msra.mxu2 %v7910_v37 }
 0x4ec   : > { %v6322_v41 = vpop.f32.mrf.mxu2  ;;  %6713 = vmatpush.bf16.msra.mxu1 %v7753_v21 }
 0x4ed   : > { %6506 = vmatmul.bf16.gmra.mxu0 %v6427_v12  ;;  %v6323_v6 = vadd.f32 %v11707_v38, %v6322_v41 }
 0x4ee   : > { %6665 = vmatpush.bf16.msra.mxu3 %v7741_v55  ;;  %v7909_v55 = vld [vmem:[%s12069_s12 + $0x28] sm:$0xff] }
 0x4ef   : > { %v6372_v7 = vadd.f32 %v6371_v5, %v6323_v6  ;;  %6875 = vmatpush.bf16.msra.mxu2 %v7909_v55 }
 0x4f0   : > { %6714 = vmatpush.bf16.msra.mxu1 %v7745_v14  ;;  %v7908_v14 = vld [vmem:[%s12069_s12 + $0x20] sm:$0xff] }
 0x4f1   : > { %v6399_v56 = vmax.f32 %v6372_v7, 0.0  ;;  %v6383_v49 = vpop.f32.mrf.mxu3 }
 0x4f3   : > { %6876 = vmatpush.bf16.msra.mxu2 %v7908_v14 }
 0x4f4   : > { %v6324_v13 = vpop.f32.mrf.mxu2 }
 0x4f5   : > { %v6325_v3 = vadd.f32 %v11707_v38, %v6324_v13 }
 0x4f7   : > { %v6374_v29 = vadd.f32 %v6373_v31, %v6325_v3 }
 0x4f9   : > { %v6400_v8 = vmax.f32 %v6374_v29, 0.0  ;;  %v6386_v19 = vpop.f32.mrf.mxu3 }
 0x4fb   : > { %v6428_v28 = vpack.c.bf16 %v6400_v8, %v6399_v56 }
 0x4fd   : > { %6511 = vmatmul.bf16.gmra.mxu0 %v6428_v28 }
 0x501   : > { %v6388_v8 = vpop.f32.mrf.mxu3 }
 0x511   : > { %v6327_v16 = vpop.f32.mrf.mxu2 }
 0x512   : > { %v6328_v17 = vadd.f32 %v11707_v38, %v6327_v16 }
 0x514   : > { %v6377_v36 = vadd.f32 %v6376_v52, %v6328_v17 }
 0x516   : > { %v6401_v27 = vmax.f32 %v6377_v36, 0.0 }
 0x519   : > { %v6329_v20 = vpop.f32.mrf.mxu2 }
 0x51a   : > { %v6330_v23 = vadd.f32 %v11707_v38, %v6329_v20 }
 0x51c   : > { %v6379_v61 = vadd.f32 %v6378_v26, %v6330_v23 }
 0x51e   : > { %v6402_v53 = vmax.f32 %v6379_v61, 0.0 }
 0x520   : > { %v6429_v59 = vpack.c.bf16 %v6402_v53, %v6401_v27  ;;  %v7907_v27 = vld [vmem:[%s12069_s12 + $0x18] sm:$0xff] }
 0x521   : > { %6877 = vmatpush.bf16.msra.mxu2 %v7907_v27 }
 0x522   : > { %6516 = vmatmul.bf16.gmra.mxu0 %v6429_v59  ;;  %v7906_v59 = vld [vmem:[%s12069_s12 + $0x10] sm:$0xff] }
 0x523   : > { %v6332_v12 = vpop.f32.mrf.mxu2 }
 0x524   : > { %v6492_v44 = vpop.f32.mrf.mxu0  ;;  %v6333_v63 = vadd.f32 %v11707_v38, %v6332_v12  ;;  %v7905_v12 = vld [vmem:[%s12069_s12 + $0x8] sm:$0xff] }
 0x525   : > { %v6493_v51 = vadd.f32 %v11833_v46, %v6492_v44  ;;  %6878 = vmatpush.bf16.msra.mxu2 %v7906_v59  ;;  %v7913_v59 = vld [vmem:[%s12071_s14 + $0x8] sm:$0xff] }
 0x526   : > { %v6382_v22 = vadd.f32 %v6381_v45, %v6333_v63  ;;  %v7904_v63 = vld [vmem:[%s12069_s12] sm:$0xff] }
 0x527   : > { %v6532_v9 = vmax.f32 %v6493_v51, 0.0 }
 0x528   : > { %v6403_v47 = vmax.f32 %v6382_v22, 0.0 }
 0x529   : > { %6879 = vmatpush.bf16.msra.mxu2 %v7905_v12  ;;  %v7912_v12 = vld [vmem:[%s12071_s14] sm:$0xff] }
 0x52b   : > { %v6334_v58 = vpop.f32.mrf.mxu2 }
 0x52c   : > { %v6335_v30 = vadd.f32 %v11707_v38, %v6334_v58  ;;  %v6494_v50 = vpop.f32.mrf.mxu0 }
 0x52d   : > { %v6495_v11 = vadd.f32 %v11833_v46, %v6494_v50  ;;  %6880 = vmatpush.bf16.msra.mxu2 %v7904_v63 }
 0x52e   : > { %v6384_v5 = vadd.f32 %v6383_v49, %v6335_v30 }
 0x52f   : > { %v6533_v15 = vmax.f32 %v6495_v11, 0.0 }
 0x530   : > { %v6404_v34 = vmax.f32 %v6384_v5, 0.0 }
 0x531   : > { %v6565_v41 = vpack.c.bf16 %v6533_v15, %v6532_v9  ;;  %v11879_v9 = vld [vmem:[%s12068_s11] sm:$0x3] }
 0x532   : > { %v6430_v32 = vpack.c.bf16 %v6404_v34, %v6403_v47 }
 0x533   : > { %6666 = vmatmul.bf16.vlgmr.msra.gmra.mxu3 %v6565_v41  ;;  %6715 = vmatmul.bf16.vlgmr.msra.gmra.mxu1 %v6565_v41 }
 0x534   : > { %6521 = vmatmul.bf16.gmra.mxu0 %v6430_v32  ;;  %v6497_v31 = vpop.f32.mrf.mxu0  ;;  %v11882_v32 = vperm.slane %v11879_v9, 0 }
 0x535   : > { %v6498_v6 = vadd.f32 %v11833_v46, %v6497_v31 }
 0x537   : > { %v6534_v54 = vmax.f32 %v6498_v6, 0.0 }
 0x53c   : > { %v6499_v42 = vpop.f32.mrf.mxu0 }
 0x53d   : > { %v6500_v25 = vadd.f32 %v11833_v46, %v6499_v42 }
 0x53f   : > { %v6535_v13 = vmax.f32 %v6500_v25, 0.0 }
 0x541   : > { %v6566_v18 = vpack.c.bf16 %v6535_v13, %v6534_v54 }
 0x543   : > { %6671 = vmatmul.bf16.gmra.mxu3 %v6566_v18  ;;  %6720 = vmatmul.bf16.gmra.mxu1 %v6566_v18 }
 0x555   : > { %v6502_v48 = vpop.f32.mrf.mxu0 }
 0x556   : > { %v6503_v60 = vadd.f32 %v11833_v46, %v6502_v48 }
 0x558   : > { %v6536_v52 = vmax.f32 %v6503_v60, 0.0 }
 0x55d   : > { %v6504_v62 = vpop.f32.mrf.mxu0 }
 0x55e   : > { %v6505_v33 = vadd.f32 %v11833_v46, %v6504_v62 }
 0x560   : > { %v6537_v56 = vmax.f32 %v6505_v33, 0.0 }
 0x562   : > { %v6567_v16 = vpack.c.bf16 %v6537_v56, %v6536_v52 }
 0x564   : > { %6676 = vmatmul.bf16.gmra.mxu3 %v6567_v16  ;;  %6725 = vmatmul.bf16.gmra.mxu1 %v6567_v16 }
 0x56a   : > { %v6507_v35 = vpop.f32.mrf.mxu0 }
 0x56b   : > { %v6508_v43 = vadd.f32 %v11833_v46, %v6507_v35 }
 0x56c   : > { %v6337_v7 = vpop.f32.mrf.mxu2 }
 0x56d   : > { %v6338_v3 = vadd.f32 %v11707_v38, %v6337_v7  ;;  %v6538_v21 = vmax.f32 %v6508_v43, 0.0 }
 0x56f   : > { %v6387_v29 = vadd.f32 %v6386_v19, %v6338_v3 }
 0x571   : > { %v6405_v39 = vmax.f32 %v6387_v29, 0.0 }
 0x574   : > { %v6339_v57 = vpop.f32.mrf.mxu2 }
 0x575   : > { %v6340_v2 = vadd.f32 %v11707_v38, %v6339_v57  ;;  %v6509_v38 = vpop.f32.mrf.mxu0  ;;  %v7915_v57 = vld [vmem:[%s12071_s14 + $0x18] sm:$0xff] }
 0x576   : > { %v6510_v40 = vadd.f32 %v11833_v46, %v6509_v38  ;;  %7002 = vmatpush.bf16.msra.mxu0 %v7915_v57 }
 0x577   : > { %v6389_v28 = vadd.f32 %v6388_v8, %v6340_v2 }
 0x578   : > { %v6539_v24 = vmax.f32 %v6510_v40, 0.0 }
 0x579   : > { %v6406_v0 = vmax.f32 %v6389_v28, 0.0 }
 0x57a   : > { %v6568_v1 = vpack.c.bf16 %v6539_v24, %v6538_v21 }
 0x57b   : > { %v6431_v10 = vpack.c.bf16 %v6406_v0, %v6405_v39 }
 0x57c   : > { %6681 = vmatmul.bf16.gmra.mxu3 %v6568_v1  ;;  %6730 = vmatmul.bf16.gmra.mxu1 %v6568_v1 }
 0x57d   : > { %6526 = vmatmul.bf16.gmra.mxu0 %v6431_v10  ;;  %v6512_v17 = vpop.f32.mrf.mxu0 }
 0x57e   : > { %v6513_v26 = vadd.f32 %v11833_v46, %v6512_v17  ;;  %v7914_v17 = vld [vmem:[%s12071_s14 + $0x10] sm:$0xff] }
 0x57f   : > { %7003 = vmatpush.bf16.msra.mxu0 %v7914_v17 }
 0x580   : > { %v6540_v23 = vmax.f32 %v6513_v26, 0.0 }
 0x583   : > { %7004 = vmatpush.bf16.msra.mxu0 %v7913_v59 }
 0x585   : > { %v6514_v20 = vpop.f32.mrf.mxu0 }
 0x586   : > { %v6515_v36 = vadd.f32 %v11833_v46, %v6514_v20 }
 0x587   : > { %7005 = vmatpush.bf16.msra.mxu0 %v7912_v12  ;;  %v11939_v12 = vld [vmem:[%s12072_s15] ss:$0 sm:$0xff] }
 0x588   : > { %v6541_v61 = vmax.f32 %v6515_v36, 0.0 }
 0x58a   : > { %v6569_v53 = vpack.c.bf16 %v6541_v61, %v6540_v23 }
 0x58c   : > { %6686 = vmatmul.bf16.gmra.mxu3 %v6569_v53  ;;  %6735 = vmatmul.bf16.gmra.mxu1 %v6569_v53 }
 0x59f   : > { %v6517_v45 = vpop.f32.mrf.mxu0 }
 0x5a0   : > { %v6518_v44 = vadd.f32 %v11833_v46, %v6517_v45 }
 0x5a2   : > { %v6542_v30 = vmax.f32 %v6518_v44, 0.0 }
 0x5a7   : > { %v6519_v58 = vpop.f32.mrf.mxu0 }
 0x5a8   : > { %v6520_v22 = vadd.f32 %v11833_v46, %v6519_v58 }
 0x5aa   : > { %v6543_v49 = vmax.f32 %v6520_v22, 0.0 }
 0x5ac   : > { %v6570_v51 = vpack.c.bf16 %v6543_v49, %v6542_v30 }
 0x5ae   : > { %6691 = vmatmul.bf16.gmra.mxu3 %v6570_v51  ;;  %6740 = vmatmul.bf16.gmra.mxu1 %v6570_v51 }
 0x5b1   : > { %v6522_v5 = vpop.f32.mrf.mxu0 }
 0x5b2   : > { %v6523_v50 = vadd.f32 %v11833_v46, %v6522_v5 }
 0x5b4   : > { %v6544_v15 = vmax.f32 %v6523_v50, 0.0 }
 0x5b6   : > { %v6667_v47 = vpop.f32.mrf.mxu3 }
 0x5b7   : > { %v6668_v6 = vadd.f32 %v6667_v47, %v11882_v32 }
 0x5b9   : > { %v6524_v11 = vpop.f32.mrf.mxu0  ;;  %v6756_v54 = vmax.f32 %v6668_v6, 0.0 }
 0x5ba   : > { %v6525_v34 = vadd.f32 %v11833_v46, %v6524_v11 }
 0x5bc   : > { %v6545_v41 = vmax.f32 %v6525_v34, 0.0  ;;  %v11915_v34 = vld [vmem:[%s12070_s13] ss:$0 sm:$0xff] }
 0x5be   : > { %v6571_v31 = vpack.c.bf16 %v6545_v41, %v6544_v15  ;;  %v6669_v42 = vpop.f32.mrf.mxu3 }
 0x5bf   : > { %v6670_v25 = vadd.f32 %v6669_v42, %v11882_v32 }
 0x5c0   : > { %6696 = vmatmul.bf16.gmra.mxu3 %v6571_v31  ;;  %6745 = vmatmul.bf16.gmra.mxu1 %v6571_v31 }
 0x5c1   : > { %v6758_v13 = vmax.f32 %v6670_v25, 0.0 }
 0x5c3   : > { %v6814_v18 = vpack.c.bf16 %v6758_v13, %v6756_v54 }
 0x5c5   : > { %6881 = vmatmul.bf16.vlgmr.msra.gmra.mxu2 %v6814_v18 }
 0x5c6   : > { %v6672_v4 = vpop.f32.mrf.mxu3 }
 0x5c7   : > { %v6673_v48 = vadd.f32 %v6672_v4, %v11882_v32 }
 0x5c9   : > { %v6760_v3 = vmax.f32 %v6673_v48, 0.0 }
 0x5ce   : > { %v6674_v19 = vpop.f32.mrf.mxu3 }
 0x5cf   : > { %v6675_v7 = vadd.f32 %v6674_v19, %v11882_v32 }
 0x5d1   : > { %v6762_v60 = vmax.f32 %v6675_v7, 0.0 }
 0x5d3   : > { %v6815_v62 = vpack.c.bf16 %v6762_v60, %v6760_v3 }
 0x5d5   : > { %6886 = vmatmul.bf16.gmra.mxu2 %v6815_v62 }
 0x5e7   : > { %v6677_v29 = vpop.f32.mrf.mxu3 }
 0x5e8   : > { %v6678_v8 = vadd.f32 %v6677_v29, %v11882_v32 }
 0x5ea   : > { %v6764_v10 = vmax.f32 %v6678_v8, 0.0 }
 0x5ef   : > { %v6679_v28 = vpop.f32.mrf.mxu3 }
 0x5f0   : > { %v6680_v0 = vadd.f32 %v6679_v28, %v11882_v32 }
 0x5f2   : > { %v6766_v37 = vmax.f32 %v6680_v0, 0.0 }
 0x5f4   : > { %v6816_v43 = vpack.c.bf16 %v6766_v37, %v6764_v10 }
 0x5f6   : > { %6891 = vmatmul.bf16.gmra.mxu2 %v6816_v43 }
 0x5fa   : > { %v6527_v33 = vpop.f32.mrf.mxu0 }
 0x5fb   : > { %v6528_v2 = vadd.f32 %v11833_v46, %v6527_v33 }
 0x5fd   : > { %v6546_v16 = vmax.f32 %v6528_v2, 0.0 }
 0x5ff   : > { %v6682_v38 = vpop.f32.mrf.mxu3 }
 0x600   : > { %v6683_v40 = vadd.f32 %v6682_v38, %v11882_v32 }
 0x602   : > { %v6529_v52 = vpop.f32.mrf.mxu0  ;;  %v6768_v24 = vmax.f32 %v6683_v40, 0.0 }
 0x603   : > { %v6530_v56 = vadd.f32 %v11833_v46, %v6529_v52 }
 0x605   : > { %v6547_v39 = vmax.f32 %v6530_v56, 0.0 }
 0x607   : > { %v6572_v35 = vpack.c.bf16 %v6547_v39, %v6546_v16  ;;  %v6684_v21 = vpop.f32.mrf.mxu3 }
 0x608   : > { %v6685_v46 = vadd.f32 %v6684_v21, %v11882_v32 }
 0x609   : > { %6701 = vmatmul.bf16.gmra.mxu3 %v6572_v35  ;;  %6750 = vmatmul.bf16.gmra.mxu1 %v6572_v35 }
 0x60a   : > { %v6770_v1 = vmax.f32 %v6685_v46, 0.0 }
 0x60c   : > { %v6817_v55 = vpack.c.bf16 %v6770_v1, %v6768_v24 }
 0x60e   : > { %6896 = vmatmul.bf16.gmra.mxu2 %v6817_v55 }
 0x60f   : > { %v6687_v14 = vpop.f32.mrf.mxu3 }
 0x610   : > { %v6688_v26 = vadd.f32 %v6687_v14, %v11882_v32 }
 0x612   : > { %v6772_v23 = vmax.f32 %v6688_v26, 0.0 }
 0x617   : > { %v6689_v20 = vpop.f32.mrf.mxu3 }
 0x618   : > { %v6690_v36 = vadd.f32 %v6689_v20, %v11882_v32 }
 0x61a   : > { %v6774_v61 = vmax.f32 %v6690_v36, 0.0 }
 0x61c   : > { %v6818_v27 = vpack.c.bf16 %v6774_v61, %v6772_v23 }
 0x61e   : > { %6901 = vmatmul.bf16.gmra.mxu2 %v6818_v27 }
 0x631   : > { %v6692_v53 = vpop.f32.mrf.mxu3 }
 0x632   : > { %v6693_v45 = vadd.f32 %v6692_v53, %v11882_v32 }
 0x634   : > { %v6776_v58 = vmax.f32 %v6693_v45, 0.0 }
 0x639   : > { %v6694_v44 = vpop.f32.mrf.mxu3 }
 0x63a   : > { %v6695_v63 = vadd.f32 %v6694_v44, %v11882_v32 }
 0x63c   : > { %v6778_v22 = vmax.f32 %v6695_v63, 0.0 }
 0x63e   : > { %v6819_v30 = vpack.c.bf16 %v6778_v22, %v6776_v58 }
 0x640   : > { %6906 = vmatmul.bf16.gmra.mxu2 %v6819_v30 }
 0x643   : > { %v6697_v49 = vpop.f32.mrf.mxu3 }
 0x644   : > { %v6698_v51 = vadd.f32 %v6697_v49, %v11882_v32 }
 0x646   : > { %v6780_v11 = vmax.f32 %v6698_v51, 0.0 }
 0x648   : > { %v6882_v5 = vpop.f32.mrf.mxu2 }
 0x649   : > { %v6883_v31 = vadd.f32 %v11915_v34, %v6882_v5 }
 0x64b   : > { %v6699_v50 = vpop.f32.mrf.mxu3  ;;  %v6922_v25 = vmax.f32 %v6883_v31, 0.0 }
 0x64c   : > { %v6700_v47 = vadd.f32 %v6699_v50, %v11882_v32 }
 0x64e   : > { %v6782_v15 = vmax.f32 %v6700_v47, 0.0 }
 0x650   : > { %v6820_v41 = vpack.c.bf16 %v6782_v15, %v6780_v11  ;;  %v6884_v6 = vpop.f32.mrf.mxu2 }
 0x651   : > { %v6885_v42 = vadd.f32 %v11915_v34, %v6884_v6 }
 0x652   : > { %6911 = vmatmul.bf16.gmra.mxu2 %v6820_v41 }
 0x653   : > { %v6923_v54 = vmax.f32 %v6885_v42, 0.0 }
 0x655   : > { %v6938_v13 = vpack.c.bf16 %v6923_v54, %v6922_v25 }
 0x657   : > { %7850 = vmatmul.msk.bf16.vlgmr.msra.gmra.mxu0 %vm6973_vm6, %v6938_v13 }
 0x658   : > { %v6887_v18 = vpop.f32.mrf.mxu2 }
 0x659   : > { %v6888_v4 = vadd.f32 %v11915_v34, %v6887_v18 }
 0x65b   : > { %v6924_v7 = vmax.f32 %v6888_v4, 0.0 }
 0x660   : > { %v6889_v48 = vpop.f32.mrf.mxu2 }
 0x661   : > { %v6890_v19 = vadd.f32 %v11915_v34, %v6889_v48 }
 0x663   : > { %v6925_v3 = vmax.f32 %v6890_v19, 0.0 }
 0x665   : > { %v6939_v60 = vpack.c.bf16 %v6925_v3, %v6924_v7 }
 0x667   : > { %7851 = vmatmul.msk.bf16.gmra.mxu0 %vm6973_vm6, %v6939_v60 }
 0x679   : > { %v6892_v33 = vpop.f32.mrf.mxu2 }
 0x67a   : > { %v6893_v52 = vadd.f32 %v11915_v34, %v6892_v33 }
 0x67c   : > { %v6926_v0 = vmax.f32 %v6893_v52, 0.0 }
 0x681   : > { %v6894_v56 = vpop.f32.mrf.mxu2 }
 0x682   : > { %v6895_v16 = vadd.f32 %v11915_v34, %v6894_v56 }
 0x684   : > { %v6927_v35 = vmax.f32 %v6895_v16, 0.0 }
 0x686   : > { %v6940_v10 = vpack.c.bf16 %v6927_v35, %v6926_v0 }
 0x688   : > { %7852 = vmatmul.msk.bf16.gmra.mxu0 %vm6973_vm6, %v6940_v10 }
 0x68c   : > { %v6702_v62 = vpop.f32.mrf.mxu3 }
 0x68d   : > { %v6703_v57 = vadd.f32 %v6702_v62, %v11882_v32 }
 0x68f   : > { %v6784_v8 = vmax.f32 %v6703_v57, 0.0 }
 0x691   : > { %v6897_v37 = vpop.f32.mrf.mxu2 }
 0x692   : > { %v6898_v43 = vadd.f32 %v11915_v34, %v6897_v37 }
 0x694   : > { %v6704_v29 = vpop.f32.mrf.mxu3  ;;  %v6928_v40 = vmax.f32 %v6898_v43, 0.0 }
 0x695   : > { %v6705_v2 = vadd.f32 %v6704_v29, %v11882_v32 }
 0x697   : > { %v6786_v28 = vmax.f32 %v6705_v2, 0.0 }
 0x699   : > { %v6821_v39 = vpack.c.bf16 %v6786_v28, %v6784_v8  ;;  %v6899_v38 = vpop.f32.mrf.mxu2 }
 0x69a   : > { %v6900_v32 = vadd.f32 %v11915_v34, %v6899_v38 }
 0x69b   : > { %6916 = vmatmul.bf16.gmra.mxu2 %v6821_v39 }
 0x69c   : > { %v6929_v21 = vmax.f32 %v6900_v32, 0.0 }
 0x69e   : > { %v6941_v46 = vpack.c.bf16 %v6929_v21, %v6928_v40 }
 0x6a0   : > { %7853 = vmatmul.msk.bf16.gmra.mxu0 %vm6973_vm6, %v6941_v46 }
 0x6a1   : > { %v6902_v24 = vpop.f32.mrf.mxu2 }
 0x6a2   : > { %v6903_v1 = vadd.f32 %v11915_v34, %v6902_v24 }
 0x6a4   : > { %v6930_v14 = vmax.f32 %v6903_v1, 0.0 }
 0x6a9   : > { %v6904_v55 = vpop.f32.mrf.mxu2 }
 0x6aa   : > { %v6905_v17 = vadd.f32 %v11915_v34, %v6904_v55 }
 0x6ac   : > { %v6931_v26 = vmax.f32 %v6905_v17, 0.0 }
 0x6ae   : > { %v6942_v20 = vpack.c.bf16 %v6931_v26, %v6930_v14 }
 0x6b0   : > { %7854 = vmatmul.msk.bf16.gmra.mxu0 %vm6973_vm6, %v6942_v20 }
 0x6c3   : > { %v6907_v36 = vpop.f32.mrf.mxu2 }
 0x6c4   : > { %v6908_v23 = vadd.f32 %v11915_v34, %v6907_v36 }
 0x6c6   : > { %v6932_v53 = vmax.f32 %v6908_v23, 0.0 }
 0x6cb   : > { %v6909_v61 = vpop.f32.mrf.mxu2 }
 0x6cc   : > { %v6910_v27 = vadd.f32 %v11915_v34, %v6909_v61 }
 0x6ce   : > { %v6933_v59 = vmax.f32 %v6910_v27, 0.0 }
 0x6d0   : > { %v6943_v45 = vpack.c.bf16 %v6933_v59, %v6932_v53 }
 0x6d2   : > { %7855 = vmatmul.msk.bf16.gmra.mxu0 %vm6973_vm6, %v6943_v45 }
 0x6d4   : > { %v7007_v63 = vpop.f32.mrf.mxu0 }
 0x6d5   : > { %v6912_v44 = vpop.f32.mrf.mxu2  ;;  %v7008_v58 = vadd.f32 %v11939_v12, %v7007_v63 }
 0x6d6   : > { %v6913_v30 = vadd.f32 %v11915_v34, %v6912_v44 }
 0x6d7   : > { %v7047_v22 = vsub.f32 0.0, %v7008_v58 }
 0x6d8   : > { %v6934_v47 = vmax.f32 %v6913_v30, 0.0 }
 0x6d9   : > { %v7063_v51 = vmul.f32 1.442695, %v7047_v22 }
 0x6db   : > { %8071 = vpow2.f32 %v7063_v51 }
 0x6dc   : > { %v7009_v50 = vpop.f32.mrf.mxu0 }
 0x6dd   : > { %v6914_v49 = vpop.f32.mrf.mxu2  ;;  %v7010_v11 = vadd.f32 %v11939_v12, %v7009_v50 }
 0x6de   : > { %v6915_v5 = vadd.f32 %v11915_v34, %v6914_v49 }
 0x6df   : > { %v7048_v31 = vsub.f32 0.0, %v7010_v11 }
 0x6e0   : > { %v6935_v15 = vmax.f32 %v6915_v5, 0.0 }
 0x6e1   : > { %v8072_v6 = vpop.eup %8071  ;;  %v7065_v42 = vmul.f32 1.442695, %v7048_v31 }
 0x6e2   : > { %v6944_v41 = vpack.c.bf16 %v6935_v15, %v6934_v47  ;;  %v7095_v25 = vadd.f32 1.0, %v8072_v6 }
 0x6e3   : > { %8073 = vpow2.f32 %v7065_v42 }
 0x6e4   : > { %7856 = vmatmul.msk.bf16.gmra.mxu0 %vm6973_vm6, %v6944_v41  ;;  %8075 = vrcp.f32 %v7095_v25  ;;  %v7122_v19 = vand.u32 2147483648, %v7095_v25  ;;  %v7120_v3 = vand.u32 2147483647, %v7095_v25  ;;  %vm7116_vm4 = vweird.f32 %v7095_v25  ;;  %v7012_v2 = vpop.f32.mrf.mxu0 }
 0x6e5   : > { %v7013_v56 = vadd.f32 %v11939_v12, %v7012_v2 }
 0x6e6   : > { %v7123_v33 = vor.u32 1.1754944e-38, %v7122_v19  ;;  %vm7121_vm3 = vcmp.eq.f32.partialorder %v7120_v3, 8.507059e+37 }
 0x6e7   : > { %v7049_v28 = vsub.f32 0.0, %v7013_v56 }
 0x6e9   : > { %v8074_v54 = vpop.eup %8073  ;;  %v7067_v35 = vmul.f32 1.442695, %v7049_v28 }
 0x6ea   : > { %v8076_v13 = vpop.eup %8075  ;;  %v7096_v18 = vadd.f32 1.0, %v8074_v54 }
 0x6eb   : > { %v7112_v4 = vmul.f32 %v8076_v13, %v7095_v25  ;;  %vm7117_vm10 = vweird.f32 %v8076_v13 }
 0x6ec   : > { %8077 = vrcp.f32 %v7096_v18  ;;  %vm7118_vm7 = vmor %vm7116_vm4, %vm7117_vm10  ;;  %v7137_v16 = vand.u32 2147483648, %v7096_v18  ;;  %v7135_v0 = vand.u32 2147483647, %v7096_v18  ;;  %vm7131_vm12 = vweird.f32 %v7096_v18  ;;  %v7014_v38 = vpop.f32.mrf.mxu0 }
 0x6ed   : > { %v7113_v48 = vsub.f32 1.0, %v7112_v4  ;;  %8079 = vpow2.f32 %v7067_v35  ;;  %v7015_v40 = vadd.f32 %v11939_v12, %v7014_v38 }
 0x6ee   : > { %v7138_v37 = vor.u32 1.1754944e-38, %v7137_v16  ;;  %vm7136_vm5 = vcmp.eq.f32.partialorder %v7135_v0, 8.507059e+37 }
 0x6ef   : > { %v7114_v7 = vmul.f32 %v8076_v13, %v7113_v48  ;;  %v7050_v21 = vsub.f32 0.0, %v7015_v40 }
 0x6f1   : > { %v7115_v60 = vadd.f32 %v8076_v13, %v7114_v7  ;;  %v7069_v24 = vmul.f32 1.442695, %v7050_v21 }
 0x6f2   : > { %v8078_v62 = vpop.eup %8077 }
 0x6f3   : > { %v7119_v57 = vsel %vm7118_vm7, %v8076_v13, %v7115_v60  ;;  %v7127_v52 = vmul.f32 %v8078_v62, %v7096_v18  ;;  %vm7132_vm15 = vweird.f32 %v8078_v62  ;;  %v8080_v46 = vpop.eup %8079  ;;  %8081 = vpow2.f32 %v7069_v24 }
 0x6f4   : > { %v7124_v29 = vsel %vm7121_vm3, %v7123_v33, %v7119_v57  ;;  %vm7133_vm0 = vmor %vm7131_vm12, %vm7132_vm15  ;;  %v7097_v1 = vadd.f32 1.0, %v8080_v46 }
 0x6f5   : > { %7367 = vrot.lane.b32.xlu0 %v7124_v29, %s8169_s27  ;;  %v7128_v8 = vsub.f32 1.0, %v7127_v52 }
 0x6f6   : > { %8083 = vrcp.f32 %v7097_v1  ;;  %v7152_v63 = vand.u32 2147483648, %v7097_v1  ;;  %v7150_v49 = vand.u32 2147483647, %v7097_v1  ;;  %vm7146_vm14 = vweird.f32 %v7097_v1 }
 0x6f7   : > { %v7129_v39 = vmul.f32 %v8078_v62, %v7128_v8 }
 0x6f8   : > { %v7153_v6 = vor.u32 1.1754944e-38, %v7152_v63  ;;  %vm7151_vm13 = vcmp.eq.f32.partialorder %v7150_v49, 8.507059e+37 }
 0x6f9   : > { %v7130_v10 = vadd.f32 %v8078_v62, %v7129_v39  ;;  %v8082_v20 = vpop.eup %8081 }
 0x6fa   : > { %v7098_v61 = vadd.f32 1.0, %v8082_v20 }
 0x6fb   : > { %v7134_v43 = vsel %vm7133_vm0, %v8078_v62, %v7130_v10 }
 0x6fc   : > { %v7139_v32 = vsel %vm7136_vm5, %v7138_v37, %v7134_v43  ;;  %v8084_v23 = vpop.eup %8083  ;;  %v7167_v48 = vand.u32 2147483648, %v7098_v61  ;;  %v7165_v3 = vand.u32 2147483647, %v7098_v61  ;;  %vm7161_vm1 = vweird.f32 %v7098_v61 }
 0x6fd   : > { %7369 = vrot.lane.b32.xlu1 %v7139_v32, %s8169_s27  ;;  %v7142_v27 = vmul.f32 %v8084_v23, %v7097_v1  ;;  %vm7147_vm11 = vweird.f32 %v8084_v23 }
 0x6fe   : > { %vm7148_vm9 = vmor %vm7146_vm14, %vm7147_vm11  ;;  %v7168_v2 = vor.u32 1.1754944e-38, %v7167_v48  ;;  %vm7166_vm10 = vcmp.eq.f32.partialorder %v7165_v3, 8.507059e+37 }
 0x6ff   : > { %v7143_v45 = vsub.f32 1.0, %v7142_v27 }
 0x701   : > { %v7144_v30 = vmul.f32 %v8084_v23, %v7143_v45 }
 0x703   : > { %v7145_v47 = vadd.f32 %v8084_v23, %v7144_v30 }
 0x705   : > { %v7017_v55 = vpop.f32.mrf.mxu0  ;;  %v7149_v42 = vsel %vm7148_vm9, %v8084_v23, %v7145_v47 }
 0x706   : > { %v7018_v17 = vadd.f32 %v11939_v12, %v7017_v55  ;;  %v7154_v13 = vsel %vm7151_vm13, %v7153_v6, %v7149_v42 }
 0x707   : > { %7371 = vrot.lane.b32.xlu2 %v7154_v13, %s8169_s27 }
 0x708   : > { %v7051_v26 = vsub.f32 0.0, %v7018_v17 }
 0x70a   : > { %v7071_v36 = vmul.f32 1.442695, %v7051_v26 }
 0x70c   : > { %8085 = vpow2.f32 %v7071_v36 }
 0x70d   : > { %8087 = vrcp.f32 %v7098_v61  ;;  %v7019_v53 = vpop.f32.mrf.mxu0 }
 0x70e   : > { %v7020_v59 = vadd.f32 %v11939_v12, %v7019_v53 }
 0x710   : > { %v7052_v22 = vsub.f32 0.0, %v7020_v59 }
 0x712   : > { %v8086_v5 = vpop.eup %8085  ;;  %v7073_v50 = vmul.f32 1.442695, %v7052_v22 }
 0x713   : > { %v8088_v11 = vpop.eup %8087  ;;  %v7099_v31 = vadd.f32 1.0, %v8086_v5 }
 0x714   : > { %8089 = vpow2.f32 %v7073_v50  ;;  %v7157_v25 = vmul.f32 %v8088_v11, %v7098_v61  ;;  %vm7162_vm8 = vweird.f32 %v8088_v11 }
 0x715   : > { %8091 = vrcp.f32 %v7099_v31  ;;  %vm7163_vm2 = vmor %vm7161_vm1, %vm7162_vm8  ;;  %v7182_v0 = vand.u32 2147483648, %v7099_v31  ;;  %v7180_v37 = vand.u32 2147483647, %v7099_v31  ;;  %vm7176_vm4 = vweird.f32 %v7099_v31 }
 0x716   : > { %v7158_v4 = vsub.f32 1.0, %v7157_v25 }
 0x717   : > { %v7183_v46 = vor.u32 1.1754944e-38, %v7182_v0  ;;  %vm7181_vm3 = vcmp.eq.f32.partialorder %v7180_v37, 8.507059e+37 }
 0x718   : > { %v7159_v7 = vmul.f32 %v8088_v11, %v7158_v4 }
 0x71a   : > { %v8090_v60 = vpop.eup %8089  ;;  %v7160_v33 = vadd.f32 %v8088_v11, %v7159_v7 }
 0x71b   : > { %v8092_v57 = vpop.eup %8091  ;;  %v7100_v29 = vadd.f32 1.0, %v8090_v60 }
 0x71c   : > { %v7164_v52 = vsel %vm7163_vm2, %v8088_v11, %v7160_v33  ;;  %v7172_v56 = vmul.f32 %v8092_v57, %v7099_v31 }
 0x71d   : > { %v7022_v18 = vpop.f32.mrf.mxu0  ;;  %v7169_v8 = vsel %vm7166_vm10, %v7168_v2, %v7164_v52  ;;  %v7195_v20 = vand.u32 2147483647, %v7100_v29  ;;  %vm7191_vm12 = vweird.f32 %v7100_v29 }
 0x71e   : > { %v6917_v14 = vpop.f32.mrf.mxu2  ;;  %7373 = vrot.lane.b32.xlu0 %v7169_v8, %s8169_s27  ;;  %v7173_v39 = vsub.f32 1.0, %v7172_v56 }
 0x71f   : > { %v6918_v44 = vadd.f32 %v11915_v34, %v6917_v14  ;;  %v7197_v14 = vand.u32 2147483648, %v7100_v29  ;;  %vm7196_vm5 = vcmp.eq.f32.partialorder %v7195_v20, 8.507059e+37  ;;  %v6716_v20 = vpop.f32.mrf.mxu1 }
 0x720   : > { %v7174_v10 = vmul.f32 %v8092_v57, %v7173_v39 }
 0x721   : > { %v6936_v15 = vmax.f32 %v6918_v44, 0.0  ;;  %v7198_v53 = vor.u32 1.1754944e-38, %v7197_v14 }
 0x722   : > { %v7175_v32 = vadd.f32 %v8092_v57, %v7174_v10 }
 0x725   : > { %v7024_v28 = vpop.f32.mrf.mxu0 }
 0x726   : > { %v6919_v58 = vpop.f32.mrf.mxu2  ;;  %v7025_v16 = vadd.f32 %v11939_v12, %v7024_v28 }
 0x727   : > { %v6920_v51 = vadd.f32 %v11915_v34, %v6919_v58  ;;  %v7023_v34 = vadd.f32 %v11939_v12, %v7022_v18 }
 0x728   : > { %v7054_v35 = vsub.f32 0.0, %v7025_v16 }
 0x729   : > { %v6937_v41 = vmax.f32 %v6920_v51, 0.0  ;;  %v7053_v19 = vsub.f32 0.0, %v7023_v34 }
 0x72a   : > { %v7077_v38 = vmul.f32 1.442695, %v7054_v35 }
 0x72b   : > { %v6945_v54 = vpack.c.bf16 %v6937_v41, %v6936_v15  ;;  %v7075_v62 = vmul.f32 1.442695, %v7053_v19 }
 0x72d   : > { %7857 = vmatmul.msk.bf16.gmra.mxu0 %vm6973_vm6, %v6945_v54  ;;  %8093 = vpow2.f32 %v7075_v62  ;;  %vm7177_vm6 = vweird.f32 %v8092_v57  ;;  %v7027_v50 = vpop.f32.mrf.mxu0 }
 0x72e   : > { %8095 = vrcp.f32 %v7100_v29  ;;  %vm7178_vm7 = vmor %vm7176_vm4, %vm7177_vm6  ;;  %v7028_v15 = vadd.f32 %v11939_v12, %v7027_v50 }
 0x72f   : > { %8097 = vpow2.f32 %v7077_v38  ;;  %v7179_v24 = vsel %vm7178_vm7, %v8092_v57, %v7175_v32 }
 0x730   : > { %v7184_v55 = vsel %vm7181_vm3, %v7183_v46, %v7179_v24  ;;  %v7055_v6 = vsub.f32 0.0, %v7028_v15 }
 0x731   : > { %7375 = vrot.lane.b32.xlu1 %v7184_v55, %s8169_s27 }
 0x732   : > { %v7079_v13 = vmul.f32 1.442695, %v7055_v6 }
 0x733   : > { %v8094_v43 = vpop.eup %8093 }
 0x734   : > { %v8096_v40 = vpop.eup %8095  ;;  %v7101_v21 = vadd.f32 1.0, %v8094_v43 }
 0x735   : > { %v7187_v1 = vmul.f32 %v8096_v40, %v7100_v29  ;;  %vm7192_vm15 = vweird.f32 %v8096_v40  ;;  %v8098_v36 = vpop.eup %8097  ;;  %v7029_v4 = vpop.f32.mrf.mxu0 }
 0x736   : > { %8099 = vrcp.f32 %v7101_v21  ;;  %v7102_v27 = vadd.f32 1.0, %v8098_v36  ;;  %vm7193_vm0 = vmor %vm7191_vm12, %vm7192_vm15  ;;  %v7212_v58 = vand.u32 2147483648, %v7101_v21  ;;  %v7210_v30 = vand.u32 2147483647, %v7101_v21 }
 0x737   : > { %v7188_v17 = vsub.f32 1.0, %v7187_v1  ;;  %vm7206_vm14 = vweird.f32 %v7101_v21  ;;  %v7030_v19 = vadd.f32 %v11939_v12, %v7029_v4 }
 0x738   : > { %8101 = vrcp.f32 %v7102_v27  ;;  %v7213_v5 = vor.u32 1.1754944e-38, %v7212_v58  ;;  %vm7211_vm13 = vcmp.eq.f32.partialorder %v7210_v30, 8.507059e+37  ;;  %v7227_v42 = vand.u32 2147483648, %v7102_v27 }
 0x739   : > { %v7189_v26 = vmul.f32 %v8096_v40, %v7188_v17  ;;  %v7225_v54 = vand.u32 2147483647, %v7102_v27  ;;  %vm7221_vm1 = vweird.f32 %v7102_v27  ;;  %8103 = vpow2.f32 %v7079_v13 }
 0x73a   : > { %v7228_v34 = vor.u32 1.1754944e-38, %v7227_v42  ;;  %v7056_v3 = vsub.f32 0.0, %v7030_v19 }
 0x73b   : > { %v7190_v23 = vadd.f32 %v8096_v40, %v7189_v26  ;;  %vm7226_vm10 = vcmp.eq.f32.partialorder %v7225_v54, 8.507059e+37 }
 0x73c   : > { %v8100_v61 = vpop.eup %8099  ;;  %v7081_v62 = vmul.f32 1.442695, %v7056_v3 }
 0x73d   : > { %v7194_v59 = vsel %vm7193_vm0, %v8096_v40, %v7190_v23  ;;  %v7202_v45 = vmul.f32 %v8100_v61, %v7101_v21  ;;  %vm7207_vm11 = vweird.f32 %v8100_v61 }
 0x73e   : > { %v7199_v44 = vsel %vm7196_vm5, %v7198_v53, %v7194_v59  ;;  %v8102_v51 = vpop.eup %8101  ;;  %vm7208_vm9 = vmor %vm7206_vm14, %vm7207_vm11  ;;  %8105 = vpow2.f32 %v7081_v62 }
 0x73f   : > { %7377 = vrot.lane.b32.xlu2 %v7199_v44, %s8169_s27  ;;  %v7203_v63 = vsub.f32 1.0, %v7202_v45  ;;  %v7217_v11 = vmul.f32 %v8102_v51, %v7102_v27  ;;  %vm7222_vm8 = vweird.f32 %v8102_v51  ;;  %v8104_v60 = vpop.eup %8103 }
 0x740   : > { %vm7223_vm2 = vmor %vm7221_vm1, %vm7222_vm8  ;;  %v7103_v33 = vadd.f32 1.0, %v8104_v60  ;;  %vm7415_vm8 = vcmask 7168   ;;  %vm7432_vm1 = vcmask 31744  }
 0x741   : > { %v7204_v22 = vmul.f32 %v8100_v61, %v7203_v63  ;;  %v7218_v31 = vsub.f32 1.0, %v7217_v11  ;;  %v6718_v11 = vpop.f32.mrf.mxu1 }
 0x742   : > { %8107 = vrcp.f32 %v7103_v33  ;;  %v7242_v10 = vand.u32 2147483648, %v7103_v33  ;;  %v7240_v38 = vand.u32 2147483647, %v7103_v33  ;;  %vm7236_vm4 = vweird.f32 %v7103_v33 }
 0x743   : > { %v7205_v49 = vadd.f32 %v8100_v61, %v7204_v22  ;;  %v7219_v25 = vmul.f32 %v8102_v51, %v7218_v31 }
 0x744   : > { %v8106_v52 = vpop.eup %8105  ;;  %v7243_v1 = vor.u32 1.1754944e-38, %v7242_v10  ;;  %vm7241_vm3 = vcmp.eq.f32.partialorder %v7240_v38, 8.507059e+37 }
 0x745   : > { %v7209_v47 = vsel %vm7208_vm9, %v8100_v61, %v7205_v49  ;;  %v7220_v18 = vadd.f32 %v8102_v51, %v7219_v25  ;;  %v7104_v28 = vadd.f32 1.0, %v8106_v52 }
 0x746   : > { %v7214_v41 = vsel %vm7211_vm13, %v7213_v5, %v7209_v47 }
 0x747   : > { %7379 = vrot.lane.b32.xlu0 %v7214_v41, %s8169_s27  ;;  %v7224_v48 = vsel %vm7223_vm2, %v8102_v51, %v7220_v18  ;;  %v7257_v36 = vand.u32 2147483648, %v7104_v28  ;;  %v7255_v61 = vand.u32 2147483647, %v7104_v28  ;;  %vm7251_vm12 = vweird.f32 %v7104_v28 }
 0x748   : > { %v7229_v7 = vsel %vm7226_vm10, %v7228_v34, %v7224_v48  ;;  %v8108_v8 = vpop.eup %8107  ;;  %v11971_v51 = vperm.slane %v11879_v9, 1 }
 0x749   : > { %7381 = vrot.lane.b32.xlu1 %v7229_v7, %s8169_s27  ;;  %v7232_v16 = vmul.f32 %v8108_v8, %v7103_v33  ;;  %vm7237_vm6 = vweird.f32 %v8108_v8  ;;  %v7258_v44 = vor.u32 1.1754944e-38, %v7257_v36  ;;  %vm7256_vm5 = vcmp.eq.f32.partialorder %v7255_v61, 8.507059e+37  ;;  %v6721_v60 = vpop.f32.mrf.mxu1 }
 0x74a   : > { %vm7238_vm7 = vmor %vm7236_vm4, %vm7237_vm6  ;;  %v6717_v31 = vadd.f32 %v6716_v20, %v11971_v51  ;;  %v6722_v52 = vadd.f32 %v6721_v60, %v11971_v51 }
 0x74b   : > { %v7233_v35 = vsub.f32 1.0, %v7232_v16 }
 0x74c   : > { %v6757_v18 = vmax.f32 %v6717_v31, 0.0 }
 0x74d   : > { %v7234_v43 = vmul.f32 %v8108_v8, %v7233_v35 }
 0x74f   : > { %v7032_v57 = vpop.f32.mrf.mxu0  ;;  %v7235_v21 = vadd.f32 %v8108_v8, %v7234_v43 }
 0x750   : > { %v7033_v29 = vadd.f32 %v11939_v12, %v7032_v57 }
 0x751   : > { %v7239_v55 = vsel %vm7238_vm7, %v8108_v8, %v7235_v21  ;;  %v6719_v8 = vadd.f32 %v6718_v11, %v11971_v51  ;;  %v6723_v43 = vpop.f32.mrf.mxu1 }
 0x752   : > { %v7057_v2 = vsub.f32 0.0, %v7033_v29  ;;  %v7244_v14 = vsel %vm7241_vm3, %v7243_v1, %v7239_v55 }
 0x753   : > { %7383 = vrot.lane.b32.xlu2 %v7244_v14, %s8169_s27 }
 0x754   : > { %v7083_v56 = vmul.f32 1.442695, %v7057_v2 }
 0x756   : > { %8109 = vpow2.f32 %v7083_v56 }
 0x757   : > { %8111 = vrcp.f32 %v7104_v28  ;;  %v7034_v39 = vpop.f32.mrf.mxu0 }
 0x758   : > { %v7035_v0 = vadd.f32 %v11939_v12, %v7034_v39  ;;  %v6761_v39 = vmax.f32 %v6722_v52, 0.0 }
 0x75a   : > { %v7058_v37 = vsub.f32 0.0, %v7035_v0  ;;  %v6759_v0 = vmax.f32 %v6719_v8, 0.0 }
 0x75c   : > { %v8110_v32 = vpop.eup %8109  ;;  %v7085_v40 = vmul.f32 1.442695, %v7058_v37 }
 0x75d   : > { %v8112_v46 = vpop.eup %8111  ;;  %v7105_v24 = vadd.f32 1.0, %v8110_v32 }
 0x75e   : > { %8113 = vpow2.f32 %v7085_v40  ;;  %v7247_v17 = vmul.f32 %v8112_v46, %v7104_v28  ;;  %vm7252_vm15 = vweird.f32 %v8112_v46 }
 0x75f   : > { %8115 = vrcp.f32 %v7105_v24  ;;  %vm7253_vm0 = vmor %vm7251_vm12, %vm7252_vm15  ;;  %v7272_v5 = vand.u32 2147483648, %v7105_v24  ;;  %v7270_v47 = vand.u32 2147483647, %v7105_v24  ;;  %vm7266_vm14 = vweird.f32 %v7105_v24 }
 0x760   : > { %v7248_v26 = vsub.f32 1.0, %v7247_v17 }
 0x761   : > { %v7037_v30 = vpop.f32.mrf.mxu0  ;;  %v7273_v42 = vor.u32 1.1754944e-38, %v7272_v5  ;;  %vm7271_vm13 = vcmp.eq.f32.partialorder %v7270_v47, 8.507059e+37  ;;  %v7372_v35 = vpop.permute.xlu2 %7371 }
 0x762   : > { %v7249_v23 = vmul.f32 %v8112_v46, %v7248_v26  ;;  %v7038_v6 = vadd.f32 %v11939_v12, %v7037_v30  ;;  %v7418_v37 = vsel %vm7415_vm8, %v6761_v39, %v7372_v35 }
 0x763   : > { %7435 = vst.msk [vmem:[%s11981_s30 + $0x10] sm:$0xff] %vm7432_vm1, %v7418_v37 }
 0x764   : > { %v8114_v27 = vpop.eup %8113  ;;  %v7250_v53 = vadd.f32 %v8112_v46, %v7249_v23  ;;  %v7059_v34 = vsub.f32 0.0, %v7038_v6 }
 0x765   : > { %v8116_v59 = vpop.eup %8115  ;;  %v7106_v45 = vadd.f32 1.0, %v8114_v27 }
 0x766   : > { %v7254_v63 = vsel %vm7253_vm0, %v8112_v46, %v7250_v53  ;;  %v7262_v58 = vmul.f32 %v8116_v59, %v7105_v24  ;;  %vm7267_vm11 = vweird.f32 %v8116_v59  ;;  %v7087_v57 = vmul.f32 1.442695, %v7059_v34  ;;  %v6726_v46 = vpop.f32.mrf.mxu1 }
 0x767   : > { %8117 = vrcp.f32 %v7106_v45  ;;  %v7259_v22 = vsel %vm7256_vm5, %v7258_v44, %v7254_v63  ;;  %vm7268_vm9 = vmor %vm7266_vm14, %vm7267_vm11  ;;  %v7287_v4 = vand.u32 2147483648, %v7106_v45  ;;  %v7368_v48 = vpop.permute.xlu0 %7367  ;;  %v7285_v3 = vand.u32 2147483647, %v7106_v45 }
 0x768   : > { %7385 = vrot.lane.b32.xlu0 %v7259_v22, %s8169_s27  ;;  %v7263_v49 = vsub.f32 1.0, %v7262_v58  ;;  %v7416_v62 = vsel %vm7415_vm8, %v6757_v18, %v7368_v48  ;;  %vm7281_vm10 = vweird.f32 %v7106_v45  ;;  %8119 = vpow2.f32 %v7087_v57 }
 0x769   : > { %v7039_v19 = vpop.f32.mrf.mxu0  ;;  %7433 = vst.msk [vmem:[%s11981_s30] sm:$0xff] %vm7432_vm1, %v7416_v62  ;;  %v7288_v2 = vor.u32 1.1754944e-38, %v7287_v4  ;;  %vm7286_vm4 = vcmp.eq.f32.partialorder %v7285_v3, 8.507059e+37 }
 0x76a   : > { %v7264_v50 = vmul.f32 %v8116_v59, %v7263_v49  ;;  %v7040_v29 = vadd.f32 %v11939_v12, %v7039_v19 }
 0x76c   : > { %v7265_v15 = vadd.f32 %v8116_v59, %v7264_v50  ;;  %v7060_v16 = vsub.f32 0.0, %v7040_v29 }
 0x76d   : > { %v8118_v41 = vpop.eup %8117 }
 0x76e   : > { %v7269_v25 = vsel %vm7268_vm9, %v8116_v59, %v7265_v15  ;;  %v7277_v54 = vmul.f32 %v8118_v41, %v7106_v45  ;;  %vm7282_vm2 = vweird.f32 %v8118_v41  ;;  %v7089_v38 = vmul.f32 1.442695, %v7060_v16  ;;  %v8120_v40 = vpop.eup %8119  ;;  %v6728_v17 = vpop.f32.mrf.mxu1 }
 0x76f   : > { %v7274_v9 = vsel %vm7271_vm13, %v7273_v42, %v7269_v25  ;;  %vm7283_vm6 = vmor %vm7281_vm10, %vm7282_vm2  ;;  %v7370_v10 = vpop.permute.xlu1 %7369  ;;  %v7107_v21 = vadd.f32 1.0, %v8120_v40  ;;  %v6729_v20 = vadd.f32 %v6728_v17, %v11971_v51  ;;  %v6724_v59 = vadd.f32 %v6723_v43, %v11971_v51 }
 0x770   : > { %7387 = vrot.lane.b32.xlu1 %v7274_v9, %s8169_s27  ;;  %v7278_v13 = vsub.f32 1.0, %v7277_v54  ;;  %v7417_v32 = vsel %vm7415_vm8, %v6759_v0, %v7370_v10  ;;  %8121 = vpow2.f32 %v7089_v38  ;;  %v6727_v25 = vadd.f32 %v6726_v46, %v11971_v51 }
 0x771   : > { %7434 = vst.msk [vmem:[%s11981_s30 + $0x8] sm:$0xff] %vm7432_vm1, %v7417_v32  ;;  %8123 = vrcp.f32 %v7107_v21  ;;  %v7302_v36 = vand.u32 2147483648, %v7107_v21  ;;  %v7300_v61 = vand.u32 2147483647, %v7107_v21  ;;  %vm7296_vm3 = vweird.f32 %v7107_v21 }
 0x772   : > { %v7279_v7 = vmul.f32 %v8118_v41, %v7278_v13  ;;  %v6767_v45 = vmax.f32 %v6729_v20, 0.0  ;;  %v6763_v50 = vmax.f32 %v6724_v59, 0.0  ;;  %v6765_v4 = vmax.f32 %v6727_v25, 0.0 }
 0x773   : > { %v7303_v44 = vor.u32 1.1754944e-38, %v7302_v36  ;;  %vm7301_vm12 = vcmp.eq.f32.partialorder %v7300_v61, 8.507059e+37 }
 0x774   : > { %v7280_v33 = vadd.f32 %v8118_v41, %v7279_v7 }
 0x776   : > { %v7284_v56 = vsel %vm7283_vm6, %v8118_v41, %v7280_v33  ;;  %v8122_v24 = vpop.eup %8121  ;;  %v6731_v31 = vpop.f32.mrf.mxu1 }
 0x777   : > { %v7289_v28 = vsel %vm7286_vm4, %v7288_v2, %v7284_v56  ;;  %v7108_v1 = vadd.f32 1.0, %v8122_v24  ;;  %v8124_v55 = vpop.eup %8123  ;;  %v6732_v56 = vadd.f32 %v6731_v31, %v11971_v51 }
 0x778   : > { %7389 = vrot.lane.b32.xlu2 %v7289_v28, %s8169_s27  ;;  %v7292_v14 = vmul.f32 %v8124_v55, %v7107_v21  ;;  %vm7297_vm7 = vweird.f32 %v8124_v55 }
 0x779   : > { %8125 = vrcp.f32 %v7108_v1  ;;  %vm7298_vm15 = vmor %vm7296_vm3, %vm7297_vm7  ;;  %v7317_v47 = vand.u32 2147483648, %v7108_v1  ;;  %v7315_v15 = vand.u32 2147483647, %v7108_v1  ;;  %vm7311_vm5 = vweird.f32 %v7108_v1 }
 0x77a   : > { %v7293_v26 = vsub.f32 1.0, %v7292_v14  ;;  %v6769_v28 = vmax.f32 %v6732_v56, 0.0 }
 0x77b   : > { %v7318_v54 = vor.u32 1.1754944e-38, %v7317_v47  ;;  %vm7316_vm14 = vcmp.eq.f32.partialorder %v7315_v15, 8.507059e+37 }
 0x77c   : > { %v7294_v23 = vmul.f32 %v8124_v55, %v7293_v26 }
 0x77e   : > { %v7295_v53 = vadd.f32 %v8124_v55, %v7294_v23  ;;  %v6733_v60 = vpop.f32.mrf.mxu1 }
 0x77f   : > { %v8126_v27 = vpop.eup %8125 }
 0x780   : > { %v7299_v63 = vsel %vm7298_vm15, %v8124_v55, %v7295_v53  ;;  %v7307_v58 = vmul.f32 %v8126_v27, %v7108_v1  ;;  %vm7312_vm0 = vweird.f32 %v8126_v27 }
 0x781   : > { %v7304_v30 = vsel %vm7301_vm12, %v7303_v44, %v7299_v63  ;;  %vm7313_vm11 = vmor %vm7311_vm5, %vm7312_vm0 }
 0x782   : > { %7391 = vrot.lane.b32.xlu0 %v7304_v30, %s8169_s27  ;;  %v7308_v5 = vsub.f32 1.0, %v7307_v58 }
 0x784   : > { %v7309_v11 = vmul.f32 %v8126_v27, %v7308_v5 }
 0x786   : > { %v7310_v42 = vadd.f32 %v8126_v27, %v7309_v11  ;;  %v6736_v8 = vpop.f32.mrf.mxu1 }
 0x787   : > { %v6737_v10 = vadd.f32 %v6736_v8, %v11971_v51 }
 0x788   : > { %v7314_v13 = vsel %vm7313_vm11, %v8126_v27, %v7310_v42 }
 0x789   : > { %v7319_v34 = vsel %vm7316_vm14, %v7318_v54, %v7314_v13  ;;  %v6773_v40 = vmax.f32 %v6737_v10, 0.0 }
 0x78a   : > { %7393 = vrot.lane.b32.xlu1 %v7319_v34, %s8169_s27 }
 0x78e   : > { %v6738_v38 = vpop.f32.mrf.mxu1 }
 0x78f   : > { %v6739_v31 = vadd.f32 %v6738_v38, %v11971_v51 }
 0x790   : > { %v7374_v41 = vpop.permute.xlu0 %7373 }
 0x791   : > { %v7419_v6 = vsel %vm7415_vm8, %v6763_v50, %v7374_v41 }
 0x792   : > { %7436 = vst.msk [vmem:[%s11981_s30 + $0x18] sm:$0xff] %vm7432_vm1, %v7419_v6  ;;  %v6775_v6 = vmax.f32 %v6739_v31, 0.0 }
 0x796   : > { %v6741_v59 = vpop.f32.mrf.mxu1 }
 0x797   : > { %v6742_v54 = vadd.f32 %v6741_v59, %v11971_v51 }
 0x799   : > { %v7378_v22 = vpop.permute.xlu2 %7377 }
 0x79a   : > { %v7421_v49 = vsel %vm7415_vm8, %v6767_v45, %v7378_v22 }
 0x79b   : > { %7438 = vst.msk [vmem:[%s11981_s30 + $0x28] sm:$0xff] %vm7432_vm1, %v7421_v49 }
 0x79e   : > { %v6743_v50 = vpop.f32.mrf.mxu1 }
 0x79f   : > { %v6744_v47 = vadd.f32 %v6743_v50, %v11971_v51 }
 0x7a1   : > { %v6779_v11 = vmax.f32 %v6744_v47, 0.0 }
 0x7a3   : > { %v7376_v19 = vpop.permute.xlu1 %7375 }
 0x7a4   : > { %v7420_v3 = vsel %vm7415_vm8, %v6765_v4, %v7376_v19 }
 0x7a5   : > { %7437 = vst.msk [vmem:[%s11981_s30 + $0x20] sm:$0xff] %vm7432_vm1, %v7420_v3 }
 0x7a6   : > { %v6746_v34 = vpop.f32.mrf.mxu1 }
 0x7a7   : > { %v6747_v4 = vadd.f32 %v6746_v34, %v11971_v51 }
 0x7aa   : > { %v7042_v9 = vpop.f32.mrf.mxu0 }
 0x7ab   : > { %v7043_v18 = vadd.f32 %v11939_v12, %v7042_v9  ;;  %v6777_v9 = vmax.f32 %v6742_v54, 0.0 }
 0x7ad   : > { %v7061_v48 = vsub.f32 0.0, %v7043_v18  ;;  %v7384_v55 = vpop.permute.xlu2 %7383 }
 0x7ae   : > { %v7424_v14 = vsel %vm7415_vm8, %v6773_v40, %v7384_v55  ;;  %v6748_v19 = vpop.f32.mrf.mxu1 }
 0x7af   : > { %v7091_v7 = vmul.f32 1.442695, %v7061_v48  ;;  %7441 = vst.msk [vmem:[%s11981_s30 + $0x40] sm:$0xff] %vm7432_vm1, %v7424_v14  ;;  %v6781_v48 = vmax.f32 %v6747_v4, 0.0 }
 0x7b1   : > { %8127 = vpow2.f32 %v7091_v7 }
 0x7b2   : > { %v7044_v62 = vpop.f32.mrf.mxu0 }
 0x7b3   : > { %v7045_v33 = vadd.f32 %v11939_v12, %v7044_v62  ;;  %v6734_v12 = vadd.f32 %v6733_v60, %v11971_v51  ;;  %v6749_v60 = vadd.f32 %v6748_v19, %v11971_v51 }
 0x7b5   : > { %v7062_v57 = vsub.f32 0.0, %v7045_v33  ;;  %v6771_v46 = vmax.f32 %v6734_v12, 0.0  ;;  %v6783_v62 = vmax.f32 %v6749_v60, 0.0 }
 0x7b6   : > { %v6751_v33 = vpop.f32.mrf.mxu1 }
 0x7b7   : > { %v8128_v29 = vpop.eup %8127  ;;  %v7093_v2 = vmul.f32 1.442695, %v7062_v57 }
 0x7b8   : > { %v7109_v52 = vadd.f32 1.0, %v8128_v29 }
 0x7b9   : > { %8129 = vpow2.f32 %v7093_v2  ;;  %v7380_v16 = vpop.permute.xlu0 %7379  ;;  %v6752_v2 = vadd.f32 %v6751_v33, %v11971_v51 }
 0x7ba   : > { %8131 = vrcp.f32 %v7109_v52  ;;  %v7422_v0 = vsel %vm7415_vm8, %v6769_v28, %v7380_v16  ;;  %v7332_v21 = vand.u32 2147483648, %v7109_v52  ;;  %v7330_v1 = vand.u32 2147483647, %v7109_v52 }
 0x7bb   : > { %7439 = vst.msk [vmem:[%s11981_s30 + $0x30] sm:$0xff] %vm7432_vm1, %v7422_v0  ;;  %v7382_v17 = vpop.permute.xlu1 %7381  ;;  %vm7326_vm13 = vweird.f32 %v7109_v52 }
 0x7bc   : > { %v7423_v20 = vsel %vm7415_vm8, %v6771_v46, %v7382_v17  ;;  %v7333_v23 = vor.u32 1.1754944e-38, %v7332_v21  ;;  %vm7331_vm10 = vcmp.eq.f32.partialorder %v7330_v1, 8.507059e+37 }
 0x7bd   : > { %7440 = vst.msk [vmem:[%s11981_s30 + $0x38] sm:$0xff] %vm7432_vm1, %v7423_v20 }
 0x7be   : > { %v6753_v28 = vpop.f32.mrf.mxu1 }
 0x7bf   : > { %v8130_v39 = vpop.eup %8129  ;;  %v6754_v16 = vadd.f32 %v6753_v28, %v11971_v51 }
 0x7c0   : > { %v8132_v35 = vpop.eup %8131  ;;  %v7110_v37 = vadd.f32 1.0, %v8130_v39 }
 0x7c1   : > { %v7322_v43 = vmul.f32 %v8132_v35, %v7109_v52  ;;  %vm7327_vm9 = vweird.f32 %v8132_v35  ;;  %v6785_v52 = vmax.f32 %v6752_v2, 0.0  ;;  %v6787_v39 = vmax.f32 %v6754_v16, 0.0 }
 0x7c2   : > { %8133 = vrcp.f32 %v7110_v37  ;;  %vm7328_vm2 = vmor %vm7326_vm13, %vm7327_vm9  ;;  %v7347_v44 = vand.u32 2147483648, %v7110_v37  ;;  %v7345_v58 = vand.u32 2147483647, %v7110_v37  ;;  %vm7341_vm4 = vweird.f32 %v7110_v37 }
 0x7c3   : > { %v7323_v32 = vsub.f32 1.0, %v7322_v43 }
 0x7c4   : > { %v7348_v30 = vor.u32 1.1754944e-38, %v7347_v44  ;;  %vm7346_vm3 = vcmp.eq.f32.partialorder %v7345_v58, 8.507059e+37 }
 0x7c5   : > { %v7324_v24 = vmul.f32 %v8132_v35, %v7323_v32 }
 0x7c7   : > { %v7325_v26 = vadd.f32 %v8132_v35, %v7324_v24 }
 0x7c8   : > { %v8134_v36 = vpop.eup %8133 }
 0x7c9   : > { %v7329_v61 = vsel %vm7328_vm2, %v8132_v35, %v7325_v26  ;;  %v7337_v27 = vmul.f32 %v8134_v36, %v7110_v37  ;;  %vm7342_vm6 = vweird.f32 %v8134_v36 }
 0x7ca   : > { %v7334_v53 = vsel %vm7331_vm10, %v7333_v23, %v7329_v61  ;;  %vm7343_vm7 = vmor %vm7341_vm4, %vm7342_vm6 }
 0x7cb   : > { %7395 = vrot.lane.b32.xlu2 %v7334_v53, %s8169_s27  ;;  %v7338_v45 = vsub.f32 1.0, %v7337_v27 }
 0x7cd   : > { %v7339_v63 = vmul.f32 %v8134_v36, %v7338_v45 }
 0x7cf   : > { %v7340_v22 = vadd.f32 %v8134_v36, %v7339_v63 }
 0x7d1   : > { %v7344_v49 = vsel %vm7343_vm7, %v8134_v36, %v7340_v22 }
 0x7d2   : > { %v7349_v5 = vsel %vm7346_vm3, %v7348_v30, %v7344_v49  ;;  %v7390_v15 = vpop.permute.xlu2 %7389 }
 0x7d3   : > { %7397 = vrot.lane.b32.xlu0 %v7349_v5, %s8169_s27  ;;  %v7427_v41 = vsel %vm7415_vm8, %v6779_v11, %v7390_v15 }
 0x7d4   : > { %7444 = vst.msk [vmem:[%s11981_s30 + $0x58] sm:$0xff] %vm7432_vm1, %v7427_v41 }
 0x7da   : > { %v7386_v42 = vpop.permute.xlu0 %7385 }
 0x7db   : > { %v7425_v25 = vsel %vm7415_vm8, %v6775_v6, %v7386_v42 }
 0x7dc   : > { %7442 = vst.msk [vmem:[%s11981_s30 + $0x48] sm:$0xff] %vm7432_vm1, %v7425_v25 }
 0x7e2   : > { %v7388_v13 = vpop.permute.xlu1 %7387 }
 0x7e3   : > { %v7426_v18 = vsel %vm7415_vm8, %v6777_v9, %v7388_v13 }
 0x7e4   : > { %7443 = vst.msk [vmem:[%s11981_s30 + $0x50] sm:$0xff] %vm7432_vm1, %v7426_v18 }
 0x7f4   : > { %v7392_v7 = vpop.permute.xlu0 %7391 }
 0x7f5   : > { %v7428_v3 = vsel %vm7415_vm8, %v6781_v48, %v7392_v7 }
 0x7f6   : > { %7445 = vst.msk [vmem:[%s11981_s30 + $0x60] sm:$0xff] %vm7432_vm1, %v7428_v3 }
 0x7fc   : > { %v7394_v57 = vpop.permute.xlu1 %7393 }
 0x7fd   : > { %v7429_v29 = vsel %vm7415_vm8, %v6783_v62, %v7394_v57 }
 0x7fe   : > { %7446 = vst.msk [vmem:[%s11981_s30 + $0x68] sm:$0xff] %vm7432_vm1, %v7429_v29 }
 0x825   : > { %v7396_v56 = vpop.permute.xlu2 %7395 }
 0x826   : > { %v7430_v8 = vsel %vm7415_vm8, %v6785_v52, %v7396_v56 }
 0x827   : > { %7447 = vst.msk [vmem:[%s11981_s30 + $0x70] sm:$0xff] %vm7432_vm1, %v7430_v8 }
 0x845   : > { %v7398_v0 = vpop.permute.xlu0 %7397 }
 0x846   : > { %v7431_v35 = vsel %vm7415_vm8, %v6787_v39, %v7398_v0 }
 0x847   : > { %7448 = vst.msk [vmem:[%s11981_s30 + $0x78] sm:$0xff] %vm7432_vm1, %v7431_v35 }
 0x848 PF: > { %s26_s21 = sadd.s32 1, %s8155_s21  }
 0x849   : > { %p23_p4 = scmp.ge.s32.totalorder %s26_s21, 4  }
 0x84b   :  { %25 = sbr.rel (!%p23_p4) target bundleno = 2 (0x2), region = 114 }

</bundles_post_ra>
